<compile_context>
chip_gen: v7x
topology: tpu7x:2x2x1
jax: 0.10.0
libtpu: 0.0.40
codegen_flags: <defaults>
</compile_context>

<pallas_src>
import functools

import jax
import jax.numpy as jnp
from jax.experimental import pallas as pl
from jax.experimental.pallas import tpu as pltpu


# ----------------------------------------------------------------------------
# Pallas fused matmul kernel: out = act(A @ B + bias), bf16 MXU, f32 epilogue
# ----------------------------------------------------------------------------
def _matmul_epilogue_kernel(a_ref, b_ref, bias_ref, o_ref, *, activation):
    acc = jnp.dot(a_ref[...], b_ref[...], preferred_element_type=jnp.float32)
    acc = acc + bias_ref[...]
    if activation == "relu":
        acc = jnp.maximum(acc, 0.0)
    elif activation == "elu":
        acc = jnp.where(acc > 0, acc, jnp.exp(acc) - 1.0)
    o_ref[...] = acc


def _round_up(x, m):
    return ((x + m - 1) // m) * m


def _pick_tm(M):
    """Tile size along M and padded M. K/N are always full-dim single blocks."""
    if M >= 1024:
        tm = 512                                    # big-step tiles, many parallel blocks
    elif M > 16:
        tm = min(512, _round_up((M + 1) // 2, 16))  # >=2 blocks so both v7x TCs get work
    else:
        tm = _round_up(M, 8)                        # single (full-dim) block
    return tm, _round_up(M, tm)


def fused_matmul(a, b, bias, activation="none"):
    """act(a @ b + bias). a:(M,K), b:(K,N) cast to bf16; bias:(1,N) f32. -> (M,N) f32."""
    a = a.astype(jnp.bfloat16)
    b = b.astype(jnp.bfloat16)
    bias = bias.astype(jnp.float32)
    M, K = a.shape
    _, N = b.shape
    tm, Mp = _pick_tm(M)
    if Mp != M:
        a = jnp.pad(a, ((0, Mp - M), (0, 0)))

    kernel = functools.partial(_matmul_epilogue_kernel, activation=activation)
    out = pl.pallas_call(
        kernel,
        out_shape=jax.ShapeDtypeStruct((Mp, N), jnp.float32),
        grid_spec=pltpu.PrefetchScalarGridSpec(
            num_scalar_prefetch=0,
            grid=(Mp // tm,),
            in_specs=[pl.BlockSpec((tm, K), lambda i: (i, 0)),   # full-K block
                      pl.BlockSpec((K, N), lambda i: (0, 0)),    # whole weight resident
                      pl.BlockSpec((1, N), lambda i: (0, 0))],   # bias
            out_specs=pl.BlockSpec((tm, N), lambda i: (i, 0))),
        compiler_params=pltpu.CompilerParams(
            dimension_semantics=("parallel",)),
    )(a, b, bias)
    return out[:M] if Mp != M else out


# ----------------------------------------------------------------------------
# Conv layers (im2col glue in JAX, fused matmul+BN+activation in Pallas)
# ----------------------------------------------------------------------------
def conv3d_fused(x, w, b, padding, activation):
    """x:(B,D,H,W,Cin); w:(Cout,Cin,kD,kH,kW) already BN-folded; stride 1."""
    B, D, H, W, Cin = x.shape
    Cout, _, kD, kH, kW = w.shape
    pd, ph, pw = padding
    xb = x.astype(jnp.bfloat16)                       # halves im2col HBM traffic
    xp = jnp.pad(xb, ((0, 0), (pd, pd), (ph, ph), (pw, pw), (0, 0)))
    Do = D + 2 * pd - kD + 1
    Ho = H + 2 * ph - kH + 1
    Wo = W + 2 * pw - kW + 1
    # TODO(synk): replace the materialized im2col with a direct-window Pallas conv
    # (tap-axis reduction over shifted NDHWC windows) to cut HBM traffic ~27x at
    # production shapes.
    patches = []
    for dk in range(kD):
        for hk in range(kH):
            for wk in range(kW):
                patches.append(xp[:, dk:dk + Do, hk:hk + Ho, wk:wk + Wo, :])
    p = jnp.stack(patches, axis=-2).reshape(B * Do * Ho * Wo, kD * kH * kW * Cin)
    wmat = jnp.transpose(w, (2, 3, 4, 1, 0)).reshape(kD * kH * kW * Cin, Cout)
    out = fused_matmul(p, wmat, b.reshape(1, Cout), activation=activation)
    return out.reshape(B, Do, Ho, Wo, Cout)


def deconv_temporal_fused(x, wmat, bias, kT=4):
    """ConvTranspose3d kernel [4,1,1], stride [2,1,1], padding [1,0,0].
    x:(B,D,H,W,Cin); wmat:(kT*Cin,Cout) already flipped+BN-folded; ELU fused."""
    B, D, H, W, Cin = x.shape
    Cout = wmat.shape[1]
    xb = x.astype(jnp.bfloat16)
    xd = jnp.zeros((B, 2 * D - 1, H, W, Cin), jnp.bfloat16).at[:, ::2].set(xb)
    pad = kT - 1 - 1                                  # kernel-1-padding = 2
    xp = jnp.pad(xd, ((0, 0), (pad, pad), (0, 0), (0, 0), (0, 0)))
    Do = 2 * D
    p = jnp.stack([xp[:, k:k + Do] for k in range(kT)], axis=-2)
    p = p.reshape(B * Do * H * W, kT * Cin)
    out = fused_matmul(p, wmat, bias, activation="elu")
    return out.reshape(B, Do, H, W, Cout)


def conv1d_small(x, w, b, pad=1):
    """Tiny 1-D conv: plain JAX (too small for the MXU). x:(B,L,Cin); w:(Cout,Cin,k)."""
    B, L, Cin = x.shape
    Cout, _, k = w.shape
    xp = jnp.pad(x, ((0, 0), (pad, pad), (0, 0)))
    Lo = L + 2 * pad - k + 1
    p = jnp.stack([xp[:, i:i + Lo, :] for i in range(k)], axis=-2).reshape(B, Lo, k * Cin)
    wmat = jnp.transpose(w, (2, 1, 0)).reshape(k * Cin, Cout)
    return jnp.einsum('blk,kc->blc', p, wmat) + b


# ----------------------------------------------------------------------------
# Small helpers (plain JAX)
# ----------------------------------------------------------------------------
_BN_EPS = 1e-5


def _bn_scale(gamma):
    # inference mode, running_mean=0 / running_var=1
    return gamma / jnp.sqrt(1.0 + _BN_EPS)


def se_block(x, p):
    # x: (B, D, H, W, C).  FCs are tiny -> plain jnp.dot.
    y = jnp.mean(x, axis=(1, 2, 3))                   # AdaptiveAvgPool3d(1)
    y = jax.nn.relu(jnp.dot(y, p['w1'].T) + p['b1'])
    y = jax.nn.sigmoid(jnp.dot(y, p['w2'].T) + p['b2'])
    return x * y[:, None, None, None, :]


def maxpool3d(x, kt, ks):
    # NOTE: requires D % kt == 0 and H, W % ks == 0 (true for the shapes used here).
    B, D, H, W, C = x.shape
    x = x.reshape(B, D // kt, kt, H // ks, ks, W // ks, ks, C)
    return x.max(axis=(2, 4, 6))


def adaptive_avg_axis(x, out_size, axis):
    n = x.shape[axis]
    if n == out_size:
        return x
    segs = []
    for i in range(out_size):
        s = (i * n) // out_size
        e = -(-((i + 1) * n) // out_size)
        segs.append(jax.lax.slice_in_dim(x, s, e, axis=axis).mean(axis=axis, keepdims=True))
    return jnp.concatenate(segs, axis=axis)


# ----------------------------------------------------------------------------
# Network blocks
# ----------------------------------------------------------------------------
def conv_block(x, p, padding):
    # Fold BN (constant affine) into the conv weight/bias; ReLU fused in-kernel.
    s = _bn_scale(p['bn_g'])
    w = p['w'] * s[:, None, None, None, None]
    b = p['b'] * s + p['bn_b']
    x = conv3d_fused(x, w, b, padding, activation="relu")
    return se_block(x, p['se'])


def dual_branch_heads(x, pa, pb, frames):
    """Run rppg + rr branches together with lane-dense (N=128) deconv matmuls."""
    B, D, H, W, C = x.shape                           # C == 64

    # deconv1: concat Cout of both heads -> 128 output lanes; BN folded; ELU fused.
    w1 = jnp.concatenate([pa['d1_w'][:, :, :, 0, 0], pb['d1_w'][:, :, :, 0, 0]], axis=1)
    b1 = jnp.concatenate([pa['d1_b'], pb['d1_b']])
    s1 = jnp.concatenate([_bn_scale(pa['bn1_g']), _bn_scale(pb['bn1_g'])])
    beta1 = jnp.concatenate([pa['bn1_b'], pb['bn1_b']])
    wmat1 = jnp.transpose(w1[:, :, ::-1], (2, 0, 1)).reshape(4 * C, 2 * C) * s1[None, :]
    bias1 = (b1 * s1 + beta1).reshape(1, 2 * C)
    y = deconv_temporal_fused(x, wmat1, bias1)        # (B, 2D, H, W, 128)

    # deconv2: block-diagonal (each head only sees its own 64 channels).
    w2 = jnp.zeros((2 * C, 2 * C, 4), jnp.float32)
    w2 = w2.at[:C, :C, :].set(pa['d2_w'][:, :, :, 0, 0])
    w2 = w2.at[C:, C:, :].set(pb['d2_w'][:, :, :, 0, 0])
    b2 = jnp.concatenate([pa['d2_b'], pb['d2_b']])
    s2 = jnp.concatenate([_bn_scale(pa['bn2_g']), _bn_scale(pb['bn2_g'])])
    beta2 = jnp.concatenate([pa['bn2_b'], pb['bn2_b']])
    wmat2 = jnp.transpose(w2[:, :, ::-1], (2, 0, 1)).reshape(4 * 2 * C, 2 * C) * s2[None, :]
    bias2 = (b2 * s2 + beta2).reshape(1, 2 * C)
    y = deconv_temporal_fused(y, wmat2, bias2)        # (B, 4D, H, W, 128)

    # AdaptiveAvgPool3d((frames,1,1)) + per-head pointwise conv (tiny -> jnp.dot)
    y = jnp.mean(y, axis=(2, 3))                      # (B, 4D, 128)
    y = adaptive_avg_axis(y, frames, axis=1)          # (B, frames, 128)
    wpw = jnp.zeros((2 * C, 2), jnp.float32)
    wpw = wpw.at[:C, 0].set(pa['pw_w'].reshape(C))
    wpw = wpw.at[C:, 1].set(pb['pw_w'].reshape(C))
    bpw = jnp.stack([pa['pw_b'][0], pb['pw_b'][0]])
    out = jnp.dot(y, wpw) + bpw                       # (B, frames, 2)
    return out[..., 0], out[..., 1]


# ----------------------------------------------------------------------------
# Forward pass
# ----------------------------------------------------------------------------
def forward(params, x1):
    """x1: (B, 3, L, H, W) PyTorch NCDHW; x2 path not taken (x2=None)."""
    B, C, L, H, W = x1.shape
    x = jnp.transpose(x1, (0, 2, 3, 4, 1)).astype(jnp.float32)  # -> NDHWC

    # encode_video
    x = conv_block(x, params['cb1'], (0, 2, 2))
    x = maxpool3d(x, 1, 2)
    x = conv_block(x, params['cb2'], (1, 1, 1))
    x = conv_block(x, params['cb3'], (1, 1, 1))
    x = maxpool3d(x, 2, 2)
    x = conv_block(x, params['cb4'], (1, 1, 1))
    x = conv_block(x, params['cb5'], (1, 1, 1))
    x = maxpool3d(x, 2, 2)
    x = conv_block(x, params['cb6'], (1, 1, 1))
    x = conv_block(x, params['cb7'], (1, 1, 1))
    x = maxpool3d(x, 1, 2)
    x = conv_block(x, params['cb8'], (1, 1, 1))

    rPPG, rr = dual_branch_heads(x, params['rppg'], params['rr'], L)   # (B,L) each

    # ConvBlock11 -> spo2 (all tiny: plain JAX)
    z = rPPG[:, :, None]                                             # (B, L, 1)
    z = jax.nn.relu(conv1d_small(z, params['c11_w1'], params['c11_b1']))
    z = jax.nn.relu(conv1d_small(z, params['c11_w2'], params['c11_b2']))
    z = adaptive_avg_axis(z, 4, axis=1)                               # (B, 4, 32)
    z = jnp.transpose(z, (0, 2, 1)).reshape(B, 32 * 4)                # Flatten (C, pos)
    spo2 = jnp.dot(z, params['lin_w'].T) + params['lin_b']
    spo2 = jax.nn.sigmoid(spo2) * 15.0 + 85.0                         # (B, 1)
    return rPPG, spo2, rr


# ----------------------------------------------------------------------------
# Deterministic parameter initialisation (synthetic weights, no checkpoint)
# ----------------------------------------------------------------------------
def init_params(key):
    keys = iter(jax.random.split(key, 256))

    def w(shape, scale=0.1):
        return jax.random.normal(next(keys), shape, jnp.float32) * scale

    def cb(cin, cout, k):
        r = max(cout // 16, 1)
        return dict(
            w=w((cout, cin) + k), b=w((cout,), 0.01),
            bn_g=1.0 + w((cout,), 0.01), bn_b=w((cout,), 0.01),
            se=dict(w1=w((r, cout)), b1=w((r,), 0.01),
                    w2=w((cout, r)), b2=w((cout,), 0.01)))

    def head():
        return dict(
            d1_w=w((64, 64, 4, 1, 1)), d1_b=w((64,), 0.01),
            bn1_g=1.0 + w((64,), 0.01), bn1_b=w((64,), 0.01),
            d2_w=w((64, 64, 4, 1, 1)), d2_b=w((64,), 0.01),
            bn2_g=1.0 + w((64,), 0.01), bn2_b=w((64,), 0.01),
            pw_w=w((1, 64, 1, 1, 1)), pw_b=w((1,), 0.01))

    return dict(
        cb1=cb(3, 16, (1, 5, 5)),
        cb2=cb(16, 32, (3, 3, 3)),
        cb3=cb(32, 64, (3, 3, 3)),
        cb4=cb(64, 64, (3, 3, 3)),
        cb5=cb(64, 64, (3, 3, 3)),
        cb6=cb(64, 64, (3, 3, 3)),
        cb7=cb(64, 64, (3, 3, 3)),
        cb8=cb(64, 64, (3, 3, 3)),
        rppg=head(),
        rr=head(),
        c11_w1=w((16, 1, 3)), c11_b1=w((16,), 0.01),
        c11_w2=w((32, 16, 3)), c11_b2=w((32,), 0.01),
        lin_w=w((1, 128)), lin_b=w((1,), 0.01),
    )


if __name__ == "__main__":
    key = jax.random.PRNGKey(0)
    pkey, xkey = jax.random.split(key)
    params = init_params(pkey)

    # small shapes consistent with the module: frames == clip length = 16
    B, C, L, H, W = 2, 3, 16, 16, 16
    x1 = jax.random.normal(xkey, (B, C, L, H, W), jnp.float32)

    fwd = jax.jit(forward)
    rPPG, spo2, rr = fwd(params, x1)
    jax.block_until_ready((rPPG, spo2, rr))

    assert rPPG.shape == (B, L), rPPG.shape
    assert rr.shape == (B, L), rr.shape
    assert spo2.shape == (B, 1), spo2.shape
    assert jnp.all(jnp.isfinite(rPPG)) and jnp.all(jnp.isfinite(rr)) and jnp.all(jnp.isfinite(spo2))
    print("KERNEL_OK")
</pallas_src>

<mosaic_0001>
module attributes {stable_mosaic.version = 11 : i64} {
  func.func @_matmul_epilogue_kernel(%arg0: i32, %arg1: memref<512x75xbf16, #tpu.memory_space<vmem>>, %arg2: memref<75x16xbf16, #tpu.memory_space<vmem>>, %arg3: memref<1x16xf32, #tpu.memory_space<vmem>>, %arg4: memref<512x16xf32, #tpu.memory_space<vmem>>) attributes {dimension_semantics = [#tpu.dimension_semantics<parallel>], iteration_bounds = array<i64: 16>, scalar_prefetch = 0 : i64, scratch_operands = 0 : i64, tpu.core_type = #tpu.core_type<tc>, window_params = [{transform_indices = @transform_0, window_bounds = array<i64: 512, 75>}, {pipeline_mode = #tpu.pipeline_mode<synchronous>, transform_indices = @transform_1, window_bounds = array<i64: 75, 16>}, {pipeline_mode = #tpu.pipeline_mode<synchronous>, transform_indices = @transform_2, window_bounds = array<i64: 1, 16>}, {transform_indices = @transform_3, window_bounds = array<i64: 512, 16>}]} {
    %c0 = arith.constant 0 : index
    %c0_0 = arith.constant 0 : index
    %0 = vector.load %arg1[%c0, %c0_0] : memref<512x75xbf16, #tpu.memory_space<vmem>>, vector<512x75xbf16>
    %c0_1 = arith.constant 0 : index
    %c0_2 = arith.constant 0 : index
    %1 = vector.load %arg2[%c0_1, %c0_2] : memref<75x16xbf16, #tpu.memory_space<vmem>>, vector<75x16xbf16>
    %cst = arith.constant dense<0.000000e+00> : vector<512x16xf32>
    %2 = tpu.matmul %0, %1, %cst {dimension_numbers = #tpu.dot_dimension_numbers<[1], [0], [0], [1], [0, 0, 1, 1], [], []>} : vector<512x75xbf16>, vector<75x16xbf16>, vector<512x16xf32> -> vector<512x16xf32>
    %c0_3 = arith.constant 0 : index
    %c0_4 = arith.constant 0 : index
    %3 = vector.load %arg3[%c0_3, %c0_4] : memref<1x16xf32, #tpu.memory_space<vmem>>, vector<1x16xf32>
    %4 = vector.broadcast %3 : vector<1x16xf32> to vector<512x16xf32>
    %5 = arith.addf %2, %4 : vector<512x16xf32>
    %cst_5 = arith.constant 0.000000e+00 : f32
    %6 = vector.broadcast %cst_5 : f32 to vector<512x16xf32>
    %7 = arith.maximumf %5, %6 : vector<512x16xf32>
    %c0_6 = arith.constant 0 : index
    %c0_7 = arith.constant 0 : index
    %8 = vector.load %arg4[%c0_6, %c0_7] : memref<512x16xf32, #tpu.memory_space<vmem>>, vector<512x16xf32>
    tpu.vector_store %arg4[%c0_6, %c0_7], %7 {strides = array<i32>} : memref<512x16xf32, #tpu.memory_space<vmem>>, vector<512x16xf32>,
    return
  }
  func.func @transform_0(%arg0: i32) -> (i32, i32) {
    %c0_i32 = arith.constant 0 : i32
    %c0_i32_0 = arith.constant 0 : i32
    return %arg0, %c0_i32 : i32, i32
  }
  func.func @transform_1(%arg0: i32) -> (i32, i32) {
    %c0_i32 = arith.constant 0 : i32
    %c0_i32_0 = arith.constant 0 : i32
    %c0_i32_1 = arith.constant 0 : i32
    return %c0_i32, %c0_i32_0 : i32, i32
  }
  func.func @transform_2(%arg0: i32) -> (i32, i32) {
    %c0_i32 = arith.constant 0 : i32
    %c0_i32_0 = arith.constant 0 : i32
    %c0_i32_1 = arith.constant 0 : i32
    return %c0_i32, %c0_i32_0 : i32, i32
  }
  func.func @transform_3(%arg0: i32) -> (i32, i32) {
    %c0_i32 = arith.constant 0 : i32
    %c0_i32_0 = arith.constant 0 : i32
    return %arg0, %c0_i32 : i32, i32
  }
}

module attributes {stable_mosaic.version = 11 : i64} {
  func.func @_matmul_epilogue_kernel(%arg0: i32, %arg1: memref<512x432xbf16, #tpu.memory_space<vmem>>, %arg2: memref<432x32xbf16, #tpu.memory_space<vmem>>, %arg3: memref<1x32xf32, #tpu.memory_space<vmem>>, %arg4: memref<512x32xf32, #tpu.memory_space<vmem>>) attributes {dimension_semantics = [#tpu.dimension_semantics<parallel>], iteration_bounds = array<i64: 4>, scalar_prefetch = 0 : i64, scratch_operands = 0 : i64, tpu.core_type = #tpu.core_type<tc>, window_params = [{transform_indices = @transform_0, window_bounds = array<i64: 512, 432>}, {pipeline_mode = #tpu.pipeline_mode<synchronous>, transform_indices = @transform_1, window_bounds = array<i64: 432, 32>}, {pipeline_mode = #tpu.pipeline_mode<synchronous>, transform_indices = @transform_2, window_bounds = array<i64: 1, 32>}, {transform_indices = @transform_3, window_bounds = array<i64: 512, 32>}]} {
    %c0 = arith.constant 0 : index
    %c0_0 = arith.constant 0 : index
    %0 = vector.load %arg1[%c0, %c0_0] : memref<512x432xbf16, #tpu.memory_space<vmem>>, vector<512x432xbf16>
    %c0_1 = arith.constant 0 : index
    %c0_2 = arith.constant 0 : index
    %1 = vector.load %arg2[%c0_1, %c0_2] : memref<432x32xbf16, #tpu.memory_space<vmem>>, vector<432x32xbf16>
    %cst = arith.constant dense<0.000000e+00> : vector<512x32xf32>
    %2 = tpu.matmul %0, %1, %cst {dimension_numbers = #tpu.dot_dimension_numbers<[1], [0], [0], [1], [0, 0, 1, 1], [], []>} : vector<512x432xbf16>, vector<432x32xbf16>, vector<512x32xf32> -> vector<512x32xf32>
    %c0_3 = arith.constant 0 : index
    %c0_4 = arith.constant 0 : index
    %3 = vector.load %arg3[%c0_3, %c0_4] : memref<1x32xf32, #tpu.memory_space<vmem>>, vector<1x32xf32>
    %4 = vector.broadcast %3 : vector<1x32xf32> to vector<512x32xf32>
    %5 = arith.addf %2, %4 : vector<512x32xf32>
    %cst_5 = arith.constant 0.000000e+00 : f32
    %6 = vector.broadcast %cst_5 : f32 to vector<512x32xf32>
    %7 = arith.maximumf %5, %6 : vector<512x32xf32>
    %c0_6 = arith.constant 0 : index
    %c0_7 = arith.constant 0 : index
    %8 = vector.load %arg4[%c0_6, %c0_7] : memref<512x32xf32, #tpu.memory_space<vmem>>, vector<512x32xf32>
    tpu.vector_store %arg4[%c0_6, %c0_7], %7 {strides = array<i32>} : memref<512x32xf32, #tpu.memory_space<vmem>>, vector<512x32xf32>,
    return
  }
  func.func @transform_0(%arg0: i32) -> (i32, i32) {
    %c0_i32 = arith.constant 0 : i32
    %c0_i32_0 = arith.constant 0 : i32
    return %arg0, %c0_i32 : i32, i32
  }
  func.func @transform_1(%arg0: i32) -> (i32, i32) {
    %c0_i32 = arith.constant 0 : i32
    %c0_i32_0 = arith.constant 0 : i32
    %c0_i32_1 = arith.constant 0 : i32
    return %c0_i32, %c0_i32_0 : i32, i32
  }
  func.func @transform_2(%arg0: i32) -> (i32, i32) {
    %c0_i32 = arith.constant 0 : i32
    %c0_i32_0 = arith.constant 0 : i32
    %c0_i32_1 = arith.constant 0 : i32
    return %c0_i32, %c0_i32_0 : i32, i32
  }
  func.func @transform_3(%arg0: i32) -> (i32, i32) {
    %c0_i32 = arith.constant 0 : i32
    %c0_i32_0 = arith.constant 0 : i32
    return %arg0, %c0_i32 : i32, i32
  }
}

module attributes {stable_mosaic.version = 11 : i64} {
  func.func @_matmul_epilogue_kernel(%arg0: i32, %arg1: memref<512x864xbf16, #tpu.memory_space<vmem>>, %arg2: memref<864x64xbf16, #tpu.memory_space<vmem>>, %arg3: memref<1x64xf32, #tpu.memory_space<vmem>>, %arg4: memref<512x64xf32, #tpu.memory_space<vmem>>) attributes {dimension_semantics = [#tpu.dimension_semantics<parallel>], iteration_bounds = array<i64: 4>, scalar_prefetch = 0 : i64, scratch_operands = 0 : i64, tpu.core_type = #tpu.core_type<tc>, window_params = [{transform_indices = @transform_0, window_bounds = array<i64: 512, 864>}, {pipeline_mode = #tpu.pipeline_mode<synchronous>, transform_indices = @transform_1, window_bounds = array<i64: 864, 64>}, {pipeline_mode = #tpu.pipeline_mode<synchronous>, transform_indices = @transform_2, window_bounds = array<i64: 1, 64>}, {transform_indices = @transform_3, window_bounds = array<i64: 512, 64>}]} {
    %c0 = arith.constant 0 : index
    %c0_0 = arith.constant 0 : index
    %0 = vector.load %arg1[%c0, %c0_0] : memref<512x864xbf16, #tpu.memory_space<vmem>>, vector<512x864xbf16>
    %c0_1 = arith.constant 0 : index
    %c0_2 = arith.constant 0 : index
    %1 = vector.load %arg2[%c0_1, %c0_2] : memref<864x64xbf16, #tpu.memory_space<vmem>>, vector<864x64xbf16>
    %cst = arith.constant dense<0.000000e+00> : vector<512x64xf32>
    %2 = tpu.matmul %0, %1, %cst {dimension_numbers = #tpu.dot_dimension_numbers<[1], [0], [0], [1], [0, 0, 1, 1], [], []>} : vector<512x864xbf16>, vector<864x64xbf16>, vector<512x64xf32> -> vector<512x64xf32>
    %c0_3 = arith.constant 0 : index
    %c0_4 = arith.constant 0 : index
    %3 = vector.load %arg3[%c0_3, %c0_4] : memref<1x64xf32, #tpu.memory_space<vmem>>, vector<1x64xf32>
    %4 = vector.broadcast %3 : vector<1x64xf32> to vector<512x64xf32>
    %5 = arith.addf %2, %4 : vector<512x64xf32>
    %cst_5 = arith.constant 0.000000e+00 : f32
    %6 = vector.broadcast %cst_5 : f32 to vector<512x64xf32>
    %7 = arith.maximumf %5, %6 : vector<512x64xf32>
    %c0_6 = arith.constant 0 : index
    %c0_7 = arith.constant 0 : index
    %8 = vector.load %arg4[%c0_6, %c0_7] : memref<512x64xf32, #tpu.memory_space<vmem>>, vector<512x64xf32>
    tpu.vector_store %arg4[%c0_6, %c0_7], %7 {strides = array<i32>} : memref<512x64xf32, #tpu.memory_space<vmem>>, vector<512x64xf32>,
    return
  }
  func.func @transform_0(%arg0: i32) -> (i32, i32) {
    %c0_i32 = arith.constant 0 : i32
    %c0_i32_0 = arith.constant 0 : i32
    return %arg0, %c0_i32 : i32, i32
  }
  func.func @transform_1(%arg0: i32) -> (i32, i32) {
    %c0_i32 = arith.constant 0 : i32
    %c0_i32_0 = arith.constant 0 : i32
    %c0_i32_1 = arith.constant 0 : i32
    return %c0_i32, %c0_i32_0 : i32, i32
  }
  func.func @transform_2(%arg0: i32) -> (i32, i32) {
    %c0_i32 = arith.constant 0 : i32
    %c0_i32_0 = arith.constant 0 : i32
    %c0_i32_1 = arith.constant 0 : i32
    return %c0_i32, %c0_i32_0 : i32, i32
  }
  func.func @transform_3(%arg0: i32) -> (i32, i32) {
    %c0_i32 = arith.constant 0 : i32
    %c0_i32_0 = arith.constant 0 : i32
    return %arg0, %c0_i32 : i32, i32
  }
}

module attributes {stable_mosaic.version = 11 : i64} {
  func.func @_matmul_epilogue_kernel(%arg0: i32, %arg1: memref<128x1728xbf16, #tpu.memory_space<vmem>>, %arg2: memref<1728x64xbf16, #tpu.memory_space<vmem>>, %arg3: memref<1x64xf32, #tpu.memory_space<vmem>>, %arg4: memref<128x64xf32, #tpu.memory_space<vmem>>) attributes {dimension_semantics = [#tpu.dimension_semantics<parallel>], iteration_bounds = array<i64: 2>, scalar_prefetch = 0 : i64, scratch_operands = 0 : i64, tpu.core_type = #tpu.core_type<tc>, window_params = [{transform_indices = @transform_0, window_bounds = array<i64: 128, 1728>}, {pipeline_mode = #tpu.pipeline_mode<synchronous>, transform_indices = @transform_1, window_bounds = array<i64: 1728, 64>}, {pipeline_mode = #tpu.pipeline_mode<synchronous>, transform_indices = @transform_2, window_bounds = array<i64: 1, 64>}, {transform_indices = @transform_3, window_bounds = array<i64: 128, 64>}]} {
    %c0 = arith.constant 0 : index
    %c0_0 = arith.constant 0 : index
    %0 = vector.load %arg1[%c0, %c0_0] : memref<128x1728xbf16, #tpu.memory_space<vmem>>, vector<128x1728xbf16>
    %c0_1 = arith.constant 0 : index
    %c0_2 = arith.constant 0 : index
    %1 = vector.load %arg2[%c0_1, %c0_2] : memref<1728x64xbf16, #tpu.memory_space<vmem>>, vector<1728x64xbf16>
    %cst = arith.constant dense<0.000000e+00> : vector<128x64xf32>
    %2 = tpu.matmul %0, %1, %cst {dimension_numbers = #tpu.dot_dimension_numbers<[1], [0], [0], [1], [0, 0, 1, 1], [], []>} : vector<128x1728xbf16>, vector<1728x64xbf16>, vector<128x64xf32> -> vector<128x64xf32>
    %c0_3 = arith.constant 0 : index
    %c0_4 = arith.constant 0 : index
    %3 = vector.load %arg3[%c0_3, %c0_4] : memref<1x64xf32, #tpu.memory_space<vmem>>, vector<1x64xf32>
    %4 = vector.broadcast %3 : vector<1x64xf32> to vector<128x64xf32>
    %5 = arith.addf %2, %4 : vector<128x64xf32>
    %cst_5 = arith.constant 0.000000e+00 : f32
    %6 = vector.broadcast %cst_5 : f32 to vector<128x64xf32>
    %7 = arith.maximumf %5, %6 : vector<128x64xf32>
    %c0_6 = arith.constant 0 : index
    %c0_7 = arith.constant 0 : index
    %8 = vector.load %arg4[%c0_6, %c0_7] : memref<128x64xf32, #tpu.memory_space<vmem>>, vector<128x64xf32>
    tpu.vector_store %arg4[%c0_6, %c0_7], %7 {strides = array<i32>} : memref<128x64xf32, #tpu.memory_space<vmem>>, vector<128x64xf32>,
    return
  }
  func.func @transform_0(%arg0: i32) -> (i32, i32) {
    %c0_i32 = arith.constant 0 : i32
    %c0_i32_0 = arith.constant 0 : i32
    return %arg0, %c0_i32 : i32, i32
  }
  func.func @transform_1(%arg0: i32) -> (i32, i32) {
    %c0_i32 = arith.constant 0 : i32
    %c0_i32_0 = arith.constant 0 : i32
    %c0_i32_1 = arith.constant 0 : i32
    return %c0_i32, %c0_i32_0 : i32, i32
  }
  func.func @transform_2(%arg0: i32) -> (i32, i32) {
    %c0_i32 = arith.constant 0 : i32
    %c0_i32_0 = arith.constant 0 : i32
    %c0_i32_1 = arith.constant 0 : i32
    return %c0_i32, %c0_i32_0 : i32, i32
  }
  func.func @transform_3(%arg0: i32) -> (i32, i32) {
    %c0_i32 = arith.constant 0 : i32
    %c0_i32_0 = arith.constant 0 : i32
    return %arg0, %c0_i32 : i32, i32
  }
}

module attributes {stable_mosaic.version = 11 : i64} {
  func.func @_matmul_epilogue_kernel(%arg0: i32, %arg1: memref<16x1728xbf16, #tpu.memory_space<vmem>>, %arg2: memref<1728x64xbf16, #tpu.memory_space<vmem>>, %arg3: memref<1x64xf32, #tpu.memory_space<vmem>>, %arg4: memref<16x64xf32, #tpu.memory_space<vmem>>) attributes {dimension_semantics = [#tpu.dimension_semantics<parallel>], iteration_bounds = array<i64: 2>, scalar_prefetch = 0 : i64, scratch_operands = 0 : i64, tpu.core_type = #tpu.core_type<tc>, window_params = [{transform_indices = @transform_0, window_bounds = array<i64: 16, 1728>}, {pipeline_mode = #tpu.pipeline_mode<synchronous>, transform_indices = @transform_1, window_bounds = array<i64: 1728, 64>}, {pipeline_mode = #tpu.pipeline_mode<synchronous>, transform_indices = @transform_2, window_bounds = array<i64: 1, 64>}, {transform_indices = @transform_3, window_bounds = array<i64: 16, 64>}]} {
    %c0 = arith.constant 0 : index
    %c0_0 = arith.constant 0 : index
    %0 = vector.load %arg1[%c0, %c0_0] : memref<16x1728xbf16, #tpu.memory_space<vmem>>, vector<16x1728xbf16>
    %c0_1 = arith.constant 0 : index
    %c0_2 = arith.constant 0 : index
    %1 = vector.load %arg2[%c0_1, %c0_2] : memref<1728x64xbf16, #tpu.memory_space<vmem>>, vector<1728x64xbf16>
    %cst = arith.constant dense<0.000000e+00> : vector<16x64xf32>
    %2 = tpu.matmul %0, %1, %cst {dimension_numbers = #tpu.dot_dimension_numbers<[1], [0], [0], [1], [0, 0, 1, 1], [], []>} : vector<16x1728xbf16>, vector<1728x64xbf16>, vector<16x64xf32> -> vector<16x64xf32>
    %c0_3 = arith.constant 0 : index
    %c0_4 = arith.constant 0 : index
    %3 = vector.load %arg3[%c0_3, %c0_4] : memref<1x64xf32, #tpu.memory_space<vmem>>, vector<1x64xf32>
    %4 = vector.broadcast %3 : vector<1x64xf32> to vector<16x64xf32>
    %5 = arith.addf %2, %4 : vector<16x64xf32>
    %cst_5 = arith.constant 0.000000e+00 : f32
    %6 = vector.broadcast %cst_5 : f32 to vector<16x64xf32>
    %7 = arith.maximumf %5, %6 : vector<16x64xf32>
    %c0_6 = arith.constant 0 : index
    %c0_7 = arith.constant 0 : index
    %8 = vector.load %arg4[%c0_6, %c0_7] : memref<16x64xf32, #tpu.memory_space<vmem>>, vector<16x64xf32>
    tpu.vector_store %arg4[%c0_6, %c0_7], %7 {strides = array<i32>} : memref<16x64xf32, #tpu.memory_space<vmem>>, vector<16x64xf32>,
    return
  }
  func.func @transform_0(%arg0: i32) -> (i32, i32) {
    %c0_i32 = arith.constant 0 : i32
    %c0_i32_0 = arith.constant 0 : i32
    return %arg0, %c0_i32 : i32, i32
  }
  func.func @transform_1(%arg0: i32) -> (i32, i32) {
    %c0_i32 = arith.constant 0 : i32
    %c0_i32_0 = arith.constant 0 : i32
    %c0_i32_1 = arith.constant 0 : i32
    return %c0_i32, %c0_i32_0 : i32, i32
  }
  func.func @transform_2(%arg0: i32) -> (i32, i32) {
    %c0_i32 = arith.constant 0 : i32
    %c0_i32_0 = arith.constant 0 : i32
    %c0_i32_1 = arith.constant 0 : i32
    return %c0_i32, %c0_i32_0 : i32, i32
  }
  func.func @transform_3(%arg0: i32) -> (i32, i32) {
    %c0_i32 = arith.constant 0 : i32
    %c0_i32_0 = arith.constant 0 : i32
    return %arg0, %c0_i32 : i32, i32
  }
}

module attributes {stable_mosaic.version = 11 : i64} {
  func.func @_matmul_epilogue_kernel(%arg0: i32, %arg1: memref<8x1728xbf16, #tpu.memory_space<vmem>>, %arg2: memref<1728x64xbf16, #tpu.memory_space<vmem>>, %arg3: memref<1x64xf32, #tpu.memory_space<vmem>>, %arg4: memref<8x64xf32, #tpu.memory_space<vmem>>) attributes {dimension_semantics = [#tpu.dimension_semantics<parallel>], iteration_bounds = array<i64: 1>, scalar_prefetch = 0 : i64, scratch_operands = 0 : i64, tpu.core_type = #tpu.core_type<tc>, window_params = [{transform_indices = @transform_0, window_bounds = array<i64: 8, 1728>}, {pipeline_mode = #tpu.pipeline_mode<synchronous>, transform_indices = @transform_1, window_bounds = array<i64: 1728, 64>}, {pipeline_mode = #tpu.pipeline_mode<synchronous>, transform_indices = @transform_2, window_bounds = array<i64: 1, 64>}, {transform_indices = @transform_3, window_bounds = array<i64: 8, 64>}]} {
    %c0 = arith.constant 0 : index
    %c0_0 = arith.constant 0 : index
    %0 = vector.load %arg1[%c0, %c0_0] : memref<8x1728xbf16, #tpu.memory_space<vmem>>, vector<8x1728xbf16>
    %c0_1 = arith.constant 0 : index
    %c0_2 = arith.constant 0 : index
    %1 = vector.load %arg2[%c0_1, %c0_2] : memref<1728x64xbf16, #tpu.memory_space<vmem>>, vector<1728x64xbf16>
    %cst = arith.constant dense<0.000000e+00> : vector<8x64xf32>
    %2 = tpu.matmul %0, %1, %cst {dimension_numbers = #tpu.dot_dimension_numbers<[1], [0], [0], [1], [0, 0, 1, 1], [], []>} : vector<8x1728xbf16>, vector<1728x64xbf16>, vector<8x64xf32> -> vector<8x64xf32>
    %c0_3 = arith.constant 0 : index
    %c0_4 = arith.constant 0 : index
    %3 = vector.load %arg3[%c0_3, %c0_4] : memref<1x64xf32, #tpu.memory_space<vmem>>, vector<1x64xf32>
    %4 = vector.broadcast %3 : vector<1x64xf32> to vector<8x64xf32>
    %5 = arith.addf %2, %4 : vector<8x64xf32>
    %cst_5 = arith.constant 0.000000e+00 : f32
    %6 = vector.broadcast %cst_5 : f32 to vector<8x64xf32>
    %7 = arith.maximumf %5, %6 : vector<8x64xf32>
    %c0_6 = arith.constant 0 : index
    %c0_7 = arith.constant 0 : index
    %8 = vector.load %arg4[%c0_6, %c0_7] : memref<8x64xf32, #tpu.memory_space<vmem>>, vector<8x64xf32>
    tpu.vector_store %arg4[%c0_6, %c0_7], %7 {strides = array<i32>} : memref<8x64xf32, #tpu.memory_space<vmem>>, vector<8x64xf32>,
    return
  }
  func.func @transform_0(%arg0: i32) -> (i32, i32) {
    %c0_i32 = arith.constant 0 : i32
    %c0_i32_0 = arith.constant 0 : i32
    return %arg0, %c0_i32 : i32, i32
  }
  func.func @transform_1(%arg0: i32) -> (i32, i32) {
    %c0_i32 = arith.constant 0 : i32
    %c0_i32_0 = arith.constant 0 : i32
    %c0_i32_1 = arith.constant 0 : i32
    return %c0_i32, %c0_i32_0 : i32, i32
  }
  func.func @transform_2(%arg0: i32) -> (i32, i32) {
    %c0_i32 = arith.constant 0 : i32
    %c0_i32_0 = arith.constant 0 : i32
    %c0_i32_1 = arith.constant 0 : i32
    return %c0_i32, %c0_i32_0 : i32, i32
  }
  func.func @transform_3(%arg0: i32) -> (i32, i32) {
    %c0_i32 = arith.constant 0 : i32
    %c0_i32_0 = arith.constant 0 : i32
    return %arg0, %c0_i32 : i32, i32
  }
}

module attributes {stable_mosaic.version = 11 : i64} {
  func.func @_matmul_epilogue_kernel(%arg0: i32, %arg1: memref<16x256xbf16, #tpu.memory_space<vmem>>, %arg2: memref<256x128xbf16, #tpu.memory_space<vmem>>, %arg3: memref<1x128xf32, #tpu.memory_space<vmem>>, %arg4: memref<16x128xf32, #tpu.memory_space<vmem>>) attributes {dimension_semantics = [#tpu.dimension_semantics<parallel>], iteration_bounds = array<i64: 1>, scalar_prefetch = 0 : i64, scratch_operands = 0 : i64, tpu.core_type = #tpu.core_type<tc>, window_params = [{transform_indices = @transform_0, window_bounds = array<i64: 16, 256>}, {pipeline_mode = #tpu.pipeline_mode<synchronous>, transform_indices = @transform_1, window_bounds = array<i64: 256, 128>}, {pipeline_mode = #tpu.pipeline_mode<synchronous>, transform_indices = @transform_2, window_bounds = array<i64: 1, 128>}, {transform_indices = @transform_3, window_bounds = array<i64: 16, 128>}]} {
    %c0 = arith.constant 0 : index
    %c0_0 = arith.constant 0 : index
    %0 = vector.load %arg1[%c0, %c0_0] : memref<16x256xbf16, #tpu.memory_space<vmem>>, vector<16x256xbf16>
    %c0_1 = arith.constant 0 : index
    %c0_2 = arith.constant 0 : index
    %1 = vector.load %arg2[%c0_1, %c0_2] : memref<256x128xbf16, #tpu.memory_space<vmem>>, vector<256x128xbf16>
    %cst = arith.constant dense<0.000000e+00> : vector<16x128xf32>
    %2 = tpu.matmul %0, %1, %cst {dimension_numbers = #tpu.dot_dimension_numbers<[1], [0], [0], [1], [0, 0, 1, 1], [], []>} : vector<16x256xbf16>, vector<256x128xbf16>, vector<16x128xf32> -> vector<16x128xf32>
    %c0_3 = arith.constant 0 : index
    %c0_4 = arith.constant 0 : index
    %3 = vector.load %arg3[%c0_3, %c0_4] : memref<1x128xf32, #tpu.memory_space<vmem>>, vector<1x128xf32>
    %4 = vector.broadcast %3 : vector<1x128xf32> to vector<16x128xf32>
    %5 = arith.addf %2, %4 : vector<16x128xf32>
    %cst_5 = arith.constant 0.000000e+00 : f32
    %6 = vector.broadcast %cst_5 : f32 to vector<16x128xf32>
    %7 = arith.cmpf ogt, %5, %6 : vector<16x128xf32>
    %8 = math.exp %5 : vector<16x128xf32>
    %cst_6 = arith.constant 1.000000e+00 : f32
    %9 = vector.broadcast %cst_6 : f32 to vector<16x128xf32>
    %10 = arith.subf %8, %9 : vector<16x128xf32>
    %11 = arith.select %7, %5, %10 : vector<16x128xi1>, vector<16x128xf32>
    %c0_7 = arith.constant 0 : index
    %c0_8 = arith.constant 0 : index
    %12 = vector.load %arg4[%c0_7, %c0_8] : memref<16x128xf32, #tpu.memory_space<vmem>>, vector<16x128xf32>
    tpu.vector_store %arg4[%c0_7, %c0_8], %11 {strides = array<i32>} : memref<16x128xf32, #tpu.memory_space<vmem>>, vector<16x128xf32>,
    return
  }
  func.func @transform_0(%arg0: i32) -> (i32, i32) {
    %c0_i32 = arith.constant 0 : i32
    %c0_i32_0 = arith.constant 0 : i32
    return %arg0, %c0_i32 : i32, i32
  }
  func.func @transform_1(%arg0: i32) -> (i32, i32) {
    %c0_i32 = arith.constant 0 : i32
    %c0_i32_0 = arith.constant 0 : i32
    %c0_i32_1 = arith.constant 0 : i32
    return %c0_i32, %c0_i32_0 : i32, i32
  }
  func.func @transform_2(%arg0: i32) -> (i32, i32) {
    %c0_i32 = arith.constant 0 : i32
    %c0_i32_0 = arith.constant 0 : i32
    %c0_i32_1 = arith.constant 0 : i32
    return %c0_i32, %c0_i32_0 : i32, i32
  }
  func.func @transform_3(%arg0: i32) -> (i32, i32) {
    %c0_i32 = arith.constant 0 : i32
    %c0_i32_0 = arith.constant 0 : i32
    return %arg0, %c0_i32 : i32, i32
  }
}

module attributes {stable_mosaic.version = 11 : i64} {
  func.func @_matmul_epilogue_kernel(%arg0: i32, %arg1: memref<16x512xbf16, #tpu.memory_space<vmem>>, %arg2: memref<512x128xbf16, #tpu.memory_space<vmem>>, %arg3: memref<1x128xf32, #tpu.memory_space<vmem>>, %arg4: memref<16x128xf32, #tpu.memory_space<vmem>>) attributes {dimension_semantics = [#tpu.dimension_semantics<parallel>], iteration_bounds = array<i64: 2>, scalar_prefetch = 0 : i64, scratch_operands = 0 : i64, tpu.core_type = #tpu.core_type<tc>, window_params = [{transform_indices = @transform_0, window_bounds = array<i64: 16, 512>}, {pipeline_mode = #tpu.pipeline_mode<synchronous>, transform_indices = @transform_1, window_bounds = array<i64: 512, 128>}, {pipeline_mode = #tpu.pipeline_mode<synchronous>, transform_indices = @transform_2, window_bounds = array<i64: 1, 128>}, {transform_indices = @transform_3, window_bounds = array<i64: 16, 128>}]} {
    %c0 = arith.constant 0 : index
    %c0_0 = arith.constant 0 : index
    %0 = vector.load %arg1[%c0, %c0_0] : memref<16x512xbf16, #tpu.memory_space<vmem>>, vector<16x512xbf16>
    %c0_1 = arith.constant 0 : index
    %c0_2 = arith.constant 0 : index
    %1 = vector.load %arg2[%c0_1, %c0_2] : memref<512x128xbf16, #tpu.memory_space<vmem>>, vector<512x128xbf16>
    %cst = arith.constant dense<0.000000e+00> : vector<16x128xf32>
    %2 = tpu.matmul %0, %1, %cst {dimension_numbers = #tpu.dot_dimension_numbers<[1], [0], [0], [1], [0, 0, 1, 1], [], []>} : vector<16x512xbf16>, vector<512x128xbf16>, vector<16x128xf32> -> vector<16x128xf32>
    %c0_3 = arith.constant 0 : index
    %c0_4 = arith.constant 0 : index
    %3 = vector.load %arg3[%c0_3, %c0_4] : memref<1x128xf32, #tpu.memory_space<vmem>>, vector<1x128xf32>
    %4 = vector.broadcast %3 : vector<1x128xf32> to vector<16x128xf32>
    %5 = arith.addf %2, %4 : vector<16x128xf32>
    %cst_5 = arith.constant 0.000000e+00 : f32
    %6 = vector.broadcast %cst_5 : f32 to vector<16x128xf32>
    %7 = arith.cmpf ogt, %5, %6 : vector<16x128xf32>
    %8 = math.exp %5 : vector<16x128xf32>
    %cst_6 = arith.constant 1.000000e+00 : f32
    %9 = vector.broadcast %cst_6 : f32 to vector<16x128xf32>
    %10 = arith.subf %8, %9 : vector<16x128xf32>
    %11 = arith.select %7, %5, %10 : vector<16x128xi1>, vector<16x128xf32>
    %c0_7 = arith.constant 0 : index
    %c0_8 = arith.constant 0 : index
    %12 = vector.load %arg4[%c0_7, %c0_8] : memref<16x128xf32, #tpu.memory_space<vmem>>, vector<16x128xf32>
    tpu.vector_store %arg4[%c0_7, %c0_8], %11 {strides = array<i32>} : memref<16x128xf32, #tpu.memory_space<vmem>>, vector<16x128xf32>,
    return
  }
  func.func @transform_0(%arg0: i32) -> (i32, i32) {
    %c0_i32 = arith.constant 0 : i32
    %c0_i32_0 = arith.constant 0 : i32
    return %arg0, %c0_i32 : i32, i32
  }
  func.func @transform_1(%arg0: i32) -> (i32, i32) {
    %c0_i32 = arith.constant 0 : i32
    %c0_i32_0 = arith.constant 0 : i32
    %c0_i32_1 = arith.constant 0 : i32
    return %c0_i32, %c0_i32_0 : i32, i32
  }
  func.func @transform_2(%arg0: i32) -> (i32, i32) {
    %c0_i32 = arith.constant 0 : i32
    %c0_i32_0 = arith.constant 0 : i32
    %c0_i32_1 = arith.constant 0 : i32
    return %c0_i32, %c0_i32_0 : i32, i32
  }
  func.func @transform_3(%arg0: i32) -> (i32, i32) {
    %c0_i32 = arith.constant 0 : i32
    %c0_i32_0 = arith.constant 0 : i32
    return %arg0, %c0_i32 : i32, i32
  }
}

</mosaic_0001>

<bundles_post_ra>
// kernel: forward.10
= control target key start
LH: loop header
LB: loop body
LE: loop exit
PB: predicated region body
PF: predicated region fallthrough
CT: control target
= control target key end

     0   :  { %s1300_s12 = smov 0   ;;  %s1601_s0 = inlined_call_operand.vmem [shape: bf16[8192,75], index: 0, kind: input, shape index: {}]   ;;  %s1602_s1 = inlined_call_operand.vmem [shape: bf16[75,16], index: 1, kind: input, shape index: {}]   ;;  %s1603_s2 = inlined_call_operand.vmem [shape: f32[1,16], index: 2, kind: input, shape index: {}]   ;;  %s1604_s3 = inlined_call_operand.vmem [shape: f32[8192,16], index: 3, kind: output, shape index: {}]  }
   0x1 LB: > { %s1023_s13 = sadd.s32 4294967295, %s1277_s12   ;;  %p1027_p0 = scmp.ge.s32.totalorder %s1277_s12, 1  ;;  %s1277_s12 = sphi %s1300_s12, %s13_s12  }
   0x2   : > { %p138_p1 = scmp.lt.s32.totalorder %s1277_s12, 17 }
   0x4   : > { %p139_p2 = pnand %p1027_p0, %p138_p1 }
   0x5   : > { %v1234_v0 = vld [vmem:[%s1602_s1] sm:$0xff] (!%p139_p2)   ;;  %v1235_v1 = vld [vmem:[%s1602_s1 + $0x8] sm:$0xff] (!%p139_p2)   ;;  %vm542_vm0 = vcmask (!%p139_p2), 1044480   ;;  %v1236_v2 = vld [vmem:[%s1602_s1 + $0x10] sm:$0xff] (!%p139_p2)   ;;  %s1028_s20 = sshll.u32 (!%p139_p2), %s1023_s13, 6  ;;  %vm543_vm1 = vcmask (!%p139_p2), 1045504  }
   0x6   : > { %142 = sbr.rel (%p139_p2) target bundleno = 302 (0x12e), region = 32  ;;  %1141 = vmatprep.subr.bf16.mxu0 (!%p139_p2), %v1234_v0  ;;  %1215 = vmatprep.subr.bf16.mxu1 (!%p139_p2), %v1234_v0  ;;  %v1279_v3 = vmov (!%p139_p2), 65535   ;;  %p163_p3 = scmp.lt.s32.totalorder (!%p139_p2), %s1028_s20, 1023  ;;  %v1237_v5 = vld [vmem:[%s1602_s1 + $0x18] sm:$0xff] (!%p139_p2)   ;;  %v1238_v6 = vld [vmem:[%s1602_s1 + $0x20] sm:$0x3f] (!%p139_p2)  }
   0x7   : > { %1142 = vmatpush3.bf16.msra.mxu0 (!%p139_p2), %v1234_v0  ;;  %1220 = vmatpush3.bf16.msra.mxu1 (!%p139_p2), %v1234_v0  ;;  %v544_v4 = vsel (!%p139_p2), %vm542_vm0, 4294967295, %v1279_v3  ;;  %vm445_vm2 = vcmask (!%p139_p2), 613376   ;;  %v1398_v41 = vld [vmem:[%s1603_s2] ss:$0 sm:$0xff] (!%p139_p2)  ;;  %vm902_vm3 = vcmask (!%p139_p2), 130048  }
   0x8   : > { %1143 = vmatprep.subr.bf16.mxu0 (!%p139_p2), %v1235_v1  ;;  %1216 = vmatprep.subr.bf16.mxu1 (!%p139_p2), %v1235_v1  ;;  %v545_v7 = vsel (!%p139_p2), %vm543_vm1, %v544_v4, 0 }
   0x9   : > { %v547_v8 = vand.u32 (!%p139_p2), %v1238_v6, %v545_v7 }
   0xb   : > { %1144 = vmatpush3.bf16.msra.mxu0 (!%p139_p2), %v1235_v1  ;;  %1221 = vmatpush3.bf16.msra.mxu1 (!%p139_p2), %v1235_v1 }
   0xc   : > { %1145 = vmatprep.subr.bf16.mxu0 (!%p139_p2), %v1236_v2  ;;  %1217 = vmatprep.subr.bf16.mxu1 (!%p139_p2), %v1236_v2 }
   0xd   : > { %s1606_s20 = smov (!%p163_p3, %s1028_s20), 1023 }
   0xe   : > { %s1029_s25 = sshll.u32 %s1606_s20, 2  ;;  %s1031_s4 = sshll.u32 %s1606_s20, 3 }
   0xf   : > { %1146 = vmatpush3.bf16.msra.mxu0 %v1236_v2  ;;  %1222 = vmatpush3.bf16.msra.mxu1 %v1236_v2  ;;  %s1329_s28 = scalar_lea.vmem %s1601_s0, %s1029_s25  ;;  %s1406_s7 = scalar_lea.vmem %s1604_s3, %s1031_s4 }
  0x10   : > { %1147 = vmatprep.subr.bf16.mxu0 %v1237_v5  ;;  %1218 = vmatprep.subr.bf16.mxu1 %v1237_v5  ;;  %v1239_v9 = vld [vmem:[%s1329_s28] sm:$0xff]   ;;  %v1241_v11 = vld [vmem:[%s1329_s28 + $0x8] sm:$0xff]   ;;  %v1243_v13 = vld [vmem:[%s1329_s28 + $0x10] sm:$0xff]  }
  0x11   : > { %v1240_v10 = vld [vmem:[%s1329_s28 + $0x80] sm:$0xff]   ;;  %1151 = vmatprep.mubr.msk.bf16.mxu0 %vm445_vm2, %v1239_v9  ;;  %v1242_v12 = vld [vmem:[%s1329_s28 + $0x88] sm:$0xff]   ;;  %v1244_v14 = vld [vmem:[%s1329_s28 + $0x90] sm:$0xff]  }
  0x12   : > { %1183 = vmatprep.mubr.msk.bf16.mxu1 %vm445_vm2, %v1240_v10  ;;  %v1245_v15 = vld [vmem:[%s1329_s28 + $0x18] sm:$0xff]   ;;  %v1247_v17 = vld [vmem:[%s1329_s28 + $0x20] sm:$0xff]   ;;  %v1249_v19 = vld [vmem:[%s1329_s28 + $0x28] sm:$0xff]  }
  0x13   : > { %1148 = vmatpush3.bf16.msra.mxu0 %v1237_v5  ;;  %1223 = vmatpush3.bf16.msra.mxu1 %v1237_v5  ;;  %v1246_v16 = vld [vmem:[%s1329_s28 + $0x98] sm:$0xff]   ;;  %v1248_v18 = vld [vmem:[%s1329_s28 + $0xa0] sm:$0xff]   ;;  %v1250_v20 = vld [vmem:[%s1329_s28 + $0xa8] sm:$0xff]  }
  0x14   : > { %1149 = vmatprep.subr.bf16.mxu0 %v547_v8  ;;  %1219 = vmatprep.subr.bf16.mxu1 %v547_v8  ;;  %v1251_v21 = vld [vmem:[%s1329_s28 + $0x30] sm:$0xff]   ;;  %v1253_v23 = vld [vmem:[%s1329_s28 + $0x38] sm:$0xff]   ;;  %v1255_v25 = vld [vmem:[%s1329_s28 + $0x40] sm:$0xff]  }
  0x15   : > { %v1252_v22 = vld [vmem:[%s1329_s28 + $0xb0] sm:$0xff]   ;;  %v1254_v24 = vld [vmem:[%s1329_s28 + $0xb8] sm:$0xff]   ;;  %v1256_v26 = vld [vmem:[%s1329_s28 + $0xc0] sm:$0xff]  }
  0x16   : > { %v1257_v27 = vld [vmem:[%s1329_s28 + $0x48] sm:$0xff]   ;;  %v1259_v29 = vld [vmem:[%s1329_s28 + $0x50] sm:$0xff]   ;;  %v1261_v31 = vld [vmem:[%s1329_s28 + $0x58] sm:$0xff]  }
  0x17   : > { %1150 = vmatpush3.bf16.msra.mxu0 %v547_v8  ;;  %1224 = vmatpush3.bf16.msra.mxu1 %v547_v8  ;;  %v1258_v28 = vld [vmem:[%s1329_s28 + $0xc8] sm:$0xff]   ;;  %v1260_v30 = vld [vmem:[%s1329_s28 + $0xd0] sm:$0xff]   ;;  %v1262_v32 = vld [vmem:[%s1329_s28 + $0xd8] sm:$0xff]  }
  0x18   : > { %v1263_v33 = vld [vmem:[%s1329_s28 + $0x60] sm:$0xff]   ;;  %v1265_v35 = vld [vmem:[%s1329_s28 + $0x68] sm:$0xff]   ;;  %v1267_v37 = vld [vmem:[%s1329_s28 + $0x70] sm:$0xff]  }
  0x19   : > { %v1264_v34 = vld [vmem:[%s1329_s28 + $0xe0] sm:$0xff]   ;;  %v1266_v36 = vld [vmem:[%s1329_s28 + $0xe8] sm:$0xff]   ;;  %v1268_v38 = vld [vmem:[%s1329_s28 + $0xf0] sm:$0xff]  }
  0x1a   : > { %1152 = vmatmul.mubr.msk.bf16.vlgmr.msra.gmra.mrb[0].mxu0 %vm445_vm2, %v1241_v11  ;;  %1184 = vmatmul.mubr.msk.bf16.vlgmr.msra.gmra.mrb[0].mxu1 %vm445_vm2, %v1242_v12  ;;  %v1269_v39 = vld [vmem:[%s1329_s28 + $0x78] sm:$0xff]  }
  0x1b   : > { %1155 = vmatprep.mubr.msk.bf16.mxu0 %vm445_vm2, %v1243_v13  ;;  %1187 = vmatprep.mubr.msk.bf16.mxu1 %vm445_vm2, %v1244_v14  ;;  %v1270_v40 = vld [vmem:[%s1329_s28 + $0xf8] sm:$0xff]  }
  0x22   : > { %1156 = vmatmul.mubr.msk.bf16.gmra.mrb[4].mxu0 %vm445_vm2, %v1245_v15  ;;  %1188 = vmatmul.mubr.msk.bf16.gmra.mrb[4].mxu1 %vm445_vm2, %v1246_v16 }
  0x23   : > { %1159 = vmatprep.mubr.msk.bf16.mxu0 %vm445_vm2, %v1247_v17  ;;  %1191 = vmatprep.mubr.msk.bf16.mxu1 %vm445_vm2, %v1248_v18 }
  0x2a   : > { %1160 = vmatmul.mubr.msk.bf16.gmra.mrb[8].mxu0 %vm445_vm2, %v1249_v19  ;;  %1192 = vmatmul.mubr.msk.bf16.gmra.mrb[8].mxu1 %vm445_vm2, %v1250_v20 }
  0x2b   : > { %1163 = vmatprep.mubr.msk.bf16.mxu0 %vm445_vm2, %v1251_v21  ;;  %1195 = vmatprep.mubr.msk.bf16.mxu1 %vm445_vm2, %v1252_v22 }
  0x32   : > { %1164 = vmatmul.mubr.msk.bf16.gmra.mrb[12].mxu0 %vm445_vm2, %v1253_v23  ;;  %1196 = vmatmul.mubr.msk.bf16.gmra.mrb[12].mxu1 %vm445_vm2, %v1254_v24 }
  0x33   : > { %1167 = vmatprep.mubr.msk.bf16.mxu0 %vm445_vm2, %v1255_v25  ;;  %1199 = vmatprep.mubr.msk.bf16.mxu1 %vm445_vm2, %v1256_v26 }
  0x3a   : > { %1168 = vmatmul.mubr.msk.bf16.gmra.mrb[16].mxu0 %vm445_vm2, %v1257_v27  ;;  %1200 = vmatmul.mubr.msk.bf16.gmra.mrb[16].mxu1 %vm445_vm2, %v1258_v28 }
  0x3b   : > { %1171 = vmatprep.mubr.msk.bf16.mxu0 %vm445_vm2, %v1259_v29  ;;  %1203 = vmatprep.mubr.msk.bf16.mxu1 %vm445_vm2, %v1260_v30 }
  0x42   : > { %1172 = vmatmul.mubr.msk.bf16.gmra.mrb[20].mxu0 %vm445_vm2, %v1261_v31  ;;  %1204 = vmatmul.mubr.msk.bf16.gmra.mrb[20].mxu1 %vm445_vm2, %v1262_v32 }
  0x43   : > { %1175 = vmatprep.mubr.msk.bf16.mxu0 %vm445_vm2, %v1263_v33  ;;  %1207 = vmatprep.mubr.msk.bf16.mxu1 %vm445_vm2, %v1264_v34 }
  0x4a   : > { %1176 = vmatmul.mubr.msk.bf16.gmra.mrb[24].mxu0 %vm445_vm2, %v1265_v35  ;;  %1208 = vmatmul.mubr.msk.bf16.gmra.mrb[24].mxu1 %vm445_vm2, %v1266_v36 }
  0x4b   : > { %1179 = vmatprep.mubr.msk.bf16.mxu0 %vm445_vm2, %v1267_v37  ;;  %1211 = vmatprep.mubr.msk.bf16.mxu1 %vm445_vm2, %v1268_v38 }
  0x52   : > { %1180 = vmatmul.mubr.msk.bf16.gmra.mrb[28].mxu0 %vm445_vm2, %v1269_v39  ;;  %1212 = vmatmul.mubr.msk.bf16.gmra.mrb[28].mxu1 %vm445_vm2, %v1270_v40 }
  0xed   : > { %v1153_v42 = vpop.f32.mrb[0].mxu0  ;;  %v1185_v43 = vpop.f32.mrb[0].mxu1 }
  0xee   : > { %v592_v44 = vadd.f32 %v1153_v42, %v1398_v41  ;;  %v720_v45 = vadd.f32 %v1185_v43, %v1398_v41  ;;  %v583_v46 = vpop.f32.mrb[1].mxu0  ;;  %v711_v47 = vpop.f32.mrb[1].mxu1 }
  0xef   : > { %v584_v48 = vadd.f32 %v1398_v41, %v583_v46  ;;  %v712_v49 = vadd.f32 %v1398_v41, %v711_v47  ;;  %v1154_v50 = vpop.f32.mrb[2].mxu0  ;;  %v1186_v51 = vpop.f32.mrb[2].mxu1 }
  0xf0   : > { %v840_v52 = vmax.f32 %v592_v44, 0.0  ;;  %v872_v53 = vmax.f32 %v720_v45, 0.0  ;;  %v595_v54 = vadd.f32 %v1154_v50, %v1398_v41  ;;  %v723_v55 = vadd.f32 %v1186_v51, %v1398_v41  ;;  %v586_v56 = vpop.f32.mrb[3].mxu0  ;;  %v714_v57 = vpop.f32.mrb[3].mxu1 }
  0xf1   : > { %v838_v58 = vmax.f32 %v584_v48, 0.0  ;;  %v870_v59 = vmax.f32 %v712_v49, 0.0  ;;  %v587_v60 = vadd.f32 %v1398_v41, %v586_v56  ;;  %v715_v61 = vadd.f32 %v1398_v41, %v714_v57 }
  0xf2   : > { %905 = vst.msk [vmem:[%s1406_s7 + $0x10] sm:$0xff] %vm902_vm3, %v840_v52  ;;  %937 = vst.msk [vmem:[%s1406_s7 + $0x110] sm:$0xff] %vm902_vm3, %v872_v53  ;;  %v841_v62 = vmax.f32 %v595_v54, 0.0  ;;  %v873_v63 = vmax.f32 %v723_v55, 0.0 }
  0xf3   : > { %903 = vst.msk [vmem:[%s1406_s7] sm:$0xff] %vm902_vm3, %v838_v58  ;;  %935 = vst.msk [vmem:[%s1406_s7 + $0x100] sm:$0xff] %vm902_vm3, %v870_v59  ;;  %v839_v0 = vmax.f32 %v587_v60, 0.0  ;;  %v871_v1 = vmax.f32 %v715_v61, 0.0 }
  0xf4   : > { %906 = vst.msk [vmem:[%s1406_s7 + $0x18] sm:$0xff] %vm902_vm3, %v841_v62  ;;  %938 = vst.msk [vmem:[%s1406_s7 + $0x118] sm:$0xff] %vm902_vm3, %v873_v63 }
  0xf5   : > { %904 = vst.msk [vmem:[%s1406_s7 + $0x8] sm:$0xff] %vm902_vm3, %v839_v0  ;;  %936 = vst.msk [vmem:[%s1406_s7 + $0x108] sm:$0xff] %vm902_vm3, %v871_v1  ;;  %v1157_v2 = vpop.f32.mrb[4].mxu0  ;;  %v1189_v3 = vpop.f32.mrb[4].mxu1 }
  0xf6   : > { %v608_v4 = vadd.f32 %v1157_v2, %v1398_v41  ;;  %v736_v5 = vadd.f32 %v1189_v3, %v1398_v41  ;;  %v599_v6 = vpop.f32.mrb[5].mxu0  ;;  %v727_v7 = vpop.f32.mrb[5].mxu1 }
  0xf7   : > { %v600_v8 = vadd.f32 %v1398_v41, %v599_v6  ;;  %v728_v9 = vadd.f32 %v1398_v41, %v727_v7  ;;  %v1158_v10 = vpop.f32.mrb[6].mxu0  ;;  %v1190_v11 = vpop.f32.mrb[6].mxu1 }
  0xf8   : > { %v844_v12 = vmax.f32 %v608_v4, 0.0  ;;  %v876_v13 = vmax.f32 %v736_v5, 0.0  ;;  %v611_v14 = vadd.f32 %v1158_v10, %v1398_v41  ;;  %v739_v15 = vadd.f32 %v1190_v11, %v1398_v41  ;;  %v602_v16 = vpop.f32.mrb[7].mxu0  ;;  %v730_v17 = vpop.f32.mrb[7].mxu1 }
  0xf9   : > { %v842_v18 = vmax.f32 %v600_v8, 0.0  ;;  %v874_v19 = vmax.f32 %v728_v9, 0.0  ;;  %v603_v20 = vadd.f32 %v1398_v41, %v602_v16  ;;  %v731_v21 = vadd.f32 %v1398_v41, %v730_v17 }
  0xfa   : > { %909 = vst.msk [vmem:[%s1406_s7 + $0x30] sm:$0xff] %vm902_vm3, %v844_v12  ;;  %941 = vst.msk [vmem:[%s1406_s7 + $0x130] sm:$0xff] %vm902_vm3, %v876_v13  ;;  %v845_v22 = vmax.f32 %v611_v14, 0.0  ;;  %v877_v23 = vmax.f32 %v739_v15, 0.0 }
  0xfb   : > { %907 = vst.msk [vmem:[%s1406_s7 + $0x20] sm:$0xff] %vm902_vm3, %v842_v18  ;;  %939 = vst.msk [vmem:[%s1406_s7 + $0x120] sm:$0xff] %vm902_vm3, %v874_v19  ;;  %v843_v24 = vmax.f32 %v603_v20, 0.0  ;;  %v875_v25 = vmax.f32 %v731_v21, 0.0 }
  0xfc   : > { %910 = vst.msk [vmem:[%s1406_s7 + $0x38] sm:$0xff] %vm902_vm3, %v845_v22  ;;  %942 = vst.msk [vmem:[%s1406_s7 + $0x138] sm:$0xff] %vm902_vm3, %v877_v23 }
  0xfd   : > { %908 = vst.msk [vmem:[%s1406_s7 + $0x28] sm:$0xff] %vm902_vm3, %v843_v24  ;;  %940 = vst.msk [vmem:[%s1406_s7 + $0x128] sm:$0xff] %vm902_vm3, %v875_v25  ;;  %v1161_v26 = vpop.f32.mrb[8].mxu0  ;;  %v1193_v27 = vpop.f32.mrb[8].mxu1 }
  0xfe   : > { %v624_v28 = vadd.f32 %v1161_v26, %v1398_v41  ;;  %v752_v29 = vadd.f32 %v1193_v27, %v1398_v41  ;;  %v615_v30 = vpop.f32.mrb[9].mxu0  ;;  %v743_v31 = vpop.f32.mrb[9].mxu1 }
  0xff   : > { %v616_v32 = vadd.f32 %v1398_v41, %v615_v30  ;;  %v744_v33 = vadd.f32 %v1398_v41, %v743_v31  ;;  %v1162_v34 = vpop.f32.mrb[10].mxu0  ;;  %v1194_v35 = vpop.f32.mrb[10].mxu1 }
 0x100   : > { %v848_v36 = vmax.f32 %v624_v28, 0.0  ;;  %v880_v37 = vmax.f32 %v752_v29, 0.0  ;;  %v627_v38 = vadd.f32 %v1162_v34, %v1398_v41  ;;  %v755_v39 = vadd.f32 %v1194_v35, %v1398_v41  ;;  %v618_v40 = vpop.f32.mrb[11].mxu0  ;;  %v746_v42 = vpop.f32.mrb[11].mxu1 }
 0x101   : > { %v846_v43 = vmax.f32 %v616_v32, 0.0  ;;  %v878_v44 = vmax.f32 %v744_v33, 0.0  ;;  %v619_v45 = vadd.f32 %v1398_v41, %v618_v40  ;;  %v747_v46 = vadd.f32 %v1398_v41, %v746_v42 }
 0x102   : > { %913 = vst.msk [vmem:[%s1406_s7 + $0x50] sm:$0xff] %vm902_vm3, %v848_v36  ;;  %945 = vst.msk [vmem:[%s1406_s7 + $0x150] sm:$0xff] %vm902_vm3, %v880_v37  ;;  %v849_v47 = vmax.f32 %v627_v38, 0.0  ;;  %v881_v48 = vmax.f32 %v755_v39, 0.0 }
 0x103   : > { %911 = vst.msk [vmem:[%s1406_s7 + $0x40] sm:$0xff] %vm902_vm3, %v846_v43  ;;  %943 = vst.msk [vmem:[%s1406_s7 + $0x140] sm:$0xff] %vm902_vm3, %v878_v44  ;;  %v847_v49 = vmax.f32 %v619_v45, 0.0  ;;  %v879_v50 = vmax.f32 %v747_v46, 0.0 }
 0x104   : > { %914 = vst.msk [vmem:[%s1406_s7 + $0x58] sm:$0xff] %vm902_vm3, %v849_v47  ;;  %946 = vst.msk [vmem:[%s1406_s7 + $0x158] sm:$0xff] %vm902_vm3, %v881_v48 }
 0x105   : > { %912 = vst.msk [vmem:[%s1406_s7 + $0x48] sm:$0xff] %vm902_vm3, %v847_v49  ;;  %944 = vst.msk [vmem:[%s1406_s7 + $0x148] sm:$0xff] %vm902_vm3, %v879_v50  ;;  %v1165_v51 = vpop.f32.mrb[12].mxu0  ;;  %v1197_v52 = vpop.f32.mrb[12].mxu1 }
 0x106   : > { %v640_v53 = vadd.f32 %v1165_v51, %v1398_v41  ;;  %v768_v54 = vadd.f32 %v1197_v52, %v1398_v41  ;;  %v631_v55 = vpop.f32.mrb[13].mxu0  ;;  %v759_v56 = vpop.f32.mrb[13].mxu1 }
 0x107   : > { %v632_v57 = vadd.f32 %v1398_v41, %v631_v55  ;;  %v760_v58 = vadd.f32 %v1398_v41, %v759_v56  ;;  %v1166_v59 = vpop.f32.mrb[14].mxu0  ;;  %v1198_v60 = vpop.f32.mrb[14].mxu1 }
 0x108   : > { %v852_v61 = vmax.f32 %v640_v53, 0.0  ;;  %v884_v62 = vmax.f32 %v768_v54, 0.0  ;;  %v643_v63 = vadd.f32 %v1166_v59, %v1398_v41  ;;  %v771_v0 = vadd.f32 %v1198_v60, %v1398_v41  ;;  %v634_v1 = vpop.f32.mrb[15].mxu0  ;;  %v762_v2 = vpop.f32.mrb[15].mxu1 }
 0x109   : > { %v850_v3 = vmax.f32 %v632_v57, 0.0  ;;  %v882_v4 = vmax.f32 %v760_v58, 0.0  ;;  %v635_v5 = vadd.f32 %v1398_v41, %v634_v1  ;;  %v763_v6 = vadd.f32 %v1398_v41, %v762_v2 }
 0x10a   : > { %917 = vst.msk [vmem:[%s1406_s7 + $0x70] sm:$0xff] %vm902_vm3, %v852_v61  ;;  %949 = vst.msk [vmem:[%s1406_s7 + $0x170] sm:$0xff] %vm902_vm3, %v884_v62  ;;  %v853_v7 = vmax.f32 %v643_v63, 0.0  ;;  %v885_v8 = vmax.f32 %v771_v0, 0.0 }
 0x10b   : > { %915 = vst.msk [vmem:[%s1406_s7 + $0x60] sm:$0xff] %vm902_vm3, %v850_v3  ;;  %947 = vst.msk [vmem:[%s1406_s7 + $0x160] sm:$0xff] %vm902_vm3, %v882_v4  ;;  %v851_v9 = vmax.f32 %v635_v5, 0.0  ;;  %v883_v10 = vmax.f32 %v763_v6, 0.0 }
 0x10c   : > { %918 = vst.msk [vmem:[%s1406_s7 + $0x78] sm:$0xff] %vm902_vm3, %v853_v7  ;;  %950 = vst.msk [vmem:[%s1406_s7 + $0x178] sm:$0xff] %vm902_vm3, %v885_v8 }
 0x10d   : > { %916 = vst.msk [vmem:[%s1406_s7 + $0x68] sm:$0xff] %vm902_vm3, %v851_v9  ;;  %948 = vst.msk [vmem:[%s1406_s7 + $0x168] sm:$0xff] %vm902_vm3, %v883_v10  ;;  %v1169_v11 = vpop.f32.mrb[16].mxu0  ;;  %v1201_v12 = vpop.f32.mrb[16].mxu1 }
 0x10e   : > { %v656_v13 = vadd.f32 %v1169_v11, %v1398_v41  ;;  %v784_v14 = vadd.f32 %v1201_v12, %v1398_v41  ;;  %v647_v15 = vpop.f32.mrb[17].mxu0  ;;  %v775_v16 = vpop.f32.mrb[17].mxu1 }
 0x10f   : > { %v648_v17 = vadd.f32 %v1398_v41, %v647_v15  ;;  %v776_v18 = vadd.f32 %v1398_v41, %v775_v16  ;;  %v1170_v19 = vpop.f32.mrb[18].mxu0  ;;  %v1202_v20 = vpop.f32.mrb[18].mxu1 }
 0x110   : > { %v856_v21 = vmax.f32 %v656_v13, 0.0  ;;  %v888_v22 = vmax.f32 %v784_v14, 0.0  ;;  %v659_v23 = vadd.f32 %v1170_v19, %v1398_v41  ;;  %v787_v24 = vadd.f32 %v1202_v20, %v1398_v41  ;;  %v650_v25 = vpop.f32.mrb[19].mxu0  ;;  %v778_v26 = vpop.f32.mrb[19].mxu1 }
 0x111   : > { %v854_v27 = vmax.f32 %v648_v17, 0.0  ;;  %v886_v28 = vmax.f32 %v776_v18, 0.0  ;;  %v651_v29 = vadd.f32 %v1398_v41, %v650_v25  ;;  %v779_v30 = vadd.f32 %v1398_v41, %v778_v26 }
 0x112   : > { %921 = vst.msk [vmem:[%s1406_s7 + $0x90] sm:$0xff] %vm902_vm3, %v856_v21  ;;  %953 = vst.msk [vmem:[%s1406_s7 + $0x190] sm:$0xff] %vm902_vm3, %v888_v22  ;;  %v857_v31 = vmax.f32 %v659_v23, 0.0  ;;  %v889_v32 = vmax.f32 %v787_v24, 0.0 }
 0x113   : > { %919 = vst.msk [vmem:[%s1406_s7 + $0x80] sm:$0xff] %vm902_vm3, %v854_v27  ;;  %951 = vst.msk [vmem:[%s1406_s7 + $0x180] sm:$0xff] %vm902_vm3, %v886_v28  ;;  %v855_v33 = vmax.f32 %v651_v29, 0.0  ;;  %v887_v34 = vmax.f32 %v779_v30, 0.0 }
 0x114   : > { %922 = vst.msk [vmem:[%s1406_s7 + $0x98] sm:$0xff] %vm902_vm3, %v857_v31  ;;  %954 = vst.msk [vmem:[%s1406_s7 + $0x198] sm:$0xff] %vm902_vm3, %v889_v32 }
 0x115   : > { %920 = vst.msk [vmem:[%s1406_s7 + $0x88] sm:$0xff] %vm902_vm3, %v855_v33  ;;  %952 = vst.msk [vmem:[%s1406_s7 + $0x188] sm:$0xff] %vm902_vm3, %v887_v34  ;;  %v1173_v35 = vpop.f32.mrb[20].mxu0  ;;  %v1205_v36 = vpop.f32.mrb[20].mxu1 }
 0x116   : > { %v672_v37 = vadd.f32 %v1173_v35, %v1398_v41  ;;  %v800_v38 = vadd.f32 %v1205_v36, %v1398_v41  ;;  %v663_v39 = vpop.f32.mrb[21].mxu0  ;;  %v791_v40 = vpop.f32.mrb[21].mxu1 }
 0x117   : > { %v664_v42 = vadd.f32 %v1398_v41, %v663_v39  ;;  %v792_v43 = vadd.f32 %v1398_v41, %v791_v40  ;;  %v1174_v44 = vpop.f32.mrb[22].mxu0  ;;  %v1206_v45 = vpop.f32.mrb[22].mxu1 }
 0x118   : > { %v860_v46 = vmax.f32 %v672_v37, 0.0  ;;  %v892_v47 = vmax.f32 %v800_v38, 0.0  ;;  %v675_v48 = vadd.f32 %v1174_v44, %v1398_v41  ;;  %v803_v49 = vadd.f32 %v1206_v45, %v1398_v41  ;;  %v666_v50 = vpop.f32.mrb[23].mxu0  ;;  %v794_v51 = vpop.f32.mrb[23].mxu1 }
 0x119   : > { %v858_v52 = vmax.f32 %v664_v42, 0.0  ;;  %v890_v53 = vmax.f32 %v792_v43, 0.0  ;;  %v667_v54 = vadd.f32 %v1398_v41, %v666_v50  ;;  %v795_v55 = vadd.f32 %v1398_v41, %v794_v51 }
 0x11a   : > { %925 = vst.msk [vmem:[%s1406_s7 + $0xb0] sm:$0xff] %vm902_vm3, %v860_v46  ;;  %957 = vst.msk [vmem:[%s1406_s7 + $0x1b0] sm:$0xff] %vm902_vm3, %v892_v47  ;;  %v861_v56 = vmax.f32 %v675_v48, 0.0  ;;  %v893_v57 = vmax.f32 %v803_v49, 0.0 }
 0x11b   : > { %923 = vst.msk [vmem:[%s1406_s7 + $0xa0] sm:$0xff] %vm902_vm3, %v858_v52  ;;  %955 = vst.msk [vmem:[%s1406_s7 + $0x1a0] sm:$0xff] %vm902_vm3, %v890_v53  ;;  %v859_v58 = vmax.f32 %v667_v54, 0.0  ;;  %v891_v59 = vmax.f32 %v795_v55, 0.0 }
 0x11c   : > { %926 = vst.msk [vmem:[%s1406_s7 + $0xb8] sm:$0xff] %vm902_vm3, %v861_v56  ;;  %958 = vst.msk [vmem:[%s1406_s7 + $0x1b8] sm:$0xff] %vm902_vm3, %v893_v57 }
 0x11d   : > { %924 = vst.msk [vmem:[%s1406_s7 + $0xa8] sm:$0xff] %vm902_vm3, %v859_v58  ;;  %956 = vst.msk [vmem:[%s1406_s7 + $0x1a8] sm:$0xff] %vm902_vm3, %v891_v59  ;;  %v1177_v60 = vpop.f32.mrb[24].mxu0  ;;  %v1209_v61 = vpop.f32.mrb[24].mxu1 }
 0x11e   : > { %v688_v62 = vadd.f32 %v1177_v60, %v1398_v41  ;;  %v816_v63 = vadd.f32 %v1209_v61, %v1398_v41  ;;  %v679_v0 = vpop.f32.mrb[25].mxu0  ;;  %v807_v1 = vpop.f32.mrb[25].mxu1 }
 0x11f   : > { %v680_v2 = vadd.f32 %v1398_v41, %v679_v0  ;;  %v808_v3 = vadd.f32 %v1398_v41, %v807_v1  ;;  %v1178_v4 = vpop.f32.mrb[26].mxu0  ;;  %v1210_v5 = vpop.f32.mrb[26].mxu1 }
 0x120   : > { %v864_v6 = vmax.f32 %v688_v62, 0.0  ;;  %v896_v7 = vmax.f32 %v816_v63, 0.0  ;;  %v691_v8 = vadd.f32 %v1178_v4, %v1398_v41  ;;  %v819_v9 = vadd.f32 %v1210_v5, %v1398_v41  ;;  %v682_v10 = vpop.f32.mrb[27].mxu0  ;;  %v810_v11 = vpop.f32.mrb[27].mxu1 }
 0x121   : > { %v862_v12 = vmax.f32 %v680_v2, 0.0  ;;  %v894_v13 = vmax.f32 %v808_v3, 0.0  ;;  %v683_v14 = vadd.f32 %v1398_v41, %v682_v10  ;;  %v811_v15 = vadd.f32 %v1398_v41, %v810_v11 }
 0x122   : > { %929 = vst.msk [vmem:[%s1406_s7 + $0xd0] sm:$0xff] %vm902_vm3, %v864_v6  ;;  %961 = vst.msk [vmem:[%s1406_s7 + $0x1d0] sm:$0xff] %vm902_vm3, %v896_v7  ;;  %v865_v16 = vmax.f32 %v691_v8, 0.0  ;;  %v897_v17 = vmax.f32 %v819_v9, 0.0 }
 0x123   : > { %927 = vst.msk [vmem:[%s1406_s7 + $0xc0] sm:$0xff] %vm902_vm3, %v862_v12  ;;  %959 = vst.msk [vmem:[%s1406_s7 + $0x1c0] sm:$0xff] %vm902_vm3, %v894_v13  ;;  %v863_v18 = vmax.f32 %v683_v14, 0.0  ;;  %v895_v19 = vmax.f32 %v811_v15, 0.0 }
 0x124   : > { %930 = vst.msk [vmem:[%s1406_s7 + $0xd8] sm:$0xff] %vm902_vm3, %v865_v16  ;;  %962 = vst.msk [vmem:[%s1406_s7 + $0x1d8] sm:$0xff] %vm902_vm3, %v897_v17 }
 0x125   : > { %928 = vst.msk [vmem:[%s1406_s7 + $0xc8] sm:$0xff] %vm902_vm3, %v863_v18  ;;  %960 = vst.msk [vmem:[%s1406_s7 + $0x1c8] sm:$0xff] %vm902_vm3, %v895_v19  ;;  %v1181_v20 = vpop.f32.mrb[28].mxu0  ;;  %v1213_v21 = vpop.f32.mrb[28].mxu1 }
 0x126   : > { %v704_v22 = vadd.f32 %v1181_v20, %v1398_v41  ;;  %v832_v23 = vadd.f32 %v1213_v21, %v1398_v41  ;;  %v695_v24 = vpop.f32.mrb[29].mxu0  ;;  %v823_v25 = vpop.f32.mrb[29].mxu1 }
 0x127   : > { %v696_v26 = vadd.f32 %v1398_v41, %v695_v24  ;;  %v824_v27 = vadd.f32 %v1398_v41, %v823_v25  ;;  %v1182_v28 = vpop.f32.mrb[30].mxu0  ;;  %v1214_v29 = vpop.f32.mrb[30].mxu1 }
 0x128   : > { %v868_v30 = vmax.f32 %v704_v22, 0.0  ;;  %v900_v31 = vmax.f32 %v832_v23, 0.0  ;;  %v707_v32 = vadd.f32 %v1182_v28, %v1398_v41  ;;  %v835_v33 = vadd.f32 %v1214_v29, %v1398_v41  ;;  %v698_v34 = vpop.f32.mrb[31].mxu0  ;;  %v826_v35 = vpop.f32.mrb[31].mxu1 }
 0x129   : > { %v866_v36 = vmax.f32 %v696_v26, 0.0  ;;  %v898_v37 = vmax.f32 %v824_v27, 0.0  ;;  %v699_v38 = vadd.f32 %v1398_v41, %v698_v34  ;;  %v827_v39 = vadd.f32 %v1398_v41, %v826_v35 }
 0x12a   : > { %933 = vst.msk [vmem:[%s1406_s7 + $0xf0] sm:$0xff] %vm902_vm3, %v868_v30  ;;  %965 = vst.msk [vmem:[%s1406_s7 + $0x1f0] sm:$0xff] %vm902_vm3, %v900_v31  ;;  %v869_v40 = vmax.f32 %v707_v32, 0.0  ;;  %v901_v42 = vmax.f32 %v835_v33, 0.0 }
 0x12b   : > { %931 = vst.msk [vmem:[%s1406_s7 + $0xe0] sm:$0xff] %vm902_vm3, %v866_v36  ;;  %963 = vst.msk [vmem:[%s1406_s7 + $0x1e0] sm:$0xff] %vm902_vm3, %v898_v37  ;;  %v867_v43 = vmax.f32 %v699_v38, 0.0  ;;  %v899_v44 = vmax.f32 %v827_v39, 0.0 }
 0x12c   : > { %934 = vst.msk [vmem:[%s1406_s7 + $0xf8] sm:$0xff] %vm902_vm3, %v869_v40  ;;  %966 = vst.msk [vmem:[%s1406_s7 + $0x1f8] sm:$0xff] %vm902_vm3, %v901_v42 }
 0x12d   : > { %932 = vst.msk [vmem:[%s1406_s7 + $0xe8] sm:$0xff] %vm902_vm3, %v867_v43  ;;  %964 = vst.msk [vmem:[%s1406_s7 + $0x1e8] sm:$0xff] %vm902_vm3, %v899_v44 }
 0x12e PF: > { %s13_s12 = sadd.s32 1, %s1277_s12  }
 0x12f   : > { %p10_p4 = scmp.ge.s32.totalorder %s13_s12, 18  }
 0x131   :  { %12 = sbr.rel (!%p10_p4) target bundleno = 1 (0x1), region = 62 }

// kernel: forward.11
= control target key start
LH: loop header
LB: loop body
LE: loop exit
PB: predicated region body
PF: predicated region fallthrough
CT: control target
= control target key end

     0   :  { %s2584_s12 = smov 0   ;;  %s3073_s0 = inlined_call_operand.vmem [shape: bf16[2048,432], index: 0, kind: input, shape index: {}]   ;;  %s3074_s1 = inlined_call_operand.vmem [shape: bf16[432,32], index: 1, kind: input, shape index: {}]   ;;  %s3075_s2 = inlined_call_operand.vmem [shape: f32[1,32], index: 2, kind: input, shape index: {}]   ;;  %s3076_s3 = inlined_call_operand.vmem [shape: f32[2048,32], index: 3, kind: output, shape index: {}]  }
   0x1 LB: > { %s1997_s13 = sadd.s32 4294967295, %s2561_s12   ;;  %p2001_p0 = scmp.ge.s32.totalorder %s2561_s12, 1  ;;  %s2561_s12 = sphi %s2584_s12, %s13_s12  }
   0x2   : > { %p139_p1 = scmp.lt.s32.totalorder %s2561_s12, 5 }
   0x4   : > { %p140_p2 = pnand %p2001_p0, %p139_p1 }
   0x5   : > { %v2335_v0 = vld [vmem:[%s3074_s1] sm:$0xff] (!%p140_p2)   ;;  %v2563_v1 = vmov (!%p140_p2), 0   ;;  %v2336_v2 = vld [vmem:[%s3074_s1 + $0x8] sm:$0xff] (!%p140_p2)   ;;  %v2337_v4 = vld [vmem:[%s3074_s1 + $0x10] sm:$0xff] (!%p140_p2)   ;;  %s2002_s28 = sshll.u32 (!%p140_p2), %s1997_s13, 6  ;;  %vm1137_vm0 = vcmask (!%p140_p2), 392192  }
   0x6   : > { %143 = sbr.rel (%p140_p2) target bundleno = 539 (0x21b), region = 32  ;;  %1234 = vmatprep.subr.bf16.mxu1 (!%p140_p2), %v2563_v1  ;;  %1523 = vmatprep.subr.bf16.mxu0 (!%p140_p2), %v2563_v1  ;;  %v2340_v3 = vld [vmem:[%s3074_s1 + $0x80] sm:$0xff] (!%p140_p2)   ;;  %v2342_v5 = vld [vmem:[%s3074_s1 + $0x88] sm:$0xff] (!%p140_p2)   ;;  %v2338_v6 = vld [vmem:[%s3074_s1 + $0x18] sm:$0xff] (!%p140_p2)   ;;  %p165_p3 = scmp.lt.s32.totalorder (!%p140_p2), %s2002_s28, 255  ;;  %vm1876_vm1 = vcmask (!%p140_p2), 261120  }
   0x7   : > { %1235 = vmatpush1.bf16.msra.mxu1 (!%p140_p2), %v2335_v0  ;;  %1524 = vmatpush1.bf16.msra.mxu0 (!%p140_p2), %v2340_v3  ;;  %v2344_v7 = vld [vmem:[%s3074_s1 + $0x90] sm:$0xff] (!%p140_p2)   ;;  %v2339_v8 = vld [vmem:[%s3074_s1 + $0x20] sm:$0xff] (!%p140_p2)   ;;  %v2346_v9 = vld [vmem:[%s3074_s1 + $0x98] sm:$0xff] (!%p140_p2)  }
   0x8   : > { %1236 = vmatprep.subr.bf16.mxu1 (!%p140_p2), %v2563_v1  ;;  %1525 = vmatprep.subr.bf16.mxu0 (!%p140_p2), %v2563_v1  ;;  %v2341_v10 = vld [vmem:[%s3074_s1 + $0x28] sm:$0xff] (!%p140_p2)   ;;  %v2348_v11 = vld [vmem:[%s3074_s1 + $0xa0] sm:$0xff] (!%p140_p2)   ;;  %v2343_v12 = vld [vmem:[%s3074_s1 + $0x30] sm:$0xff] (!%p140_p2)  }
   0x9   : > { %v2350_v13 = vld [vmem:[%s3074_s1 + $0xa8] sm:$0xff] (!%p140_p2)   ;;  %v2345_v14 = vld [vmem:[%s3074_s1 + $0x38] sm:$0xff] (!%p140_p2)   ;;  %v2352_v15 = vld [vmem:[%s3074_s1 + $0xb0] sm:$0xff] (!%p140_p2)  }
   0xa   : > { %v2347_v18 = vld [vmem:[%s3074_s1 + $0x40] sm:$0xff] (!%p140_p2)   ;;  %v2354_v19 = vld [vmem:[%s3074_s1 + $0xb8] sm:$0xff] (!%p140_p2)   ;;  %v2349_v20 = vld [vmem:[%s3074_s1 + $0x48] sm:$0xff] (!%p140_p2)  }
   0xb   : > { %1237 = vmatpush1.bf16.msra.mxu1 (!%p140_p2), %v2336_v2  ;;  %1526 = vmatpush1.bf16.msra.mxu0 (!%p140_p2), %v2342_v5  ;;  %v2356_v21 = vld [vmem:[%s3074_s1 + $0xc0] sm:$0xff] (!%p140_p2)   ;;  %v2351_v22 = vld [vmem:[%s3074_s1 + $0x50] sm:$0xff] (!%p140_p2)   ;;  %v2358_v23 = vld [vmem:[%s3074_s1 + $0xc8] sm:$0xff] (!%p140_p2)  }
   0xc   : > { %1238 = vmatprep.subr.bf16.mxu1 (!%p140_p2), %v2563_v1  ;;  %1527 = vmatprep.subr.bf16.mxu0 (!%p140_p2), %v2563_v1  ;;  %v2353_v24 = vld [vmem:[%s3074_s1 + $0x58] sm:$0xff] (!%p140_p2)   ;;  %v2360_v25 = vld [vmem:[%s3074_s1 + $0xd0] sm:$0xff] (!%p140_p2)   ;;  %v2355_v26 = vld [vmem:[%s3074_s1 + $0x60] sm:$0xff] (!%p140_p2)  }
   0xd   : > { %s3078_s28 = smov (!%p165_p3, %s2002_s28), 255  ;;  %v2357_v29 = vld [vmem:[%s3074_s1 + $0x68] sm:$0xff]   ;;  %v2359_v30 = vld [vmem:[%s3074_s1 + $0x70] sm:$0xff]   ;;  %v2361_v33 = vld [vmem:[%s3074_s1 + $0x78] sm:$0xff]  }
   0xe   : > { %s2197_s13 = sshll.u32 %s3078_s28, 4  ;;  %s2006_s25 = sshll.u32 %s3078_s28, 3 }
   0xf   : > { %1239 = vmatpush1.bf16.msra.mxu1 %v2337_v4  ;;  %1528 = vmatpush1.bf16.msra.mxu0 %v2344_v7  ;;  %s2650_s18 = scalar_lea.vmem %s3073_s0, %s2197_s13  ;;  %s2867_s28 = scalar_lea.vmem %s3076_s3, %s2006_s25 }
  0x10   : > { %1240 = vmatprep.subr.bf16.mxu1 %v2563_v1  ;;  %1529 = vmatprep.subr.bf16.mxu0 %v2563_v1  ;;  %v2364_v16 = vld [vmem:[%s2650_s18 + $0xc] ss:$16 sps:$4 sm:$0xff]   ;;  %v2367_v17 = vld [vmem:[%s2650_s18 + $0x4] ss:$16 sps:$4 sm:$0xff]   ;;  %v2362_v27 = vld [vmem:[%s2650_s18 + $0x8] ss:$16 sps:$4 sm:$0xff]  }
  0x11   : > { %2163 = vmatprep.mubr.msk.bf16.mxu0 %vm1137_vm0, %v2364_v16  ;;  %1266 = vmatprep.mubr.bf16.mxu1 %v2367_v17  ;;  %v2368_v28 = vld [vmem:[%s2650_s18 + $0x2c] ss:$16 sps:$4 sm:$0xff]   ;;  %v2372_v31 = vld [vmem:[%s2650_s18 + $0x28] ss:$16 sps:$4 sm:$0xff]   ;;  %v2365_v34 = vld [vmem:[%s2650_s18] ss:$16 sps:$4 sm:$0xff]  }
  0x12   : > { %v2374_v32 = vld [vmem:[%s2650_s18 + $0x4c] ss:$16 sps:$4 sm:$0xff]   ;;  %v2370_v35 = vld [vmem:[%s2650_s18 + $0x24] ss:$16 sps:$4 sm:$0xff]   ;;  %v2378_v36 = vld [vmem:[%s2650_s18 + $0x48] ss:$16 sps:$4 sm:$0xff]  }
  0x13   : > { %1241 = vmatpush1.bf16.msra.mxu1 %v2338_v6  ;;  %1530 = vmatpush1.bf16.msra.mxu0 %v2346_v9  ;;  %v2380_v37 = vld [vmem:[%s2650_s18 + $0x6c] ss:$16 sps:$4 sm:$0xff]   ;;  %v2373_v38 = vld [vmem:[%s2650_s18 + $0x20] ss:$16 sps:$4 sm:$0xff]   ;;  %v2376_v39 = vld [vmem:[%s2650_s18 + $0x44] ss:$16 sps:$4 sm:$0xff]  }
  0x14   : > { %1242 = vmatprep.subr.bf16.mxu1 %v2563_v1  ;;  %1531 = vmatprep.subr.bf16.mxu0 %v2563_v1  ;;  %v2384_v40 = vld [vmem:[%s2650_s18 + $0x68] ss:$16 sps:$4 sm:$0xff]   ;;  %v2386_v41 = vld [vmem:[%s2650_s18 + $0x8c] ss:$16 sps:$4 sm:$0xff]   ;;  %v2379_v42 = vld [vmem:[%s2650_s18 + $0x40] ss:$16 sps:$4 sm:$0xff]  }
  0x15   : > { %v2382_v43 = vld [vmem:[%s2650_s18 + $0x64] ss:$16 sps:$4 sm:$0xff]   ;;  %v2390_v44 = vld [vmem:[%s2650_s18 + $0x88] ss:$16 sps:$4 sm:$0xff]   ;;  %v2392_v45 = vld [vmem:[%s2650_s18 + $0xac] ss:$16 sps:$4 sm:$0xff]  }
  0x16   : > { %v2385_v46 = vld [vmem:[%s2650_s18 + $0x60] ss:$16 sps:$4 sm:$0xff]   ;;  %v2388_v47 = vld [vmem:[%s2650_s18 + $0x84] ss:$16 sps:$4 sm:$0xff]   ;;  %v2396_v48 = vld [vmem:[%s2650_s18 + $0xa8] ss:$16 sps:$4 sm:$0xff]  }
  0x17   : > { %1243 = vmatpush1.bf16.msra.mxu1 %v2339_v8  ;;  %1532 = vmatpush1.bf16.msra.mxu0 %v2348_v11  ;;  %v2398_v49 = vld [vmem:[%s2650_s18 + $0xcc] ss:$16 sps:$4 sm:$0xff]   ;;  %v2391_v50 = vld [vmem:[%s2650_s18 + $0x80] ss:$16 sps:$4 sm:$0xff]   ;;  %v2394_v51 = vld [vmem:[%s2650_s18 + $0xa4] ss:$16 sps:$4 sm:$0xff]  }
  0x18   : > { %1244 = vmatprep.subr.bf16.mxu1 %v2563_v1  ;;  %1533 = vmatprep.subr.bf16.mxu0 %v2563_v1  ;;  %v2402_v52 = vld [vmem:[%s2650_s18 + $0xc8] ss:$16 sps:$4 sm:$0xff]   ;;  %v2404_v53 = vld [vmem:[%s2650_s18 + $0xec] ss:$16 sps:$4 sm:$0xff]   ;;  %v2397_v54 = vld [vmem:[%s2650_s18 + $0xa0] ss:$16 sps:$4 sm:$0xff]  }
  0x19   : > { %v2400_v55 = vld [vmem:[%s2650_s18 + $0xc4] ss:$16 sps:$4 sm:$0xff]   ;;  %v2408_v56 = vld [vmem:[%s2650_s18 + $0xe8] ss:$16 sps:$4 sm:$0xff]   ;;  %v2410_v57 = vld [vmem:[%s2650_s18 + $0x10c] ss:$16 sps:$4 sm:$0xff]  }
  0x1a   : > { %v2403_v58 = vld [vmem:[%s2650_s18 + $0xc0] ss:$16 sps:$4 sm:$0xff]   ;;  %v2406_v59 = vld [vmem:[%s2650_s18 + $0xe4] ss:$16 sps:$4 sm:$0xff]   ;;  %v2414_v60 = vld [vmem:[%s2650_s18 + $0x108] ss:$16 sps:$4 sm:$0xff]  }
  0x1b   : > { %1245 = vmatpush1.bf16.msra.mxu1 %v2341_v10  ;;  %1534 = vmatpush1.bf16.msra.mxu0 %v2350_v13  ;;  %v2416_v61 = vld [vmem:[%s2650_s18 + $0x12c] ss:$16 sps:$4 sm:$0xff]   ;;  %v2409_v62 = vld [vmem:[%s2650_s18 + $0xe0] ss:$16 sps:$4 sm:$0xff]   ;;  %v2412_v63 = vld [vmem:[%s2650_s18 + $0x104] ss:$16 sps:$4 sm:$0xff]  }
  0x1c   : > { %1246 = vmatprep.subr.bf16.mxu1 %v2563_v1  ;;  %1535 = vmatprep.subr.bf16.mxu0 %v2563_v1  ;;  %v2420_v0 = vld [vmem:[%s2650_s18 + $0x128] ss:$16 sps:$4 sm:$0xff]   ;;  %v2415_v2 = vld [vmem:[%s2650_s18 + $0x100] ss:$16 sps:$4 sm:$0xff]   ;;  %v2418_v3 = vld [vmem:[%s2650_s18 + $0x124] ss:$16 sps:$4 sm:$0xff]  }
  0x1d   : > { %v2426_v4 = vld [vmem:[%s2650_s18 + $0x148] ss:$16 sps:$4 sm:$0xff]   ;;  %v2428_v5 = vld [vmem:[%s2650_s18 + $0x16c] ss:$16 sps:$4 sm:$0xff]   ;;  %v2421_v6 = vld [vmem:[%s2650_s18 + $0x120] ss:$16 sps:$4 sm:$0xff]  }
  0x1e   : > { %v2424_v7 = vld [vmem:[%s2650_s18 + $0x144] ss:$16 sps:$4 sm:$0xff]   ;;  %v2432_v8 = vld [vmem:[%s2650_s18 + $0x168] ss:$16 sps:$4 sm:$0xff]   ;;  %v2434_v9 = vld [vmem:[%s2650_s18 + $0x18c] ss:$16 sps:$4 sm:$0xff]  }
  0x1f   : > { %1247 = vmatpush1.bf16.msra.mxu1 %v2343_v12  ;;  %1536 = vmatpush1.bf16.msra.mxu0 %v2352_v15  ;;  %v2427_v10 = vld [vmem:[%s2650_s18 + $0x140] ss:$16 sps:$4 sm:$0xff]   ;;  %v2430_v11 = vld [vmem:[%s2650_s18 + $0x164] ss:$16 sps:$4 sm:$0xff]   ;;  %v2438_v12 = vld [vmem:[%s2650_s18 + $0x188] ss:$16 sps:$4 sm:$0xff]  }
  0x20   : > { %1248 = vmatprep.subr.bf16.mxu1 %v2563_v1  ;;  %1537 = vmatprep.subr.bf16.mxu0 %v2563_v1  ;;  %v2440_v13 = vld [vmem:[%s2650_s18 + $0x1ac] ss:$16 sps:$4 sm:$0xff]   ;;  %v2436_v15 = vld [vmem:[%s2650_s18 + $0x184] ss:$16 sps:$4 sm:$0xff]   ;;  %v2444_v16 = vld [vmem:[%s2650_s18 + $0x1a8] ss:$16 sps:$4 sm:$0xff]  }
  0x21   : > { %v2446_v17 = vld [vmem:[%s2650_s18 + $0x1cc] ss:$16 sps:$4 sm:$0xff]  }
  0x23   : > { %1249 = vmatpush1.bf16.msra.mxu1 %v2345_v14  ;;  %1538 = vmatpush1.bf16.msra.mxu0 %v2354_v19  ;;  %v2433_v14 = vld [vmem:[%s2650_s18 + $0x160] ss:$16 sps:$4 sm:$0xff]   ;;  %v2442_v19 = vld [vmem:[%s2650_s18 + $0x1a4] ss:$16 sps:$4 sm:$0xff]  }
  0x24   : > { %1250 = vmatprep.subr.bf16.mxu1 %v2563_v1  ;;  %1539 = vmatprep.subr.bf16.mxu0 %v2563_v1 }
  0x27   : > { %1251 = vmatpush1.bf16.msra.mxu1 %v2347_v18  ;;  %1540 = vmatpush1.bf16.msra.mxu0 %v2356_v21  ;;  %v2439_v18 = vld [vmem:[%s2650_s18 + $0x180] ss:$16 sps:$4 sm:$0xff]   ;;  %v2452_v21 = vld [vmem:[%s2650_s18 + $0x1ec] ss:$16 sps:$4 sm:$0xff]  }
  0x28   : > { %1252 = vmatprep.subr.bf16.mxu1 %v2563_v1  ;;  %1541 = vmatprep.subr.bf16.mxu0 %v2563_v1 }
  0x2b   : > { %1253 = vmatpush1.bf16.msra.mxu1 %v2349_v20  ;;  %1542 = vmatpush1.bf16.msra.mxu0 %v2358_v23  ;;  %v2450_v20 = vld [vmem:[%s2650_s18 + $0x1c8] ss:$16 sps:$4 sm:$0xff]   ;;  %v2448_v23 = vld [vmem:[%s2650_s18 + $0x1c4] ss:$16 sps:$4 sm:$0xff]  }
  0x2c   : > { %1254 = vmatprep.subr.bf16.mxu1 %v2563_v1  ;;  %1543 = vmatprep.subr.bf16.mxu0 %v2563_v1 }
  0x2f   : > { %1255 = vmatpush1.bf16.msra.mxu1 %v2351_v22  ;;  %1544 = vmatpush1.bf16.msra.mxu0 %v2360_v25  ;;  %v2445_v22 = vld [vmem:[%s2650_s18 + $0x1a0] ss:$16 sps:$4 sm:$0xff]   ;;  %v2458_v25 = vld [vmem:[%s2650_s18 + $0x20c] ss:$16 sps:$4 sm:$0xff]  }
  0x30   : > { %1256 = vmatprep.subr.bf16.mxu1 %v2563_v1 }
  0x32   : > { %1556 = vmatmul.mubr.bf16.vlgmr.msra.gmra.mrb[0].mxu0 %v2362_v27  ;;  %v2454_v27 = vld [vmem:[%s2650_s18 + $0x1e4] ss:$16 sps:$4 sm:$0xff]  }
  0x33   : > { %1257 = vmatpush1.bf16.msra.mxu1 %v2353_v24  ;;  %2164 = vmatprep.mubr.msk.bf16.mxu0 %vm1137_vm0, %v2368_v28  ;;  %v2456_v24 = vld [vmem:[%s2650_s18 + $0x1e8] ss:$16 sps:$4 sm:$0xff]  }
  0x34   : > { %1258 = vmatprep.subr.bf16.mxu1 %v2563_v1  ;;  %v2462_v28 = vld [vmem:[%s2650_s18 + $0x208] ss:$16 sps:$4 sm:$0xff]  }
  0x37   : > { %1259 = vmatpush1.bf16.msra.mxu1 %v2355_v26  ;;  %v2451_v26 = vld [vmem:[%s2650_s18 + $0x1c0] ss:$16 sps:$4 sm:$0xff]  }
  0x38   : > { %1260 = vmatprep.subr.bf16.mxu1 %v2563_v1 }
  0x3a   : > { %1564 = vmatmul.mubr.bf16.gmra.mrb[4].mxu0 %v2372_v31  ;;  %v2460_v31 = vld [vmem:[%s2650_s18 + $0x204] ss:$16 sps:$4 sm:$0xff]  }
  0x3b   : > { %1261 = vmatpush1.bf16.msra.mxu1 %v2357_v29  ;;  %2165 = vmatprep.mubr.msk.bf16.mxu0 %vm1137_vm0, %v2374_v32  ;;  %v2464_v29 = vld [vmem:[%s2650_s18 + $0x22c] ss:$16 sps:$4 sm:$0xff]   ;;  %v2468_v32 = vld [vmem:[%s2650_s18 + $0x228] ss:$16 sps:$4 sm:$0xff]  }
  0x3c   : > { %1262 = vmatprep.subr.bf16.mxu1 %v2563_v1 }
  0x3f   : > { %1263 = vmatpush1.bf16.msra.mxu1 %v2359_v30  ;;  %v2457_v30 = vld [vmem:[%s2650_s18 + $0x1e0] ss:$16 sps:$4 sm:$0xff]  }
  0x40   : > { %1264 = vmatprep.subr.bf16.mxu1 %v2563_v1  ;;  %v2422_v1 = vld [vmem:[%s2650_s18 + $0x14c] ss:$16 sps:$4 sm:$0xff]  }
  0x42   : > { %1572 = vmatmul.mubr.bf16.gmra.mrb[8].mxu0 %v2378_v36  ;;  %v2474_v36 = vld [vmem:[%s2650_s18 + $0x248] ss:$16 sps:$4 sm:$0xff]  }
  0x43   : > { %1265 = vmatpush1.bf16.msra.mxu1 %v2361_v33  ;;  %2166 = vmatprep.mubr.msk.bf16.mxu0 %vm1137_vm0, %v2380_v37  ;;  %v2470_v33 = vld [vmem:[%s2650_s18 + $0x24c] ss:$16 sps:$4 sm:$0xff]  }
  0x44   : > { %v2476_v37 = vld [vmem:[%s2650_s18 + $0x26c] ss:$16 sps:$4 sm:$0xff]  }
  0x46   : > { %1267 = vmatmul.mubr.bf16.vlgmr.msra.gmra.mrb[0].mxu1 %v2365_v34  ;;  %v2463_v34 = vld [vmem:[%s2650_s18 + $0x200] ss:$16 sps:$4 sm:$0xff]  }
  0x47   : > { %1274 = vmatprep.mubr.bf16.mxu1 %v2370_v35  ;;  %v2466_v35 = vld [vmem:[%s2650_s18 + $0x224] ss:$16 sps:$4 sm:$0xff]  }
  0x4a   : > { %1580 = vmatmul.mubr.bf16.gmra.mrb[12].mxu0 %v2384_v40  ;;  %v2480_v40 = vld [vmem:[%s2650_s18 + $0x268] ss:$16 sps:$4 sm:$0xff]  }
  0x4b   : > { %2167 = vmatprep.mubr.msk.bf16.mxu0 %vm1137_vm0, %v2386_v41  ;;  %v2482_v41 = vld [vmem:[%s2650_s18 + $0x28c] ss:$16 sps:$4 sm:$0xff]  }
  0x4e   : > { %1275 = vmatmul.mubr.bf16.gmra.mrb[4].mxu1 %v2373_v38  ;;  %v2469_v38 = vld [vmem:[%s2650_s18 + $0x220] ss:$16 sps:$4 sm:$0xff]  }
  0x4f   : > { %1282 = vmatprep.mubr.bf16.mxu1 %v2376_v39  ;;  %v2472_v39 = vld [vmem:[%s2650_s18 + $0x244] ss:$16 sps:$4 sm:$0xff]  }
  0x52   : > { %1588 = vmatmul.mubr.bf16.gmra.mrb[16].mxu0 %v2390_v44  ;;  %v2486_v44 = vld [vmem:[%s2650_s18 + $0x288] ss:$16 sps:$4 sm:$0xff]  }
  0x53   : > { %2168 = vmatprep.mubr.msk.bf16.mxu0 %vm1137_vm0, %v2392_v45  ;;  %v2488_v45 = vld [vmem:[%s2650_s18 + $0x2ac] ss:$16 sps:$4 sm:$0xff]  }
  0x56   : > { %1283 = vmatmul.mubr.bf16.gmra.mrb[8].mxu1 %v2379_v42  ;;  %v2475_v42 = vld [vmem:[%s2650_s18 + $0x240] ss:$16 sps:$4 sm:$0xff]  }
  0x57   : > { %1290 = vmatprep.mubr.bf16.mxu1 %v2382_v43  ;;  %v2478_v43 = vld [vmem:[%s2650_s18 + $0x264] ss:$16 sps:$4 sm:$0xff]  }
  0x5a   : > { %1596 = vmatmul.mubr.bf16.gmra.mrb[20].mxu0 %v2396_v48  ;;  %v2492_v48 = vld [vmem:[%s2650_s18 + $0x2a8] ss:$16 sps:$4 sm:$0xff]  }
  0x5b   : > { %2169 = vmatprep.mubr.msk.bf16.mxu0 %vm1137_vm0, %v2398_v49  ;;  %v2494_v49 = vld [vmem:[%s2650_s18 + $0x2cc] ss:$16 sps:$4 sm:$0xff]  }
  0x5e   : > { %1291 = vmatmul.mubr.bf16.gmra.mrb[12].mxu1 %v2385_v46  ;;  %v2481_v46 = vld [vmem:[%s2650_s18 + $0x260] ss:$16 sps:$4 sm:$0xff]  }
  0x5f   : > { %1298 = vmatprep.mubr.bf16.mxu1 %v2388_v47  ;;  %v2484_v47 = vld [vmem:[%s2650_s18 + $0x284] ss:$16 sps:$4 sm:$0xff]  }
  0x62   : > { %1604 = vmatmul.mubr.bf16.gmra.mrb[24].mxu0 %v2402_v52  ;;  %v2498_v52 = vld [vmem:[%s2650_s18 + $0x2c8] ss:$16 sps:$4 sm:$0xff]  }
  0x63   : > { %2170 = vmatprep.mubr.msk.bf16.mxu0 %vm1137_vm0, %v2404_v53  ;;  %v2500_v53 = vld [vmem:[%s2650_s18 + $0x2ec] ss:$16 sps:$4 sm:$0xff]  }
  0x66   : > { %1299 = vmatmul.mubr.bf16.gmra.mrb[16].mxu1 %v2391_v50  ;;  %v2487_v50 = vld [vmem:[%s2650_s18 + $0x280] ss:$16 sps:$4 sm:$0xff]  }
  0x67   : > { %1306 = vmatprep.mubr.bf16.mxu1 %v2394_v51  ;;  %v2490_v51 = vld [vmem:[%s2650_s18 + $0x2a4] ss:$16 sps:$4 sm:$0xff]  }
  0x6a   : > { %1612 = vmatmul.mubr.bf16.gmra.mrb[28].mxu0 %v2408_v56  ;;  %v2504_v56 = vld [vmem:[%s2650_s18 + $0x2e8] ss:$16 sps:$4 sm:$0xff]  }
  0x6b   : > { %2171 = vmatprep.mubr.msk.bf16.mxu0 %vm1137_vm0, %v2410_v57  ;;  %v2506_v57 = vld [vmem:[%s2650_s18 + $0x30c] ss:$16 sps:$4 sm:$0xff]  }
  0x6e   : > { %1307 = vmatmul.mubr.bf16.gmra.mrb[20].mxu1 %v2397_v54  ;;  %v2493_v54 = vld [vmem:[%s2650_s18 + $0x2a0] ss:$16 sps:$4 sm:$0xff]  }
  0x6f   : > { %1314 = vmatprep.mubr.bf16.mxu1 %v2400_v55  ;;  %v2496_v55 = vld [vmem:[%s2650_s18 + $0x2c4] ss:$16 sps:$4 sm:$0xff]  }
  0x72   : > { %1620 = vmatmul.mubr.bf16.gmra.mrb[32].mxu0 %v2414_v60  ;;  %v2510_v60 = vld [vmem:[%s2650_s18 + $0x308] ss:$16 sps:$4 sm:$0xff]  }
  0x73   : > { %2172 = vmatprep.mubr.msk.bf16.mxu0 %vm1137_vm0, %v2416_v61  ;;  %v2512_v61 = vld [vmem:[%s2650_s18 + $0x32c] ss:$16 sps:$4 sm:$0xff]  }
  0x76   : > { %1315 = vmatmul.mubr.bf16.gmra.mrb[24].mxu1 %v2403_v58  ;;  %v2499_v58 = vld [vmem:[%s2650_s18 + $0x2c0] ss:$16 sps:$4 sm:$0xff]  }
  0x77   : > { %1322 = vmatprep.mubr.bf16.mxu1 %v2406_v59  ;;  %v2502_v59 = vld [vmem:[%s2650_s18 + $0x2e4] ss:$16 sps:$4 sm:$0xff]  }
  0x7a   : > { %1628 = vmatmul.mubr.bf16.gmra.mrb[36].mxu0 %v2420_v0  ;;  %v2516_v0 = vld [vmem:[%s2650_s18 + $0x328] ss:$16 sps:$4 sm:$0xff]  }
  0x7b   : > { %2173 = vmatprep.mubr.msk.bf16.mxu0 %vm1137_vm0, %v2422_v1  ;;  %v2518_v1 = vld [vmem:[%s2650_s18 + $0x34c] ss:$16 sps:$4 sm:$0xff]  }
  0x7e   : > { %1323 = vmatmul.mubr.bf16.gmra.mrb[28].mxu1 %v2409_v62  ;;  %v2505_v62 = vld [vmem:[%s2650_s18 + $0x2e0] ss:$16 sps:$4 sm:$0xff]  }
  0x7f   : > { %1330 = vmatprep.mubr.bf16.mxu1 %v2412_v63  ;;  %v2508_v63 = vld [vmem:[%s2650_s18 + $0x304] ss:$16 sps:$4 sm:$0xff]  }
  0x82   : > { %1636 = vmatmul.mubr.bf16.gmra.mrb[40].mxu0 %v2426_v4  ;;  %v2522_v4 = vld [vmem:[%s2650_s18 + $0x348] ss:$16 sps:$4 sm:$0xff]  }
  0x83   : > { %2174 = vmatprep.mubr.msk.bf16.mxu0 %vm1137_vm0, %v2428_v5  ;;  %v2524_v5 = vld [vmem:[%s2650_s18 + $0x36c] ss:$16 sps:$4 sm:$0xff]  }
  0x86   : > { %1331 = vmatmul.mubr.bf16.gmra.mrb[32].mxu1 %v2415_v2  ;;  %v2511_v2 = vld [vmem:[%s2650_s18 + $0x300] ss:$16 sps:$4 sm:$0xff]  }
  0x87   : > { %1338 = vmatprep.mubr.bf16.mxu1 %v2418_v3  ;;  %v2514_v3 = vld [vmem:[%s2650_s18 + $0x324] ss:$16 sps:$4 sm:$0xff]  }
  0x8a   : > { %1644 = vmatmul.mubr.bf16.gmra.mrb[44].mxu0 %v2432_v8  ;;  %v2520_v8 = vld [vmem:[%s2650_s18 + $0x344] ss:$16 sps:$4 sm:$0xff]  }
  0x8b   : > { %2175 = vmatprep.mubr.msk.bf16.mxu0 %vm1137_vm0, %v2434_v9 }
  0x8e   : > { %1339 = vmatmul.mubr.bf16.gmra.mrb[36].mxu1 %v2421_v6  ;;  %v2517_v6 = vld [vmem:[%s2650_s18 + $0x320] ss:$16 sps:$4 sm:$0xff]  }
  0x8f   : > { %1346 = vmatprep.mubr.bf16.mxu1 %v2424_v7 }
  0x92   : > { %1652 = vmatmul.mubr.bf16.gmra.mrb[48].mxu0 %v2438_v12  ;;  %v2530_v12 = vld [vmem:[%s2650_s18 + $0x38c] ss:$16 sps:$4 sm:$0xff]  }
  0x93   : > { %2176 = vmatprep.mubr.msk.bf16.mxu0 %vm1137_vm0, %v2440_v13 }
  0x96   : > { %1347 = vmatmul.mubr.bf16.gmra.mrb[40].mxu1 %v2427_v10  ;;  %v2528_v10 = vld [vmem:[%s2650_s18 + $0x368] ss:$16 sps:$4 sm:$0xff]  }
  0x97   : > { %1354 = vmatprep.mubr.bf16.mxu1 %v2430_v11 }
  0x9a   : > { %1660 = vmatmul.mubr.bf16.gmra.mrb[52].mxu0 %v2444_v16  ;;  %v2526_v16 = vld [vmem:[%s2650_s18 + $0x364] ss:$16 sps:$4 sm:$0xff]  }
  0x9b   : > { %2177 = vmatprep.mubr.msk.bf16.mxu0 %vm1137_vm0, %v2446_v17 }
  0x9e   : > { %1355 = vmatmul.mubr.bf16.gmra.mrb[44].mxu1 %v2433_v14  ;;  %v2523_v14 = vld [vmem:[%s2650_s18 + $0x340] ss:$16 sps:$4 sm:$0xff]  }
  0x9f   : > { %1362 = vmatprep.mubr.bf16.mxu1 %v2436_v15 }
  0xa2   : > { %1668 = vmatmul.mubr.bf16.gmra.mrb[56].mxu0 %v2450_v20  ;;  %v2536_v20 = vld [vmem:[%s2650_s18 + $0x3ac] ss:$16 sps:$4 sm:$0xff]  }
  0xa3   : > { %2178 = vmatprep.mubr.msk.bf16.mxu0 %vm1137_vm0, %v2452_v21 }
  0xa6   : > { %1363 = vmatmul.mubr.bf16.gmra.mrb[48].mxu1 %v2439_v18  ;;  %v2534_v18 = vld [vmem:[%s2650_s18 + $0x388] ss:$16 sps:$4 sm:$0xff]  }
  0xa7   : > { %1370 = vmatprep.mubr.bf16.mxu1 %v2442_v19 }
  0xaa   : > { %1676 = vmatmul.mubr.bf16.gmra.mrb[60].mxu0 %v2456_v24 }
  0xab   : > { %2179 = vmatprep.mubr.msk.bf16.mxu0 %vm1137_vm0, %v2458_v25 }
  0xae   : > { %1371 = vmatmul.mubr.bf16.gmra.mrb[52].mxu1 %v2445_v22  ;;  %v2854_v22 = vld [vmem:[%s3075_s2] ss:$0 sm:$0xff] }
  0xaf   : > { %1378 = vmatprep.mubr.bf16.mxu1 %v2448_v23 }
  0xb2   : > { %1684 = vmatmul.mubr.bf16.gmra.mrb[64].mxu0 %v2462_v28 }
  0xb3   : > { %2180 = vmatprep.mubr.msk.bf16.mxu0 %vm1137_vm0, %v2464_v29  ;;  %v2532_v29 = vld [vmem:[%s2650_s18 + $0x384] ss:$16 sps:$4 sm:$0xff]  }
  0xb6   : > { %1379 = vmatmul.mubr.bf16.gmra.mrb[56].mxu1 %v2451_v26  ;;  %v2529_v26 = vld [vmem:[%s2650_s18 + $0x360] ss:$16 sps:$4 sm:$0xff]  }
  0xb7   : > { %1386 = vmatprep.mubr.bf16.mxu1 %v2454_v27 }
  0xba   : > { %1692 = vmatmul.mubr.bf16.gmra.mrb[68].mxu0 %v2468_v32 }
  0xbb   : > { %2181 = vmatprep.mubr.msk.bf16.mxu0 %vm1137_vm0, %v2470_v33 }
  0xbe   : > { %1387 = vmatmul.mubr.bf16.gmra.mrb[60].mxu1 %v2457_v30 }
  0xbf   : > { %1394 = vmatprep.mubr.bf16.mxu1 %v2460_v31  ;;  %v2540_v31 = vld [vmem:[%s2650_s18 + $0x3a8] ss:$16 sps:$4 sm:$0xff]  }
  0xc2   : > { %1700 = vmatmul.mubr.bf16.gmra.mrb[72].mxu0 %v2474_v36  ;;  %v2542_v36 = vld [vmem:[%s2650_s18 + $0x3cc] ss:$16 sps:$4 sm:$0xff]  }
  0xc3   : > { %2182 = vmatprep.mubr.msk.bf16.mxu0 %vm1137_vm0, %v2476_v37 }
  0xc6   : > { %1395 = vmatmul.mubr.bf16.gmra.mrb[64].mxu1 %v2463_v34 }
  0xc7   : > { %1402 = vmatprep.mubr.bf16.mxu1 %v2466_v35 }
  0xca   : > { %1708 = vmatmul.mubr.bf16.gmra.mrb[76].mxu0 %v2480_v40 }
  0xcb   : > { %2183 = vmatprep.mubr.msk.bf16.mxu0 %vm1137_vm0, %v2482_v41 }
  0xce   : > { %1403 = vmatmul.mubr.bf16.gmra.mrb[68].mxu1 %v2469_v38 }
  0xcf   : > { %1410 = vmatprep.mubr.bf16.mxu1 %v2472_v39 }
  0xd2   : > { %1716 = vmatmul.mubr.bf16.gmra.mrb[80].mxu0 %v2486_v44  ;;  %v2535_v44 = vld [vmem:[%s2650_s18 + $0x380] ss:$16 sps:$4 sm:$0xff]  }
  0xd3   : > { %2184 = vmatprep.mubr.msk.bf16.mxu0 %vm1137_vm0, %v2488_v45 }
  0xd6   : > { %1411 = vmatmul.mubr.bf16.gmra.mrb[72].mxu1 %v2475_v42 }
  0xd7   : > { %1418 = vmatprep.mubr.bf16.mxu1 %v2478_v43 }
  0xda   : > { %1724 = vmatmul.mubr.bf16.gmra.mrb[84].mxu0 %v2492_v48 }
  0xdb   : > { %2185 = vmatprep.mubr.msk.bf16.mxu0 %vm1137_vm0, %v2494_v49  ;;  %v2546_v49 = vld [vmem:[%s2650_s18 + $0x3c8] ss:$16 sps:$4 sm:$0xff]  }
  0xde   : > { %1419 = vmatmul.mubr.bf16.gmra.mrb[76].mxu1 %v2481_v46 }
  0xdf   : > { %1426 = vmatprep.mubr.bf16.mxu1 %v2484_v47  ;;  %v2538_v47 = vld [vmem:[%s2650_s18 + $0x3a4] ss:$16 sps:$4 sm:$0xff]  }
  0xe2   : > { %1732 = vmatmul.mubr.bf16.gmra.mrb[88].mxu0 %v2498_v52 }
  0xe3   : > { %2186 = vmatprep.mubr.msk.bf16.mxu0 %vm1137_vm0, %v2500_v53 }
  0xe6   : > { %1427 = vmatmul.mubr.bf16.gmra.mrb[80].mxu1 %v2487_v50 }
  0xe7   : > { %1434 = vmatprep.mubr.bf16.mxu1 %v2490_v51 }
  0xea   : > { %1740 = vmatmul.mubr.bf16.gmra.mrb[92].mxu0 %v2504_v56 }
  0xeb   : > { %2187 = vmatprep.mubr.msk.bf16.mxu0 %vm1137_vm0, %v2506_v57 }
  0xee   : > { %1435 = vmatmul.mubr.bf16.gmra.mrb[84].mxu1 %v2493_v54  ;;  %v2548_v54 = vld [vmem:[%s2650_s18 + $0x3ec] ss:$16 sps:$4 sm:$0xff]  }
  0xef   : > { %1442 = vmatprep.mubr.bf16.mxu1 %v2496_v55 }
  0xf2   : > { %1748 = vmatmul.mubr.bf16.gmra.mrb[96].mxu0 %v2510_v60 }
  0xf3   : > { %2188 = vmatprep.mubr.msk.bf16.mxu0 %vm1137_vm0, %v2512_v61 }
  0xf6   : > { %1443 = vmatmul.mubr.bf16.gmra.mrb[88].mxu1 %v2499_v58 }
  0xf7   : > { %1450 = vmatprep.mubr.bf16.mxu1 %v2502_v59 }
  0xfa   : > { %1756 = vmatmul.mubr.bf16.gmra.mrb[100].mxu0 %v2516_v0 }
  0xfb   : > { %2189 = vmatprep.mubr.msk.bf16.mxu0 %vm1137_vm0, %v2518_v1  ;;  %v2544_v1 = vld [vmem:[%s2650_s18 + $0x3c4] ss:$16 sps:$4 sm:$0xff]  }
  0xfe   : > { %1451 = vmatmul.mubr.bf16.gmra.mrb[92].mxu1 %v2505_v62  ;;  %v2541_v62 = vld [vmem:[%s2650_s18 + $0x3a0] ss:$16 sps:$4 sm:$0xff]  }
  0xff   : > { %1458 = vmatprep.mubr.bf16.mxu1 %v2508_v63 }
 0x102   : > { %1764 = vmatmul.mubr.bf16.gmra.mrb[104].mxu0 %v2522_v4 }
 0x103   : > { %2190 = vmatprep.mubr.msk.bf16.mxu0 %vm1137_vm0, %v2524_v5 }
 0x105   : > { %v1557_v7 = vpop.f32.mrb[0].mxu0 }
 0x106   : > { %1459 = vmatmul.mubr.bf16.gmra.mrb[96].mxu1 %v2511_v2  ;;  %v1559_v9 = vpop.f32.mrb[1].mxu0 }
 0x107   : > { %1466 = vmatprep.mubr.bf16.mxu1 %v2514_v3  ;;  %v1560_v11 = vpop.f32.mrb[2].mxu0  ;;  %v2552_v3 = vld [vmem:[%s2650_s18 + $0x3e8] ss:$16 sps:$4 sm:$0xff]  }
 0x108   : > { %v1562_v13 = vpop.f32.mrb[3].mxu0 }
 0x10a   : > { %1772 = vmatmul.mubr.bf16.gmra.mrb[108].mxu0 %v2528_v10 }
 0x10b   : > { %2191 = vmatprep.mubr.msk.bf16.mxu0 %vm1137_vm0, %v2530_v12 }
 0x10d   : > { %v1565_v15 = vpop.f32.mrb[4].mxu0 }
 0x10e   : > { %1467 = vmatmul.mubr.bf16.gmra.mrb[100].mxu1 %v2517_v6  ;;  %v1567_v17 = vpop.f32.mrb[5].mxu0 }
 0x10f   : > { %1474 = vmatprep.mubr.bf16.mxu1 %v2520_v8  ;;  %v1568_v19 = vpop.f32.mrb[6].mxu0 }
 0x110   : > { %v1570_v21 = vpop.f32.mrb[7].mxu0 }
 0x112   : > { %1780 = vmatmul.mubr.bf16.gmra.mrb[112].mxu0 %v2534_v18  ;;  %v2550_v18 = vld [vmem:[%s2650_s18 + $0x3e4] ss:$16 sps:$4 sm:$0xff]  }
 0x113   : > { %2192 = vmatprep.mubr.msk.bf16.mxu0 %vm1137_vm0, %v2536_v20 }
 0x115   : > { %v1573_v27 = vpop.f32.mrb[8].mxu0 }
 0x116   : > { %1475 = vmatmul.mubr.bf16.gmra.mrb[104].mxu1 %v2523_v14  ;;  %v1575_v30 = vpop.f32.mrb[9].mxu0 }
 0x117   : > { %1482 = vmatprep.mubr.bf16.mxu1 %v2526_v16  ;;  %v1576_v35 = vpop.f32.mrb[10].mxu0 }
 0x118   : > { %v1578_v37 = vpop.f32.mrb[11].mxu0 }
 0x119   : > { %v1268_v23 = vpop.f32.mrb[0].mxu1 }
 0x11a   : > { %v1269_v24 = vadd.f32 %v2854_v22, %v1268_v23  ;;  %v1270_v25 = vpop.f32.mrb[1].mxu1  ;;  %1788 = vmatmul.mubr.bf16.gmra.mrb[116].mxu0 %v2540_v31 }
 0x11b   : > { %v1271_v28 = vpop.f32.mrb[2].mxu1  ;;  %2193 = vmatprep.mubr.msk.bf16.mxu0 %vm1137_vm0, %v2542_v36 }
 0x11c   : > { %v1558_v32 = vadd.f32 %v1557_v7, %v1269_v24  ;;  %v1272_v33 = vadd.f32 %v2854_v22, %v1271_v28  ;;  %v1273_v34 = vpop.f32.mrb[3].mxu1 }
 0x11d   : > { %v1581_v45 = vpop.f32.mrb[12].mxu0 }
 0x11e   : > { %v1812_v38 = vmax.f32 %v1558_v32, 0.0  ;;  %v1561_v39 = vadd.f32 %v1560_v11, %v1272_v33  ;;  %1483 = vmatmul.mubr.bf16.gmra.mrb[108].mxu1 %v2529_v26  ;;  %v1583_v48 = vpop.f32.mrb[13].mxu0  ;;  %v2553_v32 = vld [vmem:[%s2650_s18 + $0x3e0] ss:$16 sps:$4 sm:$0xff]  }
 0x11f   : > { %1490 = vmatprep.mubr.bf16.mxu1 %v2532_v29  ;;  %v1584_v53 = vpop.f32.mrb[14].mxu0 }
 0x120   : > { %1877 = vst.msk [vmem:[%s2867_s28] sm:$0xff] %vm1876_vm1, %v1812_v38  ;;  %v1813_v40 = vmax.f32 %v1561_v39, 0.0  ;;  %v1586_v55 = vpop.f32.mrb[15].mxu0 }
 0x121   : > { %v1276_v41 = vpop.f32.mrb[4].mxu1 }
 0x122   : > { %1878 = vst.msk [vmem:[%s2867_s28 + $0x8] sm:$0xff] %vm1876_vm1, %v1813_v40  ;;  %v1277_v42 = vadd.f32 %v2854_v22, %v1276_v41  ;;  %v1278_v43 = vpop.f32.mrb[5].mxu1  ;;  %1796 = vmatmul.mubr.bf16.gmra.mrb[120].mxu0 %v2546_v49 }
 0x123   : > { %v1279_v46 = vpop.f32.mrb[6].mxu1  ;;  %2194 = vmatprep.mubr.msk.bf16.mxu0 %vm1137_vm0, %v2548_v54 }
 0x124   : > { %v1566_v50 = vadd.f32 %v1565_v15, %v1277_v42  ;;  %v1280_v51 = vadd.f32 %v2854_v22, %v1279_v46  ;;  %v1281_v52 = vpop.f32.mrb[7].mxu1  ;;  %v2547_v15 = vld [vmem:[%s2650_s18 + $0x3c0] ss:$16 sps:$4 sm:$0xff]  }
 0x125   : > { %v1589_v63 = vpop.f32.mrb[16].mxu0 }
 0x126   : > { %v1814_v56 = vmax.f32 %v1566_v50, 0.0  ;;  %v1569_v57 = vadd.f32 %v1568_v19, %v1280_v51  ;;  %1491 = vmatmul.mubr.bf16.gmra.mrb[112].mxu1 %v2535_v44  ;;  %v1591_v2 = vpop.f32.mrb[17].mxu0 }
 0x127   : > { %1498 = vmatprep.mubr.bf16.mxu1 %v2538_v47  ;;  %v1592_v7 = vpop.f32.mrb[18].mxu0 }
 0x128   : > { %1879 = vst.msk [vmem:[%s2867_s28 + $0x10] sm:$0xff] %vm1876_vm1, %v1814_v56  ;;  %v1815_v58 = vmax.f32 %v1569_v57, 0.0  ;;  %v1594_v8 = vpop.f32.mrb[19].mxu0 }
 0x129   : > { %v1284_v59 = vpop.f32.mrb[8].mxu1 }
 0x12a   : > { %1880 = vst.msk [vmem:[%s2867_s28 + $0x18] sm:$0xff] %vm1876_vm1, %v1815_v58  ;;  %v1285_v60 = vadd.f32 %v2854_v22, %v1284_v59  ;;  %v1286_v61 = vpop.f32.mrb[9].mxu1  ;;  %1804 = vmatmul.mubr.bf16.gmra.mrb[124].mxu0 %v2552_v3 }
 0x12b   : > { %v1287_v0 = vpop.f32.mrb[10].mxu1 }
 0x12c   : > { %v1574_v4 = vadd.f32 %v1573_v27, %v1285_v60  ;;  %v1288_v5 = vadd.f32 %v2854_v22, %v1287_v0  ;;  %v1289_v6 = vpop.f32.mrb[11].mxu1 }
 0x12d   : > { %v1597_v16 = vpop.f32.mrb[20].mxu0 }
 0x12e   : > { %v1816_v9 = vmax.f32 %v1574_v4, 0.0  ;;  %v1577_v10 = vadd.f32 %v1576_v35, %v1288_v5  ;;  %1499 = vmatmul.mubr.bf16.gmra.mrb[116].mxu1 %v2541_v62  ;;  %v1599_v19 = vpop.f32.mrb[21].mxu0 }
 0x12f   : > { %1506 = vmatprep.mubr.bf16.mxu1 %v2544_v1  ;;  %v1600_v24 = vpop.f32.mrb[22].mxu0 }
 0x130   : > { %1881 = vst.msk [vmem:[%s2867_s28 + $0x20] sm:$0xff] %vm1876_vm1, %v1816_v9  ;;  %v1817_v11 = vmax.f32 %v1577_v10, 0.0  ;;  %v1602_v25 = vpop.f32.mrb[23].mxu0 }
 0x131   : > { %v1292_v12 = vpop.f32.mrb[12].mxu1 }
 0x132   : > { %1882 = vst.msk [vmem:[%s2867_s28 + $0x28] sm:$0xff] %vm1876_vm1, %v1817_v11  ;;  %v1293_v13 = vadd.f32 %v2854_v22, %v1292_v12  ;;  %v1294_v14 = vpop.f32.mrb[13].mxu1 }
 0x133   : > { %v1295_v17 = vpop.f32.mrb[14].mxu1 }
 0x134   : > { %v1582_v20 = vadd.f32 %v1581_v45, %v1293_v13  ;;  %v1296_v21 = vadd.f32 %v2854_v22, %v1295_v17  ;;  %v1297_v23 = vpop.f32.mrb[15].mxu1 }
 0x135   : > { %v1605_v33 = vpop.f32.mrb[24].mxu0 }
 0x136   : > { %v1818_v26 = vmax.f32 %v1582_v20, 0.0  ;;  %v1585_v27 = vadd.f32 %v1584_v53, %v1296_v21  ;;  %1507 = vmatmul.mubr.bf16.gmra.mrb[120].mxu1 %v2547_v15  ;;  %v1607_v35 = vpop.f32.mrb[25].mxu0 }
 0x137   : > { %1514 = vmatprep.mubr.bf16.mxu1 %v2550_v18  ;;  %v1608_v39 = vpop.f32.mrb[26].mxu0 }
 0x138   : > { %1883 = vst.msk [vmem:[%s2867_s28 + $0x30] sm:$0xff] %vm1876_vm1, %v1818_v26  ;;  %v1819_v28 = vmax.f32 %v1585_v27, 0.0  ;;  %v1610_v40 = vpop.f32.mrb[27].mxu0 }
 0x139   : > { %v1300_v29 = vpop.f32.mrb[16].mxu1 }
 0x13a   : > { %1884 = vst.msk [vmem:[%s2867_s28 + $0x38] sm:$0xff] %vm1876_vm1, %v1819_v28  ;;  %v1301_v30 = vadd.f32 %v2854_v22, %v1300_v29  ;;  %v1302_v31 = vpop.f32.mrb[17].mxu1 }
 0x13b   : > { %v1303_v34 = vpop.f32.mrb[18].mxu1 }
 0x13c   : > { %v1590_v36 = vadd.f32 %v1589_v63, %v1301_v30  ;;  %v1304_v37 = vadd.f32 %v2854_v22, %v1303_v34  ;;  %v1305_v38 = vpop.f32.mrb[19].mxu1 }
 0x13d   : > { %v1613_v47 = vpop.f32.mrb[28].mxu0 }
 0x13e   : > { %v1820_v41 = vmax.f32 %v1590_v36, 0.0  ;;  %v1593_v42 = vadd.f32 %v1592_v7, %v1304_v37  ;;  %1515 = vmatmul.mubr.bf16.gmra.mrb[124].mxu1 %v2553_v32  ;;  %v1615_v49 = vpop.f32.mrb[29].mxu0 }
 0x13f   : > { %v1616_v53 = vpop.f32.mrb[30].mxu0 }
 0x140   : > { %1885 = vst.msk [vmem:[%s2867_s28 + $0x40] sm:$0xff] %vm1876_vm1, %v1820_v41  ;;  %v1821_v43 = vmax.f32 %v1593_v42, 0.0  ;;  %v1618_v54 = vpop.f32.mrb[31].mxu0 }
 0x141   : > { %v1308_v44 = vpop.f32.mrb[20].mxu1 }
 0x142   : > { %1886 = vst.msk [vmem:[%s2867_s28 + $0x48] sm:$0xff] %vm1876_vm1, %v1821_v43  ;;  %v1309_v45 = vadd.f32 %v2854_v22, %v1308_v44  ;;  %v1310_v46 = vpop.f32.mrb[21].mxu1 }
 0x143   : > { %v1311_v48 = vpop.f32.mrb[22].mxu1 }
 0x144   : > { %v1598_v50 = vadd.f32 %v1597_v16, %v1309_v45  ;;  %v1312_v51 = vadd.f32 %v2854_v22, %v1311_v48  ;;  %v1313_v52 = vpop.f32.mrb[23].mxu1 }
 0x145   : > { %v1621_v61 = vpop.f32.mrb[32].mxu0 }
 0x146   : > { %v1822_v55 = vmax.f32 %v1598_v50, 0.0  ;;  %v1601_v56 = vadd.f32 %v1600_v24, %v1312_v51  ;;  %v1623_v63 = vpop.f32.mrb[33].mxu0 }
 0x147   : > { %v1624_v3 = vpop.f32.mrb[34].mxu0 }
 0x148   : > { %1887 = vst.msk [vmem:[%s2867_s28 + $0x50] sm:$0xff] %vm1876_vm1, %v1822_v55  ;;  %v1823_v57 = vmax.f32 %v1601_v56, 0.0  ;;  %v1626_v4 = vpop.f32.mrb[35].mxu0 }
 0x149   : > { %v1316_v58 = vpop.f32.mrb[24].mxu1 }
 0x14a   : > { %1888 = vst.msk [vmem:[%s2867_s28 + $0x58] sm:$0xff] %vm1876_vm1, %v1823_v57  ;;  %v1317_v59 = vadd.f32 %v2854_v22, %v1316_v58  ;;  %v1318_v60 = vpop.f32.mrb[25].mxu1 }
 0x14b   : > { %v1319_v62 = vpop.f32.mrb[26].mxu1 }
 0x14c   : > { %v1606_v0 = vadd.f32 %v1605_v33, %v1317_v59  ;;  %v1320_v1 = vadd.f32 %v2854_v22, %v1319_v62  ;;  %v1321_v2 = vpop.f32.mrb[27].mxu1 }
 0x14d   : > { %v1629_v11 = vpop.f32.mrb[36].mxu0 }
 0x14e   : > { %v1824_v5 = vmax.f32 %v1606_v0, 0.0  ;;  %v1609_v6 = vadd.f32 %v1608_v39, %v1320_v1  ;;  %v1631_v13 = vpop.f32.mrb[37].mxu0 }
 0x14f   : > { %v1632_v17 = vpop.f32.mrb[38].mxu0 }
 0x150   : > { %1889 = vst.msk [vmem:[%s2867_s28 + $0x60] sm:$0xff] %vm1876_vm1, %v1824_v5  ;;  %v1825_v7 = vmax.f32 %v1609_v6, 0.0  ;;  %v1634_v18 = vpop.f32.mrb[39].mxu0 }
 0x151   : > { %v1324_v8 = vpop.f32.mrb[28].mxu1 }
 0x152   : > { %1890 = vst.msk [vmem:[%s2867_s28 + $0x68] sm:$0xff] %vm1876_vm1, %v1825_v7  ;;  %v1325_v9 = vadd.f32 %v2854_v22, %v1324_v8  ;;  %v1326_v10 = vpop.f32.mrb[29].mxu1 }
 0x153   : > { %v1327_v12 = vpop.f32.mrb[30].mxu1 }
 0x154   : > { %v1614_v14 = vadd.f32 %v1613_v47, %v1325_v9  ;;  %v1328_v15 = vadd.f32 %v2854_v22, %v1327_v12  ;;  %v1329_v16 = vpop.f32.mrb[31].mxu1 }
 0x155   : > { %v1637_v26 = vpop.f32.mrb[40].mxu0 }
 0x156   : > { %v1826_v19 = vmax.f32 %v1614_v14, 0.0  ;;  %v1617_v20 = vadd.f32 %v1616_v53, %v1328_v15  ;;  %v1639_v28 = vpop.f32.mrb[41].mxu0 }
 0x157   : > { %v1640_v32 = vpop.f32.mrb[42].mxu0 }
 0x158   : > { %1891 = vst.msk [vmem:[%s2867_s28 + $0x70] sm:$0xff] %vm1876_vm1, %v1826_v19  ;;  %v1827_v21 = vmax.f32 %v1617_v20, 0.0  ;;  %v1642_v33 = vpop.f32.mrb[43].mxu0 }
 0x159   : > { %v1332_v23 = vpop.f32.mrb[32].mxu1 }
 0x15a   : > { %1892 = vst.msk [vmem:[%s2867_s28 + $0x78] sm:$0xff] %vm1876_vm1, %v1827_v21  ;;  %v1333_v24 = vadd.f32 %v2854_v22, %v1332_v23  ;;  %v1334_v25 = vpop.f32.mrb[33].mxu1 }
 0x15b   : > { %v1335_v27 = vpop.f32.mrb[34].mxu1 }
 0x15c   : > { %v1622_v29 = vadd.f32 %v1621_v61, %v1333_v24  ;;  %v1336_v30 = vadd.f32 %v2854_v22, %v1335_v27  ;;  %v1337_v31 = vpop.f32.mrb[35].mxu1 }
 0x15d   : > { %v1645_v40 = vpop.f32.mrb[44].mxu0 }
 0x15e   : > { %v1828_v34 = vmax.f32 %v1622_v29, 0.0  ;;  %v1625_v35 = vadd.f32 %v1624_v3, %v1336_v30  ;;  %v1647_v42 = vpop.f32.mrb[45].mxu0 }
 0x15f   : > { %v1648_v46 = vpop.f32.mrb[46].mxu0 }
 0x160   : > { %1893 = vst.msk [vmem:[%s2867_s28 + $0x80] sm:$0xff] %vm1876_vm1, %v1828_v34  ;;  %v1829_v36 = vmax.f32 %v1625_v35, 0.0  ;;  %v1650_v47 = vpop.f32.mrb[47].mxu0 }
 0x161   : > { %v1340_v37 = vpop.f32.mrb[36].mxu1 }
 0x162   : > { %1894 = vst.msk [vmem:[%s2867_s28 + $0x88] sm:$0xff] %vm1876_vm1, %v1829_v36  ;;  %v1341_v38 = vadd.f32 %v2854_v22, %v1340_v37  ;;  %v1342_v39 = vpop.f32.mrb[37].mxu1 }
 0x163   : > { %v1343_v41 = vpop.f32.mrb[38].mxu1 }
 0x164   : > { %v1630_v43 = vadd.f32 %v1629_v11, %v1341_v38  ;;  %v1344_v44 = vadd.f32 %v2854_v22, %v1343_v41  ;;  %v1345_v45 = vpop.f32.mrb[39].mxu1 }
 0x165   : > { %v1653_v54 = vpop.f32.mrb[48].mxu0 }
 0x166   : > { %v1830_v48 = vmax.f32 %v1630_v43, 0.0  ;;  %v1633_v49 = vadd.f32 %v1632_v17, %v1344_v44  ;;  %v1655_v56 = vpop.f32.mrb[49].mxu0 }
 0x167   : > { %v1656_v60 = vpop.f32.mrb[50].mxu0 }
 0x168   : > { %1895 = vst.msk [vmem:[%s2867_s28 + $0x90] sm:$0xff] %vm1876_vm1, %v1830_v48  ;;  %v1831_v50 = vmax.f32 %v1633_v49, 0.0  ;;  %v1658_v61 = vpop.f32.mrb[51].mxu0 }
 0x169   : > { %v1348_v51 = vpop.f32.mrb[40].mxu1 }
 0x16a   : > { %1896 = vst.msk [vmem:[%s2867_s28 + $0x98] sm:$0xff] %vm1876_vm1, %v1831_v50  ;;  %v1349_v52 = vadd.f32 %v2854_v22, %v1348_v51  ;;  %v1350_v53 = vpop.f32.mrb[41].mxu1 }
 0x16b   : > { %v1351_v55 = vpop.f32.mrb[42].mxu1 }
 0x16c   : > { %v1638_v57 = vadd.f32 %v1637_v26, %v1349_v52  ;;  %v1352_v58 = vadd.f32 %v2854_v22, %v1351_v55  ;;  %v1353_v59 = vpop.f32.mrb[43].mxu1 }
 0x16d   : > { %v1661_v4 = vpop.f32.mrb[52].mxu0 }
 0x16e   : > { %v1832_v62 = vmax.f32 %v1638_v57, 0.0  ;;  %v1641_v63 = vadd.f32 %v1640_v32, %v1352_v58  ;;  %v1663_v6 = vpop.f32.mrb[53].mxu0 }
 0x16f   : > { %v1664_v10 = vpop.f32.mrb[54].mxu0 }
 0x170   : > { %1897 = vst.msk [vmem:[%s2867_s28 + $0xa0] sm:$0xff] %vm1876_vm1, %v1832_v62  ;;  %v1833_v0 = vmax.f32 %v1641_v63, 0.0  ;;  %v1666_v11 = vpop.f32.mrb[55].mxu0 }
 0x171   : > { %v1356_v1 = vpop.f32.mrb[44].mxu1 }
 0x172   : > { %1898 = vst.msk [vmem:[%s2867_s28 + $0xa8] sm:$0xff] %vm1876_vm1, %v1833_v0  ;;  %v1357_v2 = vadd.f32 %v2854_v22, %v1356_v1  ;;  %v1358_v3 = vpop.f32.mrb[45].mxu1 }
 0x173   : > { %v1359_v5 = vpop.f32.mrb[46].mxu1 }
 0x174   : > { %v1646_v7 = vadd.f32 %v1645_v40, %v1357_v2  ;;  %v1360_v8 = vadd.f32 %v2854_v22, %v1359_v5  ;;  %v1361_v9 = vpop.f32.mrb[47].mxu1 }
 0x175   : > { %v1669_v18 = vpop.f32.mrb[56].mxu0 }
 0x176   : > { %v1834_v12 = vmax.f32 %v1646_v7, 0.0  ;;  %v1649_v13 = vadd.f32 %v1648_v46, %v1360_v8  ;;  %v1671_v20 = vpop.f32.mrb[57].mxu0 }
 0x177   : > { %v1672_v25 = vpop.f32.mrb[58].mxu0 }
 0x178   : > { %1899 = vst.msk [vmem:[%s2867_s28 + $0xb0] sm:$0xff] %vm1876_vm1, %v1834_v12  ;;  %v1835_v14 = vmax.f32 %v1649_v13, 0.0  ;;  %v1674_v26 = vpop.f32.mrb[59].mxu0 }
 0x179   : > { %v1364_v15 = vpop.f32.mrb[48].mxu1 }
 0x17a   : > { %1900 = vst.msk [vmem:[%s2867_s28 + $0xb8] sm:$0xff] %vm1876_vm1, %v1835_v14  ;;  %v1365_v16 = vadd.f32 %v2854_v22, %v1364_v15  ;;  %v1366_v17 = vpop.f32.mrb[49].mxu1 }
 0x17b   : > { %v1367_v19 = vpop.f32.mrb[50].mxu1 }
 0x17c   : > { %v1654_v21 = vadd.f32 %v1653_v54, %v1365_v16  ;;  %v1368_v23 = vadd.f32 %v2854_v22, %v1367_v19  ;;  %v1369_v24 = vpop.f32.mrb[51].mxu1 }
 0x17d   : > { %v1677_v33 = vpop.f32.mrb[60].mxu0 }
 0x17e   : > { %v1836_v27 = vmax.f32 %v1654_v21, 0.0  ;;  %v1657_v28 = vadd.f32 %v1656_v60, %v1368_v23  ;;  %v1679_v35 = vpop.f32.mrb[61].mxu0 }
 0x17f   : > { %v1680_v39 = vpop.f32.mrb[62].mxu0 }
 0x180   : > { %1901 = vst.msk [vmem:[%s2867_s28 + $0xc0] sm:$0xff] %vm1876_vm1, %v1836_v27  ;;  %v1837_v29 = vmax.f32 %v1657_v28, 0.0  ;;  %v1682_v40 = vpop.f32.mrb[63].mxu0 }
 0x181   : > { %v1372_v30 = vpop.f32.mrb[52].mxu1 }
 0x182   : > { %1902 = vst.msk [vmem:[%s2867_s28 + $0xc8] sm:$0xff] %vm1876_vm1, %v1837_v29  ;;  %v1373_v31 = vadd.f32 %v2854_v22, %v1372_v30  ;;  %v1374_v32 = vpop.f32.mrb[53].mxu1 }
 0x183   : > { %v1375_v34 = vpop.f32.mrb[54].mxu1 }
 0x184   : > { %v1662_v36 = vadd.f32 %v1661_v4, %v1373_v31  ;;  %v1376_v37 = vadd.f32 %v2854_v22, %v1375_v34  ;;  %v1377_v38 = vpop.f32.mrb[55].mxu1 }
 0x185   : > { %v1685_v47 = vpop.f32.mrb[64].mxu0 }
 0x186   : > { %v1838_v41 = vmax.f32 %v1662_v36, 0.0  ;;  %v1665_v42 = vadd.f32 %v1664_v10, %v1376_v37  ;;  %v1687_v49 = vpop.f32.mrb[65].mxu0 }
 0x187   : > { %v1688_v53 = vpop.f32.mrb[66].mxu0 }
 0x188   : > { %1903 = vst.msk [vmem:[%s2867_s28 + $0xd0] sm:$0xff] %vm1876_vm1, %v1838_v41  ;;  %v1839_v43 = vmax.f32 %v1665_v42, 0.0  ;;  %v1690_v54 = vpop.f32.mrb[67].mxu0 }
 0x189   : > { %v1380_v44 = vpop.f32.mrb[56].mxu1 }
 0x18a   : > { %1904 = vst.msk [vmem:[%s2867_s28 + $0xd8] sm:$0xff] %vm1876_vm1, %v1839_v43  ;;  %v1381_v45 = vadd.f32 %v2854_v22, %v1380_v44  ;;  %v1382_v46 = vpop.f32.mrb[57].mxu1 }
 0x18b   : > { %v1383_v48 = vpop.f32.mrb[58].mxu1 }
 0x18c   : > { %v1670_v50 = vadd.f32 %v1669_v18, %v1381_v45  ;;  %v1384_v51 = vadd.f32 %v2854_v22, %v1383_v48  ;;  %v1385_v52 = vpop.f32.mrb[59].mxu1 }
 0x18d   : > { %v1693_v61 = vpop.f32.mrb[68].mxu0 }
 0x18e   : > { %v1840_v55 = vmax.f32 %v1670_v50, 0.0  ;;  %v1673_v56 = vadd.f32 %v1672_v25, %v1384_v51  ;;  %v1695_v63 = vpop.f32.mrb[69].mxu0 }
 0x18f   : > { %v1696_v3 = vpop.f32.mrb[70].mxu0 }
 0x190   : > { %1905 = vst.msk [vmem:[%s2867_s28 + $0xe0] sm:$0xff] %vm1876_vm1, %v1840_v55  ;;  %v1841_v57 = vmax.f32 %v1673_v56, 0.0  ;;  %v1698_v4 = vpop.f32.mrb[71].mxu0 }
 0x191   : > { %v1388_v58 = vpop.f32.mrb[60].mxu1 }
 0x192   : > { %1906 = vst.msk [vmem:[%s2867_s28 + $0xe8] sm:$0xff] %vm1876_vm1, %v1841_v57  ;;  %v1389_v59 = vadd.f32 %v2854_v22, %v1388_v58  ;;  %v1390_v60 = vpop.f32.mrb[61].mxu1 }
 0x193   : > { %v1391_v62 = vpop.f32.mrb[62].mxu1 }
 0x194   : > { %v1678_v0 = vadd.f32 %v1677_v33, %v1389_v59  ;;  %v1392_v1 = vadd.f32 %v2854_v22, %v1391_v62  ;;  %v1393_v2 = vpop.f32.mrb[63].mxu1 }
 0x195   : > { %v1701_v11 = vpop.f32.mrb[72].mxu0 }
 0x196   : > { %v1842_v5 = vmax.f32 %v1678_v0, 0.0  ;;  %v1681_v6 = vadd.f32 %v1680_v39, %v1392_v1  ;;  %v1703_v13 = vpop.f32.mrb[73].mxu0 }
 0x197   : > { %v1704_v17 = vpop.f32.mrb[74].mxu0 }
 0x198   : > { %1907 = vst.msk [vmem:[%s2867_s28 + $0xf0] sm:$0xff] %vm1876_vm1, %v1842_v5  ;;  %v1843_v7 = vmax.f32 %v1681_v6, 0.0  ;;  %v1706_v18 = vpop.f32.mrb[75].mxu0 }
 0x199   : > { %v1396_v8 = vpop.f32.mrb[64].mxu1 }
 0x19a   : > { %1908 = vst.msk [vmem:[%s2867_s28 + $0xf8] sm:$0xff] %vm1876_vm1, %v1843_v7  ;;  %v1397_v9 = vadd.f32 %v2854_v22, %v1396_v8  ;;  %v1398_v10 = vpop.f32.mrb[65].mxu1 }
 0x19b   : > { %v1399_v12 = vpop.f32.mrb[66].mxu1 }
 0x19c   : > { %v1686_v14 = vadd.f32 %v1685_v47, %v1397_v9  ;;  %v1400_v15 = vadd.f32 %v2854_v22, %v1399_v12  ;;  %v1401_v16 = vpop.f32.mrb[67].mxu1 }
 0x19d   : > { %v1709_v26 = vpop.f32.mrb[76].mxu0 }
 0x19e   : > { %v1844_v19 = vmax.f32 %v1686_v14, 0.0  ;;  %v1689_v20 = vadd.f32 %v1688_v53, %v1400_v15  ;;  %v1711_v28 = vpop.f32.mrb[77].mxu0 }
 0x19f   : > { %v1712_v32 = vpop.f32.mrb[78].mxu0 }
 0x1a0   : > { %1909 = vst.msk [vmem:[%s2867_s28 + $0x100] sm:$0xff] %vm1876_vm1, %v1844_v19  ;;  %v1845_v21 = vmax.f32 %v1689_v20, 0.0  ;;  %v1714_v33 = vpop.f32.mrb[79].mxu0 }
 0x1a1   : > { %v1404_v23 = vpop.f32.mrb[68].mxu1 }
 0x1a2   : > { %1910 = vst.msk [vmem:[%s2867_s28 + $0x108] sm:$0xff] %vm1876_vm1, %v1845_v21  ;;  %v1405_v24 = vadd.f32 %v2854_v22, %v1404_v23  ;;  %v1406_v25 = vpop.f32.mrb[69].mxu1 }
 0x1a3   : > { %v1407_v27 = vpop.f32.mrb[70].mxu1 }
 0x1a4   : > { %v1694_v29 = vadd.f32 %v1693_v61, %v1405_v24  ;;  %v1408_v30 = vadd.f32 %v2854_v22, %v1407_v27  ;;  %v1409_v31 = vpop.f32.mrb[71].mxu1 }
 0x1a5   : > { %v1717_v40 = vpop.f32.mrb[80].mxu0 }
 0x1a6   : > { %v1846_v34 = vmax.f32 %v1694_v29, 0.0  ;;  %v1697_v35 = vadd.f32 %v1696_v3, %v1408_v30  ;;  %v1719_v42 = vpop.f32.mrb[81].mxu0 }
 0x1a7   : > { %v1720_v46 = vpop.f32.mrb[82].mxu0 }
 0x1a8   : > { %1911 = vst.msk [vmem:[%s2867_s28 + $0x110] sm:$0xff] %vm1876_vm1, %v1846_v34  ;;  %v1847_v36 = vmax.f32 %v1697_v35, 0.0  ;;  %v1722_v47 = vpop.f32.mrb[83].mxu0 }
 0x1a9   : > { %v1412_v37 = vpop.f32.mrb[72].mxu1 }
 0x1aa   : > { %1912 = vst.msk [vmem:[%s2867_s28 + $0x118] sm:$0xff] %vm1876_vm1, %v1847_v36  ;;  %v1413_v38 = vadd.f32 %v2854_v22, %v1412_v37  ;;  %v1414_v39 = vpop.f32.mrb[73].mxu1 }
 0x1ab   : > { %v1415_v41 = vpop.f32.mrb[74].mxu1 }
 0x1ac   : > { %v1702_v43 = vadd.f32 %v1701_v11, %v1413_v38  ;;  %v1416_v44 = vadd.f32 %v2854_v22, %v1415_v41  ;;  %v1417_v45 = vpop.f32.mrb[75].mxu1 }
 0x1ad   : > { %v1725_v54 = vpop.f32.mrb[84].mxu0 }
 0x1ae   : > { %v1848_v48 = vmax.f32 %v1702_v43, 0.0  ;;  %v1705_v49 = vadd.f32 %v1704_v17, %v1416_v44  ;;  %v1727_v56 = vpop.f32.mrb[85].mxu0 }
 0x1af   : > { %v1728_v60 = vpop.f32.mrb[86].mxu0 }
 0x1b0   : > { %1913 = vst.msk [vmem:[%s2867_s28 + $0x120] sm:$0xff] %vm1876_vm1, %v1848_v48  ;;  %v1849_v50 = vmax.f32 %v1705_v49, 0.0  ;;  %v1730_v61 = vpop.f32.mrb[87].mxu0 }
 0x1b1   : > { %v1420_v51 = vpop.f32.mrb[76].mxu1 }
 0x1b2   : > { %1914 = vst.msk [vmem:[%s2867_s28 + $0x128] sm:$0xff] %vm1876_vm1, %v1849_v50  ;;  %v1421_v52 = vadd.f32 %v2854_v22, %v1420_v51  ;;  %v1422_v53 = vpop.f32.mrb[77].mxu1 }
 0x1b3   : > { %v1423_v55 = vpop.f32.mrb[78].mxu1 }
 0x1b4   : > { %v1710_v57 = vadd.f32 %v1709_v26, %v1421_v52  ;;  %v1424_v58 = vadd.f32 %v2854_v22, %v1423_v55  ;;  %v1425_v59 = vpop.f32.mrb[79].mxu1 }
 0x1b5   : > { %v1733_v4 = vpop.f32.mrb[88].mxu0 }
 0x1b6   : > { %v1850_v62 = vmax.f32 %v1710_v57, 0.0  ;;  %v1713_v63 = vadd.f32 %v1712_v32, %v1424_v58  ;;  %v1735_v6 = vpop.f32.mrb[89].mxu0 }
 0x1b7   : > { %v1736_v10 = vpop.f32.mrb[90].mxu0 }
 0x1b8   : > { %1915 = vst.msk [vmem:[%s2867_s28 + $0x130] sm:$0xff] %vm1876_vm1, %v1850_v62  ;;  %v1851_v0 = vmax.f32 %v1713_v63, 0.0  ;;  %v1738_v11 = vpop.f32.mrb[91].mxu0 }
 0x1b9   : > { %v1428_v1 = vpop.f32.mrb[80].mxu1 }
 0x1ba   : > { %1916 = vst.msk [vmem:[%s2867_s28 + $0x138] sm:$0xff] %vm1876_vm1, %v1851_v0  ;;  %v1429_v2 = vadd.f32 %v2854_v22, %v1428_v1  ;;  %v1430_v3 = vpop.f32.mrb[81].mxu1 }
 0x1bb   : > { %v1431_v5 = vpop.f32.mrb[82].mxu1 }
 0x1bc   : > { %v1718_v7 = vadd.f32 %v1717_v40, %v1429_v2  ;;  %v1432_v8 = vadd.f32 %v2854_v22, %v1431_v5  ;;  %v1433_v9 = vpop.f32.mrb[83].mxu1 }
 0x1bd   : > { %v1741_v18 = vpop.f32.mrb[92].mxu0 }
 0x1be   : > { %v1852_v12 = vmax.f32 %v1718_v7, 0.0  ;;  %v1721_v13 = vadd.f32 %v1720_v46, %v1432_v8  ;;  %v1743_v20 = vpop.f32.mrb[93].mxu0 }
 0x1bf   : > { %v1744_v25 = vpop.f32.mrb[94].mxu0 }
 0x1c0   : > { %1917 = vst.msk [vmem:[%s2867_s28 + $0x140] sm:$0xff] %vm1876_vm1, %v1852_v12  ;;  %v1853_v14 = vmax.f32 %v1721_v13, 0.0  ;;  %v1746_v26 = vpop.f32.mrb[95].mxu0 }
 0x1c1   : > { %v1436_v15 = vpop.f32.mrb[84].mxu1 }
 0x1c2   : > { %1918 = vst.msk [vmem:[%s2867_s28 + $0x148] sm:$0xff] %vm1876_vm1, %v1853_v14  ;;  %v1437_v16 = vadd.f32 %v2854_v22, %v1436_v15  ;;  %v1438_v17 = vpop.f32.mrb[85].mxu1 }
 0x1c3   : > { %v1439_v19 = vpop.f32.mrb[86].mxu1 }
 0x1c4   : > { %v1726_v21 = vadd.f32 %v1725_v54, %v1437_v16  ;;  %v1440_v23 = vadd.f32 %v2854_v22, %v1439_v19  ;;  %v1441_v24 = vpop.f32.mrb[87].mxu1 }
 0x1c5   : > { %v1749_v33 = vpop.f32.mrb[96].mxu0 }
 0x1c6   : > { %v1854_v27 = vmax.f32 %v1726_v21, 0.0  ;;  %v1729_v28 = vadd.f32 %v1728_v60, %v1440_v23  ;;  %v1751_v35 = vpop.f32.mrb[97].mxu0 }
 0x1c7   : > { %v1752_v39 = vpop.f32.mrb[98].mxu0 }
 0x1c8   : > { %1919 = vst.msk [vmem:[%s2867_s28 + $0x150] sm:$0xff] %vm1876_vm1, %v1854_v27  ;;  %v1855_v29 = vmax.f32 %v1729_v28, 0.0  ;;  %v1754_v40 = vpop.f32.mrb[99].mxu0 }
 0x1c9   : > { %v1444_v30 = vpop.f32.mrb[88].mxu1 }
 0x1ca   : > { %1920 = vst.msk [vmem:[%s2867_s28 + $0x158] sm:$0xff] %vm1876_vm1, %v1855_v29  ;;  %v1445_v31 = vadd.f32 %v2854_v22, %v1444_v30  ;;  %v1446_v32 = vpop.f32.mrb[89].mxu1 }
 0x1cb   : > { %v1447_v34 = vpop.f32.mrb[90].mxu1 }
 0x1cc   : > { %v1734_v36 = vadd.f32 %v1733_v4, %v1445_v31  ;;  %v1448_v37 = vadd.f32 %v2854_v22, %v1447_v34  ;;  %v1449_v38 = vpop.f32.mrb[91].mxu1 }
 0x1cd   : > { %v1757_v47 = vpop.f32.mrb[100].mxu0 }
 0x1ce   : > { %v1856_v41 = vmax.f32 %v1734_v36, 0.0  ;;  %v1737_v42 = vadd.f32 %v1736_v10, %v1448_v37  ;;  %v1759_v49 = vpop.f32.mrb[101].mxu0 }
 0x1cf   : > { %v1760_v53 = vpop.f32.mrb[102].mxu0 }
 0x1d0   : > { %1921 = vst.msk [vmem:[%s2867_s28 + $0x160] sm:$0xff] %vm1876_vm1, %v1856_v41  ;;  %v1857_v43 = vmax.f32 %v1737_v42, 0.0  ;;  %v1762_v54 = vpop.f32.mrb[103].mxu0 }
 0x1d1   : > { %v1452_v44 = vpop.f32.mrb[92].mxu1 }
 0x1d2   : > { %1922 = vst.msk [vmem:[%s2867_s28 + $0x168] sm:$0xff] %vm1876_vm1, %v1857_v43  ;;  %v1453_v45 = vadd.f32 %v2854_v22, %v1452_v44  ;;  %v1454_v46 = vpop.f32.mrb[93].mxu1 }
 0x1d3   : > { %v1455_v48 = vpop.f32.mrb[94].mxu1 }
 0x1d4   : > { %v1742_v50 = vadd.f32 %v1741_v18, %v1453_v45  ;;  %v1456_v51 = vadd.f32 %v2854_v22, %v1455_v48  ;;  %v1457_v52 = vpop.f32.mrb[95].mxu1 }
 0x1d5   : > { %v1765_v61 = vpop.f32.mrb[104].mxu0 }
 0x1d6   : > { %v1858_v55 = vmax.f32 %v1742_v50, 0.0  ;;  %v1745_v56 = vadd.f32 %v1744_v25, %v1456_v51  ;;  %v1767_v63 = vpop.f32.mrb[105].mxu0 }
 0x1d7   : > { %v1768_v3 = vpop.f32.mrb[106].mxu0 }
 0x1d8   : > { %1923 = vst.msk [vmem:[%s2867_s28 + $0x170] sm:$0xff] %vm1876_vm1, %v1858_v55  ;;  %v1859_v57 = vmax.f32 %v1745_v56, 0.0  ;;  %v1770_v4 = vpop.f32.mrb[107].mxu0 }
 0x1d9   : > { %v1460_v58 = vpop.f32.mrb[96].mxu1 }
 0x1da   : > { %1924 = vst.msk [vmem:[%s2867_s28 + $0x178] sm:$0xff] %vm1876_vm1, %v1859_v57  ;;  %v1461_v59 = vadd.f32 %v2854_v22, %v1460_v58  ;;  %v1462_v60 = vpop.f32.mrb[97].mxu1 }
 0x1db   : > { %v1463_v62 = vpop.f32.mrb[98].mxu1 }
 0x1dc   : > { %v1750_v0 = vadd.f32 %v1749_v33, %v1461_v59  ;;  %v1464_v1 = vadd.f32 %v2854_v22, %v1463_v62  ;;  %v1465_v2 = vpop.f32.mrb[99].mxu1 }
 0x1dd   : > { %v1773_v11 = vpop.f32.mrb[108].mxu0 }
 0x1de   : > { %v1860_v5 = vmax.f32 %v1750_v0, 0.0  ;;  %v1753_v6 = vadd.f32 %v1752_v39, %v1464_v1  ;;  %v1775_v13 = vpop.f32.mrb[109].mxu0 }
 0x1df   : > { %v1776_v17 = vpop.f32.mrb[110].mxu0 }
 0x1e0   : > { %1925 = vst.msk [vmem:[%s2867_s28 + $0x180] sm:$0xff] %vm1876_vm1, %v1860_v5  ;;  %v1861_v7 = vmax.f32 %v1753_v6, 0.0  ;;  %v1778_v18 = vpop.f32.mrb[111].mxu0 }
 0x1e1   : > { %v1468_v8 = vpop.f32.mrb[100].mxu1 }
 0x1e2   : > { %1926 = vst.msk [vmem:[%s2867_s28 + $0x188] sm:$0xff] %vm1876_vm1, %v1861_v7  ;;  %v1469_v9 = vadd.f32 %v2854_v22, %v1468_v8  ;;  %v1470_v10 = vpop.f32.mrb[101].mxu1 }
 0x1e3   : > { %v1471_v12 = vpop.f32.mrb[102].mxu1 }
 0x1e4   : > { %v1758_v14 = vadd.f32 %v1757_v47, %v1469_v9  ;;  %v1472_v15 = vadd.f32 %v2854_v22, %v1471_v12  ;;  %v1473_v16 = vpop.f32.mrb[103].mxu1 }
 0x1e5   : > { %v1781_v26 = vpop.f32.mrb[112].mxu0  ;;  %v2554_v16 = vld [vmem:[%s3075_s2] ss:$0 sm:$0xff] }
 0x1e6   : > { %v1862_v19 = vmax.f32 %v1758_v14, 0.0  ;;  %v1761_v20 = vadd.f32 %v1760_v53, %v1472_v15  ;;  %v1783_v28 = vpop.f32.mrb[113].mxu0 }
 0x1e7   : > { %v1784_v32 = vpop.f32.mrb[114].mxu0 }
 0x1e8   : > { %1927 = vst.msk [vmem:[%s2867_s28 + $0x190] sm:$0xff] %vm1876_vm1, %v1862_v19  ;;  %v1863_v21 = vmax.f32 %v1761_v20, 0.0  ;;  %v1786_v33 = vpop.f32.mrb[115].mxu0 }
 0x1e9   : > { %v1476_v23 = vpop.f32.mrb[104].mxu1 }
 0x1ea   : > { %1928 = vst.msk [vmem:[%s2867_s28 + $0x198] sm:$0xff] %vm1876_vm1, %v1863_v21  ;;  %v1477_v24 = vadd.f32 %v2854_v22, %v1476_v23  ;;  %v1478_v25 = vpop.f32.mrb[105].mxu1 }
 0x1eb   : > { %v1479_v27 = vpop.f32.mrb[106].mxu1 }
 0x1ec   : > { %v1766_v29 = vadd.f32 %v1765_v61, %v1477_v24  ;;  %v1480_v30 = vadd.f32 %v2854_v22, %v1479_v27  ;;  %v1481_v31 = vpop.f32.mrb[107].mxu1 }
 0x1ed   : > { %v1789_v40 = vpop.f32.mrb[116].mxu0 }
 0x1ee   : > { %v1864_v34 = vmax.f32 %v1766_v29, 0.0  ;;  %v1769_v35 = vadd.f32 %v1768_v3, %v1480_v30  ;;  %v1791_v42 = vpop.f32.mrb[117].mxu0 }
 0x1ef   : > { %v1792_v46 = vpop.f32.mrb[118].mxu0 }
 0x1f0   : > { %1929 = vst.msk [vmem:[%s2867_s28 + $0x1a0] sm:$0xff] %vm1876_vm1, %v1864_v34  ;;  %v1865_v36 = vmax.f32 %v1769_v35, 0.0  ;;  %v1794_v47 = vpop.f32.mrb[119].mxu0 }
 0x1f1   : > { %v1484_v37 = vpop.f32.mrb[108].mxu1 }
 0x1f2   : > { %1930 = vst.msk [vmem:[%s2867_s28 + $0x1a8] sm:$0xff] %vm1876_vm1, %v1865_v36  ;;  %v1485_v38 = vadd.f32 %v2854_v22, %v1484_v37  ;;  %v1486_v39 = vpop.f32.mrb[109].mxu1 }
 0x1f3   : > { %v1487_v41 = vpop.f32.mrb[110].mxu1 }
 0x1f4   : > { %v1774_v43 = vadd.f32 %v1773_v11, %v1485_v38  ;;  %v1488_v44 = vadd.f32 %v2854_v22, %v1487_v41  ;;  %v1489_v45 = vpop.f32.mrb[111].mxu1 }
 0x1f5   : > { %v1797_v54 = vpop.f32.mrb[120].mxu0 }
 0x1f6   : > { %v1866_v48 = vmax.f32 %v1774_v43, 0.0  ;;  %v1777_v49 = vadd.f32 %v1776_v17, %v1488_v44  ;;  %v1799_v56 = vpop.f32.mrb[121].mxu0 }
 0x1f7   : > { %v1800_v60 = vpop.f32.mrb[122].mxu0 }
 0x1f8   : > { %1931 = vst.msk [vmem:[%s2867_s28 + $0x1b0] sm:$0xff] %vm1876_vm1, %v1866_v48  ;;  %v1867_v50 = vmax.f32 %v1777_v49, 0.0  ;;  %v1802_v61 = vpop.f32.mrb[123].mxu0 }
 0x1f9   : > { %v1492_v51 = vpop.f32.mrb[112].mxu1 }
 0x1fa   : > { %1932 = vst.msk [vmem:[%s2867_s28 + $0x1b8] sm:$0xff] %vm1876_vm1, %v1867_v50  ;;  %v1493_v52 = vadd.f32 %v2854_v22, %v1492_v51  ;;  %v1494_v53 = vpop.f32.mrb[113].mxu1 }
 0x1fb   : > { %v1495_v55 = vpop.f32.mrb[114].mxu1 }
 0x1fc   : > { %v1782_v57 = vadd.f32 %v1781_v26, %v1493_v52  ;;  %v1496_v58 = vadd.f32 %v2854_v22, %v1495_v55  ;;  %v1497_v59 = vpop.f32.mrb[115].mxu1 }
 0x1fd   : > { %v1805_v4 = vpop.f32.mrb[124].mxu0 }
 0x1fe   : > { %v1868_v62 = vmax.f32 %v1782_v57, 0.0  ;;  %v1785_v63 = vadd.f32 %v1784_v32, %v1496_v58  ;;  %v1807_v6 = vpop.f32.mrb[125].mxu0 }
 0x1ff   : > { %v1808_v10 = vpop.f32.mrb[126].mxu0 }
 0x200   : > { %1933 = vst.msk [vmem:[%s2867_s28 + $0x1c0] sm:$0xff] %vm1876_vm1, %v1868_v62  ;;  %v1869_v0 = vmax.f32 %v1785_v63, 0.0  ;;  %v1810_v11 = vpop.f32.mrb[127].mxu0 }
 0x201   : > { %v1500_v1 = vpop.f32.mrb[116].mxu1 }
 0x202   : > { %1934 = vst.msk [vmem:[%s2867_s28 + $0x1c8] sm:$0xff] %vm1876_vm1, %v1869_v0  ;;  %v1501_v2 = vadd.f32 %v2854_v22, %v1500_v1  ;;  %v1502_v3 = vpop.f32.mrb[117].mxu1 }
 0x203   : > { %v1503_v5 = vpop.f32.mrb[118].mxu1 }
 0x204   : > { %v1790_v7 = vadd.f32 %v1789_v40, %v1501_v2  ;;  %v1504_v8 = vadd.f32 %v2854_v22, %v1503_v5  ;;  %v1505_v9 = vpop.f32.mrb[119].mxu1 }
 0x206   : > { %v1870_v12 = vmax.f32 %v1790_v7, 0.0  ;;  %v1793_v13 = vadd.f32 %v1792_v46, %v1504_v8 }
 0x208   : > { %1935 = vst.msk [vmem:[%s2867_s28 + $0x1d0] sm:$0xff] %vm1876_vm1, %v1870_v12  ;;  %v1871_v14 = vmax.f32 %v1793_v13, 0.0 }
 0x209   : > { %v1508_v15 = vpop.f32.mrb[120].mxu1 }
 0x20a   : > { %1936 = vst.msk [vmem:[%s2867_s28 + $0x1d8] sm:$0xff] %vm1876_vm1, %v1871_v14  ;;  %v1509_v17 = vadd.f32 %v2554_v16, %v1508_v15  ;;  %v1510_v18 = vpop.f32.mrb[121].mxu1 }
 0x20b   : > { %v1511_v22 = vpop.f32.mrb[122].mxu1 }
 0x20c   : > { %v1798_v19 = vadd.f32 %v1797_v54, %v1509_v17  ;;  %v1512_v20 = vadd.f32 %v2554_v16, %v1511_v22  ;;  %v1513_v21 = vpop.f32.mrb[123].mxu1 }
 0x20e   : > { %v1872_v23 = vmax.f32 %v1798_v19, 0.0  ;;  %v1801_v24 = vadd.f32 %v1800_v60, %v1512_v20 }
 0x210   : > { %1937 = vst.msk [vmem:[%s2867_s28 + $0x1e0] sm:$0xff] %vm1876_vm1, %v1872_v23  ;;  %v1873_v25 = vmax.f32 %v1801_v24, 0.0 }
 0x211   : > { %v1516_v26 = vpop.f32.mrb[124].mxu1 }
 0x212   : > { %1938 = vst.msk [vmem:[%s2867_s28 + $0x1e8] sm:$0xff] %vm1876_vm1, %v1873_v25  ;;  %v1517_v27 = vadd.f32 %v2554_v16, %v1516_v26  ;;  %v1518_v28 = vpop.f32.mrb[125].mxu1 }
 0x213   : > { %v1519_v29 = vpop.f32.mrb[126].mxu1 }
 0x214   : > { %v1806_v30 = vadd.f32 %v1805_v4, %v1517_v27  ;;  %v1520_v31 = vadd.f32 %v2554_v16, %v1519_v29  ;;  %v1521_v32 = vpop.f32.mrb[127].mxu1 }
 0x216   : > { %v1874_v33 = vmax.f32 %v1806_v30, 0.0  ;;  %v1809_v34 = vadd.f32 %v1808_v10, %v1520_v31 }
 0x218   : > { %1939 = vst.msk [vmem:[%s2867_s28 + $0x1f0] sm:$0xff] %vm1876_vm1, %v1874_v33  ;;  %v1875_v35 = vmax.f32 %v1809_v34, 0.0 }
 0x21a   : > { %1940 = vst.msk [vmem:[%s2867_s28 + $0x1f8] sm:$0xff] %vm1876_vm1, %v1875_v35 }
 0x21b PF: > { %s13_s12 = sadd.s32 1, %s2561_s12  }
 0x21c   : > { %p10_p4 = scmp.ge.s32.totalorder %s13_s12, 6  }
 0x21e   :  { %12 = sbr.rel (!%p10_p4) target bundleno = 1 (0x1), region = 62 }

// kernel: forward.12
= control target key start
LH: loop header
LB: loop body
LE: loop exit
PB: predicated region body
PF: predicated region fallthrough
CT: control target
= control target key end

     0   :  { %s4569_s12 = smov 0   ;;  %s5694_s0 = inlined_call_operand.vmem [shape: bf16[2048,864], index: 0, kind: input, shape index: {}]   ;;  %s5695_s1 = inlined_call_operand.vmem [shape: bf16[864,64], index: 1, kind: input, shape index: {}]   ;;  %s5696_s2 = inlined_call_operand.vmem [shape: f32[1,64], index: 2, kind: input, shape index: {}]   ;;  %s5697_s3 = inlined_call_operand.vmem [shape: f32[2048,64], index: 3, kind: output, shape index: {}]  }
   0x1 LB: > { %s3431_s13 = sadd.s32 4294967295, %s4546_s12   ;;  %p3435_p0 = scmp.ge.s32.totalorder %s4546_s12, 1  ;;  %s4546_s12 = sphi %s4569_s12, %s13_s12  }
   0x2   : > { %p139_p1 = scmp.lt.s32.totalorder %s4546_s12, 5 }
   0x4   : > { %p140_p2 = pnand %p3435_p0, %p139_p1 }
   0x6   : > { %143 = sbr.rel (%p140_p2) target bundleno = 739 (0x2e3), region = 32 }
   0xd   : > { %v4165_v0 = vld [vmem:[%s5695_s1] sm:$0xff]   ;;  %v4548_v1 = vmov 0   ;;  %v4167_v3 = vld [vmem:[%s5695_s1 + $0x8] sm:$0xff]   ;;  %v4169_v5 = vld [vmem:[%s5695_s1 + $0x10] sm:$0xff]   ;;  %s3436_s7 = sshll.u32 %s3431_s13, 6  ;;  %vm1993_vm0 = vcmask 785408  }
   0xe   : > { %2090 = vmatprep.subr.bf16.mxu1 %v4548_v1  ;;  %2379 = vmatprep.subr.bf16.mxu0 %v4548_v1  ;;  %v4585_v2 = vld [vmem:[%s5695_s1 + $0x80] sm:$0xff]   ;;  %v4595_v4 = vld [vmem:[%s5695_s1 + $0x88] sm:$0xff]   ;;  %v4606_v6 = vld [vmem:[%s5695_s1 + $0x90] sm:$0xff]   ;;  %p165_p3 = scmp.lt.s32.totalorder %s3436_s7, 255  ;;  %vm3310_vm1 = vcmask 523264  }
   0xf   : > { %2091 = vmatpush1.bf16.msra.mxu1 %v4165_v0  ;;  %2380 = vmatpush1.bf16.msra.mxu0 %v4585_v2  ;;  %v4171_v7 = vld [vmem:[%s5695_s1 + $0x18] sm:$0xff]   ;;  %v4173_v9 = vld [vmem:[%s5695_s1 + $0x20] sm:$0xff]   ;;  %v4175_v11 = vld [vmem:[%s5695_s1 + $0x28] sm:$0xff]  }
  0x10   : > { %2092 = vmatprep.subr.bf16.mxu1 %v4548_v1  ;;  %2381 = vmatprep.subr.bf16.mxu0 %v4548_v1  ;;  %v4617_v8 = vld [vmem:[%s5695_s1 + $0x98] sm:$0xff]   ;;  %v4628_v10 = vld [vmem:[%s5695_s1 + $0xa0] sm:$0xff]   ;;  %v4641_v12 = vld [vmem:[%s5695_s1 + $0xa8] sm:$0xff]   ;;  %s5727_s7 = smov (!%p165_p3, %s3436_s7), 255 }
  0x11   : > { %v4177_v13 = vld [vmem:[%s5695_s1 + $0x30] sm:$0xff]   ;;  %v4179_v15 = vld [vmem:[%s5695_s1 + $0x38] sm:$0xff]   ;;  %s4155_s19 = smul.u32 28, %s5727_s7  ;;  %v4181_v17 = vld [vmem:[%s5695_s1 + $0x40] sm:$0xff]  }
  0x12   : > { %v4654_v14 = vld [vmem:[%s5695_s1 + $0xb0] sm:$0xff]   ;;  %v4666_v16 = vld [vmem:[%s5695_s1 + $0xb8] sm:$0xff]   ;;  %v4682_v18 = vld [vmem:[%s5695_s1 + $0xc0] sm:$0xff]  }
  0x13   : > { %2093 = vmatpush1.bf16.msra.mxu1 %v4167_v3  ;;  %2382 = vmatpush1.bf16.msra.mxu0 %v4595_v4  ;;  %s4675_s26 = scalar_lea.vmem %s5694_s0, %s4155_s19  ;;  %v4183_v20 = vld [vmem:[%s5695_s1 + $0x48] sm:$0xff]   ;;  %v4185_v23 = vld [vmem:[%s5695_s1 + $0x50] sm:$0xff]   ;;  %v4187_v25 = vld [vmem:[%s5695_s1 + $0x58] sm:$0xff]  }
  0x14   : > { %2094 = vmatprep.subr.bf16.mxu1 %v4548_v1  ;;  %2383 = vmatprep.subr.bf16.mxu0 %v4548_v1  ;;  %v4199_v19 = vld [vmem:[%s4675_s26 + $0x4] ss:$28 sps:$4 sm:$0xff]   ;;  %v4202_v21 = vld [vmem:[%s4675_s26 + $0xc] ss:$28 sps:$4 sm:$0xff]   ;;  %v4706_v24 = vld [vmem:[%s5695_s1 + $0xd0] sm:$0xff]  }
  0x15   : > { %v4695_v22 = vld [vmem:[%s5695_s1 + $0xc8] sm:$0xff]   ;;  %2122 = vmatprep.mubr.bf16.mxu1 %v4199_v19  ;;  %2411 = vmatprep.mubr.bf16.mxu0 %v4202_v21  ;;  %v4717_v26 = vld [vmem:[%s5695_s1 + $0xd8] sm:$0xff]   ;;  %v4189_v27 = vld [vmem:[%s5695_s1 + $0x60] sm:$0xff]  }
  0x16   : > { %v4728_v28 = vld [vmem:[%s5695_s1 + $0xe0] sm:$0xff]   ;;  %v4191_v29 = vld [vmem:[%s5695_s1 + $0x68] sm:$0xff]   ;;  %v4193_v31 = vld [vmem:[%s5695_s1 + $0x70] sm:$0xff]  }
  0x17   : > { %2095 = vmatpush1.bf16.msra.mxu1 %v4169_v5  ;;  %2384 = vmatpush1.bf16.msra.mxu0 %v4606_v6  ;;  %v4739_v30 = vld [vmem:[%s5695_s1 + $0xe8] sm:$0xff]   ;;  %v4750_v32 = vld [vmem:[%s5695_s1 + $0xf0] sm:$0xff]   ;;  %v4195_v33 = vld [vmem:[%s5695_s1 + $0x78] sm:$0xff]  }
  0x18   : > { %2096 = vmatprep.subr.bf16.mxu1 %v4548_v1  ;;  %2385 = vmatprep.subr.bf16.mxu0 %v4548_v1  ;;  %v4761_v34 = vld [vmem:[%s5695_s1 + $0xf8] sm:$0xff]   ;;  %v4200_v36 = vld [vmem:[%s4675_s26 + $0x8] ss:$28 sps:$4 sm:$0xff]   ;;  %v4211_v43 = vld [vmem:[%s4675_s26 + $0x74] ss:$28 sps:$4 sm:$0xff]  }
  0x19   : > { %v4197_v35 = vld [vmem:[%s4675_s26] ss:$28 sps:$4 sm:$0xff]   ;;  %v4210_v40 = vld [vmem:[%s5695_s1 + $0x108] sm:$0xff]   ;;  %v4208_v41 = vld [vmem:[%s4675_s26 + $0x38] ss:$28 sps:$4 sm:$0xff]  }
  0x1a   : > { %v4203_v37 = vld [vmem:[%s5695_s1 + $0x100] sm:$0xff]   ;;  %v4204_v38 = vld [vmem:[%s4675_s26 + $0x3c] ss:$28 sps:$4 sm:$0xff]   ;;  %v4223_v45 = vld [vmem:[%s5695_s1 + $0x110] sm:$0xff]  }
  0x1b   : > { %2097 = vmatpush1.bf16.msra.mxu1 %v4171_v7  ;;  %2386 = vmatpush1.bf16.msra.mxu0 %v4617_v8  ;;  %v4206_v39 = vld [vmem:[%s4675_s26 + $0x44] ss:$28 sps:$4 sm:$0xff]   ;;  %v4213_v44 = vld [vmem:[%s4675_s26 + $0x7c] ss:$28 sps:$4 sm:$0xff]   ;;  %v4215_v47 = vld [vmem:[%s4675_s26 + $0x70] ss:$28 sps:$4 sm:$0xff]  }
  0x1c   : > { %2098 = vmatprep.subr.bf16.mxu1 %v4548_v1  ;;  %2387 = vmatprep.subr.bf16.mxu0 %v4548_v1  ;;  %v4209_v42 = vld [vmem:[%s4675_s26 + $0x40] ss:$28 sps:$4 sm:$0xff]   ;;  %v4216_v48 = vld [vmem:[%s4675_s26 + $0x78] ss:$28 sps:$4 sm:$0xff]   ;;  %v4217_v49 = vld [vmem:[%s4675_s26 + $0xac] ss:$28 sps:$4 sm:$0xff]  }
  0x1d   : > { %v4230_v46 = vld [vmem:[%s5695_s1 + $0x118] sm:$0xff]   ;;  %v4219_v50 = vld [vmem:[%s4675_s26 + $0xb4] ss:$28 sps:$4 sm:$0xff]   ;;  %v4243_v51 = vld [vmem:[%s5695_s1 + $0x120] sm:$0xff]  }
  0x1e   : > { %v4250_v52 = vld [vmem:[%s5695_s1 + $0x128] sm:$0xff]   ;;  %v4224_v55 = vld [vmem:[%s4675_s26 + $0xe4] ss:$28 sps:$4 sm:$0xff]   ;;  %v4263_v57 = vld [vmem:[%s5695_s1 + $0x130] sm:$0xff]  }
  0x1f   : > { %2099 = vmatpush1.bf16.msra.mxu1 %v4173_v9  ;;  %2388 = vmatpush1.bf16.msra.mxu0 %v4628_v10  ;;  %v4221_v53 = vld [vmem:[%s4675_s26 + $0xa8] ss:$28 sps:$4 sm:$0xff]   ;;  %v4222_v54 = vld [vmem:[%s4675_s26 + $0xb0] ss:$28 sps:$4 sm:$0xff]   ;;  %v4270_v58 = vld [vmem:[%s5695_s1 + $0x138] sm:$0xff]  }
  0x20   : > { %2100 = vmatprep.subr.bf16.mxu1 %v4548_v1  ;;  %2389 = vmatprep.subr.bf16.mxu0 %v4548_v1  ;;  %v4226_v56 = vld [vmem:[%s4675_s26 + $0xec] ss:$28 sps:$4 sm:$0xff]   ;;  %v4228_v59 = vld [vmem:[%s4675_s26 + $0xe0] ss:$28 sps:$4 sm:$0xff]   ;;  %v4242_v9 = vld [vmem:[%s4675_s26 + $0x158] ss:$28 sps:$4 sm:$0xff]  }
  0x21   : > { %v4229_v60 = vld [vmem:[%s4675_s26 + $0xe8] ss:$28 sps:$4 sm:$0xff]   ;;  %v4231_v61 = vld [vmem:[%s4675_s26 + $0x11c] ss:$28 sps:$4 sm:$0xff]   ;;  %v4241_v7 = vld [vmem:[%s4675_s26 + $0x150] ss:$28 sps:$4 sm:$0xff]  }
  0x22   : > { %v4233_v62 = vld [vmem:[%s4675_s26 + $0x124] ss:$28 sps:$4 sm:$0xff]   ;;  %v4290_v0 = vld [vmem:[%s5695_s1 + $0x148] sm:$0xff]   ;;  %v4239_v5 = vld [vmem:[%s4675_s26 + $0x15c] ss:$28 sps:$4 sm:$0xff]  }
  0x23   : > { %2101 = vmatpush1.bf16.msra.mxu1 %v4175_v11  ;;  %2390 = vmatpush1.bf16.msra.mxu0 %v4641_v12  ;;  %v4283_v63 = vld [vmem:[%s5695_s1 + $0x140] sm:$0xff]   ;;  %v4246_v11 = vld [vmem:[%s4675_s26 + $0x194] ss:$28 sps:$4 sm:$0xff]  }
  0x24   : > { %2102 = vmatprep.subr.bf16.mxu1 %v4548_v1  ;;  %2391 = vmatprep.subr.bf16.mxu0 %v4548_v1  ;;  %v4236_v3 = vld [vmem:[%s4675_s26 + $0x120] ss:$28 sps:$4 sm:$0xff]   ;;  %v4256_v21 = vld [vmem:[%s4675_s26 + $0x1c8] ss:$28 sps:$4 sm:$0xff]  }
  0x25   : > { %v4255_v19 = vld [vmem:[%s4675_s26 + $0x1c0] ss:$28 sps:$4 sm:$0xff]  }
  0x27   : > { %2103 = vmatpush1.bf16.msra.mxu1 %v4177_v13  ;;  %2392 = vmatpush1.bf16.msra.mxu0 %v4654_v14  ;;  %v4248_v13 = vld [vmem:[%s4675_s26 + $0x188] ss:$28 sps:$4 sm:$0xff]  }
  0x28   : > { %2104 = vmatprep.subr.bf16.mxu1 %v4548_v1  ;;  %2393 = vmatprep.subr.bf16.mxu0 %v4548_v1 }
  0x2b   : > { %2105 = vmatpush1.bf16.msra.mxu1 %v4179_v15  ;;  %2394 = vmatpush1.bf16.msra.mxu0 %v4666_v16  ;;  %v4249_v15 = vld [vmem:[%s4675_s26 + $0x190] ss:$28 sps:$4 sm:$0xff]  }
  0x2c   : > { %2106 = vmatprep.subr.bf16.mxu1 %v4548_v1  ;;  %2395 = vmatprep.subr.bf16.mxu0 %v4548_v1 }
  0x2f   : > { %2107 = vmatpush1.bf16.msra.mxu1 %v4181_v17  ;;  %2396 = vmatpush1.bf16.msra.mxu0 %v4682_v18  ;;  %v4253_v17 = vld [vmem:[%s4675_s26 + $0x1cc] ss:$28 sps:$4 sm:$0xff]  }
  0x30   : > { %2108 = vmatprep.subr.bf16.mxu1 %v4548_v1  ;;  %2397 = vmatprep.subr.bf16.mxu0 %v4548_v1 }
  0x33   : > { %2109 = vmatpush1.bf16.msra.mxu1 %v4183_v20  ;;  %2398 = vmatpush1.bf16.msra.mxu0 %v4695_v22  ;;  %v4350_v20 = vld [vmem:[%s5695_s1 + $0x178] sm:$0xff]  }
  0x34   : > { %2110 = vmatprep.subr.bf16.mxu1 %v4548_v1  ;;  %2399 = vmatprep.subr.bf16.mxu0 %v4548_v1 }
  0x37   : > { %2111 = vmatpush1.bf16.msra.mxu1 %v4185_v23  ;;  %2400 = vmatpush1.bf16.msra.mxu0 %v4706_v24  ;;  %v4259_v23 = vld [vmem:[%s4675_s26 + $0x204] ss:$28 sps:$4 sm:$0xff]  }
  0x38   : > { %2112 = vmatprep.subr.bf16.mxu1 %v4548_v1  ;;  %2401 = vmatprep.subr.bf16.mxu0 %v4548_v1 }
  0x3b   : > { %2113 = vmatpush1.bf16.msra.mxu1 %v4187_v25  ;;  %2402 = vmatpush1.bf16.msra.mxu0 %v4717_v26  ;;  %v4262_v25 = vld [vmem:[%s4675_s26 + $0x200] ss:$28 sps:$4 sm:$0xff]  }
  0x3c   : > { %2114 = vmatprep.subr.bf16.mxu1 %v4548_v1  ;;  %2403 = vmatprep.subr.bf16.mxu0 %v4548_v1 }
  0x3f   : > { %2115 = vmatpush1.bf16.msra.mxu1 %v4189_v27  ;;  %2404 = vmatpush1.bf16.msra.mxu0 %v4728_v28  ;;  %v4266_v27 = vld [vmem:[%s4675_s26 + $0x23c] ss:$28 sps:$4 sm:$0xff]  }
  0x40   : > { %2116 = vmatprep.subr.bf16.mxu1 %v4548_v1  ;;  %2405 = vmatprep.subr.bf16.mxu0 %v4548_v1 }
  0x43   : > { %2117 = vmatpush1.bf16.msra.mxu1 %v4191_v29  ;;  %2406 = vmatpush1.bf16.msra.mxu0 %v4739_v30  ;;  %v4271_v29 = vld [vmem:[%s4675_s26 + $0x26c] ss:$28 sps:$4 sm:$0xff]  }
  0x44   : > { %2118 = vmatprep.subr.bf16.mxu1 %v4548_v1  ;;  %2407 = vmatprep.subr.bf16.mxu0 %v4548_v1 }
  0x47   : > { %2119 = vmatpush1.bf16.msra.mxu1 %v4193_v31  ;;  %2408 = vmatpush1.bf16.msra.mxu0 %v4750_v32  ;;  %v4275_v31 = vld [vmem:[%s4675_s26 + $0x268] ss:$28 sps:$4 sm:$0xff]  }
  0x48   : > { %2120 = vmatprep.subr.bf16.mxu1 %v4548_v1  ;;  %2409 = vmatprep.subr.bf16.mxu0 %v4548_v1 }
  0x4b   : > { %2121 = vmatpush1.bf16.msra.mxu1 %v4195_v33  ;;  %2410 = vmatpush1.bf16.msra.mxu0 %v4761_v34  ;;  %v4277_v33 = vld [vmem:[%s4675_s26 + $0x2a4] ss:$28 sps:$4 sm:$0xff]  }
  0x4c   : > { %3867 = vmatprep.subr.bf16.mxu1 %v4548_v1  ;;  %2668 = vmatprep.subr.bf16.mxu0 %v4548_v1 }
  0x4e   : > { %2123 = vmatmul.mubr.bf16.vlgmr.msra.gmra.mrb[0].mxu1 %v4197_v35  ;;  %2412 = vmatmul.mubr.bf16.vlgmr.msra.gmra.mrb[0].mxu0 %v4200_v36  ;;  %v4281_v35 = vld [vmem:[%s4675_s26 + $0x2a0] ss:$28 sps:$4 sm:$0xff]   ;;  %v4282_v36 = vld [vmem:[%s4675_s26 + $0x2a8] ss:$28 sps:$4 sm:$0xff]  }
  0x4f   : > { %3883 = vmatpush1.bf16.msra.mxu1 %v4585_v2  ;;  %2669 = vmatpush1.bf16.msra.mxu0 %v4203_v37  ;;  %v4235_v2 = vld [vmem:[%s4675_s26 + $0x118] ss:$28 sps:$4 sm:$0xff]  }
  0x50   : > { %2130 = vmatprep.mubr.bf16.mxu1 %v4204_v38  ;;  %2419 = vmatprep.mubr.bf16.mxu0 %v4206_v39  ;;  %v4284_v37 = vld [vmem:[%s4675_s26 + $0x2dc] ss:$28 sps:$4 sm:$0xff]   ;;  %v4286_v38 = vld [vmem:[%s4675_s26 + $0x2e4] ss:$28 sps:$4 sm:$0xff]  }
  0x51   : > { %2670 = vmatprep.subr.bf16.mxu0 %v4548_v1  ;;  %3868 = vmatprep.subr.bf16.mxu1 %v4548_v1  ;;  %v4288_v39 = vld [vmem:[%s4675_s26 + $0x2d8] ss:$28 sps:$4 sm:$0xff]  }
  0x53   : > { %3884 = vmatpush1.bf16.msra.mxu1 %v4595_v4  ;;  %2671 = vmatpush1.bf16.msra.mxu0 %v4210_v40  ;;  %v4237_v4 = vld [vmem:[%s4675_s26 + $0x154] ss:$28 sps:$4 sm:$0xff]   ;;  %v4289_v40 = vld [vmem:[%s4675_s26 + $0x2e0] ss:$28 sps:$4 sm:$0xff]  }
  0x54   : > { %3869 = vmatprep.subr.bf16.mxu1 %v4548_v1  ;;  %2672 = vmatprep.subr.bf16.mxu0 %v4548_v1 }
  0x56   : > { %2131 = vmatmul.mubr.bf16.gmra.mrb[4].mxu1 %v4208_v41  ;;  %2420 = vmatmul.mubr.bf16.gmra.mrb[4].mxu0 %v4209_v42  ;;  %v4291_v41 = vld [vmem:[%s4675_s26 + $0x314] ss:$28 sps:$4 sm:$0xff]   ;;  %v4293_v42 = vld [vmem:[%s4675_s26 + $0x31c] ss:$28 sps:$4 sm:$0xff]  }
  0x57   : > { %2138 = vmatprep.mubr.bf16.mxu1 %v4211_v43  ;;  %2427 = vmatprep.mubr.bf16.mxu0 %v4213_v44  ;;  %v4295_v43 = vld [vmem:[%s4675_s26 + $0x310] ss:$28 sps:$4 sm:$0xff]   ;;  %v4296_v44 = vld [vmem:[%s4675_s26 + $0x318] ss:$28 sps:$4 sm:$0xff]  }
  0x58   : > { %2673 = vmatpush1.bf16.msra.mxu0 %v4223_v45  ;;  %3885 = vmatpush1.bf16.msra.mxu1 %v4606_v6  ;;  %v4303_v6 = vld [vmem:[%s5695_s1 + $0x150] sm:$0xff]   ;;  %v4297_v45 = vld [vmem:[%s4675_s26 + $0x34c] ss:$28 sps:$4 sm:$0xff]  }
  0x59   : > { %2674 = vmatprep.subr.bf16.mxu0 %v4548_v1  ;;  %3870 = vmatprep.subr.bf16.mxu1 %v4548_v1 }
  0x5c   : > { %2675 = vmatpush1.bf16.msra.mxu0 %v4230_v46  ;;  %3886 = vmatpush1.bf16.msra.mxu1 %v4617_v8  ;;  %v4310_v8 = vld [vmem:[%s5695_s1 + $0x158] sm:$0xff]   ;;  %v4299_v46 = vld [vmem:[%s4675_s26 + $0x354] ss:$28 sps:$4 sm:$0xff]  }
  0x5d   : > { %2676 = vmatprep.subr.bf16.mxu0 %v4548_v1  ;;  %3871 = vmatprep.subr.bf16.mxu1 %v4548_v1 }
  0x5e   : > { %2139 = vmatmul.mubr.bf16.gmra.mrb[8].mxu1 %v4215_v47  ;;  %2428 = vmatmul.mubr.bf16.gmra.mrb[8].mxu0 %v4216_v48  ;;  %v4301_v47 = vld [vmem:[%s4675_s26 + $0x348] ss:$28 sps:$4 sm:$0xff]   ;;  %v4302_v48 = vld [vmem:[%s4675_s26 + $0x350] ss:$28 sps:$4 sm:$0xff]  }
  0x5f   : > { %2146 = vmatprep.mubr.bf16.mxu1 %v4217_v49  ;;  %2435 = vmatprep.mubr.bf16.mxu0 %v4219_v50  ;;  %v4304_v49 = vld [vmem:[%s4675_s26 + $0x384] ss:$28 sps:$4 sm:$0xff]   ;;  %v4306_v50 = vld [vmem:[%s4675_s26 + $0x38c] ss:$28 sps:$4 sm:$0xff]  }
  0x60   : > { %2677 = vmatpush1.bf16.msra.mxu0 %v4243_v51  ;;  %3887 = vmatpush1.bf16.msra.mxu1 %v4628_v10  ;;  %v4244_v10 = vld [vmem:[%s4675_s26 + $0x18c] ss:$28 sps:$4 sm:$0xff]   ;;  %v4308_v51 = vld [vmem:[%s4675_s26 + $0x380] ss:$28 sps:$4 sm:$0xff]  }
  0x61   : > { %2678 = vmatprep.subr.bf16.mxu0 %v4548_v1  ;;  %3872 = vmatprep.subr.bf16.mxu1 %v4548_v1 }
  0x64   : > { %2679 = vmatpush1.bf16.msra.mxu0 %v4250_v52  ;;  %3888 = vmatpush1.bf16.msra.mxu1 %v4641_v12  ;;  %v4323_v12 = vld [vmem:[%s5695_s1 + $0x160] sm:$0xff]  }
  0x65   : > { %2680 = vmatprep.subr.bf16.mxu0 %v4548_v1  ;;  %3873 = vmatprep.subr.bf16.mxu1 %v4548_v1  ;;  %v4309_v52 = vld [vmem:[%s4675_s26 + $0x388] ss:$28 sps:$4 sm:$0xff]  }
  0x66   : > { %2147 = vmatmul.mubr.bf16.gmra.mrb[12].mxu1 %v4221_v53  ;;  %2436 = vmatmul.mubr.bf16.gmra.mrb[12].mxu0 %v4222_v54  ;;  %v4311_v53 = vld [vmem:[%s4675_s26 + $0x3bc] ss:$28 sps:$4 sm:$0xff]   ;;  %v4313_v54 = vld [vmem:[%s4675_s26 + $0x3c4] ss:$28 sps:$4 sm:$0xff]  }
  0x67   : > { %2154 = vmatprep.mubr.bf16.mxu1 %v4224_v55  ;;  %2443 = vmatprep.mubr.bf16.mxu0 %v4226_v56  ;;  %v4932_v55 = vld [vmem:[%s5695_s1 + $0x180] sm:$0xff]   ;;  %v4315_v56 = vld [vmem:[%s4675_s26 + $0x3b8] ss:$28 sps:$4 sm:$0xff]  }
  0x68   : > { %2681 = vmatpush1.bf16.msra.mxu0 %v4263_v57  ;;  %3889 = vmatpush1.bf16.msra.mxu1 %v4654_v14  ;;  %v4330_v14 = vld [vmem:[%s5695_s1 + $0x168] sm:$0xff]   ;;  %v4316_v57 = vld [vmem:[%s4675_s26 + $0x3c0] ss:$28 sps:$4 sm:$0xff]  }
  0x69   : > { %2682 = vmatprep.subr.bf16.mxu0 %v4548_v1  ;;  %3874 = vmatprep.subr.bf16.mxu1 %v4548_v1 }
  0x6c   : > { %2683 = vmatpush1.bf16.msra.mxu0 %v4270_v58  ;;  %3890 = vmatpush1.bf16.msra.mxu1 %v4666_v16  ;;  %v4251_v16 = vld [vmem:[%s4675_s26 + $0x1c4] ss:$28 sps:$4 sm:$0xff]   ;;  %v4317_v58 = vld [vmem:[%s4675_s26 + $0x3f4] ss:$28 sps:$4 sm:$0xff]  }
  0x6d   : > { %2684 = vmatprep.subr.bf16.mxu0 %v4548_v1  ;;  %3875 = vmatprep.subr.bf16.mxu1 %v4548_v1 }
  0x6e   : > { %2155 = vmatmul.mubr.bf16.gmra.mrb[16].mxu1 %v4228_v59  ;;  %2444 = vmatmul.mubr.bf16.gmra.mrb[16].mxu0 %v4229_v60  ;;  %v4319_v59 = vld [vmem:[%s4675_s26 + $0x3fc] ss:$28 sps:$4 sm:$0xff]   ;;  %v4321_v60 = vld [vmem:[%s4675_s26 + $0x3f0] ss:$28 sps:$4 sm:$0xff]  }
  0x6f   : > { %2162 = vmatprep.mubr.bf16.mxu1 %v4231_v61  ;;  %2451 = vmatprep.mubr.bf16.mxu0 %v4233_v62  ;;  %v4322_v61 = vld [vmem:[%s4675_s26 + $0x3f8] ss:$28 sps:$4 sm:$0xff]   ;;  %v4324_v62 = vld [vmem:[%s4675_s26 + $0x42c] ss:$28 sps:$4 sm:$0xff]  }
  0x70   : > { %2685 = vmatpush1.bf16.msra.mxu0 %v4283_v63  ;;  %3891 = vmatpush1.bf16.msra.mxu1 %v4682_v18  ;;  %v4343_v18 = vld [vmem:[%s5695_s1 + $0x170] sm:$0xff]  }
  0x71   : > { %2686 = vmatprep.subr.bf16.mxu0 %v4548_v1  ;;  %3876 = vmatprep.subr.bf16.mxu1 %v4548_v1  ;;  %v4326_v63 = vld [vmem:[%s4675_s26 + $0x434] ss:$28 sps:$4 sm:$0xff]  }
  0x74   : > { %2687 = vmatpush1.bf16.msra.mxu0 %v4290_v0  ;;  %3892 = vmatpush1.bf16.msra.mxu1 %v4695_v22  ;;  %v4257_v22 = vld [vmem:[%s4675_s26 + $0x1fc] ss:$28 sps:$4 sm:$0xff]   ;;  %v4328_v0 = vld [vmem:[%s4675_s26 + $0x428] ss:$28 sps:$4 sm:$0xff]  }
  0x75   : > { %2688 = vmatprep.subr.bf16.mxu0 %v4548_v1  ;;  %3877 = vmatprep.subr.bf16.mxu1 %v4548_v1 }
  0x76   : > { %2163 = vmatmul.mubr.bf16.gmra.mrb[20].mxu1 %v4235_v2  ;;  %2452 = vmatmul.mubr.bf16.gmra.mrb[20].mxu0 %v4236_v3  ;;  %v4329_v2 = vld [vmem:[%s4675_s26 + $0x430] ss:$28 sps:$4 sm:$0xff]   ;;  %v4331_v3 = vld [vmem:[%s4675_s26 + $0x464] ss:$28 sps:$4 sm:$0xff]  }
  0x77   : > { %2170 = vmatprep.mubr.bf16.mxu1 %v4237_v4  ;;  %2459 = vmatprep.mubr.bf16.mxu0 %v4239_v5  ;;  %v4333_v4 = vld [vmem:[%s4675_s26 + $0x46c] ss:$28 sps:$4 sm:$0xff]   ;;  %v4335_v5 = vld [vmem:[%s4675_s26 + $0x460] ss:$28 sps:$4 sm:$0xff]  }
  0x78   : > { %2689 = vmatpush1.bf16.msra.mxu0 %v4303_v6  ;;  %3893 = vmatpush1.bf16.msra.mxu1 %v4706_v24  ;;  %v4261_v24 = vld [vmem:[%s4675_s26 + $0x1f8] ss:$28 sps:$4 sm:$0xff]   ;;  %v4336_v6 = vld [vmem:[%s4675_s26 + $0x468] ss:$28 sps:$4 sm:$0xff]  }
  0x79   : > { %2690 = vmatprep.subr.bf16.mxu0 %v4548_v1  ;;  %3878 = vmatprep.subr.bf16.mxu1 %v4548_v1 }
  0x7c   : > { %2691 = vmatpush1.bf16.msra.mxu0 %v4310_v8  ;;  %3894 = vmatpush1.bf16.msra.mxu1 %v4717_v26  ;;  %v4264_v26 = vld [vmem:[%s4675_s26 + $0x234] ss:$28 sps:$4 sm:$0xff]   ;;  %v4339_v8 = vld [vmem:[%s4675_s26 + $0x4a4] ss:$28 sps:$4 sm:$0xff]  }
  0x7d   : > { %2692 = vmatprep.subr.bf16.mxu0 %v4548_v1  ;;  %3879 = vmatprep.subr.bf16.mxu1 %v4548_v1 }
  0x7e   : > { %2171 = vmatmul.mubr.bf16.gmra.mrb[24].mxu1 %v4241_v7  ;;  %2460 = vmatmul.mubr.bf16.gmra.mrb[24].mxu0 %v4242_v9  ;;  %v4337_v7 = vld [vmem:[%s4675_s26 + $0x49c] ss:$28 sps:$4 sm:$0xff]  }
  0x7f   : > { %2178 = vmatprep.mubr.bf16.mxu1 %v4244_v10  ;;  %2467 = vmatprep.mubr.bf16.mxu0 %v4246_v11  ;;  %v4341_v9 = vld [vmem:[%s4675_s26 + $0x498] ss:$28 sps:$4 sm:$0xff]   ;;  %v4342_v10 = vld [vmem:[%s4675_s26 + $0x4a0] ss:$28 sps:$4 sm:$0xff]  }
  0x80   : > { %2693 = vmatpush1.bf16.msra.mxu0 %v4323_v12  ;;  %3895 = vmatpush1.bf16.msra.mxu1 %v4728_v28  ;;  %v4269_v28 = vld [vmem:[%s4675_s26 + $0x238] ss:$28 sps:$4 sm:$0xff]  }
  0x81   : > { %2694 = vmatprep.subr.bf16.mxu0 %v4548_v1  ;;  %3880 = vmatprep.subr.bf16.mxu1 %v4548_v1  ;;  %v4344_v11 = vld [vmem:[%s4675_s26 + $0x4d4] ss:$28 sps:$4 sm:$0xff]   ;;  %v4346_v12 = vld [vmem:[%s4675_s26 + $0x4dc] ss:$28 sps:$4 sm:$0xff]  }
  0x84   : > { %2695 = vmatpush1.bf16.msra.mxu0 %v4330_v14  ;;  %3896 = vmatpush1.bf16.msra.mxu1 %v4739_v30  ;;  %v4273_v30 = vld [vmem:[%s4675_s26 + $0x274] ss:$28 sps:$4 sm:$0xff]  }
  0x85   : > { %2696 = vmatprep.subr.bf16.mxu0 %v4548_v1  ;;  %3881 = vmatprep.subr.bf16.mxu1 %v4548_v1  ;;  %v4349_v14 = vld [vmem:[%s4675_s26 + $0x4d8] ss:$28 sps:$4 sm:$0xff]  }
  0x86   : > { %2179 = vmatmul.mubr.bf16.gmra.mrb[28].mxu1 %v4248_v13  ;;  %2468 = vmatmul.mubr.bf16.gmra.mrb[28].mxu0 %v4249_v15  ;;  %v4348_v13 = vld [vmem:[%s4675_s26 + $0x4d0] ss:$28 sps:$4 sm:$0xff]  }
  0x87   : > { %2186 = vmatprep.mubr.bf16.mxu1 %v4251_v16  ;;  %2475 = vmatprep.mubr.bf16.mxu0 %v4253_v17  ;;  %v4351_v15 = vld [vmem:[%s4675_s26 + $0x50c] ss:$28 sps:$4 sm:$0xff]   ;;  %v4353_v16 = vld [vmem:[%s4675_s26 + $0x514] ss:$28 sps:$4 sm:$0xff]  }
  0x88   : > { %2697 = vmatpush1.bf16.msra.mxu0 %v4343_v18  ;;  %3897 = vmatpush1.bf16.msra.mxu1 %v4750_v32  ;;  %v4276_v32 = vld [vmem:[%s4675_s26 + $0x270] ss:$28 sps:$4 sm:$0xff]   ;;  %v4355_v17 = vld [vmem:[%s4675_s26 + $0x508] ss:$28 sps:$4 sm:$0xff]  }
  0x89   : > { %2698 = vmatprep.subr.bf16.mxu0 %v4548_v1  ;;  %3882 = vmatprep.subr.bf16.mxu1 %v4548_v1  ;;  %v4268_v1 = vld [vmem:[%s4675_s26 + $0x230] ss:$28 sps:$4 sm:$0xff]  }
  0x8a   : > { %v4356_v18 = vld [vmem:[%s4675_s26 + $0x510] ss:$28 sps:$4 sm:$0xff]  }
  0x8c   : > { %2699 = vmatpush1.bf16.msra.mxu0 %v4350_v20  ;;  %3898 = vmatpush1.bf16.msra.mxu1 %v4761_v34  ;;  %v4279_v34 = vld [vmem:[%s4675_s26 + $0x2ac] ss:$28 sps:$4 sm:$0xff]   ;;  %v4361_v20 = vld [vmem:[%s4675_s26 + $0x14] ss:$28 sps:$4 sm:$0xff]  }
  0x8d   : > { %3791 = vmatprep.subr.bf16.mxu1 %v4932_v55 }
  0x8e   : > { %2187 = vmatmul.mubr.bf16.gmra.mrb[32].mxu1 %v4255_v19  ;;  %2476 = vmatmul.mubr.bf16.gmra.mrb[32].mxu0 %v4256_v21  ;;  %v4357_v19 = vld [vmem:[%s4675_s26 + $0x544] ss:$28 sps:$4 sm:$0xff]  }
  0x8f   : > { %2194 = vmatprep.mubr.bf16.mxu1 %v4257_v22  ;;  %2483 = vmatprep.mubr.bf16.mxu0 %v4259_v23  ;;  %v4362_v21 = vld [vmem:[%s4675_s26 + $0x540] ss:$28 sps:$4 sm:$0xff]   ;;  %v4359_v22 = vld [vmem:[%s4675_s26 + $0x10] ss:$28 sps:$4 sm:$0xff]  }
  0x90   : > { %v4363_v23 = vld [vmem:[%s4675_s26 + $0x57c] ss:$28 sps:$4 sm:$0xff]  }
  0x96   : > { %2195 = vmatmul.mubr.bf16.gmra.mrb[36].mxu1 %v4261_v24  ;;  %2484 = vmatmul.mubr.bf16.gmra.mrb[36].mxu0 %v4262_v25  ;;  %v4365_v24 = vld [vmem:[%s4675_s26 + $0x4c] ss:$28 sps:$4 sm:$0xff]   ;;  %v4367_v25 = vld [vmem:[%s4675_s26 + $0x578] ss:$28 sps:$4 sm:$0xff]  }
  0x97   : > { %2202 = vmatprep.mubr.bf16.mxu1 %v4264_v26  ;;  %2491 = vmatprep.mubr.bf16.mxu0 %v4266_v27  ;;  %v4368_v26 = vld [vmem:[%s4675_s26 + $0x48] ss:$28 sps:$4 sm:$0xff]   ;;  %v4369_v27 = vld [vmem:[%s4675_s26 + $0x5b4] ss:$28 sps:$4 sm:$0xff]  }
  0x9e   : > { %2203 = vmatmul.mubr.bf16.gmra.mrb[40].mxu1 %v4268_v1  ;;  %2492 = vmatmul.mubr.bf16.gmra.mrb[40].mxu0 %v4269_v28  ;;  %v4371_v1 = vld [vmem:[%s4675_s26 + $0x84] ss:$28 sps:$4 sm:$0xff]   ;;  %v4373_v28 = vld [vmem:[%s4675_s26 + $0x5b0] ss:$28 sps:$4 sm:$0xff]  }
  0x9f   : > { %2210 = vmatprep.mubr.bf16.mxu1 %v4271_v29  ;;  %2499 = vmatprep.mubr.bf16.mxu0 %v4273_v30  ;;  %v4374_v29 = vld [vmem:[%s4675_s26 + $0x80] ss:$28 sps:$4 sm:$0xff]   ;;  %v4375_v30 = vld [vmem:[%s4675_s26 + $0x5ec] ss:$28 sps:$4 sm:$0xff]  }
  0xa6   : > { %2211 = vmatmul.mubr.bf16.gmra.mrb[44].mxu1 %v4275_v31  ;;  %2500 = vmatmul.mubr.bf16.gmra.mrb[44].mxu0 %v4276_v32  ;;  %v4377_v31 = vld [vmem:[%s4675_s26 + $0xbc] ss:$28 sps:$4 sm:$0xff]  }
  0xa7   : > { %2218 = vmatprep.mubr.bf16.mxu1 %v4277_v33  ;;  %2507 = vmatprep.mubr.bf16.mxu0 %v4279_v34  ;;  %v4379_v34 = vld [vmem:[%s4675_s26 + $0x5e8] ss:$28 sps:$4 sm:$0xff]  }
  0xae   : > { %2219 = vmatmul.mubr.bf16.gmra.mrb[48].mxu1 %v4281_v35  ;;  %2508 = vmatmul.mubr.bf16.gmra.mrb[48].mxu0 %v4282_v36  ;;  %v4380_v36 = vld [vmem:[%s4675_s26 + $0xb8] ss:$28 sps:$4 sm:$0xff]  }
  0xaf   : > { %2226 = vmatprep.mubr.bf16.mxu1 %v4284_v37  ;;  %2515 = vmatprep.mubr.bf16.mxu0 %v4286_v38  ;;  %v4381_v37 = vld [vmem:[%s4675_s26 + $0x624] ss:$28 sps:$4 sm:$0xff]  }
  0xb6   : > { %2227 = vmatmul.mubr.bf16.gmra.mrb[52].mxu1 %v4288_v39  ;;  %2516 = vmatmul.mubr.bf16.gmra.mrb[52].mxu0 %v4289_v40  ;;  %v4383_v39 = vld [vmem:[%s4675_s26 + $0xf4] ss:$28 sps:$4 sm:$0xff]  }
  0xb7   : > { %2234 = vmatprep.mubr.bf16.mxu1 %v4291_v41  ;;  %2523 = vmatprep.mubr.bf16.mxu0 %v4293_v42  ;;  %v4385_v42 = vld [vmem:[%s4675_s26 + $0x620] ss:$28 sps:$4 sm:$0xff]  }
  0xbe   : > { %2235 = vmatmul.mubr.bf16.gmra.mrb[56].mxu1 %v4295_v43  ;;  %2524 = vmatmul.mubr.bf16.gmra.mrb[56].mxu0 %v4296_v44  ;;  %v4386_v44 = vld [vmem:[%s4675_s26 + $0xf0] ss:$28 sps:$4 sm:$0xff]  }
  0xbf   : > { %2242 = vmatprep.mubr.bf16.mxu1 %v4297_v45  ;;  %2531 = vmatprep.mubr.bf16.mxu0 %v4299_v46  ;;  %v4387_v45 = vld [vmem:[%s4675_s26 + $0x65c] ss:$28 sps:$4 sm:$0xff]  }
  0xc6   : > { %2243 = vmatmul.mubr.bf16.gmra.mrb[60].mxu1 %v4301_v47  ;;  %2532 = vmatmul.mubr.bf16.gmra.mrb[60].mxu0 %v4302_v48  ;;  %v4389_v47 = vld [vmem:[%s4675_s26 + $0x12c] ss:$28 sps:$4 sm:$0xff]  }
  0xc7   : > { %2250 = vmatprep.mubr.bf16.mxu1 %v4304_v49  ;;  %2539 = vmatprep.mubr.bf16.mxu0 %v4306_v50  ;;  %v4391_v50 = vld [vmem:[%s4675_s26 + $0x658] ss:$28 sps:$4 sm:$0xff]  }
  0xce   : > { %2251 = vmatmul.mubr.bf16.gmra.mrb[64].mxu1 %v4308_v51  ;;  %2540 = vmatmul.mubr.bf16.gmra.mrb[64].mxu0 %v4309_v52  ;;  %v4392_v52 = vld [vmem:[%s4675_s26 + $0x128] ss:$28 sps:$4 sm:$0xff]  }
  0xcf   : > { %2258 = vmatprep.mubr.bf16.mxu1 %v4311_v53  ;;  %2547 = vmatprep.mubr.bf16.mxu0 %v4313_v54  ;;  %v4393_v53 = vld [vmem:[%s4675_s26 + $0x694] ss:$28 sps:$4 sm:$0xff]  }
  0xd6   : > { %2259 = vmatmul.mubr.bf16.gmra.mrb[68].mxu1 %v4315_v56  ;;  %2548 = vmatmul.mubr.bf16.gmra.mrb[68].mxu0 %v4316_v57  ;;  %v4395_v56 = vld [vmem:[%s4675_s26 + $0x164] ss:$28 sps:$4 sm:$0xff]  }
  0xd7   : > { %2266 = vmatprep.mubr.bf16.mxu1 %v4317_v58  ;;  %2555 = vmatprep.mubr.bf16.mxu0 %v4319_v59  ;;  %v4397_v59 = vld [vmem:[%s4675_s26 + $0x690] ss:$28 sps:$4 sm:$0xff]  }
  0xde   : > { %2267 = vmatmul.mubr.bf16.gmra.mrb[72].mxu1 %v4321_v60  ;;  %2556 = vmatmul.mubr.bf16.gmra.mrb[72].mxu0 %v4322_v61  ;;  %v4398_v61 = vld [vmem:[%s4675_s26 + $0x160] ss:$28 sps:$4 sm:$0xff]  }
  0xdf   : > { %2274 = vmatprep.mubr.bf16.mxu1 %v4324_v62  ;;  %2563 = vmatprep.mubr.bf16.mxu0 %v4326_v63  ;;  %v4399_v62 = vld [vmem:[%s4675_s26 + $0x6cc] ss:$28 sps:$4 sm:$0xff]  }
  0xe6   : > { %2275 = vmatmul.mubr.bf16.gmra.mrb[76].mxu1 %v4328_v0  ;;  %2564 = vmatmul.mubr.bf16.gmra.mrb[76].mxu0 %v4329_v2  ;;  %v4401_v0 = vld [vmem:[%s4675_s26 + $0x19c] ss:$28 sps:$4 sm:$0xff]  }
  0xe7   : > { %2282 = vmatprep.mubr.bf16.mxu1 %v4331_v3  ;;  %2571 = vmatprep.mubr.bf16.mxu0 %v4333_v4  ;;  %v4403_v4 = vld [vmem:[%s4675_s26 + $0x6c8] ss:$28 sps:$4 sm:$0xff]  }
  0xee   : > { %2283 = vmatmul.mubr.bf16.gmra.mrb[80].mxu1 %v4335_v5  ;;  %2572 = vmatmul.mubr.bf16.gmra.mrb[80].mxu0 %v4336_v6  ;;  %v4404_v6 = vld [vmem:[%s4675_s26 + $0x198] ss:$28 sps:$4 sm:$0xff]  }
  0xef   : > { %2290 = vmatprep.mubr.bf16.mxu1 %v4337_v7  ;;  %2579 = vmatprep.mubr.bf16.mxu0 %v4339_v8  ;;  %v4407_v7 = vld [vmem:[%s4675_s26 + $0x54c] ss:$28 sps:$4 sm:$0xff]  }
  0xf6   : > { %2291 = vmatmul.mubr.bf16.gmra.mrb[84].mxu1 %v4341_v9  ;;  %2580 = vmatmul.mubr.bf16.gmra.mrb[84].mxu0 %v4342_v10  ;;  %v4408_v9 = vld [vmem:[%s4675_s26 + $0x1d4] ss:$28 sps:$4 sm:$0xff]  }
  0xf7   : > { %2298 = vmatprep.mubr.bf16.mxu1 %v4344_v11  ;;  %2587 = vmatprep.mubr.bf16.mxu0 %v4346_v12  ;;  %v4405_v12 = vld [vmem:[%s4675_s26 + $0x548] ss:$28 sps:$4 sm:$0xff]  }
  0xfe   : > { %2299 = vmatmul.mubr.bf16.gmra.mrb[88].mxu1 %v4348_v13  ;;  %2588 = vmatmul.mubr.bf16.gmra.mrb[88].mxu0 %v4349_v14  ;;  %v4410_v14 = vld [vmem:[%s4675_s26 + $0x1d0] ss:$28 sps:$4 sm:$0xff]  }
  0xff   : > { %2306 = vmatprep.mubr.bf16.mxu1 %v4351_v15  ;;  %2595 = vmatprep.mubr.bf16.mxu0 %v4353_v16  ;;  %v4412_v16 = vld [vmem:[%s4675_s26 + $0x584] ss:$28 sps:$4 sm:$0xff]  }
 0x106   : > { %2307 = vmatmul.mubr.bf16.gmra.mrb[92].mxu1 %v4355_v17  ;;  %2596 = vmatmul.mubr.bf16.gmra.mrb[92].mxu0 %v4356_v18  ;;  %v4414_v17 = vld [vmem:[%s4675_s26 + $0x20c] ss:$28 sps:$4 sm:$0xff]  }
 0x107   : > { %2314 = vmatprep.mubr.bf16.mxu1 %v4357_v19  ;;  %2700 = vmatprep.mubr.bf16.mxu0 %v4361_v20  ;;  %v4418_v18 = vld [vmem:[%s5695_s1 + $0x188] sm:$0xff]   ;;  %v4429_v19 = vld [vmem:[%s5695_s1 + $0x190] sm:$0xff]  }
 0x10e   : > { %2315 = vmatmul.mubr.bf16.gmra.mrb[96].mxu1 %v4362_v21  ;;  %2701 = vmatmul.mubr.bf16.vlgmr.msra.gmra.mrb[0].mxu0 %v4359_v22  ;;  %v4416_v22 = vld [vmem:[%s4675_s26 + $0x580] ss:$28 sps:$4 sm:$0xff]  }
 0x10f   : > { %2322 = vmatprep.mubr.bf16.mxu1 %v4363_v23  ;;  %2708 = vmatprep.mubr.bf16.mxu0 %v4365_v24  ;;  %v4417_v24 = vld [vmem:[%s4675_s26 + $0x208] ss:$28 sps:$4 sm:$0xff]  }
 0x116   : > { %2323 = vmatmul.mubr.bf16.gmra.mrb[100].mxu1 %v4367_v25  ;;  %2709 = vmatmul.mubr.bf16.gmra.mrb[4].mxu0 %v4368_v26  ;;  %v4419_v25 = vld [vmem:[%s4675_s26 + $0x5bc] ss:$28 sps:$4 sm:$0xff]  }
 0x117   : > { %2330 = vmatprep.mubr.bf16.mxu1 %v4369_v27  ;;  %2716 = vmatprep.mubr.bf16.mxu0 %v4371_v1  ;;  %v4438_v27 = vld [vmem:[%s5695_s1 + $0x198] sm:$0xff]  }
 0x11e   : > { %2331 = vmatmul.mubr.bf16.gmra.mrb[104].mxu1 %v4373_v28  ;;  %2717 = vmatmul.mubr.bf16.gmra.mrb[8].mxu0 %v4374_v29  ;;  %v4445_v28 = vld [vmem:[%s5695_s1 + $0x1a0] sm:$0xff]  }
 0x11f   : > { %2338 = vmatprep.mubr.bf16.mxu1 %v4375_v30  ;;  %2724 = vmatprep.mubr.bf16.mxu0 %v4377_v31  ;;  %v4423_v30 = vld [vmem:[%s4675_s26 + $0x5b8] ss:$28 sps:$4 sm:$0xff]  }
 0x121   : > { %v4975_v32 = vpop.f32.mrb[0].mxu1 }
 0x122   : > { %v2126_v33 = vpop.f32.mrb[1].mxu1 }
 0x123   : > { %v4978_v35 = vpop.f32.mrb[2].mxu1  ;;  %v4424_v33 = vld [vmem:[%s4675_s26 + $0x240] ss:$28 sps:$4 sm:$0xff]  }
 0x124   : > { %v2129_v38 = vpop.f32.mrb[3].mxu1 }
 0x125   : > { %v4456_v38 = vld [vmem:[%s5695_s1 + $0x1a8] sm:$0xff]  }
 0x126   : > { %2339 = vmatmul.mubr.bf16.gmra.mrb[108].mxu1 %v4379_v34  ;;  %2725 = vmatmul.mubr.bf16.gmra.mrb[12].mxu0 %v4380_v36  ;;  %v4425_v34 = vld [vmem:[%s4675_s26 + $0x5f4] ss:$28 sps:$4 sm:$0xff]  }
 0x127   : > { %2346 = vmatprep.mubr.bf16.mxu1 %v4381_v37  ;;  %2732 = vmatprep.mubr.bf16.mxu0 %v4383_v39  ;;  %v4427_v37 = vld [vmem:[%s4675_s26 + $0x27c] ss:$28 sps:$4 sm:$0xff]  }
 0x129   : > { %v4983_v40 = vpop.f32.mrb[4].mxu1 }
 0x12a   : > { %v2134_v41 = vpop.f32.mrb[5].mxu1 }
 0x12b   : > { %v4986_v43 = vpop.f32.mrb[6].mxu1 }
 0x12c   : > { %v2137_v46 = vpop.f32.mrb[7].mxu1 }
 0x12d   : > { %v4432_v46 = vld [vmem:[%s4675_s26 + $0x62c] ss:$28 sps:$4 sm:$0xff]  }
 0x12e   : > { %2347 = vmatmul.mubr.bf16.gmra.mrb[112].mxu1 %v4385_v42  ;;  %2733 = vmatmul.mubr.bf16.gmra.mrb[16].mxu0 %v4386_v44  ;;  %v4430_v42 = vld [vmem:[%s4675_s26 + $0x5f0] ss:$28 sps:$4 sm:$0xff]  }
 0x12f   : > { %2354 = vmatprep.mubr.bf16.mxu1 %v4387_v45  ;;  %2740 = vmatprep.mubr.bf16.mxu0 %v4389_v47  ;;  %v4431_v45 = vld [vmem:[%s4675_s26 + $0x278] ss:$28 sps:$4 sm:$0xff]  }
 0x131   : > { %v4991_v48 = vpop.f32.mrb[8].mxu1 }
 0x132   : > { %v2142_v49 = vpop.f32.mrb[9].mxu1 }
 0x133   : > { %v4994_v51 = vpop.f32.mrb[10].mxu1  ;;  %v4434_v49 = vld [vmem:[%s4675_s26 + $0x2b4] ss:$28 sps:$4 sm:$0xff]  }
 0x134   : > { %v2145_v54 = vpop.f32.mrb[11].mxu1 }
 0x136   : > { %2355 = vmatmul.mubr.bf16.gmra.mrb[116].mxu1 %v4391_v50  ;;  %2741 = vmatmul.mubr.bf16.gmra.mrb[20].mxu0 %v4392_v52 }
 0x137   : > { %2362 = vmatprep.mubr.bf16.mxu1 %v4393_v53  ;;  %2748 = vmatprep.mubr.bf16.mxu0 %v4395_v56  ;;  %v4436_v53 = vld [vmem:[%s4675_s26 + $0x628] ss:$28 sps:$4 sm:$0xff]   ;;  %v4437_v56 = vld [vmem:[%s4675_s26 + $0x2b0] ss:$28 sps:$4 sm:$0xff]  }
 0x139   : > { %v4999_v57 = vpop.f32.mrb[12].mxu1 }
 0x13a   : > { %v2150_v58 = vpop.f32.mrb[13].mxu1 }
 0x13b   : > { %v5002_v60 = vpop.f32.mrb[14].mxu1  ;;  %v4439_v58 = vld [vmem:[%s4675_s26 + $0x664] ss:$28 sps:$4 sm:$0xff]  }
 0x13c   : > { %v2153_v63 = vpop.f32.mrb[15].mxu1 }
 0x13e   : > { %2363 = vmatmul.mubr.bf16.gmra.mrb[120].mxu1 %v4397_v59  ;;  %2749 = vmatmul.mubr.bf16.gmra.mrb[24].mxu0 %v4398_v61  ;;  %v4441_v61 = vld [vmem:[%s4675_s26 + $0x2ec] ss:$28 sps:$4 sm:$0xff]  }
 0x13f   : > { %2370 = vmatprep.mubr.bf16.mxu1 %v4399_v62  ;;  %2756 = vmatprep.mubr.bf16.mxu0 %v4401_v0  ;;  %v4443_v0 = vld [vmem:[%s4675_s26 + $0x660] ss:$28 sps:$4 sm:$0xff]  }
 0x141   : > { %v5007_v2 = vpop.f32.mrb[16].mxu1 }
 0x142   : > { %v2158_v3 = vpop.f32.mrb[17].mxu1 }
 0x143   : > { %v5010_v5 = vpop.f32.mrb[18].mxu1 }
 0x144   : > { %v2161_v8 = vpop.f32.mrb[19].mxu1 }
 0x145   : > { %v4448_v8 = vld [vmem:[%s4675_s26 + $0x324] ss:$28 sps:$4 sm:$0xff]  }
 0x146   : > { %2371 = vmatmul.mubr.bf16.gmra.mrb[124].mxu1 %v4403_v4  ;;  %2757 = vmatmul.mubr.bf16.gmra.mrb[28].mxu0 %v4404_v6  ;;  %v4444_v4 = vld [vmem:[%s4675_s26 + $0x2e8] ss:$28 sps:$4 sm:$0xff]   ;;  %v4446_v6 = vld [vmem:[%s4675_s26 + $0x69c] ss:$28 sps:$4 sm:$0xff]  }
 0x147   : > { %2603 = vmatprep.mubr.bf16.mxu1 %v4407_v7  ;;  %2764 = vmatprep.mubr.bf16.mxu0 %v4408_v9 }
 0x149   : > { %v5015_v10 = vpop.f32.mrb[20].mxu1 }
 0x14a   : > { %v2166_v11 = vpop.f32.mrb[21].mxu1 }
 0x14b   : > { %v5018_v13 = vpop.f32.mrb[22].mxu1 }
 0x14c   : > { %v2169_v15 = vpop.f32.mrb[23].mxu1 }
 0x14d   : > { %v4451_v15 = vld [vmem:[%s4675_s26 + $0x320] ss:$28 sps:$4 sm:$0xff]  }
 0x14e   : > { %2604 = vmatmul.mubr.bf16.vlgmr.msra.gmra.mrb[96].mxu1 %v4405_v12  ;;  %2765 = vmatmul.mubr.bf16.gmra.mrb[32].mxu0 %v4410_v14  ;;  %v4450_v12 = vld [vmem:[%s4675_s26 + $0x698] ss:$28 sps:$4 sm:$0xff]  }
 0x14f   : > { %3792 = vmatpush3.bf16.msra.mxu1 %v4932_v55  ;;  %2611 = vmatprep.mubr.bf16.mxu1 %v4412_v16  ;;  %v4421_v55 = vld [vmem:[%s4675_s26 + $0x244] ss:$28 sps:$4 sm:$0xff]   ;;  %v4452_v16 = vld [vmem:[%s4675_s26 + $0x6d4] ss:$28 sps:$4 sm:$0xff]  }
 0x150   : > { %2772 = vmatprep.mubr.bf16.mxu0 %v4414_v17  ;;  %3793 = vmatprep.subr.bf16.mxu1 %v4418_v18 }
 0x151   : > { %v5030_v20 = vpop.f32.mrb[24].mxu1 }
 0x152   : > { %v2174_v21 = vpop.f32.mrb[25].mxu1 }
 0x153   : > { %v5033_v23 = vpop.f32.mrb[26].mxu1  ;;  %3794 = vmatpush3.bf16.msra.mxu1 %v4418_v18  ;;  %v4454_v18 = vld [vmem:[%s4675_s26 + $0x35c] ss:$28 sps:$4 sm:$0xff]  }
 0x154   : > { %v2177_v26 = vpop.f32.mrb[27].mxu1  ;;  %3795 = vmatprep.subr.bf16.mxu1 %v4429_v19 }
 0x155   : > { %v4461_v26 = vld [vmem:[%s4675_s26 + $0x18] ss:$28 sps:$4 sm:$0xff]  }
 0x156   : > { %2612 = vmatmul.mubr.bf16.gmra.mrb[100].mxu1 %v4416_v22  ;;  %2773 = vmatmul.mubr.bf16.gmra.mrb[36].mxu0 %v4417_v24  ;;  %v4457_v22 = vld [vmem:[%s4675_s26 + $0x6d0] ss:$28 sps:$4 sm:$0xff]  }
 0x157   : > { %2619 = vmatprep.mubr.bf16.mxu1 %v4419_v25  ;;  %2780 = vmatprep.mubr.bf16.mxu0 %v4421_v55  ;;  %v4458_v25 = vld [vmem:[%s4675_s26 + $0x358] ss:$28 sps:$4 sm:$0xff]  }
 0x158   : > { %3796 = vmatpush3.bf16.msra.mxu1 %v4429_v19 }
 0x159   : > { %v5041_v1 = vpop.f32.mrb[28].mxu1  ;;  %3797 = vmatprep.subr.bf16.mxu1 %v4438_v27 }
 0x15a   : > { %v2182_v29 = vpop.f32.mrb[29].mxu1 }
 0x15b   : > { %v5047_v31 = vpop.f32.mrb[30].mxu1 }
 0x15c   : > { %v2185_v36 = vpop.f32.mrb[31].mxu1  ;;  %3798 = vmatpush3.bf16.msra.mxu1 %v4438_v27  ;;  %v4459_v27 = vld [vmem:[%s4675_s26 + $0x394] ss:$28 sps:$4 sm:$0xff]  }
 0x15d   : > { %3799 = vmatprep.subr.bf16.mxu1 %v4445_v28  ;;  %v4466_v36 = vld [vmem:[%s4675_s26 + $0x88] ss:$28 sps:$4 sm:$0xff]  }
 0x15e   : > { %2620 = vmatmul.mubr.bf16.gmra.mrb[104].mxu1 %v4423_v30  ;;  %2781 = vmatmul.mubr.bf16.gmra.mrb[40].mxu0 %v4424_v33  ;;  %v4463_v30 = vld [vmem:[%s4675_s26 + $0x50] ss:$28 sps:$4 sm:$0xff]  }
 0x15f   : > { %2627 = vmatprep.mubr.bf16.mxu1 %v4425_v34  ;;  %2788 = vmatprep.mubr.bf16.mxu0 %v4427_v37  ;;  %v4462_v34 = vld [vmem:[%s4675_s26 + $0x390] ss:$28 sps:$4 sm:$0xff]  }
 0x160   : > { %3800 = vmatpush3.bf16.msra.mxu1 %v4445_v28 }
 0x161   : > { %v5055_v39 = vpop.f32.mrb[32].mxu1  ;;  %3801 = vmatprep.subr.bf16.mxu1 %v4456_v38 }
 0x162   : > { %v2190_v41 = vpop.f32.mrb[33].mxu1 }
 0x163   : > { %v5058_v44 = vpop.f32.mrb[34].mxu1 }
 0x164   : > { %v2193_v47 = vpop.f32.mrb[35].mxu1  ;;  %3802 = vmatpush3.bf16.msra.mxu1 %v4456_v38  ;;  %v4464_v38 = vld [vmem:[%s4675_s26 + $0x3cc] ss:$28 sps:$4 sm:$0xff]  }
 0x165   : > { %v4467_v47 = vld [vmem:[%s4675_s26 + $0x3c8] ss:$28 sps:$4 sm:$0xff]  }
 0x166   : > { %2628 = vmatmul.mubr.bf16.gmra.mrb[108].mxu1 %v4430_v42  ;;  %2789 = vmatmul.mubr.bf16.gmra.mrb[44].mxu0 %v4431_v45  ;;  %v4468_v45 = vld [vmem:[%s4675_s26 + $0xc0] ss:$28 sps:$4 sm:$0xff]  }
 0x167   : > { %2635 = vmatprep.mubr.bf16.mxu1 %v4432_v46  ;;  %2796 = vmatprep.mubr.bf16.mxu0 %v4434_v49  ;;  %v4471_v49 = vld [vmem:[%s4675_s26 + $0xf8] ss:$28 sps:$4 sm:$0xff]  }
 0x169   : > { %v5063_v50 = vpop.f32.mrb[36].mxu1 }
 0x16a   : > { %v2198_v52 = vpop.f32.mrb[37].mxu1 }
 0x16b   : > { %v5066_v54 = vpop.f32.mrb[38].mxu1 }
 0x16c   : > { %v2201_v59 = vpop.f32.mrb[39].mxu1 }
 0x16d   : > { %v4473_v59 = vld [vmem:[%s4675_s26 + $0x130] ss:$28 sps:$4 sm:$0xff]  }
 0x16e   : > { %2636 = vmatmul.mubr.bf16.gmra.mrb[112].mxu1 %v4436_v53  ;;  %2797 = vmatmul.mubr.bf16.gmra.mrb[48].mxu0 %v4437_v56  ;;  %v4469_v53 = vld [vmem:[%s4675_s26 + $0x404] ss:$28 sps:$4 sm:$0xff]  }
 0x16f   : > { %2643 = vmatprep.mubr.bf16.mxu1 %v4439_v58  ;;  %2804 = vmatprep.mubr.bf16.mxu0 %v4441_v61 }
 0x171   : > { %v5071_v62 = vpop.f32.mrb[40].mxu1 }
 0x172   : > { %v2206_v63 = vpop.f32.mrb[41].mxu1 }
 0x173   : > { %v5074_v3 = vpop.f32.mrb[42].mxu1  ;;  %v4472_v63 = vld [vmem:[%s4675_s26 + $0x400] ss:$28 sps:$4 sm:$0xff]  }
 0x174   : > { %v2209_v7 = vpop.f32.mrb[43].mxu1 }
 0x176   : > { %2644 = vmatmul.mubr.bf16.gmra.mrb[116].mxu1 %v4443_v0  ;;  %2805 = vmatmul.mubr.bf16.gmra.mrb[52].mxu0 %v4444_v4  ;;  %v4476_v0 = vld [vmem:[%s4675_s26 + $0x168] ss:$28 sps:$4 sm:$0xff]  }
 0x177   : > { %2651 = vmatprep.mubr.bf16.mxu1 %v4446_v6  ;;  %2812 = vmatprep.mubr.bf16.mxu0 %v4448_v8  ;;  %v4474_v6 = vld [vmem:[%s4675_s26 + $0x43c] ss:$28 sps:$4 sm:$0xff]  }
 0x179   : > { %v5079_v9 = vpop.f32.mrb[44].mxu1 }
 0x17a   : > { %v2214_v11 = vpop.f32.mrb[45].mxu1 }
 0x17b   : > { %v5082_v14 = vpop.f32.mrb[46].mxu1  ;;  %v4478_v11 = vld [vmem:[%s4675_s26 + $0x1a0] ss:$28 sps:$4 sm:$0xff]  }
 0x17c   : > { %v2217_v17 = vpop.f32.mrb[47].mxu1 }
 0x17e   : > { %2652 = vmatmul.mubr.bf16.gmra.mrb[120].mxu1 %v4450_v12  ;;  %2813 = vmatmul.mubr.bf16.gmra.mrb[56].mxu0 %v4451_v15  ;;  %v4477_v15 = vld [vmem:[%s4675_s26 + $0x438] ss:$28 sps:$4 sm:$0xff]  }
 0x17f   : > { %2659 = vmatprep.mubr.bf16.mxu1 %v4452_v16  ;;  %2820 = vmatprep.mubr.bf16.mxu0 %v4454_v18  ;;  %v4481_v16 = vld [vmem:[%s4675_s26 + $0x1d8] ss:$28 sps:$4 sm:$0xff]  }
 0x180   : > { %v4479_v18 = vld [vmem:[%s4675_s26 + $0x474] ss:$28 sps:$4 sm:$0xff]  }
 0x181   : > { %v5087_v19 = vpop.f32.mrb[48].mxu1 }
 0x182   : > { %v2222_v21 = vpop.f32.mrb[49].mxu1 }
 0x183   : > { %v5090_v24 = vpop.f32.mrb[50].mxu1 }
 0x184   : > { %v2225_v55 = vpop.f32.mrb[51].mxu1 }
 0x185   : > { %v4482_v55 = vld [vmem:[%s4675_s26 + $0x470] ss:$28 sps:$4 sm:$0xff]  }
 0x186   : > { %2660 = vmatmul.mubr.bf16.gmra.mrb[124].mxu1 %v4457_v22  ;;  %2821 = vmatmul.mubr.bf16.gmra.mrb[60].mxu0 %v4458_v25  ;;  %v4483_v25 = vld [vmem:[%s4675_s26 + $0x210] ss:$28 sps:$4 sm:$0xff]  }
 0x187   : > { %3803 = vmatprep.mubr.msk.bf16.mxu1 %vm1993_vm0, %v4461_v26  ;;  %2828 = vmatprep.mubr.bf16.mxu0 %v4459_v27  ;;  %v4486_v27 = vld [vmem:[%s4675_s26 + $0x248] ss:$28 sps:$4 sm:$0xff]  }
 0x189   : > { %v5096_v28 = vpop.f32.mrb[52].mxu1 }
 0x18a   : > { %v2230_v29 = vpop.f32.mrb[53].mxu1 }
 0x18b   : > { %v5099_v33 = vpop.f32.mrb[54].mxu1 }
 0x18c   : > { %v2233_v37 = vpop.f32.mrb[55].mxu1 }
 0x18d   : > { %v4488_v37 = vld [vmem:[%s4675_s26 + $0x280] ss:$28 sps:$4 sm:$0xff]  }
 0x18e   : > { %3804 = vmatmul.mubr.msk.bf16.vlgmr.msra.gmra.mrb[128].mxu1 %vm1993_vm0, %v4463_v30  ;;  %2829 = vmatmul.mubr.bf16.gmra.mrb[64].mxu0 %v4462_v34  ;;  %v4484_v30 = vld [vmem:[%s4675_s26 + $0x4ac] ss:$28 sps:$4 sm:$0xff]  }
 0x18f   : > { %3807 = vmatprep.mubr.msk.bf16.mxu1 %vm1993_vm0, %v4466_v36  ;;  %2836 = vmatprep.mubr.bf16.mxu0 %v4464_v38 }
 0x191   : > { %v5106_v41 = vpop.f32.mrb[56].mxu1 }
 0x192   : > { %v2238_v42 = vpop.f32.mrb[57].mxu1 }
 0x193   : > { %v5109_v46 = vpop.f32.mrb[58].mxu1  ;;  %v4487_v42 = vld [vmem:[%s4675_s26 + $0x4a8] ss:$28 sps:$4 sm:$0xff]  }
 0x194   : > { %v2241_v52 = vpop.f32.mrb[59].mxu1 }
 0x196   : > { %3808 = vmatmul.mubr.msk.bf16.gmra.mrb[132].mxu1 %vm1993_vm0, %v4468_v45  ;;  %2837 = vmatmul.mubr.bf16.gmra.mrb[68].mxu0 %v4467_v47  ;;  %v4491_v45 = vld [vmem:[%s4675_s26 + $0x2b8] ss:$28 sps:$4 sm:$0xff]  }
 0x197   : > { %3811 = vmatprep.mubr.msk.bf16.mxu1 %vm1993_vm0, %v4471_v49  ;;  %2844 = vmatprep.mubr.bf16.mxu0 %v4469_v53  ;;  %v4489_v49 = vld [vmem:[%s4675_s26 + $0x4e4] ss:$28 sps:$4 sm:$0xff]  }
 0x199   : > { %v5116_v56 = vpop.f32.mrb[60].mxu1 }
 0x19a   : > { %v2246_v58 = vpop.f32.mrb[61].mxu1 }
 0x19b   : > { %v5119_v61 = vpop.f32.mrb[62].mxu1  ;;  %v4493_v58 = vld [vmem:[%s4675_s26 + $0x2f0] ss:$28 sps:$4 sm:$0xff]  }
 0x19c   : > { %v2249_v4 = vpop.f32.mrb[63].mxu1 }
 0x19e   : > { %3812 = vmatmul.mubr.msk.bf16.gmra.mrb[136].mxu1 %vm1993_vm0, %v4473_v59  ;;  %2845 = vmatmul.mubr.bf16.gmra.mrb[72].mxu0 %v4472_v63  ;;  %v4492_v63 = vld [vmem:[%s4675_s26 + $0x4e0] ss:$28 sps:$4 sm:$0xff]  }
 0x19f   : > { %3815 = vmatprep.mubr.msk.bf16.mxu1 %vm1993_vm0, %v4476_v0  ;;  %2852 = vmatprep.mubr.bf16.mxu0 %v4474_v6  ;;  %v4496_v0 = vld [vmem:[%s4675_s26 + $0x328] ss:$28 sps:$4 sm:$0xff]   ;;  %v4494_v6 = vld [vmem:[%s4675_s26 + $0x51c] ss:$28 sps:$4 sm:$0xff]  }
 0x1a1   : > { %v5126_v7 = vpop.f32.mrb[64].mxu1 }
 0x1a2   : > { %v2254_v8 = vpop.f32.mrb[65].mxu1 }
 0x1a3   : > { %v5129_v12 = vpop.f32.mrb[66].mxu1 }
 0x1a4   : > { %v2257_v17 = vpop.f32.mrb[67].mxu1 }
 0x1a5   : > { %v4497_v17 = vld [vmem:[%s4675_s26 + $0x518] ss:$28 sps:$4 sm:$0xff]  }
 0x1a6   : > { %3816 = vmatmul.mubr.msk.bf16.gmra.mrb[140].mxu1 %vm1993_vm0, %v4478_v11  ;;  %2853 = vmatmul.mubr.bf16.gmra.mrb[76].mxu0 %v4477_v15  ;;  %v4498_v15 = vld [vmem:[%s4675_s26 + $0x360] ss:$28 sps:$4 sm:$0xff]  }
 0x1a7   : > { %3819 = vmatprep.mubr.msk.bf16.mxu1 %vm1993_vm0, %v4481_v16  ;;  %2860 = vmatprep.mubr.bf16.mxu0 %v4479_v18  ;;  %v4501_v18 = vld [vmem:[%s4675_s26 + $0x398] ss:$28 sps:$4 sm:$0xff]  }
 0x1a9   : > { %v5136_v21 = vpop.f32.mrb[68].mxu1 }
 0x1aa   : > { %v2262_v22 = vpop.f32.mrb[69].mxu1 }
 0x1ab   : > { %v5139_v26 = vpop.f32.mrb[70].mxu1 }
 0x1ac   : > { %v2265_v29 = vpop.f32.mrb[71].mxu1 }
 0x1ad   : > { %v4503_v29 = vld [vmem:[%s4675_s26 + $0x3d0] ss:$28 sps:$4 sm:$0xff]  }
 0x1ae   : > { %3820 = vmatmul.mubr.msk.bf16.gmra.mrb[144].mxu1 %vm1993_vm0, %v4483_v25  ;;  %2861 = vmatmul.mubr.bf16.gmra.mrb[80].mxu0 %v4482_v55  ;;  %v4499_v25 = vld [vmem:[%s4675_s26 + $0x554] ss:$28 sps:$4 sm:$0xff]  }
 0x1af   : > { %3823 = vmatprep.mubr.msk.bf16.mxu1 %vm1993_vm0, %v4486_v27  ;;  %2868 = vmatprep.mubr.bf16.mxu0 %v4484_v30 }
 0x1b1   : > { %v5146_v34 = vpop.f32.mrb[72].mxu1 }
 0x1b2   : > { %v2270_v36 = vpop.f32.mrb[73].mxu1 }
 0x1b3   : > { %v5149_v38 = vpop.f32.mrb[74].mxu1  ;;  %v4502_v36 = vld [vmem:[%s4675_s26 + $0x550] ss:$28 sps:$4 sm:$0xff]  }
 0x1b4   : > { %v2273_v47 = vpop.f32.mrb[75].mxu1 }
 0x1b6   : > { %3824 = vmatmul.mubr.msk.bf16.gmra.mrb[148].mxu1 %vm1993_vm0, %v4488_v37  ;;  %2869 = vmatmul.mubr.bf16.gmra.mrb[84].mxu0 %v4487_v42  ;;  %v4506_v37 = vld [vmem:[%s4675_s26 + $0x408] ss:$28 sps:$4 sm:$0xff]  }
 0x1b7   : > { %3827 = vmatprep.mubr.msk.bf16.mxu1 %vm1993_vm0, %v4491_v45  ;;  %2876 = vmatprep.mubr.bf16.mxu0 %v4489_v49  ;;  %v4504_v45 = vld [vmem:[%s4675_s26 + $0x58c] ss:$28 sps:$4 sm:$0xff]  }
 0x1b9   : > { %v5156_v52 = vpop.f32.mrb[76].mxu1 }
 0x1ba   : > { %v2278_v53 = vpop.f32.mrb[77].mxu1 }
 0x1bb   : > { %v5159_v59 = vpop.f32.mrb[78].mxu1  ;;  %v4508_v53 = vld [vmem:[%s4675_s26 + $0x440] ss:$28 sps:$4 sm:$0xff]  }
 0x1bc   : > { %v2281_v4 = vpop.f32.mrb[79].mxu1 }
 0x1be   : > { %3828 = vmatmul.mubr.msk.bf16.gmra.mrb[152].mxu1 %vm1993_vm0, %v4493_v58  ;;  %2877 = vmatmul.mubr.bf16.gmra.mrb[88].mxu0 %v4492_v63  ;;  %v4507_v63 = vld [vmem:[%s4675_s26 + $0x588] ss:$28 sps:$4 sm:$0xff]  }
 0x1bf   : > { %3831 = vmatprep.mubr.msk.bf16.mxu1 %vm1993_vm0, %v4496_v0  ;;  %2884 = vmatprep.mubr.bf16.mxu0 %v4494_v6  ;;  %v4511_v0 = vld [vmem:[%s4675_s26 + $0x478] ss:$28 sps:$4 sm:$0xff]   ;;  %v4509_v6 = vld [vmem:[%s4675_s26 + $0x5c4] ss:$28 sps:$4 sm:$0xff]  }
 0x1c1   : > { %v5166_v8 = vpop.f32.mrb[80].mxu1 }
 0x1c2   : > { %v2286_v11 = vpop.f32.mrb[81].mxu1 }
 0x1c3   : > { %v5169_v16 = vpop.f32.mrb[82].mxu1 }
 0x1c4   : > { %v2289_v22 = vpop.f32.mrb[83].mxu1 }
 0x1c5   : > { %v4512_v22 = vld [vmem:[%s4675_s26 + $0x5c0] ss:$28 sps:$4 sm:$0xff]  }
 0x1c6   : > { %3832 = vmatmul.mubr.msk.bf16.gmra.mrb[156].mxu1 %vm1993_vm0, %v4498_v15  ;;  %2885 = vmatmul.mubr.bf16.gmra.mrb[92].mxu0 %v4497_v17  ;;  %v4513_v17 = vld [vmem:[%s4675_s26 + $0x4b0] ss:$28 sps:$4 sm:$0xff]  }
 0x1c7   : > { %3835 = vmatprep.mubr.msk.bf16.mxu1 %vm1993_vm0, %v4501_v18  ;;  %2892 = vmatprep.mubr.bf16.mxu0 %v4499_v25  ;;  %v4516_v25 = vld [vmem:[%s4675_s26 + $0x4e8] ss:$28 sps:$4 sm:$0xff]  }
 0x1c9   : > { %v5176_v55 = vpop.f32.mrb[84].mxu1 }
 0x1ca   : > { %v2294_v27 = vpop.f32.mrb[85].mxu1 }
 0x1cb   : > { %v5179_v30 = vpop.f32.mrb[86].mxu1 }
 0x1cc   : > { %v2297_v42 = vpop.f32.mrb[87].mxu1 }
 0x1ce   : > { %3836 = vmatmul.mubr.msk.bf16.gmra.mrb[160].mxu1 %vm1993_vm0, %v4503_v29  ;;  %2893 = vmatmul.mubr.bf16.gmra.mrb[96].mxu0 %v4502_v36  ;;  %v4514_v29 = vld [vmem:[%s4675_s26 + $0x5fc] ss:$28 sps:$4 sm:$0xff]   ;;  %v5207_v36 = vld [vmem:[%s5696_s2] ss:$0 sm:$0xff] }
 0x1cf   : > { %3839 = vmatprep.mubr.msk.bf16.mxu1 %vm1993_vm0, %v4506_v37  ;;  %2900 = vmatprep.mubr.bf16.mxu0 %v4504_v45  ;;  %v2125_v37 = vadd.f32 %v5207_v36, %v4975_v32  ;;  %v4518_v45 = vld [vmem:[%s4675_s26 + $0x520] ss:$28 sps:$4 sm:$0xff]   ;;  %v2133_v32 = vadd.f32 %v5207_v36, %v4983_v40  ;;  %v2141_v40 = vadd.f32 %v5207_v36, %v4991_v48 }
 0x1d0   : > { %v2149_v48 = vadd.f32 %v5207_v36, %v4999_v57  ;;  %v2157_v57 = vadd.f32 %v5207_v36, %v5007_v2 }
 0x1d1   : > { %v5186_v47 = vpop.f32.mrb[88].mxu1 }
 0x1d2   : > { %v2302_v49 = vpop.f32.mrb[89].mxu1 }
 0x1d3   : > { %v5189_v58 = vpop.f32.mrb[90].mxu1  ;;  %v2128_v49 = vadd.f32 %v5207_v36, %v4978_v35 }
 0x1d4   : > { %v2305_v4 = vpop.f32.mrb[91].mxu1 }
 0x1d5   : > { %v4521_v4 = vld [vmem:[%s4675_s26 + $0x558] ss:$28 sps:$4 sm:$0xff]  }
 0x1d6   : > { %3840 = vmatmul.mubr.msk.bf16.gmra.mrb[164].mxu1 %vm1993_vm0, %v4508_v53  ;;  %2901 = vmatmul.mubr.bf16.gmra.mrb[100].mxu0 %v4507_v63 }
 0x1d7   : > { %3843 = vmatprep.mubr.msk.bf16.mxu1 %vm1993_vm0, %v4511_v0  ;;  %2908 = vmatprep.mubr.bf16.mxu0 %v4509_v6  ;;  %v4517_v0 = vld [vmem:[%s4675_s26 + $0x5f8] ss:$28 sps:$4 sm:$0xff]  }
 0x1d9   : > { %v5196_v11 = vpop.f32.mrb[92].mxu1 }
 0x1da   : > { %v2310_v15 = vpop.f32.mrb[93].mxu1 }
 0x1db   : > { %v5199_v18 = vpop.f32.mrb[94].mxu1  ;;  %v4519_v15 = vld [vmem:[%s4675_s26 + $0x634] ss:$28 sps:$4 sm:$0xff]  }
 0x1dc   : > { %v2313_v27 = vpop.f32.mrb[95].mxu1 }
 0x1dd   : > { %v2136_v27 = vadd.f32 %v5207_v36, %v4986_v43 }
 0x1de   : > { %3844 = vmatmul.mubr.msk.bf16.gmra.mrb[168].mxu1 %vm1993_vm0, %v4513_v17  ;;  %2909 = vmatmul.mubr.bf16.gmra.mrb[104].mxu0 %v4512_v22 }
 0x1df   : > { %3847 = vmatprep.mubr.msk.bf16.mxu1 %vm1993_vm0, %v4516_v25  ;;  %2916 = vmatprep.mubr.bf16.mxu0 %v4514_v29  ;;  %v4523_v25 = vld [vmem:[%s4675_s26 + $0x590] ss:$28 sps:$4 sm:$0xff]  }
 0x1e1   : > { %v2702_v42 = vpop.f32.mrb[0].mxu0 }
 0x1e2   : > { %v5216_v53 = vadd.f32 %v2702_v42, %v2125_v37  ;;  %v2704_v63 = vpop.f32.mrb[1].mxu0  ;;  %v4522_v42 = vld [vmem:[%s4675_s26 + $0x630] ss:$28 sps:$4 sm:$0xff]  }
 0x1e3   : > { %v2705_v6 = vpop.f32.mrb[2].mxu0  ;;  %v4524_v63 = vld [vmem:[%s4675_s26 + $0x66c] ss:$28 sps:$4 sm:$0xff]  }
 0x1e4   : > { %v5221_v17 = vadd.f32 %v2705_v6, %v2128_v49  ;;  %v2707_v22 = vpop.f32.mrb[3].mxu0  ;;  %v4526_v49 = vld [vmem:[%s4675_s26 + $0x5c8] ss:$28 sps:$4 sm:$0xff]   ;;  %v4528_v6 = vld [vmem:[%s4675_s26 + $0x600] ss:$28 sps:$4 sm:$0xff]  }
 0x1e6   : > { %3848 = vmatmul.mubr.msk.bf16.gmra.mrb[172].mxu1 %vm1993_vm0, %v4518_v45  ;;  %2917 = vmatmul.mubr.bf16.gmra.mrb[108].mxu0 %v4517_v0 }
 0x1e7   : > { %3851 = vmatprep.mubr.msk.bf16.mxu1 %vm1993_vm0, %v4521_v4  ;;  %2924 = vmatprep.mubr.bf16.mxu0 %v4519_v15  ;;  %v2144_v15 = vadd.f32 %v5207_v36, %v4994_v51 }
 0x1e9   : > { %v2710_v35 = vpop.f32.mrb[4].mxu0 }
 0x1ea   : > { %v5230_v29 = vadd.f32 %v2710_v35, %v2133_v32  ;;  %v2712_v37 = vpop.f32.mrb[5].mxu0  ;;  %v4527_v35 = vld [vmem:[%s4675_s26 + $0x668] ss:$28 sps:$4 sm:$0xff]  }
 0x1eb   : > { %v2713_v45 = vpop.f32.mrb[6].mxu0  ;;  %v4529_v37 = vld [vmem:[%s4675_s26 + $0x6a4] ss:$28 sps:$4 sm:$0xff]  }
 0x1ec   : > { %v5235_v0 = vadd.f32 %v2713_v45, %v2136_v27  ;;  %v2715_v4 = vpop.f32.mrb[7].mxu0  ;;  %v4531_v27 = vld [vmem:[%s4675_s26 + $0x638] ss:$28 sps:$4 sm:$0xff]   ;;  %v4533_v45 = vld [vmem:[%s4675_s26 + $0x670] ss:$28 sps:$4 sm:$0xff]  }
 0x1ee   : > { %3852 = vmatmul.mubr.msk.bf16.gmra.mrb[176].mxu1 %vm1993_vm0, %v4523_v25  ;;  %2925 = vmatmul.mubr.bf16.gmra.mrb[112].mxu0 %v4522_v42 }
 0x1ef   : > { %3855 = vmatprep.mubr.msk.bf16.mxu1 %vm1993_vm0, %v4526_v49  ;;  %2932 = vmatprep.mubr.bf16.mxu0 %v4524_v63  ;;  %v2152_v63 = vadd.f32 %v5207_v36, %v5002_v60 }
 0x1f1   : > { %v2718_v43 = vpop.f32.mrb[8].mxu0 }
 0x1f2   : > { %v5244_v22 = vadd.f32 %v2718_v43, %v2141_v40  ;;  %v2720_v32 = vpop.f32.mrb[9].mxu0  ;;  %v4532_v43 = vld [vmem:[%s4675_s26 + $0x6a0] ss:$28 sps:$4 sm:$0xff]  }
 0x1f3   : > { %v2721_v25 = vpop.f32.mrb[10].mxu0  ;;  %v4534_v32 = vld [vmem:[%s4675_s26 + $0x6dc] ss:$28 sps:$4 sm:$0xff]  }
 0x1f4   : > { %v5249_v42 = vadd.f32 %v2721_v25, %v2144_v15  ;;  %v2723_v49 = vpop.f32.mrb[11].mxu0  ;;  %v4536_v15 = vld [vmem:[%s4675_s26 + $0x6a8] ss:$28 sps:$4 sm:$0xff]   ;;  %v4538_v25 = vld [vmem:[%s4675_s26 + $0x6e0] ss:$28 sps:$4 sm:$0xff]  }
 0x1f6   : > { %3856 = vmatmul.mubr.msk.bf16.gmra.mrb[180].mxu1 %vm1993_vm0, %v4528_v6  ;;  %2933 = vmatmul.mubr.bf16.gmra.mrb[116].mxu0 %v4527_v35 }
 0x1f7   : > { %3859 = vmatprep.mubr.msk.bf16.mxu1 %vm1993_vm0, %v4531_v27  ;;  %2940 = vmatprep.mubr.bf16.mxu0 %v4529_v37  ;;  %v2160_v37 = vadd.f32 %v5207_v36, %v5010_v5 }
 0x1f9   : > { %v2726_v51 = vpop.f32.mrb[12].mxu0 }
 0x1fa   : > { %v5258_v4 = vadd.f32 %v2726_v51, %v2149_v48  ;;  %v2728_v40 = vpop.f32.mrb[13].mxu0  ;;  %v4537_v51 = vld [vmem:[%s4675_s26 + $0x6d8] ss:$28 sps:$4 sm:$0xff]   ;;  %s3439_s26 = sshll.u32 %s5727_s7, 3 }
 0x1fb   : > { %v2729_v6 = vpop.f32.mrb[14].mxu0  ;;  %s5409_s6 = scalar_lea.vmem %s5697_s3, %s3439_s26 }
 0x1fc   : > { %v5263_v35 = vadd.f32 %v2729_v6, %v2152_v63  ;;  %v2731_v27 = vpop.f32.mrb[15].mxu0 }
 0x1fe   : > { %3860 = vmatmul.mubr.msk.bf16.gmra.mrb[184].mxu1 %vm1993_vm0, %v4533_v45  ;;  %2941 = vmatmul.mubr.bf16.gmra.mrb[120].mxu0 %v4532_v43  ;;  %v2165_v43 = vadd.f32 %v5207_v36, %v5015_v10 }
 0x1ff   : > { %3863 = vmatprep.mubr.msk.bf16.mxu1 %vm1993_vm0, %v4536_v15  ;;  %2948 = vmatprep.mubr.bf16.mxu0 %v4534_v32  ;;  %v2168_v15 = vadd.f32 %v5207_v36, %v5018_v13 }
 0x201   : > { %v2734_v60 = vpop.f32.mrb[16].mxu0 }
 0x202   : > { %v5272_v49 = vadd.f32 %v2734_v60, %v2157_v57  ;;  %v2736_v48 = vpop.f32.mrb[17].mxu0  ;;  %v2173_v60 = vadd.f32 %v5207_v36, %v5030_v20 }
 0x203   : > { %v2737_v63 = vpop.f32.mrb[18].mxu0 }
 0x204   : > { %v5275_v40 = vadd.f32 %v2737_v63, %v2160_v37  ;;  %v2739_v45 = vpop.f32.mrb[19].mxu0 }
 0x205   : > { %v2181_v45 = vadd.f32 %v5207_v36, %v5041_v1  ;;  %v2192_v1 = vadd.f32 %v5207_v36, %v5058_v44  ;;  %v2200_v44 = vadd.f32 %v5207_v36, %v5066_v54  ;;  %v2208_v54 = vadd.f32 %v5207_v36, %v5074_v3 }
 0x206   : > { %3864 = vmatmul.mubr.msk.bf16.gmra.mrb[188].mxu1 %vm1993_vm0, %v4538_v25  ;;  %2949 = vmatmul.mubr.bf16.gmra.mrb[124].mxu0 %v4537_v51  ;;  %v2176_v25 = vadd.f32 %v5207_v36, %v5033_v23  ;;  %v2216_v3 = vadd.f32 %v5207_v36, %v5082_v14  ;;  %v2224_v14 = vadd.f32 %v5207_v36, %v5090_v24 }
 0x207   : > { %v2232_v24 = vadd.f32 %v5207_v36, %v5099_v33  ;;  %v2240_v33 = vadd.f32 %v5207_v36, %v5109_v46  ;;  %v2248_v46 = vadd.f32 %v5207_v36, %v5119_v61  ;;  %v2256_v61 = vadd.f32 %v5207_v36, %v5129_v12 }
 0x209   : > { %v2742_v2 = vpop.f32.mrb[20].mxu0 }
 0x20a   : > { %v5282_v6 = vadd.f32 %v2742_v2, %v2165_v43  ;;  %v2744_v5 = vpop.f32.mrb[21].mxu0  ;;  %v2184_v2 = vadd.f32 %v5207_v36, %v5047_v31 }
 0x20b   : > { %v2745_v32 = vpop.f32.mrb[22].mxu0 }
 0x20c   : > { %v5284_v27 = vadd.f32 %v2745_v32, %v2168_v15  ;;  %v2747_v57 = vpop.f32.mrb[23].mxu0 }
 0x20d   : > { %v2189_v57 = vadd.f32 %v5207_v36, %v5055_v39  ;;  %v2197_v39 = vadd.f32 %v5207_v36, %v5063_v50  ;;  %v2205_v50 = vadd.f32 %v5207_v36, %v5071_v62  ;;  %v2213_v62 = vadd.f32 %v5207_v36, %v5079_v9 }
 0x20e   : > { %v2221_v9 = vadd.f32 %v5207_v36, %v5087_v19  ;;  %v2229_v19 = vadd.f32 %v5207_v36, %v5096_v28  ;;  %v2237_v28 = vadd.f32 %v5207_v36, %v5106_v41  ;;  %v2245_v41 = vadd.f32 %v5207_v36, %v5116_v56 }
 0x20f   : > { %v2253_v56 = vadd.f32 %v5207_v36, %v5126_v7 }
 0x211   : > { %v2750_v37 = vpop.f32.mrb[24].mxu0 }
 0x212   : > { %v5290_v48 = vadd.f32 %v2750_v37, %v2173_v60  ;;  %v2752_v10 = vpop.f32.mrb[25].mxu0 }
 0x213   : > { %v2753_v51 = vpop.f32.mrb[26].mxu0 }
 0x214   : > { %v5292_v63 = vadd.f32 %v2753_v51, %v2176_v25  ;;  %v2755_v13 = vpop.f32.mrb[27].mxu0 }
 0x219   : > { %v2758_v43 = vpop.f32.mrb[28].mxu0 }
 0x21a   : > { %v5298_v15 = vadd.f32 %v2758_v43, %v2181_v45  ;;  %v2760_v20 = vpop.f32.mrb[29].mxu0 }
 0x21b   : > { %v2761_v5 = vpop.f32.mrb[30].mxu0 }
 0x21c   : > { %v5300_v32 = vadd.f32 %v2761_v5, %v2184_v2  ;;  %v2763_v23 = vpop.f32.mrb[31].mxu0 }
 0x221   : > { %v5304_v60 = vpop.f32.mrb[96].mxu1  ;;  %v2766_v37 = vpop.f32.mrb[32].mxu0 }
 0x222   : > { %v2607_v25 = vpop.f32.mrb[97].mxu1  ;;  %v5308_v10 = vadd.f32 %v2766_v37, %v2189_v57  ;;  %v2768_v31 = vpop.f32.mrb[33].mxu0 }
 0x223   : > { %v5310_v51 = vpop.f32.mrb[98].mxu1  ;;  %v2769_v13 = vpop.f32.mrb[34].mxu0 }
 0x224   : > { %5698 = vst [vmem:[#allocation2_spill] sm:$0xff] %v5310_v51  ;;  %v2610_v45 = vpop.f32.mrb[99].mxu1  ;;  %v5312_v43 = vadd.f32 %v2769_v13, %v2192_v1  ;;  %v2771_v2 = vpop.f32.mrb[35].mxu0 }
 0x229   : > { %v5316_v20 = vpop.f32.mrb[100].mxu1  ;;  %v2774_v5 = vpop.f32.mrb[36].mxu0 }
 0x22a   : > { %5699 = vst [vmem:[#allocation3_spill] sm:$0xff] %v5316_v20  ;;  %v2615_v23 = vpop.f32.mrb[101].mxu1  ;;  %v5320_v57 = vadd.f32 %v2774_v5, %v2197_v39  ;;  %v2776_v37 = vpop.f32.mrb[37].mxu0 }
 0x22b   : > { %v5322_v25 = vpop.f32.mrb[102].mxu1  ;;  %v2777_v31 = vpop.f32.mrb[38].mxu0 }
 0x22c   : > { %5700 = vst [vmem:[#allocation4_spill] sm:$0xff] %v5322_v25  ;;  %v2618_v45 = vpop.f32.mrb[103].mxu1  ;;  %v5324_v1 = vadd.f32 %v2777_v31, %v2200_v44  ;;  %v2779_v13 = vpop.f32.mrb[39].mxu0 }
 0x231   : > { %v5328_v2 = vpop.f32.mrb[104].mxu1  ;;  %v2782_v20 = vpop.f32.mrb[40].mxu0 }
 0x232   : > { %5701 = vst [vmem:[#allocation5_spill] sm:$0xff] %v5328_v2  ;;  %v2623_v23 = vpop.f32.mrb[105].mxu1  ;;  %v5332_v39 = vadd.f32 %v2782_v20, %v2205_v50  ;;  %v2784_v5 = vpop.f32.mrb[41].mxu0 }
 0x233   : > { %v5334_v37 = vpop.f32.mrb[106].mxu1  ;;  %v2785_v25 = vpop.f32.mrb[42].mxu0 }
 0x234   : > { %5702 = vst [vmem:[#allocation6_spill] sm:$0xff] %v5334_v37  ;;  %v2626_v45 = vpop.f32.mrb[107].mxu1  ;;  %v5336_v44 = vadd.f32 %v2785_v25, %v2208_v54  ;;  %v2787_v31 = vpop.f32.mrb[43].mxu0 }
 0x239   : > { %v5340_v13 = vpop.f32.mrb[108].mxu1  ;;  %v2790_v2 = vpop.f32.mrb[44].mxu0 }
 0x23a   : > { %5703 = vst [vmem:[#allocation7_spill] sm:$0xff] %v5340_v13  ;;  %v2631_v23 = vpop.f32.mrb[109].mxu1  ;;  %v5344_v20 = vadd.f32 %v2790_v2, %v2213_v62  ;;  %v2792_v50 = vpop.f32.mrb[45].mxu0 }
 0x23b   : > { %v5346_v5 = vpop.f32.mrb[110].mxu1  ;;  %v2793_v37 = vpop.f32.mrb[46].mxu0 }
 0x23c   : > { %5704 = vst [vmem:[#allocation8_spill] sm:$0xff] %v5346_v5  ;;  %v2634_v45 = vpop.f32.mrb[111].mxu1  ;;  %v5348_v25 = vadd.f32 %v2793_v37, %v2216_v3  ;;  %v2795_v54 = vpop.f32.mrb[47].mxu0 }
 0x241   : > { %v5352_v31 = vpop.f32.mrb[112].mxu1  ;;  %v2798_v13 = vpop.f32.mrb[48].mxu0 }
 0x242   : > { %5705 = vst [vmem:[#allocation9_spill] sm:$0xff] %v5352_v31  ;;  %v2639_v23 = vpop.f32.mrb[113].mxu1  ;;  %v5356_v2 = vadd.f32 %v2798_v13, %v2221_v9  ;;  %v2800_v62 = vpop.f32.mrb[49].mxu0 }
 0x243   : > { %v5358_v50 = vpop.f32.mrb[114].mxu1  ;;  %v2801_v5 = vpop.f32.mrb[50].mxu0 }
 0x244   : > { %5706 = vst [vmem:[#allocation10_spill] sm:$0xff] %v5358_v50  ;;  %v2642_v45 = vpop.f32.mrb[115].mxu1  ;;  %v5360_v37 = vadd.f32 %v2801_v5, %v2224_v14  ;;  %v2803_v3 = vpop.f32.mrb[51].mxu0 }
 0x249   : > { %v5364_v54 = vpop.f32.mrb[116].mxu1  ;;  %v2806_v31 = vpop.f32.mrb[52].mxu0 }
 0x24a   : > { %5707 = vst [vmem:[#allocation11_spill] sm:$0xff] %v5364_v54  ;;  %v2647_v23 = vpop.f32.mrb[117].mxu1  ;;  %v5368_v13 = vadd.f32 %v2806_v31, %v2229_v19  ;;  %v2808_v9 = vpop.f32.mrb[53].mxu0 }
 0x24b   : > { %v5370_v62 = vpop.f32.mrb[118].mxu1  ;;  %v2809_v50 = vpop.f32.mrb[54].mxu0 }
 0x24c   : > { %5708 = vst [vmem:[#allocation12_spill] sm:$0xff] %v5370_v62  ;;  %v2650_v45 = vpop.f32.mrb[119].mxu1  ;;  %v5372_v5 = vadd.f32 %v2809_v50, %v2232_v24  ;;  %v2811_v14 = vpop.f32.mrb[55].mxu0 }
 0x251   : > { %v5376_v3 = vpop.f32.mrb[120].mxu1  ;;  %v2814_v54 = vpop.f32.mrb[56].mxu0 }
 0x252   : > { %5709 = vst [vmem:[#allocation13_spill] sm:$0xff] %v5376_v3  ;;  %v2655_v23 = vpop.f32.mrb[121].mxu1  ;;  %v5380_v31 = vadd.f32 %v2814_v54, %v2237_v28  ;;  %v2816_v19 = vpop.f32.mrb[57].mxu0 }
 0x253   : > { %v5382_v9 = vpop.f32.mrb[122].mxu1  ;;  %v2817_v62 = vpop.f32.mrb[58].mxu0 }
 0x254   : > { %5710 = vst [vmem:[#allocation14_spill] sm:$0xff] %v5382_v9  ;;  %v2658_v50 = vpop.f32.mrb[123].mxu1  ;;  %v5384_v24 = vadd.f32 %v2817_v62, %v2240_v33  ;;  %v2819_v45 = vpop.f32.mrb[59].mxu0 }
 0x259   : > { %v5388_v14 = vpop.f32.mrb[124].mxu1  ;;  %v2822_v23 = vpop.f32.mrb[60].mxu0 }
 0x25a   : > { %5711 = vst [vmem:[#allocation15_spill] sm:$0xff] %v5388_v14  ;;  %v2663_v3 = vpop.f32.mrb[125].mxu1  ;;  %v5392_v54 = vadd.f32 %v2822_v23, %v2245_v41  ;;  %v2824_v28 = vpop.f32.mrb[61].mxu0 }
 0x25b   : > { %v5394_v19 = vpop.f32.mrb[126].mxu1  ;;  %v2825_v9 = vpop.f32.mrb[62].mxu0 }
 0x25c   : > { %v2666_v50 = vpop.f32.mrb[127].mxu1  ;;  %v5396_v62 = vadd.f32 %v2825_v9, %v2248_v46  ;;  %v2827_v33 = vpop.f32.mrb[63].mxu0 }
 0x261   : > { %v3805_v45 = vpop.f32.mrb[128].mxu1  ;;  %v2830_v14 = vpop.f32.mrb[64].mxu0 }
 0x262   : > { %v3000_v3 = vadd.f32 %v5230_v29, %v3805_v45  ;;  %v2991_v51 = vpop.f32.mrb[129].mxu1  ;;  %v5404_v41 = vadd.f32 %v2830_v14, %v2253_v56  ;;  %v2832_v7 = vpop.f32.mrb[65].mxu0 }
 0x263   : > { %v2992_v9 = vadd.f32 %v5216_v53, %v2991_v51  ;;  %v3806_v29 = vpop.f32.mrb[130].mxu1  ;;  %v2833_v46 = vpop.f32.mrb[66].mxu0  ;;  %v2261_v53 = vadd.f32 %v5207_v36, %v5136_v21 }
 0x264   : > { %v3248_v23 = vmax.f32 %v3000_v3, 0.0  ;;  %v3003_v12 = vadd.f32 %v5235_v0, %v3806_v29  ;;  %v2994_v14 = vpop.f32.mrb[131].mxu1  ;;  %v5413_v50 = vadd.f32 %v2833_v46, %v2256_v61  ;;  %v2835_v33 = vpop.f32.mrb[67].mxu0 }
 0x265   : > { %v3246_v28 = vmax.f32 %v2992_v9, 0.0  ;;  %v2995_v56 = vadd.f32 %v5221_v17, %v2994_v14  ;;  %v2264_v17 = vadd.f32 %v5207_v36, %v5139_v26 }
 0x266   : > { %3313 = vst.msk [vmem:[%s5409_s6 + $0x10] sm:$0xff] %vm3310_vm1, %v3248_v23  ;;  %v3249_v45 = vmax.f32 %v3003_v12, 0.0 }
 0x267   : > { %3311 = vst.msk [vmem:[%s5409_s6] sm:$0xff] %vm3310_vm1, %v3246_v28  ;;  %v3247_v7 = vmax.f32 %v2995_v56, 0.0 }
 0x268   : > { %3314 = vst.msk [vmem:[%s5409_s6 + $0x18] sm:$0xff] %vm3310_vm1, %v3249_v45 }
 0x269   : > { %3312 = vst.msk [vmem:[%s5409_s6 + $0x8] sm:$0xff] %vm3310_vm1, %v3247_v7  ;;  %v3809_v0 = vpop.f32.mrb[132].mxu1  ;;  %v2838_v51 = vpop.f32.mrb[68].mxu0 }
 0x26a   : > { %v3016_v3 = vadd.f32 %v5258_v4, %v3809_v0  ;;  %v3007_v61 = vpop.f32.mrb[133].mxu1  ;;  %v5429_v9 = vadd.f32 %v2838_v51, %v2261_v53  ;;  %v2840_v29 = vpop.f32.mrb[69].mxu0 }
 0x26b   : > { %v3008_v23 = vadd.f32 %v5244_v22, %v3007_v61  ;;  %v3810_v21 = vpop.f32.mrb[134].mxu1  ;;  %v2841_v12 = vpop.f32.mrb[70].mxu0  ;;  %v2269_v22 = vadd.f32 %v5207_v36, %v5146_v34 }
 0x26c   : > { %v3252_v46 = vmax.f32 %v3016_v3, 0.0  ;;  %v3019_v14 = vadd.f32 %v5263_v35, %v3810_v21  ;;  %v3010_v28 = vpop.f32.mrb[135].mxu1  ;;  %v5433_v4 = vadd.f32 %v2841_v12, %v2264_v17  ;;  %v2843_v56 = vpop.f32.mrb[71].mxu0 }
 0x26d   : > { %v3250_v33 = vmax.f32 %v3008_v23, 0.0  ;;  %v3011_v45 = vadd.f32 %v5249_v42, %v3010_v28  ;;  %v2272_v42 = vadd.f32 %v5207_v36, %v5149_v38 }
 0x26e   : > { %3317 = vst.msk [vmem:[%s5409_s6 + $0x30] sm:$0xff] %vm3310_vm1, %v3252_v46  ;;  %v3253_v26 = vmax.f32 %v3019_v14, 0.0 }
 0x26f   : > { %3315 = vst.msk [vmem:[%s5409_s6 + $0x20] sm:$0xff] %vm3310_vm1, %v3250_v33  ;;  %v3251_v7 = vmax.f32 %v3011_v45, 0.0 }
 0x270   : > { %3318 = vst.msk [vmem:[%s5409_s6 + $0x38] sm:$0xff] %vm3310_vm1, %v3253_v26 }
 0x271   : > { %3316 = vst.msk [vmem:[%s5409_s6 + $0x28] sm:$0xff] %vm3310_vm1, %v3251_v7  ;;  %v3813_v35 = vpop.f32.mrb[136].mxu1  ;;  %v2846_v53 = vpop.f32.mrb[72].mxu0 }
 0x272   : > { %v3032_v0 = vadd.f32 %v5282_v6, %v3813_v35  ;;  %v3023_v51 = vpop.f32.mrb[137].mxu1  ;;  %v5449_v3 = vadd.f32 %v2846_v53, %v2269_v22  ;;  %v2848_v61 = vpop.f32.mrb[73].mxu0 }
 0x273   : > { %v3024_v17 = vadd.f32 %v5272_v49, %v3023_v51  ;;  %v3814_v34 = vpop.f32.mrb[138].mxu1  ;;  %v2849_v23 = vpop.f32.mrb[74].mxu0  ;;  %v2277_v49 = vadd.f32 %v5207_v36, %v5156_v52 }
 0x274   : > { %v3256_v29 = vmax.f32 %v3032_v0, 0.0  ;;  %v3035_v21 = vadd.f32 %v5284_v27, %v3814_v34  ;;  %v3026_v46 = vpop.f32.mrb[139].mxu1  ;;  %v5453_v6 = vadd.f32 %v2849_v23, %v2272_v42  ;;  %v2851_v14 = vpop.f32.mrb[75].mxu0 }
 0x275   : > { %v3254_v12 = vmax.f32 %v3024_v17, 0.0  ;;  %v3027_v28 = vadd.f32 %v5275_v40, %v3026_v46  ;;  %v2280_v40 = vadd.f32 %v5207_v36, %v5159_v59 }
 0x276   : > { %3321 = vst.msk [vmem:[%s5409_s6 + $0x50] sm:$0xff] %vm3310_vm1, %v3256_v29  ;;  %v3257_v38 = vmax.f32 %v3035_v21, 0.0 }
 0x277   : > { %3319 = vst.msk [vmem:[%s5409_s6 + $0x40] sm:$0xff] %vm3310_vm1, %v3254_v12  ;;  %v3255_v33 = vmax.f32 %v3027_v28, 0.0 }
 0x278   : > { %3322 = vst.msk [vmem:[%s5409_s6 + $0x58] sm:$0xff] %vm3310_vm1, %v3257_v38 }
 0x279   : > { %3320 = vst.msk [vmem:[%s5409_s6 + $0x48] sm:$0xff] %vm3310_vm1, %v3255_v33  ;;  %v3817_v27 = vpop.f32.mrb[140].mxu1  ;;  %v2854_v56 = vpop.f32.mrb[76].mxu0 }
 0x27a   : > { %v3048_v45 = vadd.f32 %v5298_v15, %v3817_v27  ;;  %v3039_v26 = vpop.f32.mrb[141].mxu1  ;;  %v5469_v7 = vadd.f32 %v2854_v56, %v2277_v49  ;;  %v2856_v22 = vpop.f32.mrb[77].mxu0 }
 0x27b   : > { %v3040_v35 = vadd.f32 %v5290_v48, %v3039_v26  ;;  %v3818_v52 = vpop.f32.mrb[142].mxu1  ;;  %v2857_v0 = vpop.f32.mrb[78].mxu0  ;;  %v2285_v48 = vadd.f32 %v5207_v36, %v5166_v8 }
 0x27c   : > { %v3260_v53 = vmax.f32 %v3048_v45, 0.0  ;;  %v3051_v51 = vadd.f32 %v5300_v32, %v3818_v52  ;;  %v3042_v42 = vpop.f32.mrb[143].mxu1  ;;  %v5473_v15 = vadd.f32 %v2857_v0, %v2280_v40  ;;  %v2859_v17 = vpop.f32.mrb[79].mxu0 }
 0x27d   : > { %v3258_v61 = vmax.f32 %v3040_v35, 0.0  ;;  %v3043_v34 = vadd.f32 %v5292_v63, %v3042_v42  ;;  %v2288_v63 = vadd.f32 %v5207_v36, %v5169_v16 }
 0x27e   : > { %3325 = vst.msk [vmem:[%s5409_s6 + $0x70] sm:$0xff] %vm3310_vm1, %v3260_v53  ;;  %v3261_v59 = vmax.f32 %v3051_v51, 0.0 }
 0x27f   : > { %3323 = vst.msk [vmem:[%s5409_s6 + $0x60] sm:$0xff] %vm3310_vm1, %v3258_v61  ;;  %v3259_v29 = vmax.f32 %v3043_v34, 0.0 }
 0x280   : > { %3326 = vst.msk [vmem:[%s5409_s6 + $0x78] sm:$0xff] %vm3310_vm1, %v3261_v59 }
 0x281   : > { %3324 = vst.msk [vmem:[%s5409_s6 + $0x68] sm:$0xff] %vm3310_vm1, %v3259_v29  ;;  %v3821_v32 = vpop.f32.mrb[144].mxu1  ;;  %v2862_v23 = vpop.f32.mrb[80].mxu0 }
 0x282   : > { %v3064_v21 = vadd.f32 %v5320_v57, %v3821_v32  ;;  %v3055_v46 = vpop.f32.mrb[145].mxu1  ;;  %v5489_v12 = vadd.f32 %v2862_v23, %v2285_v48  ;;  %v2864_v14 = vpop.f32.mrb[81].mxu0 }
 0x283   : > { %v3056_v28 = vadd.f32 %v5308_v10, %v3055_v46  ;;  %v3822_v8 = vpop.f32.mrb[146].mxu1  ;;  %v2865_v33 = vpop.f32.mrb[82].mxu0  ;;  %v2293_v10 = vadd.f32 %v5207_v36, %v5176_v55 }
 0x284   : > { %v3264_v38 = vmax.f32 %v3064_v21, 0.0  ;;  %v3067_v49 = vadd.f32 %v5324_v1, %v3822_v8  ;;  %v3058_v27 = vpop.f32.mrb[147].mxu1  ;;  %v5493_v57 = vadd.f32 %v2865_v33, %v2288_v63  ;;  %v2867_v45 = vpop.f32.mrb[83].mxu0 }
 0x285   : > { %v3262_v56 = vmax.f32 %v3056_v28, 0.0  ;;  %v3059_v26 = vadd.f32 %v5312_v43, %v3058_v27  ;;  %v2296_v43 = vadd.f32 %v5207_v36, %v5179_v30 }
 0x286   : > { %3329 = vst.msk [vmem:[%s5409_s6 + $0x90] sm:$0xff] %vm3310_vm1, %v3264_v38  ;;  %v3265_v16 = vmax.f32 %v3067_v49, 0.0 }
 0x287   : > { %3327 = vst.msk [vmem:[%s5409_s6 + $0x80] sm:$0xff] %vm3310_vm1, %v3262_v56  ;;  %v3263_v40 = vmax.f32 %v3059_v26, 0.0 }
 0x288   : > { %3330 = vst.msk [vmem:[%s5409_s6 + $0x98] sm:$0xff] %vm3310_vm1, %v3265_v16 }
 0x289   : > { %3328 = vst.msk [vmem:[%s5409_s6 + $0x88] sm:$0xff] %vm3310_vm1, %v3263_v40  ;;  %v3825_v1 = vpop.f32.mrb[148].mxu1  ;;  %v2870_v22 = vpop.f32.mrb[84].mxu0 }
 0x28a   : > { %v3080_v35 = vadd.f32 %v5344_v20, %v3825_v1  ;;  %v3071_v52 = vpop.f32.mrb[149].mxu1  ;;  %v5509_v53 = vadd.f32 %v2870_v22, %v2293_v10  ;;  %v2872_v0 = vpop.f32.mrb[85].mxu0 }
 0x28b   : > { %v3072_v51 = vadd.f32 %v5332_v39, %v3071_v52  ;;  %v3826_v55 = vpop.f32.mrb[150].mxu1  ;;  %v2873_v61 = vpop.f32.mrb[86].mxu0  ;;  %v2301_v39 = vadd.f32 %v5207_v36, %v5186_v47 }
 0x28c   : > { %v3268_v42 = vmax.f32 %v3080_v35, 0.0  ;;  %v3083_v17 = vadd.f32 %v5348_v25, %v3826_v55  ;;  %v3074_v34 = vpop.f32.mrb[151].mxu1  ;;  %v5513_v20 = vadd.f32 %v2873_v61, %v2296_v43  ;;  %v2875_v29 = vpop.f32.mrb[87].mxu0 }
 0x28d   : > { %v3266_v59 = vmax.f32 %v3072_v51, 0.0  ;;  %v3075_v48 = vadd.f32 %v5336_v44, %v3074_v34  ;;  %v2304_v44 = vadd.f32 %v5207_v36, %v5189_v58 }
 0x28e   : > { %3333 = vst.msk [vmem:[%s5409_s6 + $0xb0] sm:$0xff] %vm3310_vm1, %v3268_v42  ;;  %v3269_v30 = vmax.f32 %v3083_v17, 0.0 }
 0x28f   : > { %3331 = vst.msk [vmem:[%s5409_s6 + $0xa0] sm:$0xff] %vm3310_vm1, %v3266_v59  ;;  %v3267_v32 = vmax.f32 %v3075_v48, 0.0 }
 0x290   : > { %3334 = vst.msk [vmem:[%s5409_s6 + $0xb8] sm:$0xff] %vm3310_vm1, %v3269_v30 }
 0x291   : > { %3332 = vst.msk [vmem:[%s5409_s6 + $0xa8] sm:$0xff] %vm3310_vm1, %v3267_v32  ;;  %v3829_v25 = vpop.f32.mrb[152].mxu1  ;;  %v2878_v23 = vpop.f32.mrb[88].mxu0 }
 0x292   : > { %v3096_v21 = vadd.f32 %v5368_v13, %v3829_v25  ;;  %v3087_v46 = vpop.f32.mrb[153].mxu1  ;;  %v5529_v63 = vadd.f32 %v2878_v23, %v2301_v39  ;;  %v2880_v14 = vpop.f32.mrb[89].mxu0 }
 0x293   : > { %v3088_v28 = vadd.f32 %v5356_v2, %v3087_v46  ;;  %v3830_v47 = vpop.f32.mrb[154].mxu1  ;;  %v2881_v38 = vpop.f32.mrb[90].mxu0  ;;  %v2309_v2 = vadd.f32 %v5207_v36, %v5196_v11 }
 0x294   : > { %v3272_v8 = vmax.f32 %v3096_v21, 0.0  ;;  %v3099_v33 = vadd.f32 %v5372_v5, %v3830_v47  ;;  %v3090_v49 = vpop.f32.mrb[155].mxu1  ;;  %v5533_v13 = vadd.f32 %v2881_v38, %v2304_v44  ;;  %v2883_v56 = vpop.f32.mrb[91].mxu0 }
 0x295   : > { %v3270_v27 = vmax.f32 %v3088_v28, 0.0  ;;  %v3091_v45 = vadd.f32 %v5360_v37, %v3090_v49  ;;  %v2312_v37 = vadd.f32 %v5207_v36, %v5199_v18 }
 0x296   : > { %3337 = vst.msk [vmem:[%s5409_s6 + $0xd0] sm:$0xff] %vm3310_vm1, %v3272_v8  ;;  %v3273_v58 = vmax.f32 %v3099_v33, 0.0 }
 0x297   : > { %3335 = vst.msk [vmem:[%s5409_s6 + $0xc0] sm:$0xff] %vm3310_vm1, %v3270_v27  ;;  %v3271_v26 = vmax.f32 %v3091_v45, 0.0 }
 0x298   : > { %3338 = vst.msk [vmem:[%s5409_s6 + $0xd8] sm:$0xff] %vm3310_vm1, %v3273_v58 }
 0x299   : > { %3336 = vst.msk [vmem:[%s5409_s6 + $0xc8] sm:$0xff] %vm3310_vm1, %v3271_v26  ;;  %v3833_v5 = vpop.f32.mrb[156].mxu1  ;;  %v2886_v16 = vpop.f32.mrb[92].mxu0 }
 0x29a   : > { %v3112_v40 = vadd.f32 %v5392_v54, %v3833_v5  ;;  %v3103_v10 = vpop.f32.mrb[157].mxu1  ;;  %v5549_v1 = vadd.f32 %v2886_v16, %v2309_v2  ;;  %v2888_v22 = vpop.f32.mrb[93].mxu0 }
 0x29b   : > { %v3104_v35 = vadd.f32 %v5380_v31, %v3103_v10  ;;  %v3834_v11 = vpop.f32.mrb[158].mxu1  ;;  %v2889_v43 = vpop.f32.mrb[94].mxu0  ;;  %v3995_v31 = vadd.f32 %v5207_v36, %v5304_v60 }
 0x29c   : > { %v3276_v52 = vmax.f32 %v3112_v40, 0.0  ;;  %v3115_v0 = vadd.f32 %v5396_v62, %v3834_v11  ;;  %v3106_v51 = vpop.f32.mrb[159].mxu1  ;;  %v5553_v54 = vadd.f32 %v2889_v43, %v2312_v37  ;;  %v2891_v42 = vpop.f32.mrb[95].mxu0 }
 0x29d   : > { %v3274_v55 = vmax.f32 %v3104_v35, 0.0  ;;  %v3107_v61 = vadd.f32 %v5384_v24, %v3106_v51  ;;  %v5712_v24 = vld [vmem:[#allocation2_spill] sm:$0xff] }
 0x29e   : > { %3341 = vst.msk [vmem:[%s5409_s6 + $0xf0] sm:$0xff] %vm3310_vm1, %v3276_v52  ;;  %v3277_v18 = vmax.f32 %v3115_v0, 0.0  ;;  %v3997_v48 = vadd.f32 %v5207_v36, %v5712_v24 }
 0x29f   : > { %3339 = vst.msk [vmem:[%s5409_s6 + $0xe0] sm:$0xff] %vm3310_vm1, %v3274_v55  ;;  %v3275_v17 = vmax.f32 %v3107_v61, 0.0 }
 0x2a0   : > { %3342 = vst.msk [vmem:[%s5409_s6 + $0xf8] sm:$0xff] %vm3310_vm1, %v3277_v18 }
 0x2a1   : > { %3340 = vst.msk [vmem:[%s5409_s6 + $0xe8] sm:$0xff] %vm3310_vm1, %v3275_v17  ;;  %v3837_v62 = vpop.f32.mrb[160].mxu1  ;;  %v2894_v34 = vpop.f32.mrb[96].mxu0 }
 0x2a2   : > { %v3128_v59 = vadd.f32 %v5429_v9, %v3837_v62  ;;  %v3119_v29 = vpop.f32.mrb[161].mxu1  ;;  %v5569_v30 = vadd.f32 %v3995_v31, %v2894_v34  ;;  %v2896_v32 = vpop.f32.mrb[97].mxu0 }
 0x2a3   : > { %v3120_v39 = vadd.f32 %v5404_v41, %v3119_v29  ;;  %v3838_v60 = vpop.f32.mrb[162].mxu1  ;;  %v2897_v23 = vpop.f32.mrb[98].mxu0  ;;  %v5713_v41 = vld [vmem:[#allocation3_spill] sm:$0xff] }
 0x2a4   : > { %v3280_v25 = vmax.f32 %v3128_v59, 0.0  ;;  %v3131_v21 = vadd.f32 %v5433_v4, %v3838_v60  ;;  %v3122_v46 = vpop.f32.mrb[163].mxu1  ;;  %v5573_v9 = vadd.f32 %v3997_v48, %v2897_v23  ;;  %v2899_v14 = vpop.f32.mrb[99].mxu0  ;;  %v3999_v38 = vadd.f32 %v5207_v36, %v5713_v41 }
 0x2a5   : > { %v3278_v44 = vmax.f32 %v3120_v39, 0.0  ;;  %v3123_v28 = vadd.f32 %v5413_v50, %v3122_v46  ;;  %v5714_v50 = vld [vmem:[#allocation4_spill] sm:$0xff] }
 0x2a6   : > { %3345 = vst.msk [vmem:[%s5409_s6 + $0x110] sm:$0xff] %vm3310_vm1, %v3280_v25  ;;  %v3281_v47 = vmax.f32 %v3131_v21, 0.0  ;;  %v4001_v56 = vadd.f32 %v5207_v36, %v5714_v50 }
 0x2a7   : > { %3343 = vst.msk [vmem:[%s5409_s6 + $0x100] sm:$0xff] %vm3310_vm1, %v3278_v44  ;;  %v3279_v8 = vmax.f32 %v3123_v28, 0.0 }
 0x2a8   : > { %3346 = vst.msk [vmem:[%s5409_s6 + $0x118] sm:$0xff] %vm3310_vm1, %v3281_v47 }
 0x2a9   : > { %3344 = vst.msk [vmem:[%s5409_s6 + $0x108] sm:$0xff] %vm3310_vm1, %v3279_v8  ;;  %v3841_v4 = vpop.f32.mrb[164].mxu1  ;;  %v2902_v33 = vpop.f32.mrb[100].mxu0 }
 0x2aa   : > { %v3144_v49 = vadd.f32 %v5469_v7, %v3841_v4  ;;  %v3135_v27 = vpop.f32.mrb[165].mxu1  ;;  %v5589_v45 = vadd.f32 %v3999_v38, %v2902_v33  ;;  %v2904_v58 = vpop.f32.mrb[101].mxu0 }
 0x2ab   : > { %v3136_v26 = vadd.f32 %v5449_v3, %v3135_v27  ;;  %v3842_v2 = vpop.f32.mrb[166].mxu1  ;;  %v2905_v16 = vpop.f32.mrb[102].mxu0  ;;  %v5715_v3 = vld [vmem:[#allocation5_spill] sm:$0xff] }
 0x2ac   : > { %v3284_v5 = vmax.f32 %v3144_v49, 0.0  ;;  %v3147_v40 = vadd.f32 %v5473_v15, %v3842_v2  ;;  %v3138_v10 = vpop.f32.mrb[167].mxu1  ;;  %v5593_v7 = vadd.f32 %v4001_v56, %v2905_v16  ;;  %v2907_v22 = vpop.f32.mrb[103].mxu0  ;;  %v4003_v43 = vadd.f32 %v5207_v36, %v5715_v3 }
 0x2ad   : > { %v3282_v37 = vmax.f32 %v3136_v26, 0.0  ;;  %v3139_v35 = vadd.f32 %v5453_v6, %v3138_v10  ;;  %v5716_v6 = vld [vmem:[#allocation6_spill] sm:$0xff] }
 0x2ae   : > { %3349 = vst.msk [vmem:[%s5409_s6 + $0x130] sm:$0xff] %vm3310_vm1, %v3284_v5  ;;  %v3285_v11 = vmax.f32 %v3147_v40, 0.0  ;;  %v4005_v42 = vadd.f32 %v5207_v36, %v5716_v6  ;;  %v5721_v6 = vld [vmem:[#allocation11_spill] sm:$0xff] }
 0x2af   : > { %3347 = vst.msk [vmem:[%s5409_s6 + $0x120] sm:$0xff] %vm3310_vm1, %v3282_v37  ;;  %v3283_v52 = vmax.f32 %v3139_v35, 0.0 }
 0x2b0   : > { %3350 = vst.msk [vmem:[%s5409_s6 + $0x138] sm:$0xff] %vm3310_vm1, %v3285_v11 }
 0x2b1   : > { %3348 = vst.msk [vmem:[%s5409_s6 + $0x128] sm:$0xff] %vm3310_vm1, %v3283_v52  ;;  %v3845_v15 = vpop.f32.mrb[168].mxu1  ;;  %v2910_v0 = vpop.f32.mrb[104].mxu0 }
 0x2b2   : > { %v3160_v51 = vadd.f32 %v5509_v53, %v3845_v15  ;;  %v3151_v55 = vpop.f32.mrb[169].mxu1  ;;  %v5609_v61 = vadd.f32 %v4003_v43, %v2910_v0  ;;  %v2912_v18 = vpop.f32.mrb[105].mxu0 }
 0x2b3   : > { %v3152_v17 = vadd.f32 %v5489_v12, %v3151_v55  ;;  %v3846_v31 = vpop.f32.mrb[170].mxu1  ;;  %v2913_v34 = vpop.f32.mrb[106].mxu0  ;;  %v5717_v12 = vld [vmem:[#allocation7_spill] sm:$0xff] }
 0x2b4   : > { %v3288_v62 = vmax.f32 %v3160_v51, 0.0  ;;  %v3163_v59 = vadd.f32 %v5513_v20, %v3846_v31  ;;  %v3154_v29 = vpop.f32.mrb[171].mxu1  ;;  %v5613_v53 = vadd.f32 %v4005_v42, %v2913_v34  ;;  %v2915_v48 = vpop.f32.mrb[107].mxu0  ;;  %v4007_v25 = vadd.f32 %v5207_v36, %v5717_v12  ;;  %v5722_v31 = vld [vmem:[#allocation12_spill] sm:$0xff] }
 0x2b5   : > { %v3286_v24 = vmax.f32 %v3152_v17, 0.0  ;;  %v3155_v32 = vadd.f32 %v5493_v57, %v3154_v29  ;;  %v5718_v57 = vld [vmem:[#allocation8_spill] sm:$0xff] }
 0x2b6   : > { %3353 = vst.msk [vmem:[%s5409_s6 + $0x150] sm:$0xff] %vm3310_vm1, %v3288_v62  ;;  %v3289_v39 = vmax.f32 %v3163_v59, 0.0  ;;  %v4009_v44 = vadd.f32 %v5207_v36, %v5718_v57 }
 0x2b7   : > { %3351 = vst.msk [vmem:[%s5409_s6 + $0x140] sm:$0xff] %vm3310_vm1, %v3286_v24  ;;  %v3287_v60 = vmax.f32 %v3155_v32, 0.0 }
 0x2b8   : > { %3354 = vst.msk [vmem:[%s5409_s6 + $0x158] sm:$0xff] %vm3310_vm1, %v3289_v39 }
 0x2b9   : > { %3352 = vst.msk [vmem:[%s5409_s6 + $0x148] sm:$0xff] %vm3310_vm1, %v3287_v60  ;;  %v3849_v20 = vpop.f32.mrb[172].mxu1  ;;  %v2918_v23 = vpop.f32.mrb[108].mxu0 }
 0x2ba   : > { %v3176_v21 = vadd.f32 %v5549_v1, %v3849_v20  ;;  %v3167_v46 = vpop.f32.mrb[173].mxu1  ;;  %v4008_v14 = vadd.f32 %v4007_v25, %v2918_v23  ;;  %v2920_v28 = vpop.f32.mrb[109].mxu0 }
 0x2bb   : > { %v3168_v47 = vadd.f32 %v5529_v63, %v3167_v46  ;;  %v3850_v8 = vpop.f32.mrb[174].mxu1  ;;  %v2921_v38 = vpop.f32.mrb[110].mxu0  ;;  %v5719_v63 = vld [vmem:[#allocation9_spill] sm:$0xff] }
 0x2bc   : > { %v3292_v41 = vmax.f32 %v3176_v21, 0.0  ;;  %v3179_v4 = vadd.f32 %v5553_v54, %v3850_v8  ;;  %v3170_v33 = vpop.f32.mrb[175].mxu1  ;;  %v4010_v27 = vadd.f32 %v4009_v44, %v2921_v38  ;;  %v2923_v1 = vpop.f32.mrb[111].mxu0  ;;  %v4011_v26 = vadd.f32 %v5207_v36, %v5719_v63  ;;  %v5724_v8 = vld [vmem:[#allocation14_spill] sm:$0xff] }
 0x2bd   : > { %v3290_v49 = vmax.f32 %v3168_v47, 0.0  ;;  %v3171_v50 = vadd.f32 %v5533_v13, %v3170_v33  ;;  %v5720_v13 = vld [vmem:[#allocation10_spill] sm:$0xff] }
 0x2be   : > { %3357 = vst.msk [vmem:[%s5409_s6 + $0x170] sm:$0xff] %vm3310_vm1, %v3292_v41  ;;  %v3293_v56 = vmax.f32 %v3179_v4, 0.0  ;;  %v4013_v40 = vadd.f32 %v5207_v36, %v5720_v13 }
 0x2bf   : > { %3355 = vst.msk [vmem:[%s5409_s6 + $0x160] sm:$0xff] %vm3310_vm1, %v3290_v49  ;;  %v3291_v58 = vmax.f32 %v3171_v50, 0.0 }
 0x2c0   : > { %3358 = vst.msk [vmem:[%s5409_s6 + $0x178] sm:$0xff] %vm3310_vm1, %v3293_v56 }
 0x2c1   : > { %3356 = vst.msk [vmem:[%s5409_s6 + $0x168] sm:$0xff] %vm3310_vm1, %v3291_v58  ;;  %v3853_v54 = vpop.f32.mrb[176].mxu1  ;;  %v2926_v2 = vpop.f32.mrb[112].mxu0 }
 0x2c2   : > { %v3192_v5 = vadd.f32 %v5589_v45, %v3853_v54  ;;  %v3183_v16 = vpop.f32.mrb[177].mxu1  ;;  %v4012_v10 = vadd.f32 %v4011_v26, %v2926_v2  ;;  %v2928_v37 = vpop.f32.mrb[113].mxu0 }
 0x2c3   : > { %v3184_v22 = vadd.f32 %v5569_v30, %v3183_v16  ;;  %v3854_v35 = vpop.f32.mrb[178].mxu1  ;;  %v2929_v52 = vpop.f32.mrb[114].mxu0  ;;  %v4539_v30 = vld [vmem:[%s5696_s2] ss:$0 sm:$0xff] }
 0x2c4   : > { %v3296_v11 = vmax.f32 %v3192_v5, 0.0  ;;  %v3195_v3 = vadd.f32 %v5593_v7, %v3854_v35  ;;  %v3186_v43 = vpop.f32.mrb[179].mxu1  ;;  %v4014_v0 = vadd.f32 %v4013_v40, %v2929_v52  ;;  %v2931_v45 = vpop.f32.mrb[115].mxu0  ;;  %v4015_v7 = vadd.f32 %v4539_v30, %v5721_v6  ;;  %v5725_v5 = vld [vmem:[#allocation15_spill] sm:$0xff] }
 0x2c5   : > { %v3294_v15 = vmax.f32 %v3184_v22, 0.0  ;;  %v3187_v51 = vadd.f32 %v5573_v9, %v3186_v43  ;;  %v4017_v62 = vadd.f32 %v4539_v30, %v5722_v31  ;;  %v4023_v16 = vadd.f32 %v4539_v30, %v5725_v5 }
 0x2c6   : > { %3361 = vst.msk [vmem:[%s5409_s6 + $0x190] sm:$0xff] %vm3310_vm1, %v3296_v11  ;;  %v3297_v36 = vmax.f32 %v3195_v3, 0.0  ;;  %v4025_v37 = vadd.f32 %v4539_v30, %v5394_v19 }
 0x2c7   : > { %3359 = vst.msk [vmem:[%s5409_s6 + $0x180] sm:$0xff] %vm3310_vm1, %v3294_v15  ;;  %v3295_v55 = vmax.f32 %v3187_v51, 0.0 }
 0x2c8   : > { %3362 = vst.msk [vmem:[%s5409_s6 + $0x198] sm:$0xff] %vm3310_vm1, %v3297_v36 }
 0x2c9   : > { %3360 = vst.msk [vmem:[%s5409_s6 + $0x188] sm:$0xff] %vm3310_vm1, %v3295_v55  ;;  %v3857_v42 = vpop.f32.mrb[180].mxu1  ;;  %v2934_v18 = vpop.f32.mrb[116].mxu0 }
 0x2ca   : > { %v3208_v9 = vadd.f32 %v4008_v14, %v3857_v42  ;;  %v3199_v17 = vpop.f32.mrb[181].mxu1  ;;  %v4016_v34 = vadd.f32 %v4015_v7, %v2934_v18  ;;  %v2936_v59 = vpop.f32.mrb[117].mxu0 }
 0x2cb   : > { %v3200_v29 = vadd.f32 %v5609_v61, %v3199_v17  ;;  %v3858_v24 = vpop.f32.mrb[182].mxu1  ;;  %v2937_v32 = vpop.f32.mrb[118].mxu0  ;;  %v5723_v61 = vld [vmem:[#allocation13_spill] sm:$0xff] }
 0x2cc   : > { %v3300_v48 = vmax.f32 %v3208_v9, 0.0  ;;  %v3211_v39 = vadd.f32 %v4010_v27, %v3858_v24  ;;  %v3202_v60 = vpop.f32.mrb[183].mxu1  ;;  %v4018_v25 = vadd.f32 %v4017_v62, %v2937_v32  ;;  %v2939_v20 = vpop.f32.mrb[119].mxu0  ;;  %v4019_v57 = vadd.f32 %v4539_v30, %v5723_v61 }
 0x2cd   : > { %v3298_v12 = vmax.f32 %v3200_v29, 0.0  ;;  %v3203_v23 = vadd.f32 %v5613_v53, %v3202_v60  ;;  %v4021_v53 = vadd.f32 %v4539_v30, %v5724_v8 }
 0x2ce   : > { %3365 = vst.msk [vmem:[%s5409_s6 + $0x1b0] sm:$0xff] %vm3310_vm1, %v3300_v48  ;;  %v3301_v21 = vmax.f32 %v3211_v39, 0.0 }
 0x2cf   : > { %3363 = vst.msk [vmem:[%s5409_s6 + $0x1a0] sm:$0xff] %vm3310_vm1, %v3298_v12  ;;  %v3299_v46 = vmax.f32 %v3203_v23, 0.0 }
 0x2d0   : > { %3366 = vst.msk [vmem:[%s5409_s6 + $0x1b8] sm:$0xff] %vm3310_vm1, %v3301_v21 }
 0x2d1   : > { %3364 = vst.msk [vmem:[%s5409_s6 + $0x1a8] sm:$0xff] %vm3310_vm1, %v3299_v46  ;;  %v3861_v44 = vpop.f32.mrb[184].mxu1  ;;  %v2942_v14 = vpop.f32.mrb[120].mxu0 }
 0x2d2   : > { %v3224_v28 = vadd.f32 %v4016_v34, %v3861_v44  ;;  %v3215_v47 = vpop.f32.mrb[185].mxu1  ;;  %v4020_v41 = vadd.f32 %v4019_v57, %v2942_v14  ;;  %v2944_v38 = vpop.f32.mrb[121].mxu0 }
 0x2d3   : > { %v3216_v4 = vadd.f32 %v4012_v10, %v3215_v47  ;;  %v3862_v33 = vpop.f32.mrb[186].mxu1  ;;  %v2945_v27 = vpop.f32.mrb[122].mxu0 }
 0x2d4   : > { %v3304_v49 = vmax.f32 %v3224_v28, 0.0  ;;  %v3227_v1 = vadd.f32 %v4018_v25, %v3862_v33  ;;  %v3218_v50 = vpop.f32.mrb[187].mxu1  ;;  %v4022_v58 = vadd.f32 %v4021_v53, %v2945_v27  ;;  %v2947_v63 = vpop.f32.mrb[123].mxu0 }
 0x2d5   : > { %v3302_v56 = vmax.f32 %v3216_v4, 0.0  ;;  %v3219_v26 = vadd.f32 %v4014_v0, %v3218_v50 }
 0x2d6   : > { %3369 = vst.msk [vmem:[%s5409_s6 + $0x1d0] sm:$0xff] %vm3310_vm1, %v3304_v49  ;;  %v3305_v54 = vmax.f32 %v3227_v1, 0.0 }
 0x2d7   : > { %3367 = vst.msk [vmem:[%s5409_s6 + $0x1c0] sm:$0xff] %vm3310_vm1, %v3302_v56  ;;  %v3303_v2 = vmax.f32 %v3219_v26, 0.0 }
 0x2d8   : > { %3370 = vst.msk [vmem:[%s5409_s6 + $0x1d8] sm:$0xff] %vm3310_vm1, %v3305_v54 }
 0x2d9   : > { %3368 = vst.msk [vmem:[%s5409_s6 + $0x1c8] sm:$0xff] %vm3310_vm1, %v3303_v2  ;;  %v3865_v13 = vpop.f32.mrb[188].mxu1  ;;  %v2950_v40 = vpop.f32.mrb[124].mxu0 }
 0x2da   : > { %v3231_v10 = vpop.f32.mrb[189].mxu1  ;;  %v4024_v22 = vadd.f32 %v4023_v16, %v2950_v40  ;;  %v2952_v35 = vpop.f32.mrb[125].mxu0 }
 0x2db   : > { %v3232_v11 = vadd.f32 %v4020_v41, %v3231_v10  ;;  %v3866_v52 = vpop.f32.mrb[190].mxu1  ;;  %v2953_v3 = vpop.f32.mrb[126].mxu0 }
 0x2dc   : > { %v3234_v43 = vpop.f32.mrb[191].mxu1  ;;  %v3240_v15 = vadd.f32 %v4024_v22, %v3865_v13  ;;  %v4026_v45 = vadd.f32 %v4025_v37, %v2953_v3  ;;  %v2955_v51 = vpop.f32.mrb[127].mxu0 }
 0x2dd   : > { %v3306_v0 = vmax.f32 %v3232_v11, 0.0  ;;  %v3235_v36 = vadd.f32 %v4022_v58, %v3234_v43 }
 0x2de   : > { %v3308_v55 = vmax.f32 %v3240_v15, 0.0  ;;  %v3243_v6 = vadd.f32 %v4026_v45, %v3866_v52 }
 0x2df   : > { %3371 = vst.msk [vmem:[%s5409_s6 + $0x1e0] sm:$0xff] %vm3310_vm1, %v3306_v0  ;;  %v3307_v7 = vmax.f32 %v3235_v36, 0.0 }
 0x2e0   : > { %3373 = vst.msk [vmem:[%s5409_s6 + $0x1f0] sm:$0xff] %vm3310_vm1, %v3308_v55  ;;  %v3309_v19 = vmax.f32 %v3243_v6, 0.0 }
 0x2e1   : > { %3372 = vst.msk [vmem:[%s5409_s6 + $0x1e8] sm:$0xff] %vm3310_vm1, %v3307_v7 }
 0x2e2   : > { %3374 = vst.msk [vmem:[%s5409_s6 + $0x1f8] sm:$0xff] %vm3310_vm1, %v3309_v19 }
 0x2e3 PF: > { %s13_s12 = sadd.s32 1, %s4546_s12  }
 0x2e4   : > { %p10_p4 = scmp.ge.s32.totalorder %s13_s12, 6  }
 0x2e6   :  { %12 = sbr.rel (!%p10_p4) target bundleno = 1 (0x1), region = 62 }

// kernel: forward.13
= control target key start
LH: loop header
LB: loop body
LE: loop exit
PB: predicated region body
PF: predicated region fallthrough
CT: control target
= control target key end

     0   :  { %s3460_s12 = smov 0   ;;  %s4120_s0 = inlined_call_operand.vmem [shape: bf16[256,1728], index: 0, kind: input, shape index: {}]   ;;  %s4121_s1 = inlined_call_operand.vmem [shape: bf16[1728,64], index: 1, kind: input, shape index: {}]   ;;  %s4122_s2 = inlined_call_operand.vmem [shape: f32[1,64], index: 2, kind: input, shape index: {}]   ;;  %s4123_s3 = inlined_call_operand.vmem [shape: f32[256,64], index: 3, kind: output, shape index: {}]  }
   0x1 LB: > { %s2505_s13 = sadd.s32 4294967295, %s3437_s12   ;;  %p2509_p0 = scmp.ge.s32.totalorder %s3437_s12, 1  ;;  %s3437_s12 = sphi %s3460_s12, %s13_s12  }
   0x2   : > { %p139_p1 = scmp.lt.s32.totalorder %s3437_s12, 3 }
   0x4   : > { %p140_p2 = pnand %p2509_p0, %p139_p1 }
   0x5   : > { %v3155_v0 = vld [vmem:[%s4121_s1 + $0x40] sm:$0xff] (!%p140_p2)   ;;  %s2510_s16 = sshll.u32 (!%p140_p2), %s2505_s13, 4  ;;  %v3157_v2 = vld [vmem:[%s4121_s1 + $0x48] sm:$0xff] (!%p140_p2)   ;;  %v3159_v4 = vld [vmem:[%s4121_s1 + $0x50] sm:$0xff] (!%p140_p2)   ;;  %vm1713_vm0 = vcmask (!%p140_p2), 523264  }
   0x6   : > { %143 = sbr.rel (%p140_p2) target bundleno = 478 (0x1de), region = 32  ;;  %v3156_v1 = vld [vmem:[%s4121_s1] sm:$0xff] (!%p140_p2)   ;;  %3129 = vmatprep.subr.bf16.mxu1 (!%p140_p2), %v3155_v0  ;;  %2745 = vmatprep.subr.bf16.mxu0 (!%p140_p2), %v3155_v0  ;;  %p165_p3 = scmp.lt.s32.totalorder (!%p140_p2), %s2510_s16, 31  ;;  %v3158_v3 = vld [vmem:[%s4121_s1 + $0x8] sm:$0xff] (!%p140_p2)   ;;  %v3160_v5 = vld [vmem:[%s4121_s1 + $0x10] sm:$0xff] (!%p140_p2)  }
   0x7   : > { %3137 = vmatpush3.bf16.msra.mxu1 (!%p140_p2), %v3156_v1  ;;  %2746 = vmatpush3.bf16.msra.mxu0 (!%p140_p2), %v3156_v1  ;;  %v3161_v6 = vld [vmem:[%s4121_s1 + $0x58] sm:$0xff] (!%p140_p2)   ;;  %v3163_v8 = vld [vmem:[%s4121_s1 + $0x60] sm:$0xff] (!%p140_p2)   ;;  %v3165_v10 = vld [vmem:[%s4121_s1 + $0x68] sm:$0xff] (!%p140_p2)  }
   0x8   : > { %3130 = vmatprep.subr.bf16.mxu1 (!%p140_p2), %v3157_v2  ;;  %2747 = vmatprep.subr.bf16.mxu0 (!%p140_p2), %v3157_v2  ;;  %v3162_v7 = vld [vmem:[%s4121_s1 + $0x18] sm:$0xff] (!%p140_p2)   ;;  %v3164_v9 = vld [vmem:[%s4121_s1 + $0x20] sm:$0xff] (!%p140_p2)   ;;  %v3166_v12 = vld [vmem:[%s4121_s1 + $0x28] sm:$0xff] (!%p140_p2)  }
   0x9   : > { %v3167_v14 = vld [vmem:[%s4121_s1 + $0x70] sm:$0xff] (!%p140_p2)   ;;  %v3169_v16 = vld [vmem:[%s4121_s1 + $0x78] sm:$0xff] (!%p140_p2)   ;;  %v3174_v18 = vld [vmem:[%s4121_s1 + $0xc0] sm:$0xff] (!%p140_p2)  }
   0xa   : > { %v3168_v15 = vld [vmem:[%s4121_s1 + $0x30] sm:$0xff] (!%p140_p2)   ;;  %v3170_v17 = vld [vmem:[%s4121_s1 + $0x38] sm:$0xff] (!%p140_p2)   ;;  %v3179_v21 = vld [vmem:[%s4121_s1 + $0x140] sm:$0xff] (!%p140_p2)  }
   0xb   : > { %3138 = vmatpush3.bf16.msra.mxu1 (!%p140_p2), %v3158_v3  ;;  %2748 = vmatpush3.bf16.msra.mxu0 (!%p140_p2), %v3158_v3  ;;  %v3178_v22 = vld [vmem:[%s4121_s1 + $0x80] sm:$0xff] (!%p140_p2)   ;;  %v3181_v24 = vld [vmem:[%s4121_s1 + $0xc8] sm:$0xff] (!%p140_p2)   ;;  %v3188_v30 = vld [vmem:[%s4121_s1 + $0xd0] sm:$0xff] (!%p140_p2)  }
   0xc   : > { %3131 = vmatprep.subr.bf16.mxu1 (!%p140_p2), %v3159_v4  ;;  %2749 = vmatprep.subr.bf16.mxu0 (!%p140_p2), %v3159_v4  ;;  %v3180_v23 = vld [vmem:[%s4121_s1 + $0x100] sm:$0xff] (!%p140_p2)   ;;  %v3183_v25 = vld [vmem:[%s4121_s1 + $0x148] sm:$0xff] (!%p140_p2)   ;;  %v3193_v32 = vld [vmem:[%s4121_s1 + $0x150] sm:$0xff] (!%p140_p2)  }
   0xd   : > { %s4125_s16 = smov (!%p165_p3, %s2510_s16), 31  ;;  %v3182_v27 = vld [vmem:[%s4121_s1 + $0x88] sm:$0xff]   ;;  %v3191_v33 = vld [vmem:[%s4121_s1 + $0x90] sm:$0xff]   ;;  %v3195_v36 = vld [vmem:[%s4121_s1 + $0xd8] sm:$0xff]  }
   0xe   : > { %s3145_s29 = smul.u32 56, %s4125_s16  ;;  %v3186_v29 = vld [vmem:[%s4121_s1 + $0x108] sm:$0xff]   ;;  %v3194_v35 = vld [vmem:[%s4121_s1 + $0x110] sm:$0xff]   ;;  %v3197_v37 = vld [vmem:[%s4121_s1 + $0x158] sm:$0xff]   ;;  %s2513_s19 = sshll.u32 %s4125_s16, 3 }
   0xf   : > { %3139 = vmatpush3.bf16.msra.mxu1 %v3160_v5  ;;  %2750 = vmatpush3.bf16.msra.mxu0 %v3160_v5  ;;  %v3196_v38 = vld [vmem:[%s4121_s1 + $0x98] sm:$0xff]   ;;  %v3202_v42 = vld [vmem:[%s4121_s1 + $0xe0] sm:$0xff]   ;;  %v3209_v48 = vld [vmem:[%s4121_s1 + $0xe8] sm:$0xff]   ;;  %s4069_s22 = scalar_lea.vmem %s4123_s3, %s2513_s19 }
  0x10   : > { %3132 = vmatprep.subr.bf16.mxu1 %v3161_v6  ;;  %2751 = vmatprep.subr.bf16.mxu0 %v3161_v6  ;;  %s3501_s9 = scalar_lea.vmem %s4120_s0, %s3145_s29  ;;  %v3200_v41 = vld [vmem:[%s4121_s1 + $0x118] sm:$0xff]   ;;  %v3207_v44 = vld [vmem:[%s4121_s1 + $0x160] sm:$0xff]   ;;  %v3211_v49 = vld [vmem:[%s4121_s1 + $0x168] sm:$0xff]  }
  0x11   : > { %v3173_v11 = vld [vmem:[%s3501_s9 + $0x1c4] ss:$56 sps:$4 sm:$0xff]   ;;  %v3171_v19 = vld [vmem:[%s3501_s9 + $0x1c0] ss:$56 sps:$4 sm:$0xff]   ;;  %v3184_v26 = vld [vmem:[%s3501_s9 + $0x234] ss:$56 sps:$4 sm:$0xff]  }
  0x12   : > { %v3177_v13 = vld [vmem:[%s3501_s9 + $0x4] ss:$56 sps:$4 sm:$0xff]   ;;  %1802 = vmatprep.mubr.bf16.mxu1 %v3173_v11  ;;  %v3175_v20 = vld [vmem:[%s3501_s9] ss:$56 sps:$4 sm:$0xff]   ;;  %v3189_v28 = vld [vmem:[%s3501_s9 + $0x74] ss:$56 sps:$4 sm:$0xff]  }
  0x13   : > { %3140 = vmatpush3.bf16.msra.mxu1 %v3162_v7  ;;  %2752 = vmatpush3.bf16.msra.mxu0 %v3162_v7  ;;  %v3187_v31 = vld [vmem:[%s3501_s9 + $0x230] ss:$56 sps:$4 sm:$0xff]   ;;  %v3198_v39 = vld [vmem:[%s3501_s9 + $0x2a4] ss:$56 sps:$4 sm:$0xff]   ;;  %v3201_v43 = vld [vmem:[%s3501_s9 + $0x2a0] ss:$56 sps:$4 sm:$0xff]  }
  0x14   : > { %3133 = vmatprep.subr.bf16.mxu1 %v3163_v8  ;;  %2753 = vmatprep.subr.bf16.mxu0 %v3163_v8  ;;  %v3192_v34 = vld [vmem:[%s3501_s9 + $0x70] ss:$56 sps:$4 sm:$0xff]   ;;  %v3203_v40 = vld [vmem:[%s3501_s9 + $0xe4] ss:$56 sps:$4 sm:$0xff]   ;;  %v3206_v46 = vld [vmem:[%s3501_s9 + $0xe0] ss:$56 sps:$4 sm:$0xff]  }
  0x15   : > { %1770 = vmatprep.mubr.bf16.mxu0 %v3177_v13  ;;  %v3205_v45 = vld [vmem:[%s4121_s1 + $0xa0] sm:$0xff]   ;;  %v3210_v50 = vld [vmem:[%s4121_s1 + $0xa8] sm:$0xff]   ;;  %v3216_v55 = vld [vmem:[%s4121_s1 + $0xf0] sm:$0xff]  }
  0x16   : > { %v3208_v47 = vld [vmem:[%s4121_s1 + $0x120] sm:$0xff]   ;;  %v3212_v51 = vld [vmem:[%s3501_s9 + $0x314] ss:$56 sps:$4 sm:$0xff]   ;;  %v3215_v54 = vld [vmem:[%s3501_s9 + $0x310] ss:$56 sps:$4 sm:$0xff]  }
  0x17   : > { %3141 = vmatpush3.bf16.msra.mxu1 %v3164_v9  ;;  %2754 = vmatpush3.bf16.msra.mxu0 %v3164_v9  ;;  %v3214_v52 = vld [vmem:[%s4121_s1 + $0x128] sm:$0xff]   ;;  %v3219_v56 = vld [vmem:[%s4121_s1 + $0xb0] sm:$0xff]   ;;  %v3223_v60 = vld [vmem:[%s4121_s1 + $0xf8] sm:$0xff]  }
  0x18   : > { %3134 = vmatprep.subr.bf16.mxu1 %v3165_v10  ;;  %2755 = vmatprep.subr.bf16.mxu0 %v3165_v10  ;;  %v3217_v53 = vld [vmem:[%s3501_s9 + $0x154] ss:$56 sps:$4 sm:$0xff]   ;;  %v3220_v58 = vld [vmem:[%s3501_s9 + $0x150] ss:$56 sps:$4 sm:$0xff]   ;;  %v3225_v61 = vld [vmem:[%s4121_s1 + $0x178] sm:$0xff]  }
  0x19   : > { %v3221_v57 = vld [vmem:[%s4121_s1 + $0x170] sm:$0xff]   ;;  %v3224_v62 = vld [vmem:[%s4121_s1 + $0xb8] sm:$0xff]   ;;  %v3228_v63 = vld [vmem:[%s3501_s9 + $0xc] ss:$56 sps:$4 sm:$0xff]  }
  0x1a   : > { %v3222_v59 = vld [vmem:[%s4121_s1 + $0x130] sm:$0xff]   ;;  %v3229_v0 = vld [vmem:[%s4121_s1 + $0x138] sm:$0xff]   ;;  %v3226_v1 = vld [vmem:[%s3501_s9 + $0x8] ss:$56 sps:$4 sm:$0xff]  }
  0x1b   : > { %3142 = vmatpush3.bf16.msra.mxu1 %v3166_v12  ;;  %2756 = vmatpush3.bf16.msra.mxu0 %v3166_v12  ;;  %v3230_v2 = vld [vmem:[%s4121_s1 + $0x1c0] sm:$0xff]   ;;  %v3231_v3 = vld [vmem:[%s3501_s9 + $0x10] ss:$56 sps:$4 sm:$0xff]   ;;  %v3233_v4 = vld [vmem:[%s3501_s9 + $0x14] ss:$56 sps:$4 sm:$0xff]  }
  0x1c   : > { %3135 = vmatprep.subr.bf16.mxu1 %v3167_v14  ;;  %2757 = vmatprep.subr.bf16.mxu0 %v3167_v14  ;;  %v3234_v5 = vld [vmem:[%s4121_s1 + $0x180] sm:$0xff]   ;;  %v3237_v8 = vld [vmem:[%s3501_s9 + $0x7c] ss:$56 sps:$4 sm:$0xff]   ;;  %v3240_v9 = vld [vmem:[%s4121_s1 + $0x1c8] sm:$0xff]  }
  0x1d   : > { %v3235_v6 = vld [vmem:[%s4121_s1 + $0x240] sm:$0xff]   ;;  %v3239_v10 = vld [vmem:[%s3501_s9 + $0x78] ss:$56 sps:$4 sm:$0xff]   ;;  %v3243_v12 = vld [vmem:[%s4121_s1 + $0x188] sm:$0xff]  }
  0x1e   : > { %v3236_v7 = vld [vmem:[%s4121_s1 + $0x200] sm:$0xff]   ;;  %v3245_v14 = vld [vmem:[%s4121_s1 + $0x248] sm:$0xff]  }
  0x1f   : > { %3143 = vmatpush3.bf16.msra.mxu1 %v3168_v15  ;;  %2758 = vmatpush3.bf16.msra.mxu0 %v3168_v15  ;;  %v3241_v11 = vld [vmem:[%s3501_s9 + $0x84] ss:$56 sps:$4 sm:$0xff]   ;;  %v3244_v13 = vld [vmem:[%s3501_s9 + $0x80] ss:$56 sps:$4 sm:$0xff]   ;;  %v3246_v15 = vld [vmem:[%s4121_s1 + $0x208] sm:$0xff]  }
  0x20   : > { %3136 = vmatprep.subr.bf16.mxu1 %v3169_v16  ;;  %2759 = vmatprep.subr.bf16.mxu0 %v3169_v16  ;;  %v3247_v16 = vld [vmem:[%s3501_s9 + $0xec] ss:$56 sps:$4 sm:$0xff]  }
  0x23   : > { %3144 = vmatpush3.bf16.msra.mxu1 %v3170_v17  ;;  %2760 = vmatpush3.bf16.msra.mxu0 %v3170_v17  ;;  %v3250_v17 = vld [vmem:[%s4121_s1 + $0x1d0] sm:$0xff]  }
  0x24   : > { %2809 = vmatprep.subr.bf16.mxu1 %v3174_v18  ;;  %2873 = vmatprep.subr.bf16.mxu0 %v3179_v21  ;;  %v3251_v18 = vld [vmem:[%s3501_s9 + $0xf4] ss:$56 sps:$4 sm:$0xff]   ;;  %v3254_v21 = vld [vmem:[%s3501_s9 + $0xf0] ss:$56 sps:$4 sm:$0xff]  }
  0x26   : > { %1803 = vmatmul.mubr.bf16.vlgmr.msra.gmra.mrb[0].mxu1 %v3171_v19  ;;  %1771 = vmatmul.mubr.bf16.vlgmr.msra.gmra.mrb[0].mxu0 %v3175_v20  ;;  %v3249_v19 = vld [vmem:[%s3501_s9 + $0xe8] ss:$56 sps:$4 sm:$0xff]   ;;  %v3253_v20 = vld [vmem:[%s4121_s1 + $0x190] sm:$0xff]  }
  0x27   : > { %2810 = vmatpush3.bf16.msra.mxu1 %v3178_v22  ;;  %2874 = vmatpush3.bf16.msra.mxu0 %v3180_v23  ;;  %v3255_v22 = vld [vmem:[%s4121_s1 + $0x250] sm:$0xff]  }
  0x28   : > { %2811 = vmatprep.subr.bf16.mxu1 %v3181_v24  ;;  %2875 = vmatprep.subr.bf16.mxu0 %v3183_v25  ;;  %v3256_v23 = vld [vmem:[%s4121_s1 + $0x210] sm:$0xff]   ;;  %v3260_v25 = vld [vmem:[%s4121_s1 + $0x1d8] sm:$0xff]  }
  0x29   : > { %1810 = vmatprep.mubr.bf16.mxu1 %v3184_v26  ;;  %1778 = vmatprep.mubr.bf16.mxu0 %v3189_v28  ;;  %v3257_v24 = vld [vmem:[%s3501_s9 + $0x15c] ss:$56 sps:$4 sm:$0xff]   ;;  %v3259_v28 = vld [vmem:[%s3501_s9 + $0x158] ss:$56 sps:$4 sm:$0xff]  }
  0x2a   : > { %v3261_v26 = vld [vmem:[%s3501_s9 + $0x164] ss:$56 sps:$4 sm:$0xff]  }
  0x2b   : > { %2812 = vmatpush3.bf16.msra.mxu1 %v3182_v27  ;;  %2876 = vmatpush3.bf16.msra.mxu0 %v3186_v29  ;;  %v3263_v27 = vld [vmem:[%s4121_s1 + $0x198] sm:$0xff]  }
  0x2c   : > { %2813 = vmatprep.subr.bf16.mxu1 %v3188_v30  ;;  %2877 = vmatprep.subr.bf16.mxu0 %v3193_v32  ;;  %v3265_v29 = vld [vmem:[%s4121_s1 + $0x258] sm:$0xff]   ;;  %v3267_v32 = vld [vmem:[%s3501_s9 + $0x1cc] ss:$56 sps:$4 sm:$0xff]  }
  0x2d   : > { %v3266_v30 = vld [vmem:[%s4121_s1 + $0x218] sm:$0xff]  }
  0x2e   : > { %1811 = vmatmul.mubr.bf16.gmra.mrb[4].mxu1 %v3187_v31  ;;  %1779 = vmatmul.mubr.bf16.gmra.mrb[4].mxu0 %v3192_v34  ;;  %v3264_v31 = vld [vmem:[%s3501_s9 + $0x160] ss:$56 sps:$4 sm:$0xff]   ;;  %v3271_v34 = vld [vmem:[%s3501_s9 + $0x1d4] ss:$56 sps:$4 sm:$0xff]  }
  0x2f   : > { %2814 = vmatpush3.bf16.msra.mxu1 %v3191_v33  ;;  %2878 = vmatpush3.bf16.msra.mxu0 %v3194_v35  ;;  %v3270_v33 = vld [vmem:[%s4121_s1 + $0x1e0] sm:$0xff]  }
  0x30   : > { %2815 = vmatprep.subr.bf16.mxu1 %v3195_v36  ;;  %2879 = vmatprep.subr.bf16.mxu0 %v3197_v37  ;;  %v3273_v35 = vld [vmem:[%s4121_s1 + $0x1a0] sm:$0xff]  }
  0x31   : > { %1818 = vmatprep.mubr.bf16.mxu1 %v3198_v39  ;;  %1786 = vmatprep.mubr.bf16.mxu0 %v3203_v40  ;;  %v3275_v36 = vld [vmem:[%s4121_s1 + $0x260] sm:$0xff]   ;;  %v3274_v39 = vld [vmem:[%s3501_s9 + $0x1d0] ss:$56 sps:$4 sm:$0xff]   ;;  %v3277_v40 = vld [vmem:[%s3501_s9 + $0x23c] ss:$56 sps:$4 sm:$0xff]  }
  0x32   : > { %v3276_v37 = vld [vmem:[%s4121_s1 + $0x220] sm:$0xff]  }
  0x33   : > { %2816 = vmatpush3.bf16.msra.mxu1 %v3196_v38  ;;  %2880 = vmatpush3.bf16.msra.mxu0 %v3200_v41  ;;  %v3269_v38 = vld [vmem:[%s3501_s9 + $0x1c8] ss:$56 sps:$4 sm:$0xff]  }
  0x34   : > { %2817 = vmatprep.subr.bf16.mxu1 %v3202_v42  ;;  %2881 = vmatprep.subr.bf16.mxu0 %v3207_v44  ;;  %v3280_v41 = vld [vmem:[%s4121_s1 + $0x1e8] sm:$0xff]   ;;  %v3281_v42 = vld [vmem:[%s3501_s9 + $0x244] ss:$56 sps:$4 sm:$0xff]  }
  0x35   : > { %v3285_v44 = vld [vmem:[%s4121_s1 + $0x268] sm:$0xff]  }
  0x36   : > { %1819 = vmatmul.mubr.bf16.gmra.mrb[8].mxu1 %v3201_v43  ;;  %1787 = vmatmul.mubr.bf16.gmra.mrb[8].mxu0 %v3206_v46  ;;  %v3283_v43 = vld [vmem:[%s4121_s1 + $0x1a8] sm:$0xff]   ;;  %v3279_v46 = vld [vmem:[%s3501_s9 + $0x238] ss:$56 sps:$4 sm:$0xff]  }
  0x37   : > { %2818 = vmatpush3.bf16.msra.mxu1 %v3205_v45  ;;  %2882 = vmatpush3.bf16.msra.mxu0 %v3208_v47  ;;  %v3286_v45 = vld [vmem:[%s4121_s1 + $0x228] sm:$0xff]   ;;  %v3284_v47 = vld [vmem:[%s3501_s9 + $0x240] ss:$56 sps:$4 sm:$0xff]  }
  0x38   : > { %2819 = vmatprep.subr.bf16.mxu1 %v3209_v48  ;;  %2883 = vmatprep.subr.bf16.mxu0 %v3211_v49  ;;  %v3290_v48 = vld [vmem:[%s4121_s1 + $0x1f0] sm:$0xff]   ;;  %v3287_v49 = vld [vmem:[%s3501_s9 + $0x2ac] ss:$56 sps:$4 sm:$0xff]  }
  0x39   : > { %1826 = vmatprep.mubr.bf16.mxu1 %v3212_v51  ;;  %1794 = vmatprep.mubr.bf16.mxu0 %v3217_v53  ;;  %v3291_v51 = vld [vmem:[%s3501_s9 + $0x2b4] ss:$56 sps:$4 sm:$0xff]  }
  0x3a   : > { %v3296_v53 = vld [vmem:[%s4121_s1 + $0x230] sm:$0xff]  }
  0x3b   : > { %2820 = vmatpush3.bf16.msra.mxu1 %v3210_v50  ;;  %2884 = vmatpush3.bf16.msra.mxu0 %v3214_v52  ;;  %v3293_v50 = vld [vmem:[%s4121_s1 + $0x1b0] sm:$0xff]  }
  0x3c   : > { %2821 = vmatprep.subr.bf16.mxu1 %v3216_v55  ;;  %2885 = vmatprep.subr.bf16.mxu0 %v3221_v57  ;;  %v3295_v52 = vld [vmem:[%s4121_s1 + $0x270] sm:$0xff]   ;;  %v3289_v55 = vld [vmem:[%s3501_s9 + $0x2a8] ss:$56 sps:$4 sm:$0xff]  }
  0x3d   : > { %v3297_v57 = vld [vmem:[%s3501_s9 + $0x31c] ss:$56 sps:$4 sm:$0xff]  }
  0x3e   : > { %1827 = vmatmul.mubr.bf16.gmra.mrb[12].mxu1 %v3215_v54  ;;  %1795 = vmatmul.mubr.bf16.gmra.mrb[12].mxu0 %v3220_v58  ;;  %v3300_v54 = vld [vmem:[%s4121_s1 + $0x1f8] sm:$0xff]  }
  0x3f   : > { %2822 = vmatpush3.bf16.msra.mxu1 %v3219_v56  ;;  %2886 = vmatpush3.bf16.msra.mxu0 %v3222_v59  ;;  %v3294_v56 = vld [vmem:[%s3501_s9 + $0x2b0] ss:$56 sps:$4 sm:$0xff]   ;;  %v3301_v58 = vld [vmem:[%s3501_s9 + $0x324] ss:$56 sps:$4 sm:$0xff]  }
  0x40   : > { %2823 = vmatprep.subr.bf16.mxu1 %v3223_v60  ;;  %2887 = vmatprep.subr.bf16.mxu0 %v3225_v61  ;;  %v3303_v59 = vld [vmem:[%s4121_s1 + $0x1b8] sm:$0xff]  }
  0x41   : > { %1867 = vmatprep.mubr.bf16.mxu1 %v3228_v63  ;;  %1964 = vmatprep.mubr.bf16.mxu0 %v3233_v4  ;;  %v3305_v60 = vld [vmem:[%s4121_s1 + $0x278] sm:$0xff]   ;;  %v3439_v63 = vmov 0  }
  0x42   : > { %v3306_v61 = vld [vmem:[%s4121_s1 + $0x238] sm:$0xff]  }
  0x43   : > { %2824 = vmatpush3.bf16.msra.mxu1 %v3224_v62  ;;  %2888 = vmatpush3.bf16.msra.mxu0 %v3229_v0  ;;  %v3310_v62 = vld [vmem:[%s4121_s1 + $0x2c0] sm:$0xff]   ;;  %v3299_v0 = vld [vmem:[%s3501_s9 + $0x318] ss:$56 sps:$4 sm:$0xff]  }
  0x44   : > { %2937 = vmatprep.subr.bf16.mxu1 %v3230_v2  ;;  %3001 = vmatprep.subr.bf16.mxu0 %v3235_v6  ;;  %v3309_v2 = vld [vmem:[%s3501_s9 + $0x1c] ss:$56 sps:$4 sm:$0xff]   ;;  %v3307_v4 = vld [vmem:[%s3501_s9 + $0x18] ss:$56 sps:$4 sm:$0xff]   ;;  %v3314_v6 = vld [vmem:[%s4121_s1 + $0x280] sm:$0xff]  }
  0x46   : > { %1868 = vmatmul.mubr.bf16.vlgmr.msra.gmra.mrb[16].mxu1 %v3226_v1  ;;  %1965 = vmatmul.mubr.bf16.vlgmr.msra.gmra.mrb[16].mxu0 %v3231_v3  ;;  %v3304_v1 = vld [vmem:[%s3501_s9 + $0x320] ss:$56 sps:$4 sm:$0xff]   ;;  %v3313_v3 = vld [vmem:[%s3501_s9 + $0x24] ss:$56 sps:$4 sm:$0xff]  }
  0x47   : > { %2938 = vmatpush3.bf16.msra.mxu1 %v3234_v5  ;;  %3002 = vmatpush3.bf16.msra.mxu0 %v3236_v7  ;;  %v3311_v5 = vld [vmem:[%s3501_s9 + $0x20] ss:$56 sps:$4 sm:$0xff]  }
  0x48   : > { %1875 = vmatprep.mubr.bf16.mxu1 %v3237_v8  ;;  %2939 = vmatprep.subr.bf16.mxu1 %v3240_v9  ;;  %v3315_v7 = vld [vmem:[%s4121_s1 + $0x300] sm:$0xff]   ;;  %v3319_v9 = vld [vmem:[%s4121_s1 + $0x2c8] sm:$0xff]  }
  0x49   : > { %1972 = vmatprep.mubr.bf16.mxu0 %v3241_v11  ;;  %3003 = vmatprep.subr.bf16.mxu0 %v3245_v14  ;;  %v3316_v8 = vld [vmem:[%s3501_s9 + $0x8c] ss:$56 sps:$4 sm:$0xff]   ;;  %v3318_v14 = vld [vmem:[%s3501_s9 + $0x88] ss:$56 sps:$4 sm:$0xff]  }
  0x4a   : > { %v3322_v11 = vld [vmem:[%s4121_s1 + $0x288] sm:$0xff]  }
  0x4b   : > { %2940 = vmatpush3.bf16.msra.mxu1 %v3243_v12  ;;  %3004 = vmatpush3.bf16.msra.mxu0 %v3246_v15  ;;  %v3324_v12 = vld [vmem:[%s4121_s1 + $0x308] sm:$0xff]  }
  0x4c   : > { %2941 = vmatprep.subr.bf16.mxu1 %v3250_v17  ;;  %3005 = vmatprep.subr.bf16.mxu0 %v3255_v22  ;;  %v3323_v15 = vld [vmem:[%s3501_s9 + $0x90] ss:$56 sps:$4 sm:$0xff]   ;;  %v3329_v17 = vld [vmem:[%s3501_s9 + $0x104] ss:$56 sps:$4 sm:$0xff]  }
  0x4d   : > { %v3327_v22 = vld [vmem:[%s3501_s9 + $0xf8] ss:$56 sps:$4 sm:$0xff]  }
  0x4e   : > { %1876 = vmatmul.mubr.bf16.gmra.mrb[20].mxu1 %v3239_v10  ;;  %1973 = vmatmul.mubr.bf16.gmra.mrb[20].mxu0 %v3244_v13  ;;  %v3320_v10 = vld [vmem:[%s3501_s9 + $0x94] ss:$56 sps:$4 sm:$0xff]  }
  0x4f   : > { %1883 = vmatprep.mubr.bf16.mxu1 %v3247_v16  ;;  %1980 = vmatprep.mubr.bf16.mxu0 %v3251_v18  ;;  %v3328_v13 = vld [vmem:[%s4121_s1 + $0x2d0] sm:$0xff]  }
  0x50   : > { %2942 = vmatpush3.bf16.msra.mxu1 %v3253_v20  ;;  %3006 = vmatpush3.bf16.msra.mxu0 %v3256_v23  ;;  %v3325_v16 = vld [vmem:[%s3501_s9 + $0xfc] ss:$56 sps:$4 sm:$0xff]   ;;  %v3333_v23 = vld [vmem:[%s3501_s9 + $0x100] ss:$56 sps:$4 sm:$0xff]  }
  0x51   : > { %2943 = vmatprep.subr.bf16.mxu1 %v3260_v25  ;;  %3007 = vmatprep.subr.bf16.mxu0 %v3265_v29  ;;  %v3331_v18 = vld [vmem:[%s4121_s1 + $0x290] sm:$0xff]   ;;  %v3338_v20 = vld [vmem:[%s4121_s1 + $0x2d8] sm:$0xff]   ;;  %v3347_v25 = vld [vmem:[%s4121_s1 + $0x2e0] sm:$0xff]  }
  0x52   : > { %v3350_v29 = vld [vmem:[%s4121_s1 + $0x2a0] sm:$0xff]  }
  0x54   : > { %2944 = vmatpush3.bf16.msra.mxu1 %v3263_v27  ;;  %3008 = vmatpush3.bf16.msra.mxu0 %v3266_v30  ;;  %v3339_v27 = vld [vmem:[%s3501_s9 + $0x174] ss:$56 sps:$4 sm:$0xff]  }
  0x55   : > { %2945 = vmatprep.subr.bf16.mxu1 %v3270_v33  ;;  %3009 = vmatprep.subr.bf16.mxu0 %v3275_v36  ;;  %v3357_v30 = vld [vmem:[%s4121_s1 + $0x2e8] sm:$0xff]   ;;  %v3348_v36 = vld [vmem:[%s3501_s9 + $0x1e4] ss:$56 sps:$4 sm:$0xff]  }
  0x56   : > { %1884 = vmatmul.mubr.bf16.gmra.mrb[24].mxu1 %v3249_v19  ;;  %1981 = vmatmul.mubr.bf16.gmra.mrb[24].mxu0 %v3254_v21  ;;  %v3332_v19 = vld [vmem:[%s4121_s1 + $0x310] sm:$0xff]   ;;  %v3334_v21 = vld [vmem:[%s4121_s1 + $0x318] sm:$0xff]  }
  0x57   : > { %1891 = vmatprep.mubr.bf16.mxu1 %v3257_v24  ;;  %1988 = vmatprep.mubr.bf16.mxu0 %v3261_v26  ;;  %v3341_v24 = vld [vmem:[%s4121_s1 + $0x298] sm:$0xff]   ;;  %v3335_v26 = vld [vmem:[%s3501_s9 + $0x16c] ss:$56 sps:$4 sm:$0xff]   ;;  %v3342_v33 = vld [vmem:[%s3501_s9 + $0x170] ss:$56 sps:$4 sm:$0xff]  }
  0x58   : > { %2946 = vmatpush3.bf16.msra.mxu1 %v3273_v35  ;;  %3010 = vmatpush3.bf16.msra.mxu0 %v3276_v37  ;;  %v3344_v35 = vld [vmem:[%s3501_s9 + $0x1dc] ss:$56 sps:$4 sm:$0xff]  }
  0x59   : > { %2947 = vmatprep.subr.bf16.mxu1 %v3280_v41  ;;  %3011 = vmatprep.subr.bf16.mxu0 %v3285_v44  ;;  %v3366_v37 = vld [vmem:[%s4121_s1 + $0x2f0] sm:$0xff]   ;;  %v3354_v44 = vld [vmem:[%s3501_s9 + $0x24c] ss:$56 sps:$4 sm:$0xff]  }
  0x5a   : > { %v3346_v41 = vld [vmem:[%s3501_s9 + $0x1d8] ss:$56 sps:$4 sm:$0xff]  }
  0x5c   : > { %2948 = vmatpush3.bf16.msra.mxu1 %v3283_v43  ;;  %3012 = vmatpush3.bf16.msra.mxu0 %v3286_v45  ;;  %v3376_v43 = vld [vmem:[%s4121_s1 + $0x2f8] sm:$0xff]  }
  0x5d   : > { %2949 = vmatprep.subr.bf16.mxu1 %v3290_v48  ;;  %3013 = vmatprep.subr.bf16.mxu0 %v3295_v52  ;;  %v3379_v45 = vld [vmem:[%s4121_s1 + $0x2b8] sm:$0xff]   ;;  %v3372_v48 = vld [vmem:[%s4121_s1 + $0x348] sm:$0xff]  }
  0x5e   : > { %1892 = vmatmul.mubr.bf16.gmra.mrb[28].mxu1 %v3259_v28  ;;  %1989 = vmatmul.mubr.bf16.gmra.mrb[28].mxu0 %v3264_v31  ;;  %v3343_v28 = vld [vmem:[%s4121_s1 + $0x320] sm:$0xff]   ;;  %v3351_v31 = vld [vmem:[%s4121_s1 + $0x328] sm:$0xff]  }
  0x5f   : > { %1899 = vmatprep.mubr.bf16.mxu1 %v3267_v32  ;;  %1996 = vmatprep.mubr.bf16.mxu0 %v3271_v34  ;;  %v3337_v32 = vld [vmem:[%s3501_s9 + $0x168] ss:$56 sps:$4 sm:$0xff]   ;;  %v3367_v52 = vld [vmem:[%s3501_s9 + $0x2c4] ss:$56 sps:$4 sm:$0xff]  }
  0x60   : > { %2950 = vmatpush3.bf16.msra.mxu1 %v3293_v50  ;;  %3014 = vmatpush3.bf16.msra.mxu0 %v3296_v53  ;;  %v3360_v34 = vld [vmem:[%s4121_s1 + $0x2a8] sm:$0xff]   ;;  %v3381_v53 = vld [vmem:[%s4121_s1 + $0x350] sm:$0xff]  }
  0x61   : > { %2951 = vmatprep.subr.bf16.mxu1 %v3300_v54  ;;  %3015 = vmatprep.subr.bf16.mxu0 %v3305_v60  ;;  %v3361_v50 = vld [vmem:[%s3501_s9 + $0x250] ss:$56 sps:$4 sm:$0xff]   ;;  %v3385_v54 = vld [vmem:[%s4121_s1 + $0x358] sm:$0xff]  }
  0x62   : > { %v3380_v60 = vld [vmem:[%s3501_s9 + $0x330] ss:$56 sps:$4 sm:$0xff]  }
  0x64   : > { %2952 = vmatpush3.bf16.msra.mxu1 %v3303_v59  ;;  %3016 = vmatpush3.bf16.msra.mxu0 %v3306_v61  ;;  %v3375_v59 = vld [vmem:[%s3501_s9 + $0x328] ss:$56 sps:$4 sm:$0xff]   ;;  %v3384_v61 = vld [vmem:[%s3501_s9 + $0x2c] ss:$56 sps:$4 sm:$0xff]  }
  0x65   : > { %3065 = vmatprep.subr.bf16.mxu1 %v3310_v62  ;;  %2320 = vmatprep.subr.bf16.mxu0 %v3439_v63  ;;  %v3388_v62 = vld [vmem:[%s3501_s9 + $0x34] ss:$56 sps:$4 sm:$0xff]  }
  0x66   : > { %1900 = vmatmul.mubr.bf16.gmra.mrb[32].mxu1 %v3269_v38  ;;  %1997 = vmatmul.mubr.bf16.gmra.mrb[32].mxu0 %v3274_v39  ;;  %v3353_v38 = vld [vmem:[%s4121_s1 + $0x330] sm:$0xff]  }
  0x67   : > { %1907 = vmatprep.mubr.bf16.mxu1 %v3277_v40  ;;  %2004 = vmatprep.mubr.bf16.mxu0 %v3281_v42  ;;  %v3369_v39 = vld [vmem:[%s4121_s1 + $0x2b0] sm:$0xff]   ;;  %v3362_v40 = vld [vmem:[%s4121_s1 + $0x338] sm:$0xff]  }
  0x68   : > { %v3352_v42 = vld [vmem:[%s3501_s9 + $0x1e0] ss:$56 sps:$4 sm:$0xff]  }
  0x6e   : > { %1908 = vmatmul.mubr.bf16.gmra.mrb[36].mxu1 %v3279_v46  ;;  %2005 = vmatmul.mubr.bf16.gmra.mrb[36].mxu0 %v3284_v47  ;;  %v3358_v46 = vld [vmem:[%s3501_s9 + $0x254] ss:$56 sps:$4 sm:$0xff]   ;;  %v3370_v47 = vld [vmem:[%s4121_s1 + $0x340] sm:$0xff]  }
  0x6f   : > { %1915 = vmatprep.mubr.bf16.mxu1 %v3287_v49  ;;  %2012 = vmatprep.mubr.bf16.mxu0 %v3291_v51  ;;  %v3356_v49 = vld [vmem:[%s3501_s9 + $0x248] ss:$56 sps:$4 sm:$0xff]   ;;  %v3363_v51 = vld [vmem:[%s3501_s9 + $0x2bc] ss:$56 sps:$4 sm:$0xff]  }
  0x76   : > { %1916 = vmatmul.mubr.bf16.gmra.mrb[40].mxu1 %v3289_v55  ;;  %2013 = vmatmul.mubr.bf16.gmra.mrb[40].mxu0 %v3294_v56  ;;  %v3365_v55 = vld [vmem:[%s3501_s9 + $0x2b8] ss:$56 sps:$4 sm:$0xff]  }
  0x77   : > { %1923 = vmatprep.mubr.bf16.mxu1 %v3297_v57  ;;  %2020 = vmatprep.mubr.bf16.mxu0 %v3301_v58  ;;  %v3371_v56 = vld [vmem:[%s3501_s9 + $0x2c0] ss:$56 sps:$4 sm:$0xff]   ;;  %v3373_v57 = vld [vmem:[%s3501_s9 + $0x32c] ss:$56 sps:$4 sm:$0xff]  }
  0x78   : > { %v3377_v58 = vld [vmem:[%s3501_s9 + $0x334] ss:$56 sps:$4 sm:$0xff]  }
  0x7e   : > { %1924 = vmatmul.mubr.bf16.gmra.mrb[44].mxu1 %v3299_v0  ;;  %2021 = vmatmul.mubr.bf16.gmra.mrb[44].mxu0 %v3304_v1  ;;  %v3386_v0 = vld [vmem:[%s3501_s9 + $0x30] ss:$56 sps:$4 sm:$0xff]   ;;  %v3389_v1 = vld [vmem:[%s3501_s9 + $0x9c] ss:$56 sps:$4 sm:$0xff]  }
  0x7f   : > { %2061 = vmatprep.mubr.bf16.mxu1 %v3309_v2  ;;  %2158 = vmatprep.mubr.bf16.mxu0 %v3313_v3  ;;  %v3392_v2 = vld [vmem:[%s3501_s9 + $0xa4] ss:$56 sps:$4 sm:$0xff]   ;;  %v3391_v3 = vld [vmem:[%s3501_s9 + $0x98] ss:$56 sps:$4 sm:$0xff]  }
  0x86   : > { %2062 = vmatmul.mubr.bf16.vlgmr.msra.gmra.mrb[48].mxu1 %v3307_v4  ;;  %2159 = vmatmul.mubr.bf16.vlgmr.msra.gmra.mrb[48].mxu0 %v3311_v5  ;;  %v3394_v4 = vld [vmem:[%s3501_s9 + $0xa0] ss:$56 sps:$4 sm:$0xff]   ;;  %v3395_v5 = vld [vmem:[%s3501_s9 + $0x10c] ss:$56 sps:$4 sm:$0xff]  }
  0x87   : > { %3066 = vmatpush3.bf16.msra.mxu1 %v3314_v6  ;;  %2321 = vmatpush1.bf16.msra.mxu0 %v3315_v7  ;;  %v3398_v6 = vld [vmem:[%s3501_s9 + $0x114] ss:$56 sps:$4 sm:$0xff]   ;;  %v3397_v7 = vld [vmem:[%s3501_s9 + $0x108] ss:$56 sps:$4 sm:$0xff]  }
  0x88   : > { %2069 = vmatprep.mubr.bf16.mxu1 %v3316_v8  ;;  %3067 = vmatprep.subr.bf16.mxu1 %v3319_v9  ;;  %v3400_v8 = vld [vmem:[%s3501_s9 + $0x110] ss:$56 sps:$4 sm:$0xff]   ;;  %v3401_v9 = vld [vmem:[%s3501_s9 + $0x17c] ss:$56 sps:$4 sm:$0xff]  }
  0x89   : > { %2166 = vmatprep.mubr.bf16.mxu0 %v3320_v10  ;;  %2322 = vmatprep.subr.bf16.mxu0 %v3439_v63  ;;  %v3404_v10 = vld [vmem:[%s3501_s9 + $0x184] ss:$56 sps:$4 sm:$0xff]  }
  0x8b   : > { %3068 = vmatpush3.bf16.msra.mxu1 %v3322_v11  ;;  %2323 = vmatpush1.bf16.msra.mxu0 %v3324_v12  ;;  %v3403_v11 = vld [vmem:[%s3501_s9 + $0x178] ss:$56 sps:$4 sm:$0xff]  }
  0x8c   : > { %3069 = vmatprep.subr.bf16.mxu1 %v3328_v13  ;;  %2324 = vmatprep.subr.bf16.mxu0 %v3439_v63  ;;  %v3406_v12 = vld [vmem:[%s3501_s9 + $0x180] ss:$56 sps:$4 sm:$0xff]   ;;  %v3407_v13 = vld [vmem:[%s3501_s9 + $0x1ec] ss:$56 sps:$4 sm:$0xff]  }
  0x8e   : > { %2070 = vmatmul.mubr.bf16.gmra.mrb[52].mxu1 %v3318_v14  ;;  %2167 = vmatmul.mubr.bf16.gmra.mrb[52].mxu0 %v3323_v15  ;;  %v3410_v14 = vld [vmem:[%s3501_s9 + $0x1f4] ss:$56 sps:$4 sm:$0xff]   ;;  %v3409_v15 = vld [vmem:[%s3501_s9 + $0x1e8] ss:$56 sps:$4 sm:$0xff]  }
  0x8f   : > { %2077 = vmatprep.mubr.bf16.mxu1 %v3325_v16  ;;  %2174 = vmatprep.mubr.bf16.mxu0 %v3329_v17  ;;  %v3412_v16 = vld [vmem:[%s3501_s9 + $0x1f0] ss:$56 sps:$4 sm:$0xff]   ;;  %v3413_v17 = vld [vmem:[%s3501_s9 + $0x25c] ss:$56 sps:$4 sm:$0xff]  }
  0x90   : > { %3070 = vmatpush3.bf16.msra.mxu1 %v3331_v18  ;;  %2325 = vmatpush1.bf16.msra.mxu0 %v3332_v19  ;;  %v3416_v18 = vld [vmem:[%s3501_s9 + $0x264] ss:$56 sps:$4 sm:$0xff]   ;;  %v3415_v19 = vld [vmem:[%s3501_s9 + $0x258] ss:$56 sps:$4 sm:$0xff]  }
  0x91   : > { %2326 = vmatprep.subr.bf16.mxu0 %v3439_v63  ;;  %3071 = vmatprep.subr.bf16.mxu1 %v3338_v20  ;;  %v3418_v20 = vld [vmem:[%s3501_s9 + $0x260] ss:$56 sps:$4 sm:$0xff]  }
  0x94   : > { %2327 = vmatpush1.bf16.msra.mxu0 %v3334_v21  ;;  %3072 = vmatpush3.bf16.msra.mxu1 %v3341_v24  ;;  %v3419_v21 = vld [vmem:[%s3501_s9 + $0x2cc] ss:$56 sps:$4 sm:$0xff]   ;;  %v3424_v24 = vld [vmem:[%s3501_s9 + $0x2d0] ss:$56 sps:$4 sm:$0xff]  }
  0x95   : > { %2328 = vmatprep.subr.bf16.mxu0 %v3439_v63  ;;  %3073 = vmatprep.subr.bf16.mxu1 %v3347_v25  ;;  %v3425_v25 = vld [vmem:[%s3501_s9 + $0x33c] ss:$56 sps:$4 sm:$0xff]  }
  0x96   : > { %2078 = vmatmul.mubr.bf16.gmra.mrb[56].mxu1 %v3327_v22  ;;  %2175 = vmatmul.mubr.bf16.gmra.mrb[56].mxu0 %v3333_v23  ;;  %v3422_v22 = vld [vmem:[%s3501_s9 + $0x2d4] ss:$56 sps:$4 sm:$0xff]   ;;  %v3421_v23 = vld [vmem:[%s3501_s9 + $0x2c8] ss:$56 sps:$4 sm:$0xff]  }
  0x97   : > { %2085 = vmatprep.mubr.bf16.mxu1 %v3335_v26  ;;  %2182 = vmatprep.mubr.bf16.mxu0 %v3339_v27  ;;  %v3428_v26 = vld [vmem:[%s3501_s9 + $0x344] ss:$56 sps:$4 sm:$0xff]  }
  0x98   : > { %2329 = vmatpush1.bf16.msra.mxu0 %v3343_v28  ;;  %3074 = vmatpush3.bf16.msra.mxu1 %v3350_v29 }
  0x99   : > { %2330 = vmatprep.subr.bf16.mxu0 %v3439_v63  ;;  %3075 = vmatprep.subr.bf16.mxu1 %v3357_v30 }
  0x9c   : > { %2331 = vmatpush1.bf16.msra.mxu0 %v3351_v31  ;;  %3076 = vmatpush3.bf16.msra.mxu1 %v3360_v34  ;;  %v3427_v31 = vld [vmem:[%s3501_s9 + $0x338] ss:$56 sps:$4 sm:$0xff]  }
  0x9d   : > { %2332 = vmatprep.subr.bf16.mxu0 %v3439_v63  ;;  %3077 = vmatprep.subr.bf16.mxu1 %v3366_v37 }
  0x9e   : > { %2086 = vmatmul.mubr.bf16.gmra.mrb[60].mxu1 %v3337_v32  ;;  %2183 = vmatmul.mubr.bf16.gmra.mrb[60].mxu0 %v3342_v33  ;;  %v3430_v32 = vld [vmem:[%s3501_s9 + $0x340] ss:$56 sps:$4 sm:$0xff]  }
  0x9f   : > { %2093 = vmatprep.mubr.bf16.mxu1 %v3344_v35  ;;  %2190 = vmatprep.mubr.bf16.mxu0 %v3348_v36 }
  0xa0   : > { %2333 = vmatpush1.bf16.msra.mxu0 %v3353_v38  ;;  %3078 = vmatpush3.bf16.msra.mxu1 %v3369_v39 }
  0xa1   : > { %2334 = vmatprep.subr.bf16.mxu0 %v3439_v63  ;;  %3079 = vmatprep.subr.bf16.mxu1 %v3376_v43 }
  0xa4   : > { %2335 = vmatpush1.bf16.msra.mxu0 %v3362_v40  ;;  %3080 = vmatpush3.bf16.msra.mxu1 %v3379_v45 }
  0xa5   : > { %2336 = vmatprep.subr.bf16.mxu0 %v3439_v63 }
  0xa6   : > { %2094 = vmatmul.mubr.bf16.gmra.mrb[64].mxu1 %v3346_v41  ;;  %2191 = vmatmul.mubr.bf16.gmra.mrb[64].mxu0 %v3352_v42 }
  0xa7   : > { %2101 = vmatprep.mubr.bf16.mxu1 %v3354_v44  ;;  %2198 = vmatprep.mubr.bf16.mxu0 %v3358_v46 }
  0xa8   : > { %2337 = vmatpush1.bf16.msra.mxu0 %v3370_v47 }
  0xa9   : > { %2338 = vmatprep.subr.bf16.mxu0 %v3439_v63 }
  0xac   : > { %2339 = vmatpush1.bf16.msra.mxu0 %v3372_v48 }
  0xad   : > { %2340 = vmatprep.subr.bf16.mxu0 %v3439_v63 }
  0xae   : > { %2102 = vmatmul.mubr.bf16.gmra.mrb[68].mxu1 %v3356_v49  ;;  %2199 = vmatmul.mubr.bf16.gmra.mrb[68].mxu0 %v3361_v50 }
  0xaf   : > { %2109 = vmatprep.mubr.bf16.mxu1 %v3363_v51  ;;  %2206 = vmatprep.mubr.bf16.mxu0 %v3367_v52 }
  0xb0   : > { %2341 = vmatpush1.bf16.msra.mxu0 %v3381_v53 }
  0xb1   : > { %2342 = vmatprep.subr.bf16.mxu0 %v3439_v63  ;;  %v3382_v63 = vld [vmem:[%s3501_s9 + $0x28] ss:$56 sps:$4 sm:$0xff]  }
  0xb4   : > { %2343 = vmatpush1.bf16.msra.mxu0 %v3385_v54 }
  0xb6   : > { %2110 = vmatmul.mubr.bf16.gmra.mrb[72].mxu1 %v3365_v55  ;;  %2207 = vmatmul.mubr.bf16.gmra.mrb[72].mxu0 %v3371_v56 }
  0xb7   : > { %2117 = vmatprep.mubr.bf16.mxu1 %v3373_v57  ;;  %2214 = vmatprep.mubr.bf16.mxu0 %v3377_v58 }
  0xbe   : > { %2118 = vmatmul.mubr.bf16.gmra.mrb[76].mxu1 %v3375_v59  ;;  %2215 = vmatmul.mubr.bf16.gmra.mrb[76].mxu0 %v3380_v60 }
  0xbf   : > { %2255 = vmatprep.mubr.bf16.mxu1 %v3384_v61  ;;  %2735 = vmatprep.mubr.msk.bf16.mxu0 %vm1713_vm0, %v3388_v62 }
  0xc6   : > { %2256 = vmatmul.mubr.bf16.vlgmr.msra.gmra.mrb[80].mxu1 %v3382_v63  ;;  %2353 = vmatmul.mubr.bf16.vlgmr.msra.gmra.mrb[80].mxu0 %v3386_v0 }
  0xc7   : > { %2263 = vmatprep.mubr.bf16.mxu1 %v3389_v1  ;;  %2736 = vmatprep.mubr.msk.bf16.mxu0 %vm1713_vm0, %v3392_v2 }
  0xce   : > { %2264 = vmatmul.mubr.bf16.gmra.mrb[84].mxu1 %v3391_v3  ;;  %2361 = vmatmul.mubr.bf16.gmra.mrb[84].mxu0 %v3394_v4 }
  0xcf   : > { %2271 = vmatprep.mubr.bf16.mxu1 %v3395_v5  ;;  %2737 = vmatprep.mubr.msk.bf16.mxu0 %vm1713_vm0, %v3398_v6 }
  0xd6   : > { %2272 = vmatmul.mubr.bf16.gmra.mrb[88].mxu1 %v3397_v7  ;;  %2369 = vmatmul.mubr.bf16.gmra.mrb[88].mxu0 %v3400_v8 }
  0xd7   : > { %2279 = vmatprep.mubr.bf16.mxu1 %v3401_v9  ;;  %2738 = vmatprep.mubr.msk.bf16.mxu0 %vm1713_vm0, %v3404_v10 }
  0xde   : > { %2280 = vmatmul.mubr.bf16.gmra.mrb[92].mxu1 %v3403_v11  ;;  %2377 = vmatmul.mubr.bf16.gmra.mrb[92].mxu0 %v3406_v12 }
  0xdf   : > { %2287 = vmatprep.mubr.bf16.mxu1 %v3407_v13  ;;  %2739 = vmatprep.mubr.msk.bf16.mxu0 %vm1713_vm0, %v3410_v14 }
  0xe6   : > { %2288 = vmatmul.mubr.bf16.gmra.mrb[96].mxu1 %v3409_v15  ;;  %2385 = vmatmul.mubr.bf16.gmra.mrb[96].mxu0 %v3412_v16  ;;  %v3955_v15 = vld [vmem:[%s4122_s2] ss:$0 sm:$0xff] }
  0xe7   : > { %2295 = vmatprep.mubr.bf16.mxu1 %v3413_v17  ;;  %2740 = vmatprep.mubr.msk.bf16.mxu0 %vm1713_vm0, %v3416_v18 }
  0xee   : > { %2296 = vmatmul.mubr.bf16.gmra.mrb[100].mxu1 %v3415_v19  ;;  %2393 = vmatmul.mubr.bf16.gmra.mrb[100].mxu0 %v3418_v20 }
  0xef   : > { %2303 = vmatprep.mubr.bf16.mxu1 %v3419_v21  ;;  %2741 = vmatprep.mubr.msk.bf16.mxu0 %vm1713_vm0, %v3422_v22 }
  0xf6   : > { %2304 = vmatmul.mubr.bf16.gmra.mrb[104].mxu1 %v3421_v23  ;;  %2401 = vmatmul.mubr.bf16.gmra.mrb[104].mxu0 %v3424_v24 }
  0xf7   : > { %2311 = vmatprep.mubr.bf16.mxu1 %v3425_v25  ;;  %2742 = vmatprep.mubr.msk.bf16.mxu0 %vm1713_vm0, %v3428_v26 }
  0xf9   : > { %v2785_v27 = vpop.f32.mrb[0].mxu1  ;;  %v2761_v28 = vpop.f32.mrb[0].mxu0 }
  0xfa   : > { %v2786_v29 = vpop.f32.mrb[1].mxu1  ;;  %v2762_v30 = vpop.f32.mrb[1].mxu0 }
  0xfb   : > { %v3932_v33 = vadd.f32 %v2786_v29, %v2785_v27  ;;  %v2788_v34 = vpop.f32.mrb[2].mxu1  ;;  %v2763_v35 = vadd.f32 %v2762_v30, %v2761_v28  ;;  %v2764_v36 = vpop.f32.mrb[2].mxu0 }
  0xfc   : > { %v2789_v37 = vpop.f32.mrb[3].mxu1  ;;  %v2765_v38 = vpop.f32.mrb[3].mxu0 }
  0xfd   : > { %v3934_v39 = vadd.f32 %v2789_v37, %v2788_v34  ;;  %v2766_v40 = vadd.f32 %v2765_v38, %v2764_v36  ;;  %v1773_v18 = vadd.f32 %v2763_v35, %v3955_v15 }
  0xfe   : > { %2312 = vmatmul.mubr.bf16.gmra.mrb[108].mxu1 %v3427_v31  ;;  %2409 = vmatmul.mubr.bf16.gmra.mrb[108].mxu0 %v3430_v32 }
  0xff   : > { %v1776_v25 = vadd.f32 %v2766_v40, %v3955_v15 }
 0x101   : > { %v2791_v41 = vpop.f32.mrb[4].mxu1  ;;  %v2767_v42 = vpop.f32.mrb[4].mxu0 }
 0x102   : > { %v2792_v43 = vpop.f32.mrb[5].mxu1  ;;  %v2768_v44 = vpop.f32.mrb[5].mxu0 }
 0x103   : > { %v3936_v45 = vadd.f32 %v2792_v43, %v2791_v41  ;;  %v2794_v46 = vpop.f32.mrb[6].mxu1  ;;  %v2769_v47 = vadd.f32 %v2768_v44, %v2767_v42  ;;  %v2770_v48 = vpop.f32.mrb[6].mxu0 }
 0x104   : > { %v2795_v49 = vpop.f32.mrb[7].mxu1  ;;  %v2771_v50 = vpop.f32.mrb[7].mxu0 }
 0x105   : > { %v3938_v51 = vadd.f32 %v2795_v49, %v2794_v46  ;;  %v2772_v52 = vadd.f32 %v2771_v50, %v2770_v48  ;;  %v1781_v37 = vadd.f32 %v2769_v47, %v3955_v15 }
 0x107   : > { %v1784_v46 = vadd.f32 %v2772_v52, %v3955_v15 }
 0x109   : > { %v2797_v53 = vpop.f32.mrb[8].mxu1  ;;  %v2773_v54 = vpop.f32.mrb[8].mxu0 }
 0x10a   : > { %v2798_v55 = vpop.f32.mrb[9].mxu1  ;;  %v2774_v56 = vpop.f32.mrb[9].mxu0 }
 0x10b   : > { %v3940_v57 = vadd.f32 %v2798_v55, %v2797_v53  ;;  %v2800_v58 = vpop.f32.mrb[10].mxu1  ;;  %v2775_v59 = vadd.f32 %v2774_v56, %v2773_v54  ;;  %v2776_v60 = vpop.f32.mrb[10].mxu0 }
 0x10c   : > { %v2801_v61 = vpop.f32.mrb[11].mxu1  ;;  %v2777_v62 = vpop.f32.mrb[11].mxu0 }
 0x10d   : > { %v3942_v63 = vadd.f32 %v2801_v61, %v2800_v58  ;;  %v2778_v0 = vadd.f32 %v2777_v62, %v2776_v60  ;;  %v1789_v61 = vadd.f32 %v2775_v59, %v3955_v15 }
 0x111   : > { %v2803_v1 = vpop.f32.mrb[12].mxu1  ;;  %v2779_v2 = vpop.f32.mrb[12].mxu0 }
 0x112   : > { %v2804_v3 = vpop.f32.mrb[13].mxu1  ;;  %v2780_v4 = vpop.f32.mrb[13].mxu0 }
 0x113   : > { %v3944_v5 = vadd.f32 %v2804_v3, %v2803_v1  ;;  %v2806_v6 = vpop.f32.mrb[14].mxu1  ;;  %v3946_v7 = vadd.f32 %v2780_v4, %v2779_v2  ;;  %v2782_v8 = vpop.f32.mrb[14].mxu0 }
 0x114   : > { %v2807_v9 = vpop.f32.mrb[15].mxu1  ;;  %v2783_v10 = vpop.f32.mrb[15].mxu0 }
 0x115   : > { %v3948_v11 = vadd.f32 %v2807_v9, %v2806_v6  ;;  %v3950_v12 = vadd.f32 %v2783_v10, %v2782_v8  ;;  %v1792_v6 = vadd.f32 %v2778_v0, %v3955_v15 }
 0x119   : > { %v2825_v13 = vpop.f32.mrb[16].mxu1  ;;  %v2889_v14 = vpop.f32.mrb[16].mxu0 }
 0x11a   : > { %v2826_v16 = vpop.f32.mrb[17].mxu1  ;;  %v2890_v17 = vpop.f32.mrb[17].mxu0 }
 0x11b   : > { %v2827_v19 = vadd.f32 %v2826_v16, %v2825_v13  ;;  %v2828_v20 = vpop.f32.mrb[18].mxu1  ;;  %v2891_v21 = vadd.f32 %v2890_v17, %v2889_v14  ;;  %v2892_v22 = vpop.f32.mrb[18].mxu0 }
 0x11c   : > { %v2829_v23 = vpop.f32.mrb[19].mxu1  ;;  %v2893_v24 = vpop.f32.mrb[19].mxu0 }
 0x11d   : > { %v1870_v26 = vadd.f32 %v2827_v19, %v1773_v18  ;;  %v2830_v27 = vadd.f32 %v2829_v23, %v2828_v20  ;;  %v2894_v28 = vadd.f32 %v2893_v24, %v2892_v22  ;;  %v1797_v20 = vadd.f32 %v3946_v7, %v3955_v15 }
 0x11f   : > { %v1873_v29 = vadd.f32 %v2830_v27, %v1776_v25  ;;  %v3959_v30 = vadd.f32 %v2891_v21, %v1870_v26  ;;  %v1800_v26 = vadd.f32 %v3950_v12, %v3955_v15 }
 0x121   : > { %v3961_v31 = vadd.f32 %v2894_v28, %v1873_v29  ;;  %v2831_v32 = vpop.f32.mrb[20].mxu1  ;;  %v2895_v34 = vpop.f32.mrb[20].mxu0 }
 0x122   : > { %v2832_v36 = vpop.f32.mrb[21].mxu1  ;;  %v2896_v35 = vpop.f32.mrb[21].mxu0 }
 0x123   : > { %v2833_v38 = vadd.f32 %v2832_v36, %v2831_v32  ;;  %v2834_v41 = vpop.f32.mrb[22].mxu1  ;;  %v2897_v42 = vadd.f32 %v2896_v35, %v2895_v34  ;;  %v2898_v43 = vpop.f32.mrb[22].mxu0 }
 0x124   : > { %v2835_v44 = vpop.f32.mrb[23].mxu1  ;;  %v2899_v40 = vpop.f32.mrb[23].mxu0 }
 0x125   : > { %v1878_v48 = vadd.f32 %v2833_v38, %v1781_v37  ;;  %v2836_v49 = vadd.f32 %v2835_v44, %v2834_v41  ;;  %v2900_v50 = vadd.f32 %v2899_v40, %v2898_v43  ;;  %v1805_v41 = vadd.f32 %v3932_v33, %v3955_v15 }
 0x127   : > { %v1881_v53 = vadd.f32 %v2836_v49, %v1784_v46  ;;  %v3965_v54 = vadd.f32 %v2897_v42, %v1878_v48  ;;  %v1808_v48 = vadd.f32 %v3934_v39, %v3955_v15 }
 0x129   : > { %v3967_v55 = vadd.f32 %v2900_v50, %v1881_v53  ;;  %v2837_v56 = vpop.f32.mrb[24].mxu1  ;;  %v2901_v58 = vpop.f32.mrb[24].mxu0 }
 0x12a   : > { %v2838_v60 = vpop.f32.mrb[25].mxu1  ;;  %v2902_v47 = vpop.f32.mrb[25].mxu0 }
 0x12b   : > { %v2839_v62 = vadd.f32 %v2838_v60, %v2837_v56  ;;  %v2840_v1 = vpop.f32.mrb[26].mxu1  ;;  %v2903_v2 = vadd.f32 %v2902_v47, %v2901_v58  ;;  %v2904_v3 = vpop.f32.mrb[26].mxu0 }
 0x12c   : > { %v2841_v4 = vpop.f32.mrb[27].mxu1  ;;  %v2905_v52 = vpop.f32.mrb[27].mxu0 }
 0x12d   : > { %v1886_v8 = vadd.f32 %v2839_v62, %v1789_v61  ;;  %v2842_v9 = vadd.f32 %v2841_v4, %v2840_v1  ;;  %v2906_v10 = vadd.f32 %v2905_v52, %v2904_v3  ;;  %v1813_v1 = vadd.f32 %v3936_v45, %v3955_v15 }
 0x12f   : > { %v1889_v13 = vadd.f32 %v2842_v9, %v1792_v6  ;;  %v3971_v14 = vadd.f32 %v2903_v2, %v1886_v8  ;;  %v1816_v8 = vadd.f32 %v3938_v51, %v3955_v15 }
 0x131   : > { %v3973_v16 = vadd.f32 %v2906_v10, %v1889_v13  ;;  %v2843_v17 = vpop.f32.mrb[28].mxu1  ;;  %v2907_v18 = vpop.f32.mrb[28].mxu0 }
 0x132   : > { %v2844_v19 = vpop.f32.mrb[29].mxu1  ;;  %v2908_v59 = vpop.f32.mrb[29].mxu0 }
 0x133   : > { %v2845_v21 = vadd.f32 %v2844_v19, %v2843_v17  ;;  %v2846_v22 = vpop.f32.mrb[30].mxu1  ;;  %v2909_v23 = vadd.f32 %v2908_v59, %v2907_v18  ;;  %v2910_v24 = vpop.f32.mrb[30].mxu0 }
 0x134   : > { %v2847_v0 = vpop.f32.mrb[31].mxu1  ;;  %v2911_v25 = vpop.f32.mrb[31].mxu0 }
 0x135   : > { %v1894_v27 = vadd.f32 %v2845_v21, %v1797_v20  ;;  %v2848_v28 = vadd.f32 %v2847_v0, %v2846_v22  ;;  %v2912_v29 = vadd.f32 %v2911_v25, %v2910_v24  ;;  %v1821_v22 = vadd.f32 %v3940_v57, %v3955_v15 }
 0x137   : > { %v1897_v32 = vadd.f32 %v2848_v28, %v1800_v26  ;;  %v3979_v34 = vadd.f32 %v2909_v23, %v1894_v27  ;;  %v1824_v27 = vadd.f32 %v3942_v63, %v3955_v15 }
 0x139   : > { %v3981_v36 = vadd.f32 %v2912_v29, %v1897_v32  ;;  %v2849_v35 = vpop.f32.mrb[32].mxu1  ;;  %v2913_v37 = vpop.f32.mrb[32].mxu0 }
 0x13a   : > { %v2850_v7 = vpop.f32.mrb[33].mxu1  ;;  %v2914_v38 = vpop.f32.mrb[33].mxu0 }
 0x13b   : > { %v2851_v42 = vadd.f32 %v2850_v7, %v2849_v35  ;;  %v2852_v43 = vpop.f32.mrb[34].mxu1  ;;  %v2915_v44 = vadd.f32 %v2914_v38, %v2913_v37  ;;  %v2916_v40 = vpop.f32.mrb[34].mxu0 }
 0x13c   : > { %v2853_v12 = vpop.f32.mrb[35].mxu1  ;;  %v2917_v46 = vpop.f32.mrb[35].mxu0 }
 0x13d   : > { %v1902_v49 = vadd.f32 %v2851_v42, %v1805_v41  ;;  %v2854_v50 = vadd.f32 %v2853_v12, %v2852_v43  ;;  %v2918_v53 = vadd.f32 %v2917_v46, %v2916_v40  ;;  %v1829_v43 = vadd.f32 %v3944_v5, %v3955_v15 }
 0x13f   : > { %v1905_v56 = vadd.f32 %v2854_v50, %v1808_v48  ;;  %v3987_v58 = vadd.f32 %v2915_v44, %v1902_v49  ;;  %v1832_v49 = vadd.f32 %v3948_v11, %v3955_v15 }
 0x141   : > { %v3989_v60 = vadd.f32 %v2918_v53, %v1905_v56  ;;  %v2855_v47 = vpop.f32.mrb[36].mxu1  ;;  %v2919_v61 = vpop.f32.mrb[36].mxu0 }
 0x142   : > { %v2856_v33 = vpop.f32.mrb[37].mxu1  ;;  %v2920_v62 = vpop.f32.mrb[37].mxu0 }
 0x143   : > { %v2857_v2 = vadd.f32 %v2856_v33, %v2855_v47  ;;  %v2858_v3 = vpop.f32.mrb[38].mxu1  ;;  %v2921_v4 = vadd.f32 %v2920_v62, %v2919_v61  ;;  %v2922_v52 = vpop.f32.mrb[38].mxu0 }
 0x144   : > { %v2859_v39 = vpop.f32.mrb[39].mxu1  ;;  %v2923_v6 = vpop.f32.mrb[39].mxu0 }
 0x145   : > { %v1910_v9 = vadd.f32 %v2857_v2, %v1813_v1  ;;  %v2860_v10 = vadd.f32 %v2859_v39, %v2858_v3  ;;  %v2924_v13 = vadd.f32 %v2923_v6, %v2922_v52 }
 0x147   : > { %v1913_v17 = vadd.f32 %v2860_v10, %v1816_v8  ;;  %v3995_v18 = vadd.f32 %v2921_v4, %v1910_v9 }
 0x149   : > { %v3997_v19 = vadd.f32 %v2924_v13, %v1913_v17  ;;  %v2861_v59 = vpop.f32.mrb[40].mxu1  ;;  %v2925_v20 = vpop.f32.mrb[40].mxu0 }
 0x14a   : > { %v2862_v45 = vpop.f32.mrb[41].mxu1  ;;  %v2926_v21 = vpop.f32.mrb[41].mxu0 }
 0x14b   : > { %v2863_v23 = vadd.f32 %v2862_v45, %v2861_v59  ;;  %v2864_v24 = vpop.f32.mrb[42].mxu1  ;;  %v2927_v0 = vadd.f32 %v2926_v21, %v2925_v20  ;;  %v2928_v25 = vpop.f32.mrb[42].mxu0 }
 0x14c   : > { %v2865_v51 = vpop.f32.mrb[43].mxu1  ;;  %v2929_v26 = vpop.f32.mrb[43].mxu0 }
 0x14d   : > { %v1918_v28 = vadd.f32 %v2863_v23, %v1821_v22  ;;  %v2866_v29 = vadd.f32 %v2865_v51, %v2864_v24  ;;  %v2930_v32 = vadd.f32 %v2929_v26, %v2928_v25 }
 0x14f   : > { %v1921_v35 = vadd.f32 %v2866_v29, %v1824_v27  ;;  %v4003_v37 = vadd.f32 %v2927_v0, %v1918_v28 }
 0x151   : > { %v4005_v7 = vadd.f32 %v2930_v32, %v1921_v35  ;;  %v2867_v38 = vpop.f32.mrb[44].mxu1  ;;  %v2931_v41 = vpop.f32.mrb[44].mxu0 }
 0x152   : > { %v2868_v57 = vpop.f32.mrb[45].mxu1  ;;  %v2932_v42 = vpop.f32.mrb[45].mxu0 }
 0x153   : > { %v2869_v44 = vadd.f32 %v2868_v57, %v2867_v38  ;;  %v2870_v40 = vpop.f32.mrb[46].mxu1  ;;  %v2933_v12 = vadd.f32 %v2932_v42, %v2931_v41  ;;  %v2934_v46 = vpop.f32.mrb[46].mxu0 }
 0x154   : > { %v2871_v63 = vpop.f32.mrb[47].mxu1  ;;  %v2935_v48 = vpop.f32.mrb[47].mxu0 }
 0x155   : > { %v1926_v50 = vadd.f32 %v2869_v44, %v1829_v43  ;;  %v2872_v53 = vadd.f32 %v2871_v63, %v2870_v40  ;;  %v2936_v56 = vadd.f32 %v2935_v48, %v2934_v46 }
 0x157   : > { %v1929_v47 = vadd.f32 %v2872_v53, %v1832_v49  ;;  %v4011_v61 = vadd.f32 %v2933_v12, %v1926_v50 }
 0x159   : > { %v4013_v33 = vadd.f32 %v2936_v56, %v1929_v47  ;;  %v2953_v62 = vpop.f32.mrb[48].mxu1  ;;  %v3017_v1 = vpop.f32.mrb[48].mxu0 }
 0x15a   : > { %v2954_v5 = vpop.f32.mrb[49].mxu1  ;;  %v3018_v2 = vpop.f32.mrb[49].mxu0 }
 0x15b   : > { %v2955_v3 = vadd.f32 %v2954_v5, %v2953_v62  ;;  %v2956_v4 = vpop.f32.mrb[50].mxu1  ;;  %v3019_v52 = vadd.f32 %v3018_v2, %v3017_v1  ;;  %v3020_v39 = vpop.f32.mrb[50].mxu0 }
 0x15c   : > { %v2957_v6 = vpop.f32.mrb[51].mxu1  ;;  %v3021_v8 = vpop.f32.mrb[51].mxu0 }
 0x15d   : > { %v2064_v11 = vadd.f32 %v2955_v3, %v3959_v30  ;;  %v2958_v15 = vadd.f32 %v2957_v6, %v2956_v4  ;;  %v3022_v9 = vadd.f32 %v3021_v8, %v3020_v39 }
 0x15f   : > { %v2067_v10 = vadd.f32 %v2958_v15, %v3961_v31  ;;  %v4017_v13 = vadd.f32 %v3019_v52, %v2064_v11 }
 0x161   : > { %v4019_v17 = vadd.f32 %v3022_v9, %v2067_v10  ;;  %v2959_v59 = vpop.f32.mrb[52].mxu1  ;;  %v3023_v20 = vpop.f32.mrb[52].mxu0 }
 0x162   : > { %v2960_v45 = vpop.f32.mrb[53].mxu1  ;;  %v3024_v21 = vpop.f32.mrb[53].mxu0 }
 0x163   : > { %v2961_v22 = vadd.f32 %v2960_v45, %v2959_v59  ;;  %v2962_v23 = vpop.f32.mrb[54].mxu1  ;;  %v3025_v24 = vadd.f32 %v3024_v21, %v3023_v20  ;;  %v3026_v0 = vpop.f32.mrb[54].mxu0 }
 0x164   : > { %v2963_v25 = vpop.f32.mrb[55].mxu1  ;;  %v3027_v51 = vpop.f32.mrb[55].mxu0 }
 0x165   : > { %v2072_v30 = vadd.f32 %v2961_v22, %v3965_v54  ;;  %v2964_v26 = vadd.f32 %v2963_v25, %v2962_v23  ;;  %v3028_v27 = vadd.f32 %v3027_v51, %v3026_v0 }
 0x167   : > { %v2075_v31 = vadd.f32 %v2964_v26, %v3967_v55  ;;  %v4023_v28 = vadd.f32 %v3025_v24, %v2072_v30 }
 0x169   : > { %v4025_v29 = vadd.f32 %v3028_v27, %v2075_v31  ;;  %v2965_v32 = vpop.f32.mrb[56].mxu1  ;;  %v3029_v35 = vpop.f32.mrb[56].mxu0 }
 0x16a   : > { %v2966_v38 = vpop.f32.mrb[57].mxu1  ;;  %v3030_v41 = vpop.f32.mrb[57].mxu0 }
 0x16b   : > { %v2967_v57 = vadd.f32 %v2966_v38, %v2965_v32  ;;  %v2968_v42 = vpop.f32.mrb[58].mxu1  ;;  %v3031_v43 = vadd.f32 %v3030_v41, %v3029_v35  ;;  %v3032_v44 = vpop.f32.mrb[58].mxu0 }
 0x16c   : > { %v2969_v40 = vpop.f32.mrb[59].mxu1  ;;  %v3033_v12 = vpop.f32.mrb[59].mxu0 }
 0x16d   : > { %v2080_v54 = vadd.f32 %v2967_v57, %v3971_v14  ;;  %v2970_v46 = vadd.f32 %v2969_v40, %v2968_v42  ;;  %v3034_v63 = vadd.f32 %v3033_v12, %v3032_v44 }
 0x16f   : > { %v2083_v55 = vadd.f32 %v2970_v46, %v3973_v16  ;;  %v4029_v48 = vadd.f32 %v3031_v43, %v2080_v54 }
 0x171   : > { %v4031_v49 = vadd.f32 %v3034_v63, %v2083_v55  ;;  %v2971_v50 = vpop.f32.mrb[60].mxu1  ;;  %v3035_v53 = vpop.f32.mrb[60].mxu0 }
 0x172   : > { %v2972_v56 = vpop.f32.mrb[61].mxu1  ;;  %v3036_v47 = vpop.f32.mrb[61].mxu0 }
 0x173   : > { %v2973_v62 = vadd.f32 %v2972_v56, %v2971_v50  ;;  %v2974_v1 = vpop.f32.mrb[62].mxu1  ;;  %v3037_v5 = vadd.f32 %v3036_v47, %v3035_v53  ;;  %v3038_v2 = vpop.f32.mrb[62].mxu0 }
 0x174   : > { %v2975_v3 = vpop.f32.mrb[63].mxu1  ;;  %v3039_v4 = vpop.f32.mrb[63].mxu0 }
 0x175   : > { %v2088_v14 = vadd.f32 %v2973_v62, %v3979_v34  ;;  %v2976_v52 = vadd.f32 %v2975_v3, %v2974_v1  ;;  %v3040_v39 = vadd.f32 %v3039_v4, %v3038_v2 }
 0x177   : > { %v2091_v16 = vadd.f32 %v2976_v52, %v3981_v36  ;;  %v4035_v6 = vadd.f32 %v3037_v5, %v2088_v14 }
 0x179   : > { %v4037_v8 = vadd.f32 %v3040_v39, %v2091_v16  ;;  %v2977_v11 = vpop.f32.mrb[64].mxu1  ;;  %v3041_v15 = vpop.f32.mrb[64].mxu0 }
 0x17a   : > { %v2978_v9 = vpop.f32.mrb[65].mxu1  ;;  %v3042_v10 = vpop.f32.mrb[65].mxu0 }
 0x17b   : > { %v2979_v59 = vadd.f32 %v2978_v9, %v2977_v11  ;;  %v2980_v20 = vpop.f32.mrb[66].mxu1  ;;  %v3043_v45 = vadd.f32 %v3042_v10, %v3041_v15  ;;  %v3044_v21 = vpop.f32.mrb[66].mxu0 }
 0x17c   : > { %v2981_v22 = vpop.f32.mrb[67].mxu1  ;;  %v3045_v23 = vpop.f32.mrb[67].mxu0 }
 0x17d   : > { %v2096_v34 = vadd.f32 %v2979_v59, %v3987_v58  ;;  %v2982_v24 = vadd.f32 %v2981_v22, %v2980_v20  ;;  %v3046_v0 = vadd.f32 %v3045_v23, %v3044_v21 }
 0x17f   : > { %v2099_v36 = vadd.f32 %v2982_v24, %v3989_v60  ;;  %v4041_v25 = vadd.f32 %v3043_v45, %v2096_v34 }
 0x181   : > { %v4043_v51 = vadd.f32 %v3046_v0, %v2099_v36  ;;  %v2983_v30 = vpop.f32.mrb[68].mxu1  ;;  %v3047_v26 = vpop.f32.mrb[68].mxu0 }
 0x182   : > { %v2984_v27 = vpop.f32.mrb[69].mxu1  ;;  %v3048_v31 = vpop.f32.mrb[69].mxu0 }
 0x183   : > { %v2985_v32 = vadd.f32 %v2984_v27, %v2983_v30  ;;  %v2986_v35 = vpop.f32.mrb[70].mxu1  ;;  %v3049_v38 = vadd.f32 %v3048_v31, %v3047_v26  ;;  %v3050_v41 = vpop.f32.mrb[70].mxu0 }
 0x184   : > { %v2987_v57 = vpop.f32.mrb[71].mxu1  ;;  %v3051_v42 = vpop.f32.mrb[71].mxu0 }
 0x185   : > { %v2104_v58 = vadd.f32 %v2985_v32, %v3995_v18  ;;  %v2988_v43 = vadd.f32 %v2987_v57, %v2986_v35  ;;  %v3052_v44 = vadd.f32 %v3051_v42, %v3050_v41 }
 0x187   : > { %v2107_v60 = vadd.f32 %v2988_v43, %v3997_v19  ;;  %v4047_v40 = vadd.f32 %v3049_v38, %v2104_v58 }
 0x189   : > { %v4049_v12 = vadd.f32 %v3052_v44, %v2107_v60  ;;  %v2989_v54 = vpop.f32.mrb[72].mxu1  ;;  %v3053_v46 = vpop.f32.mrb[72].mxu0 }
 0x18a   : > { %v2990_v63 = vpop.f32.mrb[73].mxu1  ;;  %v3054_v55 = vpop.f32.mrb[73].mxu0 }
 0x18b   : > { %v2991_v50 = vadd.f32 %v2990_v63, %v2989_v54  ;;  %v2992_v53 = vpop.f32.mrb[74].mxu1  ;;  %v3055_v56 = vadd.f32 %v3054_v55, %v3053_v46  ;;  %v3056_v47 = vpop.f32.mrb[74].mxu0 }
 0x18c   : > { %v2993_v62 = vpop.f32.mrb[75].mxu1  ;;  %v3057_v1 = vpop.f32.mrb[75].mxu0 }
 0x18d   : > { %v2112_v18 = vadd.f32 %v2991_v50, %v4003_v37  ;;  %v2994_v5 = vadd.f32 %v2993_v62, %v2992_v53  ;;  %v3058_v2 = vadd.f32 %v3057_v1, %v3056_v47 }
 0x18f   : > { %v2115_v19 = vadd.f32 %v2994_v5, %v4005_v7  ;;  %v4053_v3 = vadd.f32 %v3055_v56, %v2112_v18 }
 0x191   : > { %v4055_v4 = vadd.f32 %v3058_v2, %v2115_v19  ;;  %v2995_v14 = vpop.f32.mrb[76].mxu1  ;;  %v3059_v52 = vpop.f32.mrb[76].mxu0 }
 0x192   : > { %v2996_v39 = vpop.f32.mrb[77].mxu1  ;;  %v3060_v16 = vpop.f32.mrb[77].mxu0 }
 0x193   : > { %v2997_v11 = vadd.f32 %v2996_v39, %v2995_v14  ;;  %v2998_v15 = vpop.f32.mrb[78].mxu1  ;;  %v3061_v9 = vadd.f32 %v3060_v16, %v3059_v52  ;;  %v3062_v10 = vpop.f32.mrb[78].mxu0 }
 0x194   : > { %v2999_v59 = vpop.f32.mrb[79].mxu1  ;;  %v3063_v20 = vpop.f32.mrb[79].mxu0 }
 0x195   : > { %v2120_v37 = vadd.f32 %v2997_v11, %v4011_v61  ;;  %v3000_v45 = vadd.f32 %v2999_v59, %v2998_v15  ;;  %v3064_v21 = vadd.f32 %v3063_v20, %v3062_v10 }
 0x197   : > { %v2123_v7 = vadd.f32 %v3000_v45, %v4013_v33  ;;  %v4059_v22 = vadd.f32 %v3061_v9, %v2120_v37 }
 0x199   : > { %v4061_v23 = vadd.f32 %v3064_v21, %v2123_v7  ;;  %v3081_v34 = vpop.f32.mrb[80].mxu1  ;;  %v2354_v24 = vpop.f32.mrb[80].mxu0 }
 0x19a   : > { %v3082_v0 = vpop.f32.mrb[81].mxu1  ;;  %v2356_v36 = vpop.f32.mrb[81].mxu0 }
 0x19b   : > { %v3083_v30 = vadd.f32 %v3082_v0, %v3081_v34  ;;  %v3084_v26 = vpop.f32.mrb[82].mxu1  ;;  %v2357_v27 = vpop.f32.mrb[82].mxu0 }
 0x19c   : > { %v3085_v31 = vpop.f32.mrb[83].mxu1  ;;  %v2359_v32 = vpop.f32.mrb[83].mxu0 }
 0x19d   : > { %v3086_v35 = vadd.f32 %v3085_v31, %v3084_v26  ;;  %v2258_v61 = vadd.f32 %v3083_v30, %v4017_v13 }
 0x19f   : > { %v2355_v38 = vadd.f32 %v2354_v24, %v2258_v61  ;;  %v2261_v33 = vadd.f32 %v3086_v35, %v4019_v17 }
 0x1a1   : > { %v2417_v41 = vmax.f32 %v2355_v38, 0.0  ;;  %v2358_v57 = vadd.f32 %v2357_v27, %v2261_v33  ;;  %v3087_v42 = vpop.f32.mrb[84].mxu1  ;;  %v2362_v58 = vpop.f32.mrb[84].mxu0 }
 0x1a2   : > { %v3088_v43 = vpop.f32.mrb[85].mxu1  ;;  %v2364_v44 = vpop.f32.mrb[85].mxu0 }
 0x1a3   : > { %2433 = vst.msk [vmem:[%s4069_s22] sm:$0xff] %vm1713_vm0, %v2417_v41  ;;  %v2418_v60 = vmax.f32 %v2358_v57, 0.0  ;;  %v3089_v13 = vadd.f32 %v3088_v43, %v3087_v42  ;;  %v3090_v54 = vpop.f32.mrb[86].mxu1  ;;  %v2365_v17 = vpop.f32.mrb[86].mxu0 }
 0x1a4   : > { %v3091_v46 = vpop.f32.mrb[87].mxu1  ;;  %v2367_v63 = vpop.f32.mrb[87].mxu0 }
 0x1a5   : > { %2434 = vst.msk [vmem:[%s4069_s22 + $0x8] sm:$0xff] %vm1713_vm0, %v2418_v60  ;;  %v3092_v55 = vadd.f32 %v3091_v46, %v3090_v54  ;;  %v2266_v50 = vadd.f32 %v3089_v13, %v4023_v28 }
 0x1a7   : > { %v2363_v53 = vadd.f32 %v2362_v58, %v2266_v50  ;;  %v2269_v56 = vadd.f32 %v3092_v55, %v4025_v29 }
 0x1a9   : > { %v2419_v47 = vmax.f32 %v2363_v53, 0.0  ;;  %v2366_v62 = vadd.f32 %v2365_v17, %v2269_v56  ;;  %v3093_v1 = vpop.f32.mrb[88].mxu1  ;;  %v2370_v18 = vpop.f32.mrb[88].mxu0 }
 0x1aa   : > { %v3094_v5 = vpop.f32.mrb[89].mxu1  ;;  %v2372_v2 = vpop.f32.mrb[89].mxu0 }
 0x1ab   : > { %2435 = vst.msk [vmem:[%s4069_s22 + $0x10] sm:$0xff] %vm1713_vm0, %v2419_v47  ;;  %v2420_v19 = vmax.f32 %v2366_v62, 0.0  ;;  %v3095_v14 = vadd.f32 %v3094_v5, %v3093_v1  ;;  %v3096_v52 = vpop.f32.mrb[90].mxu1  ;;  %v2373_v39 = vpop.f32.mrb[90].mxu0 }
 0x1ac   : > { %v3097_v16 = vpop.f32.mrb[91].mxu1  ;;  %v2375_v11 = vpop.f32.mrb[91].mxu0 }
 0x1ad   : > { %2436 = vst.msk [vmem:[%s4069_s22 + $0x18] sm:$0xff] %vm1713_vm0, %v2420_v19  ;;  %v3098_v28 = vadd.f32 %v3097_v16, %v3096_v52  ;;  %v2274_v29 = vadd.f32 %v3095_v14, %v4029_v48 }
 0x1af   : > { %v2371_v15 = vadd.f32 %v2370_v18, %v2274_v29  ;;  %v2277_v9 = vadd.f32 %v3098_v28, %v4031_v49 }
 0x1b1   : > { %v2421_v10 = vmax.f32 %v2371_v15, 0.0  ;;  %v2374_v59 = vadd.f32 %v2373_v39, %v2277_v9  ;;  %v3099_v20 = vpop.f32.mrb[92].mxu1  ;;  %v2378_v37 = vpop.f32.mrb[92].mxu0 }
 0x1b2   : > { %v3100_v45 = vpop.f32.mrb[93].mxu1  ;;  %v2380_v21 = vpop.f32.mrb[93].mxu0 }
 0x1b3   : > { %2437 = vst.msk [vmem:[%s4069_s22 + $0x20] sm:$0xff] %vm1713_vm0, %v2421_v10  ;;  %v2422_v7 = vmax.f32 %v2374_v59, 0.0  ;;  %v3101_v34 = vadd.f32 %v3100_v45, %v3099_v20  ;;  %v3102_v24 = vpop.f32.mrb[94].mxu1  ;;  %v2381_v0 = vpop.f32.mrb[94].mxu0 }
 0x1b4   : > { %v3103_v36 = vpop.f32.mrb[95].mxu1  ;;  %v2383_v30 = vpop.f32.mrb[95].mxu0 }
 0x1b5   : > { %2438 = vst.msk [vmem:[%s4069_s22 + $0x28] sm:$0xff] %vm1713_vm0, %v2422_v7  ;;  %v3104_v48 = vadd.f32 %v3103_v36, %v3102_v24  ;;  %v2282_v49 = vadd.f32 %v3101_v34, %v4035_v6 }
 0x1b7   : > { %v2379_v26 = vadd.f32 %v2378_v37, %v2282_v49  ;;  %v2285_v27 = vadd.f32 %v3104_v48, %v4037_v8 }
 0x1b9   : > { %v2423_v31 = vmax.f32 %v2379_v26, 0.0  ;;  %v2382_v32 = vadd.f32 %v2381_v0, %v2285_v27  ;;  %v3105_v35 = vpop.f32.mrb[96].mxu1  ;;  %v2386_v61 = vpop.f32.mrb[96].mxu0 }
 0x1ba   : > { %v3106_v38 = vpop.f32.mrb[97].mxu1  ;;  %v2388_v33 = vpop.f32.mrb[97].mxu0 }
 0x1bb   : > { %2439 = vst.msk [vmem:[%s4069_s22 + $0x30] sm:$0xff] %vm1713_vm0, %v2423_v31  ;;  %v2424_v41 = vmax.f32 %v2382_v32, 0.0  ;;  %v3107_v57 = vadd.f32 %v3106_v38, %v3105_v35  ;;  %v3108_v42 = vpop.f32.mrb[98].mxu1  ;;  %v2389_v58 = vpop.f32.mrb[98].mxu0 }
 0x1bc   : > { %v3109_v43 = vpop.f32.mrb[99].mxu1  ;;  %v2391_v44 = vpop.f32.mrb[99].mxu0 }
 0x1bd   : > { %2440 = vst.msk [vmem:[%s4069_s22 + $0x38] sm:$0xff] %vm1713_vm0, %v2424_v41  ;;  %v3110_v6 = vadd.f32 %v3109_v43, %v3108_v42  ;;  %v2290_v8 = vadd.f32 %v3107_v57, %v4041_v25 }
 0x1bf   : > { %v2387_v60 = vadd.f32 %v2386_v61, %v2290_v8  ;;  %v2293_v13 = vadd.f32 %v3110_v6, %v4043_v51 }
 0x1c1   : > { %v2425_v54 = vmax.f32 %v2387_v60, 0.0  ;;  %v2390_v17 = vadd.f32 %v2389_v58, %v2293_v13  ;;  %v3111_v46 = vpop.f32.mrb[100].mxu1  ;;  %v2394_v63 = vpop.f32.mrb[100].mxu0 }
 0x1c2   : > { %v3112_v55 = vpop.f32.mrb[101].mxu1  ;;  %v2396_v50 = vpop.f32.mrb[101].mxu0 }
 0x1c3   : > { %2441 = vst.msk [vmem:[%s4069_s22 + $0x40] sm:$0xff] %vm1713_vm0, %v2425_v54  ;;  %v2426_v53 = vmax.f32 %v2390_v17, 0.0  ;;  %v3113_v56 = vadd.f32 %v3112_v55, %v3111_v46  ;;  %v3114_v47 = vpop.f32.mrb[102].mxu1  ;;  %v2397_v62 = vpop.f32.mrb[102].mxu0 }
 0x1c4   : > { %v3115_v1 = vpop.f32.mrb[103].mxu1  ;;  %v2399_v18 = vpop.f32.mrb[103].mxu0 }
 0x1c5   : > { %2442 = vst.msk [vmem:[%s4069_s22 + $0x48] sm:$0xff] %vm1713_vm0, %v2426_v53  ;;  %v3116_v25 = vadd.f32 %v3115_v1, %v3114_v47  ;;  %v2298_v51 = vadd.f32 %v3113_v56, %v4047_v40 }
 0x1c7   : > { %v2395_v5 = vadd.f32 %v2394_v63, %v2298_v51  ;;  %v2301_v2 = vadd.f32 %v3116_v25, %v4049_v12 }
 0x1c9   : > { %v2427_v19 = vmax.f32 %v2395_v5, 0.0  ;;  %v2398_v14 = vadd.f32 %v2397_v62, %v2301_v2  ;;  %v3117_v52 = vpop.f32.mrb[104].mxu1  ;;  %v2402_v39 = vpop.f32.mrb[104].mxu0 }
 0x1ca   : > { %v3118_v16 = vpop.f32.mrb[105].mxu1  ;;  %v2404_v11 = vpop.f32.mrb[105].mxu0 }
 0x1cb   : > { %2443 = vst.msk [vmem:[%s4069_s22 + $0x50] sm:$0xff] %vm1713_vm0, %v2427_v19  ;;  %v2428_v28 = vmax.f32 %v2398_v14, 0.0  ;;  %v3119_v29 = vadd.f32 %v3118_v16, %v3117_v52  ;;  %v3120_v15 = vpop.f32.mrb[106].mxu1  ;;  %v2405_v9 = vpop.f32.mrb[106].mxu0 }
 0x1cc   : > { %v3121_v10 = vpop.f32.mrb[107].mxu1  ;;  %v2407_v59 = vpop.f32.mrb[107].mxu0 }
 0x1cd   : > { %2444 = vst.msk [vmem:[%s4069_s22 + $0x58] sm:$0xff] %vm1713_vm0, %v2428_v28  ;;  %v3122_v40 = vadd.f32 %v3121_v10, %v3120_v15  ;;  %v2306_v12 = vadd.f32 %v3119_v29, %v4053_v3 }
 0x1cf   : > { %v2403_v20 = vadd.f32 %v2402_v39, %v2306_v12  ;;  %v2309_v37 = vadd.f32 %v3122_v40, %v4055_v4 }
 0x1d1   : > { %v2429_v45 = vmax.f32 %v2403_v20, 0.0  ;;  %v2406_v21 = vadd.f32 %v2405_v9, %v2309_v37  ;;  %v3123_v7 = vpop.f32.mrb[108].mxu1  ;;  %v2410_v34 = vpop.f32.mrb[108].mxu0 }
 0x1d2   : > { %v3124_v24 = vpop.f32.mrb[109].mxu1  ;;  %v2412_v0 = vpop.f32.mrb[109].mxu0 }
 0x1d3   : > { %2445 = vst.msk [vmem:[%s4069_s22 + $0x60] sm:$0xff] %vm1713_vm0, %v2429_v45  ;;  %v2430_v36 = vmax.f32 %v2406_v21, 0.0  ;;  %v3125_v30 = vadd.f32 %v3124_v24, %v3123_v7  ;;  %v3126_v48 = vpop.f32.mrb[110].mxu1  ;;  %v2413_v49 = vpop.f32.mrb[110].mxu0 }
 0x1d4   : > { %v3127_v26 = vpop.f32.mrb[111].mxu1  ;;  %v2415_v3 = vpop.f32.mrb[111].mxu0 }
 0x1d5   : > { %2446 = vst.msk [vmem:[%s4069_s22 + $0x68] sm:$0xff] %vm1713_vm0, %v2430_v36  ;;  %v3128_v27 = vadd.f32 %v3127_v26, %v3126_v48  ;;  %v2314_v4 = vadd.f32 %v3125_v30, %v4059_v22 }
 0x1d7   : > { %v2411_v31 = vadd.f32 %v2410_v34, %v2314_v4  ;;  %v2317_v32 = vadd.f32 %v3128_v27, %v4061_v23 }
 0x1d9   : > { %v2431_v35 = vmax.f32 %v2411_v31, 0.0  ;;  %v2414_v61 = vadd.f32 %v2413_v49, %v2317_v32 }
 0x1db   : > { %2447 = vst.msk [vmem:[%s4069_s22 + $0x70] sm:$0xff] %vm1713_vm0, %v2431_v35  ;;  %v2432_v38 = vmax.f32 %v2414_v61, 0.0 }
 0x1dd   : > { %2448 = vst.msk [vmem:[%s4069_s22 + $0x78] sm:$0xff] %vm1713_vm0, %v2432_v38 }
 0x1de PF: > { %s13_s12 = sadd.s32 1, %s3437_s12  }
 0x1df   : > { %p10_p4 = scmp.ge.s32.totalorder %s13_s12, 4  }
 0x1e1   :  { %12 = sbr.rel (!%p10_p4) target bundleno = 1 (0x1), region = 62 }

// kernel: forward.15
= control target key start
LH: loop header
LB: loop body
LE: loop exit
PB: predicated region body
PF: predicated region fallthrough
CT: control target
= control target key end

     0   :  { %s1918_s12 = smov 0   ;;  %s2297_s0 = inlined_call_operand.vmem [shape: bf16[32,1728], index: 0, kind: input, shape index: {}]   ;;  %s2298_s1 = inlined_call_operand.vmem [shape: bf16[1728,64], index: 1, kind: input, shape index: {}]   ;;  %s2299_s2 = inlined_call_operand.vmem [shape: f32[1,64], index: 2, kind: input, shape index: {}]   ;;  %s2300_s3 = inlined_call_operand.vmem [shape: f32[32,64], index: 3, kind: output, shape index: {}]  }
   0x1 LB: > { %s1483_s13 = sadd.s32 4294967295, %s1895_s12   ;;  %p1487_p0 = scmp.ge.s32.totalorder %s1895_s12, 1  ;;  %s1895_s12 = sphi %s1918_s12, %s13_s12  }
   0x2   : > { %p139_p1 = scmp.lt.s32.totalorder %s1895_s12, 3 }
   0x4   : > { %p140_p2 = pnand %p1487_p0, %p139_p1 }
   0x5   : > { %v1760_v0 = vld [vmem:[%s2298_s1 + $0x40] sm:$0xff] (!%p140_p2)   ;;  %v1762_v2 = vld [vmem:[%s2298_s1 + $0x48] sm:$0xff] (!%p140_p2)   ;;  %v1764_v4 = vld [vmem:[%s2298_s1 + $0x50] sm:$0xff] (!%p140_p2)   ;;  %s1488_s24 = sshll.u32 (!%p140_p2), %s1483_s13, 1  ;;  %vm1132_vm0 = vcmask (!%p140_p2), 523264  }
   0x6   : > { %143 = sbr.rel (%p140_p2) target bundleno = 358 (0x166), region = 32  ;;  %v1761_v1 = vld [vmem:[%s2298_s1] sm:$0xff] (!%p140_p2)   ;;  %1618 = vmatprep.subr.bf16.mxu1 (!%p140_p2), %v1760_v0  ;;  %v1763_v3 = vld [vmem:[%s2298_s1 + $0x8] sm:$0xff] (!%p140_p2)   ;;  %v1765_v5 = vld [vmem:[%s2298_s1 + $0x10] sm:$0xff] (!%p140_p2)   ;;  %p165_p3 = scmp.lt.s32.totalorder (!%p140_p2), %s1488_s24, 3 }
   0x7   : > { %1619 = vmatpush3.bf16.msra.mxu1 (!%p140_p2), %v1761_v1  ;;  %v1766_v6 = vld [vmem:[%s2298_s1 + $0x58] sm:$0xff] (!%p140_p2)   ;;  %v1770_v8 = vld [vmem:[%s2298_s1 + $0x140] sm:$0xff] (!%p140_p2)   ;;  %v1774_v12 = vld [vmem:[%s2298_s1 + $0x148] sm:$0xff] (!%p140_p2)  }
   0x8   : > { %1620 = vmatprep.subr.bf16.mxu1 (!%p140_p2), %v1762_v2  ;;  %v1767_v7 = vld [vmem:[%s2298_s1 + $0x18] sm:$0xff] (!%p140_p2)   ;;  %v1771_v9 = vld [vmem:[%s2298_s1 + $0x100] sm:$0xff] (!%p140_p2)   ;;  %1662 = vmatprep.subr.bf16.mxu0 (!%p140_p2), %v1770_v8  ;;  %v1775_v13 = vld [vmem:[%s2298_s1 + $0x108] sm:$0xff] (!%p140_p2)  }
   0x9   : > { %v1768_v10 = vld [vmem:[%s2298_s1 + $0x60] sm:$0xff] (!%p140_p2)   ;;  %1663 = vmatpush3.bf16.msra.mxu0 (!%p140_p2), %v1771_v9  ;;  %v1772_v14 = vld [vmem:[%s2298_s1 + $0x68] sm:$0xff] (!%p140_p2)   ;;  %v1778_v16 = vld [vmem:[%s2298_s1 + $0x150] sm:$0xff] (!%p140_p2)  }
   0xa   : > { %v1769_v11 = vld [vmem:[%s2298_s1 + $0x20] sm:$0xff] (!%p140_p2)   ;;  %1664 = vmatprep.subr.bf16.mxu0 (!%p140_p2), %v1774_v12  ;;  %v1773_v15 = vld [vmem:[%s2298_s1 + $0x28] sm:$0xff] (!%p140_p2)   ;;  %v1779_v17 = vld [vmem:[%s2298_s1 + $0x110] sm:$0xff] (!%p140_p2)  }
   0xb   : > { %1621 = vmatpush3.bf16.msra.mxu1 (!%p140_p2), %v1763_v3  ;;  %v1776_v18 = vld [vmem:[%s2298_s1 + $0x70] sm:$0xff] (!%p140_p2)   ;;  %v1782_v20 = vld [vmem:[%s2298_s1 + $0x158] sm:$0xff] (!%p140_p2)   ;;  %v1787_v25 = vld [vmem:[%s2298_s1 + $0xc0] sm:$0xff] (!%p140_p2)  }
   0xc   : > { %1622 = vmatprep.subr.bf16.mxu1 (!%p140_p2), %v1764_v4  ;;  %v1777_v19 = vld [vmem:[%s2298_s1 + $0x30] sm:$0xff] (!%p140_p2)   ;;  %v1780_v21 = vld [vmem:[%s2298_s1 + $0x78] sm:$0xff] (!%p140_p2)   ;;  %v1789_v27 = vld [vmem:[%s2298_s1 + $0x160] sm:$0xff] (!%p140_p2)  }
   0xd   : > { %s2302_s24 = smov (!%p165_p3, %s1488_s24), 3  ;;  %1665 = vmatpush3.bf16.msra.mxu0 %v1775_v13  ;;  %v1786_v23 = vld [vmem:[%s2298_s1 + $0x118] sm:$0xff]   ;;  %v1790_v28 = vld [vmem:[%s2298_s1 + $0x120] sm:$0xff]   ;;  %v1791_v30 = vld [vmem:[%s2298_s1 + $0xc8] sm:$0xff]  }
   0xe   : > { %s1750_s21 = smul.u32 56, %s2302_s24  ;;  %1666 = vmatprep.subr.bf16.mxu0 %v1778_v16  ;;  %v1781_v24 = vld [vmem:[%s2298_s1 + $0x38] sm:$0xff]   ;;  %v1788_v29 = vld [vmem:[%s2298_s1 + $0x80] sm:$0xff]   ;;  %v1793_v31 = vld [vmem:[%s2298_s1 + $0x168] sm:$0xff]  }
   0xf   : > { %1623 = vmatpush3.bf16.msra.mxu1 %v1765_v5  ;;  %v1794_v32 = vld [vmem:[%s2298_s1 + $0x128] sm:$0xff]   ;;  %v1795_v34 = vld [vmem:[%s2298_s1 + $0xd0] sm:$0xff]   ;;  %v1799_v38 = vld [vmem:[%s2298_s1 + $0xd8] sm:$0xff]  }
  0x10   : > { %1624 = vmatprep.subr.bf16.mxu1 %v1766_v6  ;;  %s1992_s6 = scalar_lea.vmem %s2297_s0, %s1750_s21  ;;  %v1792_v33 = vld [vmem:[%s2298_s1 + $0x88] sm:$0xff]   ;;  %v1797_v35 = vld [vmem:[%s2298_s1 + $0x170] sm:$0xff]   ;;  %v1801_v39 = vld [vmem:[%s2298_s1 + $0x178] sm:$0xff]  }
  0x11   : > { %1667 = vmatpush3.bf16.msra.mxu0 %v1779_v17  ;;  %v1785_v22 = vld [vmem:[%s1992_s6 + $0x4] ss:$56 sps:$4 sm:$0xff]   ;;  %v1783_v26 = vld [vmem:[%s1992_s6] ss:$56 sps:$4 sm:$0xff]   ;;  %v1798_v36 = vld [vmem:[%s2298_s1 + $0x130] sm:$0xff]   ;;  %v1897_v17 = vmov 0  }
  0x12   : > { %1668 = vmatprep.subr.bf16.mxu0 %v1782_v20  ;;  %1168 = vmatprep.mubr.bf16.mxu1 %v1785_v22  ;;  %v1796_v37 = vld [vmem:[%s2298_s1 + $0x90] sm:$0xff]   ;;  %v1802_v40 = vld [vmem:[%s2298_s1 + $0x138] sm:$0xff]   ;;  %v1803_v42 = vld [vmem:[%s2298_s1 + $0xe0] sm:$0xff]  }
  0x13   : > { %1625 = vmatpush3.bf16.msra.mxu1 %v1767_v7  ;;  %v1800_v41 = vld [vmem:[%s2298_s1 + $0x98] sm:$0xff]   ;;  %v1805_v43 = vld [vmem:[%s1992_s6 + $0x10] ss:$56 sps:$4 sm:$0xff]   ;;  %v1807_v44 = vld [vmem:[%s1992_s6 + $0x14] ss:$56 sps:$4 sm:$0xff]  }
  0x14   : > { %1626 = vmatprep.subr.bf16.mxu1 %v1768_v10  ;;  %v1808_v45 = vld [vmem:[%s2298_s1 + $0x240] sm:$0xff]   ;;  %1250 = vmatprep.mubr.bf16.mxu0 %v1807_v44  ;;  %v1810_v48 = vld [vmem:[%s2298_s1 + $0xe8] sm:$0xff]   ;;  %v1814_v52 = vld [vmem:[%s2298_s1 + $0xf0] sm:$0xff]  }
  0x15   : > { %1669 = vmatpush3.bf16.msra.mxu0 %v1786_v23  ;;  %v1809_v46 = vld [vmem:[%s2298_s1 + $0x200] sm:$0xff]   ;;  %v1812_v49 = vld [vmem:[%s2298_s1 + $0x248] sm:$0xff]   ;;  %v1816_v53 = vld [vmem:[%s2298_s1 + $0x250] sm:$0xff]  }
  0x16   : > { %1670 = vmatprep.subr.bf16.mxu0 %v1789_v27  ;;  %v1804_v47 = vld [vmem:[%s2298_s1 + $0xa0] sm:$0xff]   ;;  %v1813_v50 = vld [vmem:[%s2298_s1 + $0x208] sm:$0xff]   ;;  %v1817_v54 = vld [vmem:[%s2298_s1 + $0x210] sm:$0xff]  }
  0x17   : > { %1627 = vmatpush3.bf16.msra.mxu1 %v1769_v11  ;;  %v1811_v51 = vld [vmem:[%s2298_s1 + $0xa8] sm:$0xff]   ;;  %v1815_v55 = vld [vmem:[%s2298_s1 + $0xb0] sm:$0xff]   ;;  %v1818_v56 = vld [vmem:[%s2298_s1 + $0xf8] sm:$0xff]  }
  0x18   : > { %1628 = vmatprep.subr.bf16.mxu1 %v1772_v14  ;;  %v1820_v57 = vld [vmem:[%s2298_s1 + $0x258] sm:$0xff]   ;;  %v1823_v59 = vld [vmem:[%s1992_s6 + $0xc] ss:$56 sps:$4 sm:$0xff]   ;;  %v1821_v61 = vld [vmem:[%s1992_s6 + $0x8] ss:$56 sps:$4 sm:$0xff]  }
  0x19   : > { %1671 = vmatpush3.bf16.msra.mxu0 %v1790_v28  ;;  %v1819_v58 = vld [vmem:[%s2298_s1 + $0xb8] sm:$0xff]   ;;  %v1825_v62 = vld [vmem:[%s2298_s1 + $0x1c0] sm:$0xff]   ;;  %v1829_v2 = vld [vmem:[%s2298_s1 + $0x1c8] sm:$0xff]  }
  0x1a   : > { %1672 = vmatprep.subr.bf16.mxu0 %v1793_v31  ;;  %v1824_v60 = vld [vmem:[%s2298_s1 + $0x218] sm:$0xff]   ;;  %v1826_v63 = vld [vmem:[%s2298_s1 + $0x180] sm:$0xff]   ;;  %v1830_v3 = vld [vmem:[%s2298_s1 + $0x188] sm:$0xff]  }
  0x1b   : > { %1629 = vmatpush3.bf16.msra.mxu1 %v1773_v15  ;;  %v1827_v0 = vld [vmem:[%s2298_s1 + $0x260] sm:$0xff]   ;;  %v1831_v4 = vld [vmem:[%s2298_s1 + $0x268] sm:$0xff]   ;;  %v1833_v6 = vld [vmem:[%s2298_s1 + $0x1d0] sm:$0xff]  }
  0x1c   : > { %1630 = vmatprep.subr.bf16.mxu1 %v1776_v18  ;;  %v1828_v1 = vld [vmem:[%s2298_s1 + $0x220] sm:$0xff]   ;;  %v1832_v5 = vld [vmem:[%s2298_s1 + $0x228] sm:$0xff]   ;;  %v1834_v7 = vld [vmem:[%s2298_s1 + $0x190] sm:$0xff]  }
  0x1d   : > { %1673 = vmatpush3.bf16.msra.mxu0 %v1794_v32  ;;  %v1835_v8 = vld [vmem:[%s2298_s1 + $0x270] sm:$0xff]   ;;  %v1837_v10 = vld [vmem:[%s2298_s1 + $0x1d8] sm:$0xff]   ;;  %v1841_v14 = vld [vmem:[%s2298_s1 + $0x1e0] sm:$0xff]  }
  0x1e   : > { %1674 = vmatprep.subr.bf16.mxu0 %v1797_v35  ;;  %v1836_v9 = vld [vmem:[%s2298_s1 + $0x230] sm:$0xff]   ;;  %v1838_v11 = vld [vmem:[%s2298_s1 + $0x198] sm:$0xff]   ;;  %v1842_v15 = vld [vmem:[%s2298_s1 + $0x1a0] sm:$0xff]  }
  0x1f   : > { %1631 = vmatpush3.bf16.msra.mxu1 %v1777_v19  ;;  %v1839_v12 = vld [vmem:[%s2298_s1 + $0x278] sm:$0xff]   ;;  %v1846_v19 = vld [vmem:[%s2298_s1 + $0x300] sm:$0xff]   ;;  %v1847_v20 = vld [vmem:[%s2298_s1 + $0x1e8] sm:$0xff]  }
  0x20   : > { %1632 = vmatprep.subr.bf16.mxu1 %v1780_v21  ;;  %v1840_v13 = vld [vmem:[%s2298_s1 + $0x238] sm:$0xff]   ;;  %v1848_v21 = vld [vmem:[%s2298_s1 + $0x1a8] sm:$0xff]   ;;  %v1850_v23 = vld [vmem:[%s2298_s1 + $0x1f0] sm:$0xff]  }
  0x21   : > { %1675 = vmatpush3.bf16.msra.mxu0 %v1798_v36  ;;  %v1843_v16 = vld [vmem:[%s1992_s6 + $0x20] ss:$56 sps:$4 sm:$0xff]   ;;  %v1845_v18 = vld [vmem:[%s1992_s6 + $0x24] ss:$56 sps:$4 sm:$0xff]   ;;  %v1849_v22 = vld [vmem:[%s2298_s1 + $0x308] sm:$0xff]  }
  0x22   : > { %1676 = vmatprep.subr.bf16.mxu0 %v1801_v39  ;;  %v1857_v27 = vld [vmem:[%s1992_s6 + $0x1c] ss:$56 sps:$4 sm:$0xff]   ;;  %v1855_v31 = vld [vmem:[%s1992_s6 + $0x18] ss:$56 sps:$4 sm:$0xff]   ;;  %v1860_v32 = vld [vmem:[%s2298_s1 + $0x280] sm:$0xff]  }
  0x23   : > { %1633 = vmatpush3.bf16.msra.mxu1 %v1781_v24  ;;  %v1851_v24 = vld [vmem:[%s2298_s1 + $0x1b0] sm:$0xff]   ;;  %v1854_v28 = vld [vmem:[%s2298_s1 + $0x1b8] sm:$0xff]   ;;  %v1863_v35 = vld [vmem:[%s2298_s1 + $0x288] sm:$0xff]  }
  0x24   : > { %1640 = vmatprep.subr.bf16.mxu1 %v1787_v25  ;;  %v1852_v25 = vld [vmem:[%s2298_s1 + $0x310] sm:$0xff]   ;;  %v1864_v36 = vld [vmem:[%s2298_s1 + $0x328] sm:$0xff]   ;;  %v1872_v44 = vld [vmem:[%s2298_s1 + $0x2a0] sm:$0xff]  }
  0x25   : > { %1677 = vmatpush3.bf16.msra.mxu0 %v1802_v40  ;;  %v1867_v39 = vld [vmem:[%s2298_s1 + $0x330] sm:$0xff]   ;;  %v1868_v40 = vld [vmem:[%s2298_s1 + $0x2d8] sm:$0xff]  }
  0x26   : > { %1169 = vmatmul.mubr.bf16.vlgmr.msra.gmra.mrb[0].mxu1 %v1783_v26  ;;  %1706 = vmatprep.subr.bf16.mxu0 %v1808_v45  ;;  %v1853_v26 = vld [vmem:[%s2298_s1 + $0x1f8] sm:$0xff]   ;;  %v1873_v45 = vld [vmem:[%s2298_s1 + $0x340] sm:$0xff]  }
  0x27   : > { %1641 = vmatpush3.bf16.msra.mxu1 %v1788_v29  ;;  %1209 = vmatprep.mubr.bf16.mxu1 %v1823_v59  ;;  %v1858_v29 = vld [vmem:[%s2298_s1 + $0x318] sm:$0xff]  }
  0x28   : > { %1642 = vmatprep.subr.bf16.mxu1 %v1791_v30  ;;  %1251 = vmatmul.mubr.bf16.vlgmr.msra.gmra.mrb[0].mxu0 %v1805_v43  ;;  %v1859_v30 = vld [vmem:[%s2298_s1 + $0x2c0] sm:$0xff]  }
  0x29   : > { %1707 = vmatpush3.bf16.msra.mxu0 %v1809_v46  ;;  %1332 = vmatprep.mubr.bf16.mxu0 %v1845_v18  ;;  %v1871_v43 = vld [vmem:[%s2298_s1 + $0x2e0] sm:$0xff]   ;;  %v1874_v46 = vld [vmem:[%s2298_s1 + $0x2e8] sm:$0xff]  }
  0x2a   : > { %1708 = vmatprep.subr.bf16.mxu0 %v1812_v49  ;;  %v1884_v49 = vld [vmem:[%s1992_s6 + $0x2c] ss:$56 sps:$4 sm:$0xff]  }
  0x2b   : > { %1643 = vmatpush3.bf16.msra.mxu1 %v1792_v33  ;;  %v1861_v33 = vld [vmem:[%s2298_s1 + $0x320] sm:$0xff]  }
  0x2c   : > { %1644 = vmatprep.subr.bf16.mxu1 %v1795_v34  ;;  %v1862_v34 = vld [vmem:[%s2298_s1 + $0x2c8] sm:$0xff]  }
  0x2d   : > { %1709 = vmatpush3.bf16.msra.mxu0 %v1813_v50  ;;  %v1877_v50 = vld [vmem:[%s2298_s1 + $0x2f0] sm:$0xff]  }
  0x2e   : > { %1710 = vmatprep.subr.bf16.mxu0 %v1816_v53  ;;  %v1879_v53 = vld [vmem:[%s2298_s1 + $0x350] sm:$0xff]  }
  0x2f   : > { %1645 = vmatpush3.bf16.msra.mxu1 %v1796_v37  ;;  %v1865_v37 = vld [vmem:[%s2298_s1 + $0x2d0] sm:$0xff]  }
  0x30   : > { %1646 = vmatprep.subr.bf16.mxu1 %v1799_v38  ;;  %v1866_v38 = vld [vmem:[%s2298_s1 + $0x290] sm:$0xff]  }
  0x31   : > { %1711 = vmatpush3.bf16.msra.mxu0 %v1817_v54  ;;  %v1880_v54 = vld [vmem:[%s2298_s1 + $0x2f8] sm:$0xff]  }
  0x32   : > { %1712 = vmatprep.subr.bf16.mxu0 %v1820_v57  ;;  %v1882_v57 = vld [vmem:[%s1992_s6 + $0x28] ss:$56 sps:$4 sm:$0xff]  }
  0x33   : > { %1647 = vmatpush3.bf16.msra.mxu1 %v1800_v41  ;;  %v1869_v41 = vld [vmem:[%s2298_s1 + $0x298] sm:$0xff]  }
  0x34   : > { %1648 = vmatprep.subr.bf16.mxu1 %v1803_v42  ;;  %v1870_v42 = vld [vmem:[%s2298_s1 + $0x338] sm:$0xff]  }
  0x35   : > { %1713 = vmatpush3.bf16.msra.mxu0 %v1824_v60 }
  0x36   : > { %1714 = vmatprep.subr.bf16.mxu0 %v1827_v0 }
  0x37   : > { %1649 = vmatpush3.bf16.msra.mxu1 %v1804_v47  ;;  %v1875_v47 = vld [vmem:[%s2298_s1 + $0x2a8] sm:$0xff]  }
  0x38   : > { %1650 = vmatprep.subr.bf16.mxu1 %v1810_v48  ;;  %v1876_v48 = vld [vmem:[%s2298_s1 + $0x348] sm:$0xff]  }
  0x39   : > { %1715 = vmatpush3.bf16.msra.mxu0 %v1828_v1 }
  0x3a   : > { %1716 = vmatprep.subr.bf16.mxu0 %v1831_v4 }
  0x3b   : > { %1651 = vmatpush3.bf16.msra.mxu1 %v1811_v51  ;;  %v1886_v51 = vld [vmem:[%s1992_s6 + $0x34] ss:$56 sps:$4 sm:$0xff]  }
  0x3c   : > { %1652 = vmatprep.subr.bf16.mxu1 %v1814_v52  ;;  %v1878_v52 = vld [vmem:[%s2298_s1 + $0x2b0] sm:$0xff]  }
  0x3d   : > { %1717 = vmatpush3.bf16.msra.mxu0 %v1832_v5 }
  0x3e   : > { %1718 = vmatprep.subr.bf16.mxu0 %v1835_v8 }
  0x3f   : > { %1653 = vmatpush3.bf16.msra.mxu1 %v1815_v55  ;;  %v1881_v55 = vld [vmem:[%s2298_s1 + $0x2b8] sm:$0xff]  }
  0x40   : > { %1654 = vmatprep.subr.bf16.mxu1 %v1818_v56  ;;  %v1885_v56 = vld [vmem:[%s2298_s1 + $0x358] sm:$0xff]  }
  0x41   : > { %1719 = vmatpush3.bf16.msra.mxu0 %v1836_v9 }
  0x42   : > { %1720 = vmatprep.subr.bf16.mxu0 %v1839_v12 }
  0x43   : > { %1655 = vmatpush3.bf16.msra.mxu1 %v1819_v58  ;;  %v1888_v58 = vld [vmem:[%s1992_s6 + $0x30] ss:$56 sps:$4 sm:$0xff]   ;;  %s1491_s6 = sshll.u32 %s2302_s24, 3 }
  0x44   : > { %1684 = vmatprep.subr.bf16.mxu1 %v1825_v62  ;;  %s175_s20 = scalar_lea.vmem %s2300_s3, %s1491_s6 }
  0x45   : > { %1721 = vmatpush3.bf16.msra.mxu0 %v1840_v13 }
  0x46   : > { %1210 = vmatmul.mubr.bf16.vlgmr.msra.gmra.mrb[4].mxu1 %v1821_v61  ;;  %1382 = vmatprep.subr.bf16.mxu0 %v1897_v17 }
  0x47   : > { %1685 = vmatpush3.bf16.msra.mxu1 %v1826_v63  ;;  %1291 = vmatprep.mubr.bf16.mxu1 %v1857_v27 }
  0x48   : > { %1686 = vmatprep.subr.bf16.mxu1 %v1829_v2  ;;  %1333 = vmatmul.mubr.bf16.vlgmr.msra.gmra.mrb[4].mxu0 %v1843_v16 }
  0x49   : > { %1383 = vmatpush1.bf16.msra.mxu0 %v1846_v19  ;;  %1615 = vmatprep.mubr.msk.bf16.mxu0 %vm1132_vm0, %v1886_v51 }
  0x4a   : > { %1384 = vmatprep.subr.bf16.mxu0 %v1897_v17 }
  0x4b   : > { %1687 = vmatpush3.bf16.msra.mxu1 %v1830_v3 }
  0x4c   : > { %1688 = vmatprep.subr.bf16.mxu1 %v1833_v6 }
  0x4d   : > { %1385 = vmatpush1.bf16.msra.mxu0 %v1849_v22 }
  0x4e   : > { %1386 = vmatprep.subr.bf16.mxu0 %v1897_v17 }
  0x4f   : > { %1689 = vmatpush3.bf16.msra.mxu1 %v1834_v7  ;;  %v1492_v7 = vld [vmem:[%s2299_s2] ss:$0 sm:$0xff] }
  0x50   : > { %1690 = vmatprep.subr.bf16.mxu1 %v1837_v10 }
  0x51   : > { %1387 = vmatpush1.bf16.msra.mxu0 %v1852_v25 }
  0x52   : > { %1388 = vmatprep.subr.bf16.mxu0 %v1897_v17 }
  0x53   : > { %1691 = vmatpush3.bf16.msra.mxu1 %v1838_v11 }
  0x54   : > { %1692 = vmatprep.subr.bf16.mxu1 %v1841_v14 }
  0x55   : > { %1389 = vmatpush1.bf16.msra.mxu0 %v1858_v29 }
  0x56   : > { %1390 = vmatprep.subr.bf16.mxu0 %v1897_v17 }
  0x57   : > { %1693 = vmatpush3.bf16.msra.mxu1 %v1842_v15 }
  0x58   : > { %1694 = vmatprep.subr.bf16.mxu1 %v1847_v20 }
  0x59   : > { %1391 = vmatpush1.bf16.msra.mxu0 %v1861_v33 }
  0x5a   : > { %1392 = vmatprep.subr.bf16.mxu0 %v1897_v17 }
  0x5b   : > { %1695 = vmatpush3.bf16.msra.mxu1 %v1848_v21 }
  0x5c   : > { %1696 = vmatprep.subr.bf16.mxu1 %v1850_v23 }
  0x5d   : > { %1393 = vmatpush1.bf16.msra.mxu0 %v1864_v36 }
  0x5e   : > { %1394 = vmatprep.subr.bf16.mxu0 %v1897_v17 }
  0x5f   : > { %1697 = vmatpush3.bf16.msra.mxu1 %v1851_v24 }
  0x60   : > { %1698 = vmatprep.subr.bf16.mxu1 %v1853_v26 }
  0x61   : > { %1395 = vmatpush1.bf16.msra.mxu0 %v1867_v39 }
  0x62   : > { %1396 = vmatprep.subr.bf16.mxu0 %v1897_v17 }
  0x63   : > { %1699 = vmatpush3.bf16.msra.mxu1 %v1854_v28 }
  0x64   : > { %1728 = vmatprep.subr.bf16.mxu1 %v1859_v30 }
  0x65   : > { %1397 = vmatpush1.bf16.msra.mxu0 %v1870_v42 }
  0x66   : > { %1292 = vmatmul.mubr.bf16.vlgmr.msra.gmra.mrb[8].mxu1 %v1855_v31  ;;  %1398 = vmatprep.subr.bf16.mxu0 %v1897_v17 }
  0x67   : > { %1729 = vmatpush3.bf16.msra.mxu1 %v1860_v32  ;;  %1373 = vmatprep.mubr.bf16.mxu1 %v1884_v49 }
  0x68   : > { %1730 = vmatprep.subr.bf16.mxu1 %v1862_v34 }
  0x69   : > { %1399 = vmatpush1.bf16.msra.mxu0 %v1873_v45 }
  0x6a   : > { %1400 = vmatprep.subr.bf16.mxu0 %v1897_v17 }
  0x6b   : > { %1731 = vmatpush3.bf16.msra.mxu1 %v1863_v35 }
  0x6c   : > { %1732 = vmatprep.subr.bf16.mxu1 %v1865_v37 }
  0x6d   : > { %1401 = vmatpush1.bf16.msra.mxu0 %v1876_v48 }
  0x6e   : > { %1402 = vmatprep.subr.bf16.mxu0 %v1897_v17 }
  0x6f   : > { %1733 = vmatpush3.bf16.msra.mxu1 %v1866_v38 }
  0x70   : > { %1734 = vmatprep.subr.bf16.mxu1 %v1868_v40 }
  0x71   : > { %1403 = vmatpush1.bf16.msra.mxu0 %v1879_v53 }
  0x72   : > { %1404 = vmatprep.subr.bf16.mxu0 %v1897_v17 }
  0x73   : > { %1735 = vmatpush3.bf16.msra.mxu1 %v1869_v41 }
  0x74   : > { %1736 = vmatprep.subr.bf16.mxu1 %v1871_v43 }
  0x75   : > { %1405 = vmatpush1.bf16.msra.mxu0 %v1885_v56 }
  0x77   : > { %1737 = vmatpush3.bf16.msra.mxu1 %v1872_v44 }
  0x78   : > { %1738 = vmatprep.subr.bf16.mxu1 %v1874_v46  ;;  %1415 = vmatmul.mubr.bf16.vlgmr.msra.gmra.mrb[8].mxu0 %v1888_v58 }
  0x7b   : > { %1739 = vmatpush3.bf16.msra.mxu1 %v1875_v47 }
  0x7c   : > { %1740 = vmatprep.subr.bf16.mxu1 %v1877_v50 }
  0x7f   : > { %1741 = vmatpush3.bf16.msra.mxu1 %v1878_v52 }
  0x80   : > { %1742 = vmatprep.subr.bf16.mxu1 %v1880_v54 }
  0x83   : > { %1743 = vmatpush3.bf16.msra.mxu1 %v1881_v55 }
  0x86   : > { %1374 = vmatmul.mubr.bf16.vlgmr.msra.gmra.mrb[12].mxu1 %v1882_v57 }
  0xf9   : > { %v1634_v59 = vpop.f32.mrb[0].mxu1 }
  0xfa   : > { %v1635_v60 = vpop.f32.mrb[1].mxu1 }
  0xfb   : > { %v1636_v61 = vadd.f32 %v1635_v60, %v1634_v59  ;;  %v1637_v62 = vpop.f32.mrb[2].mxu1  ;;  %v1678_v1 = vpop.f32.mrb[0].mxu0 }
  0xfc   : > { %v1638_v63 = vpop.f32.mrb[3].mxu1  ;;  %v1679_v2 = vpop.f32.mrb[1].mxu0 }
  0xfd   : > { %v1639_v0 = vadd.f32 %v1638_v63, %v1637_v62  ;;  %v1680_v3 = vadd.f32 %v1679_v2, %v1678_v1  ;;  %v1681_v4 = vpop.f32.mrb[2].mxu0  ;;  %v1171_v10 = vadd.f32 %v1636_v61, %v1492_v7 }
  0xfe   : > { %v1682_v5 = vpop.f32.mrb[3].mxu0 }
  0xff   : > { %v1683_v6 = vadd.f32 %v1682_v5, %v1681_v4  ;;  %v1174_v14 = vadd.f32 %v1639_v0, %v1492_v7 }
 0x119   : > { %v1656_v8 = vpop.f32.mrb[4].mxu1 }
 0x11a   : > { %v1657_v9 = vpop.f32.mrb[5].mxu1 }
 0x11b   : > { %v1658_v11 = vadd.f32 %v1657_v9, %v1656_v8  ;;  %v1659_v12 = vpop.f32.mrb[6].mxu1  ;;  %v1722_v20 = vpop.f32.mrb[4].mxu0 }
 0x11c   : > { %v1660_v13 = vpop.f32.mrb[7].mxu1  ;;  %v1723_v21 = vpop.f32.mrb[5].mxu0 }
 0x11d   : > { %v1212_v15 = vadd.f32 %v1658_v11, %v1171_v10  ;;  %v1661_v16 = vadd.f32 %v1660_v13, %v1659_v12  ;;  %v1724_v22 = vadd.f32 %v1723_v21, %v1722_v20  ;;  %v1725_v23 = vpop.f32.mrb[6].mxu0 }
 0x11e   : > { %v1726_v24 = vpop.f32.mrb[7].mxu0 }
 0x11f   : > { %v1215_v17 = vadd.f32 %v1661_v16, %v1174_v14  ;;  %v1253_v18 = vadd.f32 %v1680_v3, %v1212_v15  ;;  %v1727_v25 = vadd.f32 %v1726_v24, %v1725_v23 }
 0x121   : > { %v1256_v19 = vadd.f32 %v1683_v6, %v1215_v17 }
 0x139   : > { %v1700_v26 = vpop.f32.mrb[8].mxu1 }
 0x13a   : > { %v1701_v27 = vpop.f32.mrb[9].mxu1 }
 0x13b   : > { %v1702_v28 = vadd.f32 %v1701_v27, %v1700_v26  ;;  %v1703_v29 = vpop.f32.mrb[10].mxu1 }
 0x13c   : > { %v1704_v30 = vpop.f32.mrb[11].mxu1 }
 0x13d   : > { %v1294_v31 = vadd.f32 %v1702_v28, %v1253_v18  ;;  %v1705_v32 = vadd.f32 %v1704_v30, %v1703_v29 }
 0x13f   : > { %v1297_v33 = vadd.f32 %v1705_v32, %v1256_v19  ;;  %v1335_v34 = vadd.f32 %v1724_v22, %v1294_v31 }
 0x141   : > { %v1338_v35 = vadd.f32 %v1727_v25, %v1297_v33 }
 0x14b   : > { %v1416_v37 = vpop.f32.mrb[8].mxu0 }
 0x14c   : > { %v1418_v39 = vpop.f32.mrb[9].mxu0 }
 0x14d   : > { %v1419_v42 = vpop.f32.mrb[10].mxu0 }
 0x14e   : > { %v1421_v44 = vpop.f32.mrb[11].mxu0 }
 0x159   : > { %v1744_v36 = vpop.f32.mrb[12].mxu1 }
 0x15a   : > { %v1745_v38 = vpop.f32.mrb[13].mxu1 }
 0x15b   : > { %v1746_v40 = vadd.f32 %v1745_v38, %v1744_v36  ;;  %v1747_v41 = vpop.f32.mrb[14].mxu1 }
 0x15c   : > { %v1748_v43 = vpop.f32.mrb[15].mxu1 }
 0x15d   : > { %v1376_v45 = vadd.f32 %v1746_v40, %v1335_v34  ;;  %v1749_v46 = vadd.f32 %v1748_v43, %v1747_v41 }
 0x15f   : > { %v1417_v47 = vadd.f32 %v1416_v37, %v1376_v45  ;;  %v1379_v48 = vadd.f32 %v1749_v46, %v1338_v35 }
 0x161   : > { %v1423_v49 = vmax.f32 %v1417_v47, 0.0  ;;  %v1420_v50 = vadd.f32 %v1419_v42, %v1379_v48 }
 0x163   : > { %1425 = vst.msk [vmem:[%s175_s20] sm:$0xff] %vm1132_vm0, %v1423_v49  ;;  %v1424_v51 = vmax.f32 %v1420_v50, 0.0 }
 0x165   : > { %1426 = vst.msk [vmem:[%s175_s20 + $0x8] sm:$0xff] %vm1132_vm0, %v1424_v51 }
 0x166 PF: > { %s13_s12 = sadd.s32 1, %s1895_s12  }
 0x167   : > { %p10_p4 = scmp.ge.s32.totalorder %s13_s12, 4  }
 0x169   :  { %12 = sbr.rel (!%p10_p4) target bundleno = 1 (0x1), region = 62 }

// kernel: forward.17
= control target key start
LH: loop header
LB: loop body
LE: loop exit
PB: predicated region body
PF: predicated region fallthrough
CT: control target
= control target key end

     0   :  { %vm941_vm0 = vcmask 523264   ;;  %s1996_s1 = inlined_call_operand.vmem [shape: bf16[1728,64], index: 1, kind: input, shape index: {}]   ;;  %s1997_s0 = inlined_call_operand.vmem [shape: bf16[8,1728], index: 0, kind: input, shape index: {}]   ;;  %s1998_s2 = inlined_call_operand.vmem [shape: f32[1,64], index: 2, kind: input, shape index: {}]   ;;  %s1999_s3 = inlined_call_operand.vmem [shape: f32[8,64], index: 3, kind: output, shape index: {}]  }
   0x1   :  { %v1488_v0 = vld [vmem:[%s1996_s1 + $0x40] sm:$0xff]   ;;  %v1490_v2 = vld [vmem:[%s1996_s1 + $0x48] sm:$0xff]   ;;  %v1492_v4 = vld [vmem:[%s1996_s1 + $0x50] sm:$0xff]  }
   0x2   :  { %v1489_v1 = vld [vmem:[%s1996_s1] sm:$0xff]   ;;  %1355 = vmatprep.subr.bf16.mxu1 %v1488_v0  ;;  %v1491_v3 = vld [vmem:[%s1996_s1 + $0x8] sm:$0xff]   ;;  %v1493_v5 = vld [vmem:[%s1996_s1 + $0x10] sm:$0xff]  }
   0x3   :  { %1356 = vmatpush3.bf16.msra.mxu1 %v1489_v1  ;;  %v1494_v6 = vld [vmem:[%s1996_s1 + $0x58] sm:$0xff]   ;;  %v1498_v8 = vld [vmem:[%s1996_s1 + $0x140] sm:$0xff]   ;;  %v1502_v12 = vld [vmem:[%s1996_s1 + $0x148] sm:$0xff]  }
   0x4   :  { %1357 = vmatprep.subr.bf16.mxu1 %v1490_v2  ;;  %v1495_v7 = vld [vmem:[%s1996_s1 + $0x18] sm:$0xff]   ;;  %v1499_v9 = vld [vmem:[%s1996_s1 + $0x100] sm:$0xff]   ;;  %1399 = vmatprep.subr.bf16.mxu0 %v1498_v8  ;;  %v1503_v13 = vld [vmem:[%s1996_s1 + $0x108] sm:$0xff]  }
   0x5   :  { %v1496_v10 = vld [vmem:[%s1996_s1 + $0x60] sm:$0xff]   ;;  %1400 = vmatpush3.bf16.msra.mxu0 %v1499_v9  ;;  %v1500_v14 = vld [vmem:[%s1996_s1 + $0x68] sm:$0xff]   ;;  %v1506_v16 = vld [vmem:[%s1996_s1 + $0x150] sm:$0xff]  }
   0x6   :  { %v1497_v11 = vld [vmem:[%s1996_s1 + $0x20] sm:$0xff]   ;;  %1401 = vmatprep.subr.bf16.mxu0 %v1502_v12  ;;  %v1501_v15 = vld [vmem:[%s1996_s1 + $0x28] sm:$0xff]   ;;  %v1507_v17 = vld [vmem:[%s1996_s1 + $0x110] sm:$0xff]  }
   0x7   :  { %1358 = vmatpush3.bf16.msra.mxu1 %v1491_v3  ;;  %v1504_v18 = vld [vmem:[%s1996_s1 + $0x70] sm:$0xff]   ;;  %v1508_v20 = vld [vmem:[%s1996_s1 + $0x78] sm:$0xff]   ;;  %v15_v22 = vld [vmem:[%s1997_s0] sm:$0xff] }
   0x8   :  { %1359 = vmatprep.subr.bf16.mxu1 %v1492_v4  ;;  %v1505_v19 = vld [vmem:[%s1996_s1 + $0x30] sm:$0xff]   ;;  %v1510_v21 = vld [vmem:[%s1996_s1 + $0x158] sm:$0xff]   ;;  %v1233_v23 = vcombine.high %v15_v22, %v15_v22  ;;  %v1514_v26 = vld [vmem:[%s1996_s1 + $0xc0] sm:$0xff]   ;;  %v1232_v30 = vcombine.low %v15_v22, %v15_v22 }
   0x9   :  { %1402 = vmatpush3.bf16.msra.mxu0 %v1503_v13  ;;  %v1513_v24 = vld [vmem:[%s1996_s1 + $0x118] sm:$0xff]   ;;  %v1516_v27 = vld [vmem:[%s1996_s1 + $0x160] sm:$0xff]   ;;  %v1518_v31 = vld [vmem:[%s1996_s1 + $0xc8] sm:$0xff]  }
   0xa   :  { %1403 = vmatprep.subr.bf16.mxu0 %v1506_v16  ;;  %v1509_v25 = vld [vmem:[%s1996_s1 + $0x38] sm:$0xff]   ;;  %977 = vmatprep.mubr.bf16.mxu1 %v1233_v23  ;;  %v1517_v28 = vld [vmem:[%s1996_s1 + $0x120] sm:$0xff]   ;;  %v1520_v32 = vld [vmem:[%s1996_s1 + $0x168] sm:$0xff]  }
   0xb   :  { %1360 = vmatpush3.bf16.msra.mxu1 %v1493_v5  ;;  %v1515_v29 = vld [vmem:[%s1996_s1 + $0x80] sm:$0xff]   ;;  %v1521_v33 = vld [vmem:[%s1996_s1 + $0x128] sm:$0xff]   ;;  %v1522_v35 = vld [vmem:[%s1996_s1 + $0xd0] sm:$0xff]  }
   0xc   :  { %1361 = vmatprep.subr.bf16.mxu1 %v1494_v6  ;;  %v1519_v34 = vld [vmem:[%s1996_s1 + $0x88] sm:$0xff]   ;;  %v1524_v36 = vld [vmem:[%s1996_s1 + $0x170] sm:$0xff]   ;;  %v1526_v39 = vld [vmem:[%s1996_s1 + $0xd8] sm:$0xff]  }
   0xd   :  { %1404 = vmatpush3.bf16.msra.mxu0 %v1507_v17  ;;  %v1525_v37 = vld [vmem:[%s1996_s1 + $0x130] sm:$0xff]   ;;  %v1528_v40 = vld [vmem:[%s1996_s1 + $0x178] sm:$0xff]   ;;  %v1530_v43 = vld [vmem:[%s1996_s1 + $0xe0] sm:$0xff]  }
   0xe   :  { %1405 = vmatprep.subr.bf16.mxu0 %v1510_v21  ;;  %v1523_v38 = vld [vmem:[%s1996_s1 + $0x90] sm:$0xff]   ;;  %v1529_v41 = vld [vmem:[%s1996_s1 + $0x138] sm:$0xff]   ;;  %v1534_v47 = vld [vmem:[%s1996_s1 + $0x240] sm:$0xff]   ;;  %v1610_v21 = vmov 0  }
   0xf   :  { %1362 = vmatpush3.bf16.msra.mxu1 %v1495_v7  ;;  %v1527_v42 = vld [vmem:[%s1996_s1 + $0x98] sm:$0xff]   ;;  %v17_v44 = vld [vmem:[%s1997_s0 + $0x10] sm:$0xff]  ;;  %v1535_v48 = vld [vmem:[%s1996_s1 + $0x200] sm:$0xff]  }
  0x10   :  { %1363 = vmatprep.subr.bf16.mxu1 %v1496_v10  ;;  %v1236_v45 = vcombine.low %v17_v44, %v17_v44  ;;  %v1237_v46 = vcombine.high %v17_v44, %v17_v44  ;;  %v1531_v49 = vld [vmem:[%s1996_s1 + $0xa0] sm:$0xff]   ;;  %v1536_v50 = vld [vmem:[%s1996_s1 + $0xe8] sm:$0xff]   ;;  %v1540_v54 = vld [vmem:[%s1996_s1 + $0xf0] sm:$0xff]  }
  0x11   :  { %1406 = vmatpush3.bf16.msra.mxu0 %v1513_v24  ;;  %v1538_v51 = vld [vmem:[%s1996_s1 + $0x248] sm:$0xff]   ;;  %v1542_v55 = vld [vmem:[%s1996_s1 + $0x250] sm:$0xff]   ;;  %v1544_v58 = vld [vmem:[%s1996_s1 + $0xf8] sm:$0xff]  }
  0x12   :  { %1407 = vmatprep.subr.bf16.mxu0 %v1516_v27  ;;  %1057 = vmatprep.mubr.bf16.mxu0 %v1237_v46  ;;  %v1539_v52 = vld [vmem:[%s1996_s1 + $0x208] sm:$0xff]   ;;  %v1543_v56 = vld [vmem:[%s1996_s1 + $0x210] sm:$0xff]   ;;  %v1546_v59 = vld [vmem:[%s1996_s1 + $0x258] sm:$0xff]  }
  0x13   :  { %1364 = vmatpush3.bf16.msra.mxu1 %v1497_v11  ;;  %v1537_v53 = vld [vmem:[%s1996_s1 + $0xa8] sm:$0xff]   ;;  %v1541_v57 = vld [vmem:[%s1996_s1 + $0xb0] sm:$0xff]   ;;  %v1549_v62 = vld [vmem:[%s1996_s1 + $0x218] sm:$0xff]  }
  0x14   :  { %1365 = vmatprep.subr.bf16.mxu1 %v1500_v14  ;;  %v16_v60 = vld [vmem:[%s1997_s0 + $0x8] sm:$0xff]  ;;  %v1545_v63 = vld [vmem:[%s1996_s1 + $0xb8] sm:$0xff]   ;;  %v1550_v0 = vld [vmem:[%s1996_s1 + $0x1c0] sm:$0xff]  }
  0x15   :  { %1408 = vmatpush3.bf16.msra.mxu0 %v1517_v28  ;;  %v1235_v61 = vcombine.high %v16_v60, %v16_v60  ;;  %v1552_v1 = vld [vmem:[%s1996_s1 + $0x260] sm:$0xff]   ;;  %v1234_v4 = vcombine.low %v16_v60, %v16_v60  ;;  %v1554_v5 = vld [vmem:[%s1996_s1 + $0x1c8] sm:$0xff]   ;;  %v1558_v9 = vld [vmem:[%s1996_s1 + $0x1d0] sm:$0xff]  }
  0x16   :  { %1409 = vmatprep.subr.bf16.mxu0 %v1520_v32  ;;  %v1553_v2 = vld [vmem:[%s1996_s1 + $0x220] sm:$0xff]   ;;  %v1556_v6 = vld [vmem:[%s1996_s1 + $0x268] sm:$0xff]   ;;  %v1560_v10 = vld [vmem:[%s1996_s1 + $0x270] sm:$0xff]  }
  0x17   :  { %1366 = vmatpush3.bf16.msra.mxu1 %v1501_v15  ;;  %v1551_v3 = vld [vmem:[%s1996_s1 + $0x180] sm:$0xff]   ;;  %v1557_v7 = vld [vmem:[%s1996_s1 + $0x228] sm:$0xff]   ;;  %v1561_v11 = vld [vmem:[%s1996_s1 + $0x230] sm:$0xff]  }
  0x18   :  { %1367 = vmatprep.subr.bf16.mxu1 %v1504_v18  ;;  %v1555_v8 = vld [vmem:[%s1996_s1 + $0x188] sm:$0xff]   ;;  %v1559_v12 = vld [vmem:[%s1996_s1 + $0x190] sm:$0xff]   ;;  %v1562_v13 = vld [vmem:[%s1996_s1 + $0x1d8] sm:$0xff]  }
  0x19   :  { %1410 = vmatpush3.bf16.msra.mxu0 %v1521_v33  ;;  %v1564_v14 = vld [vmem:[%s1996_s1 + $0x278] sm:$0xff]   ;;  %v1566_v17 = vld [vmem:[%s1996_s1 + $0x1e0] sm:$0xff]   ;;  %v1571_v24 = vld [vmem:[%s1996_s1 + $0x1e8] sm:$0xff]  }
  0x1a   :  { %1411 = vmatprep.subr.bf16.mxu0 %v1524_v36  ;;  %v1565_v15 = vld [vmem:[%s1996_s1 + $0x238] sm:$0xff]   ;;  %v19_v18 = vld [vmem:[%s1997_s0 + $0x20] sm:$0xff]  ;;  %v1574_v27 = vld [vmem:[%s1996_s1 + $0x1f0] sm:$0xff]  }
  0x1b   :  { %1368 = vmatpush3.bf16.msra.mxu1 %v1505_v19  ;;  %v1563_v16 = vld [vmem:[%s1996_s1 + $0x198] sm:$0xff]   ;;  %v1240_v19 = vcombine.low %v19_v18, %v19_v18  ;;  %v1570_v22 = vld [vmem:[%s1996_s1 + $0x300] sm:$0xff]   ;;  %v1576_v28 = vld [vmem:[%s1996_s1 + $0x310] sm:$0xff]  }
  0x1c   :  { %1369 = vmatprep.subr.bf16.mxu1 %v1508_v20  ;;  %v1241_v20 = vcombine.high %v19_v18, %v19_v18  ;;  %v1567_v23 = vld [vmem:[%s1996_s1 + $0x1a0] sm:$0xff]   ;;  %v1577_v32 = vld [vmem:[%s1996_s1 + $0x1f8] sm:$0xff]   ;;  %v1589_v44 = vld [vmem:[%s1996_s1 + $0x290] sm:$0xff]  }
  0x1d   :  { %1412 = vmatpush3.bf16.msra.mxu0 %v1525_v37  ;;  %v1581_v33 = vld [vmem:[%s1996_s1 + $0x318] sm:$0xff]   ;;  %v1584_v36 = vld [vmem:[%s1996_s1 + $0x320] sm:$0xff]   ;;  %v1601_v60 = vld [vmem:[%s1996_s1 + $0x2b0] sm:$0xff]  }
  0x1e   :  { %1413 = vmatprep.subr.bf16.mxu0 %v1528_v40  ;;  %v1587_v40 = vld [vmem:[%s1996_s1 + $0x328] sm:$0xff]   ;;  %v1593_v46 = vld [vmem:[%s1996_s1 + $0x338] sm:$0xff]  }
  0x1f   :  { %1370 = vmatpush3.bf16.msra.mxu1 %v1509_v25  ;;  %v1573_v25 = vld [vmem:[%s1996_s1 + $0x308] sm:$0xff]  }
  0x20   :  { %1377 = vmatprep.subr.bf16.mxu1 %v1514_v26  ;;  %v1572_v26 = vld [vmem:[%s1996_s1 + $0x1a8] sm:$0xff]  }
  0x21   :  { %1414 = vmatpush3.bf16.msra.mxu0 %v1529_v41  ;;  %v1586_v41 = vld [vmem:[%s1996_s1 + $0x288] sm:$0xff]  }
  0x22   :  { %978 = vmatmul.mubr.bf16.vlgmr.msra.gmra.mrb[0].mxu1 %v1232_v30  ;;  %1443 = vmatprep.subr.bf16.mxu0 %v1534_v47  ;;  %v1592_v47 = vld [vmem:[%s1996_s1 + $0x298] sm:$0xff]  }
  0x23   :  { %1378 = vmatpush3.bf16.msra.mxu1 %v1515_v29  ;;  %1017 = vmatprep.mubr.bf16.mxu1 %v1235_v61  ;;  %v18_v29 = vld [vmem:[%s1997_s0 + $0x18] sm:$0xff] }
  0x24   :  { %1379 = vmatprep.subr.bf16.mxu1 %v1518_v31  ;;  %1058 = vmatmul.mubr.bf16.vlgmr.msra.gmra.mrb[0].mxu0 %v1236_v45  ;;  %v1239_v30 = vcombine.high %v18_v29, %v18_v29  ;;  %v1575_v31 = vld [vmem:[%s1996_s1 + $0x1b0] sm:$0xff]   ;;  %v1238_v37 = vcombine.low %v18_v29, %v18_v29  ;;  %v1591_v45 = vld [vmem:[%s1996_s1 + $0x2d8] sm:$0xff]  }
  0x25   :  { %1444 = vmatpush3.bf16.msra.mxu0 %v1535_v48  ;;  %1137 = vmatprep.mubr.bf16.mxu0 %v1241_v20  ;;  %v1594_v48 = vld [vmem:[%s1996_s1 + $0x2e0] sm:$0xff]   ;;  %v1603_v61 = vld [vmem:[%s1996_s1 + $0x2f8] sm:$0xff]  }
  0x26   :  { %1445 = vmatprep.subr.bf16.mxu0 %v1538_v51 }
  0x27   :  { %1380 = vmatpush3.bf16.msra.mxu1 %v1519_v34  ;;  %v1578_v34 = vld [vmem:[%s1996_s1 + $0x1b8] sm:$0xff]  }
  0x28   :  { %1381 = vmatprep.subr.bf16.mxu1 %v1522_v35  ;;  %v1582_v35 = vld [vmem:[%s1996_s1 + $0x2c0] sm:$0xff]  }
  0x29   :  { %1446 = vmatpush3.bf16.msra.mxu0 %v1539_v52  ;;  %v21_v52 = vld [vmem:[%s1997_s0 + $0x30] sm:$0xff] }
  0x2a   :  { %1447 = vmatprep.subr.bf16.mxu0 %v1542_v55  ;;  %v1597_v55 = vld [vmem:[%s1996_s1 + $0x2e8] sm:$0xff]  }
  0x2b   :  { %1382 = vmatpush3.bf16.msra.mxu1 %v1523_v38  ;;  %v1583_v38 = vld [vmem:[%s1996_s1 + $0x280] sm:$0xff]  }
  0x2c   :  { %1383 = vmatprep.subr.bf16.mxu1 %v1526_v39  ;;  %v1585_v39 = vld [vmem:[%s1996_s1 + $0x2c8] sm:$0xff]  }
  0x2d   :  { %1448 = vmatpush3.bf16.msra.mxu0 %v1543_v56  ;;  %v1599_v56 = vld [vmem:[%s1996_s1 + $0x348] sm:$0xff]  }
  0x2e   :  { %1449 = vmatprep.subr.bf16.mxu0 %v1546_v59  ;;  %v1602_v59 = vld [vmem:[%s1996_s1 + $0x350] sm:$0xff]  }
  0x2f   :  { %1384 = vmatpush3.bf16.msra.mxu1 %v1527_v42  ;;  %v1588_v42 = vld [vmem:[%s1996_s1 + $0x2d0] sm:$0xff]  }
  0x30   :  { %1385 = vmatprep.subr.bf16.mxu1 %v1530_v43  ;;  %v1590_v43 = vld [vmem:[%s1996_s1 + $0x330] sm:$0xff]  }
  0x31   :  { %1450 = vmatpush3.bf16.msra.mxu0 %v1549_v62  ;;  %v1607_v62 = vld [vmem:[%s1996_s1 + $0x358] sm:$0xff]  }
  0x32   :  { %1451 = vmatprep.subr.bf16.mxu0 %v1552_v1 }
  0x33   :  { %1386 = vmatpush3.bf16.msra.mxu1 %v1531_v49  ;;  %v1596_v49 = vld [vmem:[%s1996_s1 + $0x340] sm:$0xff]  }
  0x34   :  { %1387 = vmatprep.subr.bf16.mxu1 %v1536_v50  ;;  %v20_v50 = vld [vmem:[%s1997_s0 + $0x28] sm:$0xff] }
  0x35   :  { %1452 = vmatpush3.bf16.msra.mxu0 %v1553_v2  ;;  %v1243_v51 = vcombine.high %v20_v50, %v20_v50  ;;  %v1242_v1 = vcombine.low %v20_v50, %v20_v50 }
  0x36   :  { %1453 = vmatprep.subr.bf16.mxu0 %v1556_v6 }
  0x37   :  { %1388 = vmatpush3.bf16.msra.mxu1 %v1537_v53  ;;  %v1595_v53 = vld [vmem:[%s1996_s1 + $0x2a0] sm:$0xff]  }
  0x38   :  { %1389 = vmatprep.subr.bf16.mxu1 %v1540_v54  ;;  %v1245_v54 = vcombine.high %v21_v52, %v21_v52 }
  0x39   :  { %1454 = vmatpush3.bf16.msra.mxu0 %v1557_v7 }
  0x3a   :  { %1455 = vmatprep.subr.bf16.mxu0 %v1560_v10 }
  0x3b   :  { %1390 = vmatpush3.bf16.msra.mxu1 %v1541_v57  ;;  %v1598_v57 = vld [vmem:[%s1996_s1 + $0x2a8] sm:$0xff]  }
  0x3c   :  { %1391 = vmatprep.subr.bf16.mxu1 %v1544_v58  ;;  %v1600_v58 = vld [vmem:[%s1996_s1 + $0x2f0] sm:$0xff]  }
  0x3d   :  { %1456 = vmatpush3.bf16.msra.mxu0 %v1561_v11 }
  0x3e   :  { %1457 = vmatprep.subr.bf16.mxu0 %v1564_v14 }
  0x3f   :  { %1392 = vmatpush3.bf16.msra.mxu1 %v1545_v63  ;;  %v1604_v63 = vld [vmem:[%s1996_s1 + $0x2b8] sm:$0xff]  }
  0x40   :  { %1421 = vmatprep.subr.bf16.mxu1 %v1550_v0  ;;  %v1244_v0 = vcombine.low %v21_v52, %v21_v52 }
  0x41   :  { %1458 = vmatpush3.bf16.msra.mxu0 %v1565_v15 }
  0x42   :  { %1018 = vmatmul.mubr.bf16.vlgmr.msra.gmra.mrb[4].mxu1 %v1234_v4  ;;  %1185 = vmatprep.subr.bf16.mxu0 %v1610_v21 }
  0x43   :  { %1422 = vmatpush3.bf16.msra.mxu1 %v1551_v3  ;;  %1097 = vmatprep.mubr.bf16.mxu1 %v1239_v30 }
  0x44   :  { %1423 = vmatprep.subr.bf16.mxu1 %v1554_v5  ;;  %1138 = vmatmul.mubr.bf16.vlgmr.msra.gmra.mrb[4].mxu0 %v1240_v19 }
  0x45   :  { %1186 = vmatpush1.bf16.msra.mxu0 %v1570_v22  ;;  %1354 = vmatprep.mubr.msk.bf16.mxu0 %vm941_vm0, %v1245_v54 }
  0x46   :  { %1187 = vmatprep.subr.bf16.mxu0 %v1610_v21 }
  0x47   :  { %1424 = vmatpush3.bf16.msra.mxu1 %v1555_v8 }
  0x48   :  { %1425 = vmatprep.subr.bf16.mxu1 %v1558_v9 }
  0x49   :  { %1188 = vmatpush1.bf16.msra.mxu0 %v1573_v25 }
  0x4a   :  { %1189 = vmatprep.subr.bf16.mxu0 %v1610_v21 }
  0x4b   :  { %1426 = vmatpush3.bf16.msra.mxu1 %v1559_v12  ;;  %v1231_v12 = vld [vmem:[%s1998_s2] ss:$0 sm:$0xff] }
  0x4c   :  { %1427 = vmatprep.subr.bf16.mxu1 %v1562_v13 }
  0x4d   :  { %1190 = vmatpush1.bf16.msra.mxu0 %v1576_v28 }
  0x4e   :  { %1191 = vmatprep.subr.bf16.mxu0 %v1610_v21 }
  0x4f   :  { %1428 = vmatpush3.bf16.msra.mxu1 %v1563_v16 }
  0x50   :  { %1429 = vmatprep.subr.bf16.mxu1 %v1566_v17 }
  0x51   :  { %1192 = vmatpush1.bf16.msra.mxu0 %v1581_v33 }
  0x52   :  { %1193 = vmatprep.subr.bf16.mxu0 %v1610_v21 }
  0x53   :  { %1430 = vmatpush3.bf16.msra.mxu1 %v1567_v23 }
  0x54   :  { %1431 = vmatprep.subr.bf16.mxu1 %v1571_v24 }
  0x55   :  { %1194 = vmatpush1.bf16.msra.mxu0 %v1584_v36 }
  0x56   :  { %1195 = vmatprep.subr.bf16.mxu0 %v1610_v21 }
  0x57   :  { %1432 = vmatpush3.bf16.msra.mxu1 %v1572_v26 }
  0x58   :  { %1433 = vmatprep.subr.bf16.mxu1 %v1574_v27 }
  0x59   :  { %1196 = vmatpush1.bf16.msra.mxu0 %v1587_v40 }
  0x5a   :  { %1197 = vmatprep.subr.bf16.mxu0 %v1610_v21 }
  0x5b   :  { %1434 = vmatpush3.bf16.msra.mxu1 %v1575_v31 }
  0x5c   :  { %1435 = vmatprep.subr.bf16.mxu1 %v1577_v32 }
  0x5d   :  { %1198 = vmatpush1.bf16.msra.mxu0 %v1590_v43 }
  0x5e   :  { %1199 = vmatprep.subr.bf16.mxu0 %v1610_v21 }
  0x5f   :  { %1436 = vmatpush3.bf16.msra.mxu1 %v1578_v34 }
  0x60   :  { %1465 = vmatprep.subr.bf16.mxu1 %v1582_v35 }
  0x61   :  { %1200 = vmatpush1.bf16.msra.mxu0 %v1593_v46 }
  0x62   :  { %1098 = vmatmul.mubr.bf16.vlgmr.msra.gmra.mrb[8].mxu1 %v1238_v37  ;;  %1201 = vmatprep.subr.bf16.mxu0 %v1610_v21 }
  0x63   :  { %1466 = vmatpush3.bf16.msra.mxu1 %v1583_v38  ;;  %1177 = vmatprep.mubr.bf16.mxu1 %v1243_v51 }
  0x64   :  { %1467 = vmatprep.subr.bf16.mxu1 %v1585_v39 }
  0x65   :  { %1202 = vmatpush1.bf16.msra.mxu0 %v1596_v49 }
  0x66   :  { %1203 = vmatprep.subr.bf16.mxu0 %v1610_v21 }
  0x67   :  { %1468 = vmatpush3.bf16.msra.mxu1 %v1586_v41 }
  0x68   :  { %1469 = vmatprep.subr.bf16.mxu1 %v1588_v42 }
  0x69   :  { %1204 = vmatpush1.bf16.msra.mxu0 %v1599_v56 }
  0x6a   :  { %1205 = vmatprep.subr.bf16.mxu0 %v1610_v21 }
  0x6b   :  { %1470 = vmatpush3.bf16.msra.mxu1 %v1589_v44 }
  0x6c   :  { %1471 = vmatprep.subr.bf16.mxu1 %v1591_v45 }
  0x6d   :  { %1206 = vmatpush1.bf16.msra.mxu0 %v1602_v59 }
  0x6e   :  { %1207 = vmatprep.subr.bf16.mxu0 %v1610_v21 }
  0x6f   :  { %1472 = vmatpush3.bf16.msra.mxu1 %v1592_v47 }
  0x70   :  { %1473 = vmatprep.subr.bf16.mxu1 %v1594_v48 }
  0x71   :  { %1208 = vmatpush1.bf16.msra.mxu0 %v1607_v62 }
  0x73   :  { %1474 = vmatpush3.bf16.msra.mxu1 %v1595_v53 }
  0x74   :  { %1475 = vmatprep.subr.bf16.mxu1 %v1597_v55  ;;  %1218 = vmatmul.mubr.bf16.vlgmr.msra.gmra.mrb[8].mxu0 %v1244_v0 }
  0x77   :  { %1476 = vmatpush3.bf16.msra.mxu1 %v1598_v57 }
  0x78   :  { %1477 = vmatprep.subr.bf16.mxu1 %v1600_v58 }
  0x7b   :  { %1478 = vmatpush3.bf16.msra.mxu1 %v1601_v60 }
  0x7c   :  { %1479 = vmatprep.subr.bf16.mxu1 %v1603_v61 }
  0x7f   :  { %1480 = vmatpush3.bf16.msra.mxu1 %v1604_v63 }
  0x82   :  { %1178 = vmatmul.mubr.bf16.vlgmr.msra.gmra.mrb[12].mxu1 %v1242_v1 }
  0xf5   :  { %v1371_v2 = vpop.f32.mrb[0].mxu1 }
  0xf6   :  { %v1372_v3 = vpop.f32.mrb[1].mxu1 }
  0xf7   :  { %v1373_v4 = vadd.f32 %v1372_v3, %v1371_v2  ;;  %v1374_v5 = vpop.f32.mrb[2].mxu1  ;;  %v1415_v7 = vpop.f32.mrb[0].mxu0 }
  0xf8   :  { %v1375_v6 = vpop.f32.mrb[3].mxu1  ;;  %v1416_v8 = vpop.f32.mrb[1].mxu0 }
  0xf9   :  { %v1417_v9 = vadd.f32 %v1416_v8, %v1415_v7  ;;  %v1418_v10 = vpop.f32.mrb[2].mxu0  ;;  %v980_v15 = vadd.f32 %v1373_v4, %v1231_v12 }
  0xfa   :  { %v1419_v11 = vpop.f32.mrb[3].mxu0 }
 0x115   :  { %v1393_v13 = vpop.f32.mrb[4].mxu1 }
 0x116   :  { %v1394_v14 = vpop.f32.mrb[5].mxu1 }
 0x117   :  { %v1395_v16 = vadd.f32 %v1394_v14, %v1393_v13  ;;  %v1396_v17 = vpop.f32.mrb[6].mxu1  ;;  %v1459_v21 = vpop.f32.mrb[4].mxu0 }
 0x118   :  { %v1397_v18 = vpop.f32.mrb[7].mxu1  ;;  %v1460_v22 = vpop.f32.mrb[5].mxu0 }
 0x119   :  { %v1020_v19 = vadd.f32 %v1395_v16, %v980_v15  ;;  %v1461_v23 = vadd.f32 %v1460_v22, %v1459_v21  ;;  %v1462_v24 = vpop.f32.mrb[6].mxu0 }
 0x11a   :  { %v1463_v25 = vpop.f32.mrb[7].mxu0 }
 0x11b   :  { %v1060_v20 = vadd.f32 %v1417_v9, %v1020_v19 }
 0x135   :  { %v1437_v26 = vpop.f32.mrb[8].mxu1 }
 0x136   :  { %v1438_v27 = vpop.f32.mrb[9].mxu1 }
 0x137   :  { %v1439_v28 = vadd.f32 %v1438_v27, %v1437_v26  ;;  %v1440_v29 = vpop.f32.mrb[10].mxu1 }
 0x138   :  { %v1441_v30 = vpop.f32.mrb[11].mxu1 }
 0x139   :  { %v1100_v31 = vadd.f32 %v1439_v28, %v1060_v20 }
 0x13b   :  { %v1140_v32 = vadd.f32 %v1461_v23, %v1100_v31 }
 0x147   :  { %v1219_v33 = vpop.f32.mrb[8].mxu0 }
 0x148   :  { %v1221_v34 = vpop.f32.mrb[9].mxu0 }
 0x149   :  { %v1222_v35 = vpop.f32.mrb[10].mxu0 }
 0x14a   :  { %v1223_v37 = vpop.f32.mrb[11].mxu0 }
 0x155   :  { %v1481_v36 = vpop.f32.mrb[12].mxu1 }
 0x156   :  { %v1482_v38 = vpop.f32.mrb[13].mxu1 }
 0x157   :  { %v1483_v39 = vadd.f32 %v1482_v38, %v1481_v36  ;;  %v1484_v40 = vpop.f32.mrb[14].mxu1 }
 0x158   :  { %v1485_v41 = vpop.f32.mrb[15].mxu1 }
 0x159   :  { %v1180_v42 = vadd.f32 %v1483_v39, %v1140_v32 }
 0x15b   :  { %v1220_v43 = vadd.f32 %v1219_v33, %v1180_v42 }
 0x15d   :  { %v1225_v44 = vmax.f32 %v1220_v43, 0.0 }
 0x15f   :  { %1226 = vst.msk [vmem:[%s1999_s3] sm:$0xff] %vm941_vm0, %v1225_v44 }

// kernel: forward.18
= control target key start
LH: loop header
LB: loop body
LE: loop exit
PB: predicated region body
PF: predicated region fallthrough
CT: control target
= control target key end

     0   :  { %s368_s1 = inlined_call_operand.vmem [shape: bf16[256,128], index: 1, kind: input, shape index: {}]   ;;  %s369_s0 = inlined_call_operand.vmem [shape: bf16[16,256], index: 0, kind: input, shape index: {}]   ;;  %s370_s2 = inlined_call_operand.vmem [shape: f32[1,128], index: 2, kind: input, shape index: {}]   ;;  %s371_s3 = inlined_call_operand.vmem [shape: f32[16,128], index: 3, kind: output, shape index: {}]  }
   0x1   :  { %v262_v0 = vld [vmem:[%s368_s1 + $0x40] sm:$0xff]   ;;  %v264_v2 = vld [vmem:[%s368_s1 + $0x48] sm:$0xff]   ;;  %v266_v4 = vld [vmem:[%s368_s1 + $0x50] sm:$0xff]  }
   0x2   :  { %v263_v1 = vld [vmem:[%s368_s1] sm:$0xff]   ;;  %240 = vmatprep.subr.bf16.mxu0 %v262_v0  ;;  %v265_v3 = vld [vmem:[%s368_s1 + $0x8] sm:$0xff]   ;;  %v267_v5 = vld [vmem:[%s368_s1 + $0x10] sm:$0xff]  }
   0x3   :  { %241 = vmatpush3.bf16.msra.mxu0 %v263_v1  ;;  %v268_v6 = vld [vmem:[%s368_s1 + $0x58] sm:$0xff]   ;;  %v270_v8 = vld [vmem:[%s368_s1 + $0x60] sm:$0xff]   ;;  %v272_v10 = vld [vmem:[%s368_s1 + $0x68] sm:$0xff]  }
   0x4   :  { %242 = vmatprep.subr.bf16.mxu0 %v264_v2  ;;  %v269_v7 = vld [vmem:[%s368_s1 + $0x18] sm:$0xff]   ;;  %v271_v9 = vld [vmem:[%s368_s1 + $0x20] sm:$0xff]   ;;  %v273_v12 = vld [vmem:[%s368_s1 + $0x28] sm:$0xff]  }
   0x5   :  { %v280_v11 = vld [vmem:[%s369_s0 + $0x4] ss:$8 sps:$4 sm:$0xff]   ;;  %v274_v13 = vld [vmem:[%s368_s1 + $0x70] sm:$0xff]   ;;  %v276_v15 = vld [vmem:[%s368_s1 + $0x78] sm:$0xff]  }
   0x6   :  { %194 = vmatprep.mubr.bf16.mxu0 %v280_v11  ;;  %v275_v14 = vld [vmem:[%s368_s1 + $0x30] sm:$0xff]   ;;  %v277_v16 = vld [vmem:[%s368_s1 + $0x38] sm:$0xff]   ;;  %v278_v17 = vld [vmem:[%s369_s0] ss:$8 sps:$4 sm:$0xff]  }
   0x7   :  { %243 = vmatpush3.bf16.msra.mxu0 %v265_v3  ;;  %v219_v19 = vld [vmem:[%s370_s2] ss:$0 sm:$0xff] }
   0x8   :  { %244 = vmatprep.subr.bf16.mxu0 %v266_v4 }
   0xb   :  { %245 = vmatpush3.bf16.msra.mxu0 %v267_v5 }
   0xc   :  { %246 = vmatprep.subr.bf16.mxu0 %v268_v6 }
   0xf   :  { %247 = vmatpush3.bf16.msra.mxu0 %v269_v7 }
  0x10   :  { %248 = vmatprep.subr.bf16.mxu0 %v270_v8 }
  0x13   :  { %249 = vmatpush3.bf16.msra.mxu0 %v271_v9 }
  0x14   :  { %250 = vmatprep.subr.bf16.mxu0 %v272_v10 }
  0x17   :  { %251 = vmatpush3.bf16.msra.mxu0 %v273_v12 }
  0x18   :  { %252 = vmatprep.subr.bf16.mxu0 %v274_v13 }
  0x1b   :  { %253 = vmatpush3.bf16.msra.mxu0 %v275_v14 }
  0x1c   :  { %254 = vmatprep.subr.bf16.mxu0 %v276_v15 }
  0x1f   :  { %255 = vmatpush3.bf16.msra.mxu0 %v277_v16 }
  0x22   :  { %195 = vmatmul.mubr.bf16.vlgmr.msra.gmra.mrb[0].mxu0 %v278_v17 }
  0xf5   :  { %v256_v18 = vpop.f32.mrb[0].mxu0 }
  0xf6   :  { %v257_v20 = vpop.f32.mrb[1].mxu0 }
  0xf7   :  { %v258_v21 = vadd.f32 %v257_v20, %v256_v18  ;;  %v259_v22 = vpop.f32.mrb[2].mxu0 }
  0xf8   :  { %v260_v23 = vpop.f32.mrb[3].mxu0 }
  0xf9   :  { %v197_v24 = vadd.f32 %v258_v21, %v219_v19  ;;  %v261_v25 = vadd.f32 %v260_v23, %v259_v22 }
  0xfb   :  { %v205_v26 = vmul.f32 1.442695, %v197_v24  ;;  %v200_v27 = vadd.f32 %v261_v25, %v219_v19  ;;  %vm203_vm0 = vcmp.gt.f32.partialorder %v197_v24, 0.0 }
  0xfd   :  { %281 = vpow2.f32 %v205_v26  ;;  %v207_v28 = vmul.f32 1.442695, %v200_v27  ;;  %vm204_vm1 = vcmp.gt.f32.partialorder %v200_v27, 0.0 }
  0xff   :  { %283 = vpow2.f32 %v207_v28 }
 0x107   :  { %v282_v29 = vpop.eup %281 }
 0x108   :  { %v238_v30 = vadd.f32 -1.0, %v282_v29 }
 0x109   :  { %v284_v31 = vpop.eup %283 }
 0x10a   :  { %v211_v32 = vsel %vm203_vm0, %v197_v24, %v238_v30  ;;  %v239_v33 = vadd.f32 -1.0, %v284_v31 }
 0x10b   :  { %213 = vst [vmem:[%s371_s3] sm:$0xff] %v211_v32 }
 0x10c   :  { %v212_v34 = vsel %vm204_vm1, %v200_v27, %v239_v33 }
 0x10d   :  { %214 = vst [vmem:[%s371_s3 + $0x8] sm:$0xff] %v212_v34 }

// kernel: forward.19
= control target key start
LH: loop header
LB: loop body
LE: loop exit
PB: predicated region body
PF: predicated region fallthrough
CT: control target
= control target key end

     0   :  { %s789_s12 = smov 0   ;;  %s911_s0 = inlined_call_operand.vmem [shape: bf16[32,512], index: 0, kind: input, shape index: {}]   ;;  %s912_s1 = inlined_call_operand.vmem [shape: bf16[512,128], index: 1, kind: input, shape index: {}]   ;;  %s913_s2 = inlined_call_operand.vmem [shape: f32[1,128], index: 2, kind: input, shape index: {}]   ;;  %s914_s3 = inlined_call_operand.vmem [shape: f32[32,128], index: 3, kind: output, shape index: {}]  }
   0x1 LB: > { %s615_s13 = sadd.s32 4294967295, %s767_s12   ;;  %p619_p0 = scmp.ge.s32.totalorder %s767_s12, 1  ;;  %s767_s12 = sphi %s789_s12, %s13_s12  }
   0x2   : > { %p139_p1 = scmp.lt.s32.totalorder %s767_s12, 3 }
   0x4   : > { %p140_p2 = pnand %p619_p0, %p139_p1 }
   0x5   : > { %v719_v0 = vld [vmem:[%s912_s1 + $0x40] sm:$0xff] (!%p140_p2)   ;;  %v723_v4 = vld [vmem:[%s912_s1 + $0x48] sm:$0xff] (!%p140_p2)   ;;  %v727_v8 = vld [vmem:[%s912_s1 + $0x50] sm:$0xff] (!%p140_p2)   ;;  %s620_s21 = sshll.u32 (!%p140_p2), %s615_s13, 1 }
   0x6   : > { %143 = sbr.rel (%p140_p2) target bundleno = 277 (0x115), region = 32  ;;  %v720_v1 = vld [vmem:[%s912_s1 + $0xc0] sm:$0xff] (!%p140_p2)   ;;  %667 = vmatprep.subr.bf16.mxu0 (!%p140_p2), %v719_v0  ;;  %v724_v5 = vld [vmem:[%s912_s1 + $0xc8] sm:$0xff] (!%p140_p2)   ;;  %v728_v9 = vld [vmem:[%s912_s1 + $0xd0] sm:$0xff] (!%p140_p2)   ;;  %p165_p3 = scmp.lt.s32.totalorder (!%p140_p2), %s620_s21, 3 }
   0x7   : > { %v721_v2 = vld [vmem:[%s912_s1] sm:$0xff] (!%p140_p2)   ;;  %689 = vmatprep.subr.bf16.mxu1 (!%p140_p2), %v720_v1  ;;  %v725_v6 = vld [vmem:[%s912_s1 + $0x8] sm:$0xff] (!%p140_p2)   ;;  %v729_v10 = vld [vmem:[%s912_s1 + $0x10] sm:$0xff] (!%p140_p2)  }
   0x8   : > { %v722_v3 = vld [vmem:[%s912_s1 + $0x80] sm:$0xff] (!%p140_p2)   ;;  %668 = vmatpush3.bf16.msra.mxu0 (!%p140_p2), %v721_v2  ;;  %v726_v7 = vld [vmem:[%s912_s1 + $0x88] sm:$0xff] (!%p140_p2)   ;;  %v730_v11 = vld [vmem:[%s912_s1 + $0x90] sm:$0xff] (!%p140_p2)  }
   0x9   : > { %690 = vmatpush3.bf16.msra.mxu1 (!%p140_p2), %v722_v3  ;;  %669 = vmatprep.subr.bf16.mxu0 (!%p140_p2), %v723_v4  ;;  %v731_v12 = vld [vmem:[%s912_s1 + $0x58] sm:$0xff] (!%p140_p2)   ;;  %v735_v16 = vld [vmem:[%s912_s1 + $0x60] sm:$0xff] (!%p140_p2)   ;;  %v739_v20 = vld [vmem:[%s912_s1 + $0x68] sm:$0xff] (!%p140_p2)  }
   0xa   : > { %691 = vmatprep.subr.bf16.mxu1 (!%p140_p2), %v724_v5  ;;  %v732_v13 = vld [vmem:[%s912_s1 + $0xd8] sm:$0xff] (!%p140_p2)   ;;  %v736_v17 = vld [vmem:[%s912_s1 + $0xe0] sm:$0xff] (!%p140_p2)   ;;  %v740_v21 = vld [vmem:[%s912_s1 + $0xe8] sm:$0xff] (!%p140_p2)  }
   0xb   : > { %v733_v14 = vld [vmem:[%s912_s1 + $0x18] sm:$0xff] (!%p140_p2)   ;;  %v737_v18 = vld [vmem:[%s912_s1 + $0x20] sm:$0xff] (!%p140_p2)   ;;  %v741_v22 = vld [vmem:[%s912_s1 + $0x28] sm:$0xff] (!%p140_p2)  }
   0xc   : > { %670 = vmatpush3.bf16.msra.mxu0 (!%p140_p2), %v725_v6  ;;  %v734_v15 = vld [vmem:[%s912_s1 + $0x98] sm:$0xff] (!%p140_p2)   ;;  %v738_v19 = vld [vmem:[%s912_s1 + $0xa0] sm:$0xff] (!%p140_p2)   ;;  %v742_v23 = vld [vmem:[%s912_s1 + $0xa8] sm:$0xff] (!%p140_p2)  }
   0xd   : > { %692 = vmatpush3.bf16.msra.mxu1 %v726_v7  ;;  %671 = vmatprep.subr.bf16.mxu0 %v727_v8  ;;  %s916_s21 = smov (!%p165_p3, %s620_s21), 3  ;;  %v743_v24 = vld [vmem:[%s912_s1 + $0x70] sm:$0xff]   ;;  %v747_v28 = vld [vmem:[%s912_s1 + $0x78] sm:$0xff]   ;;  %v625_v38 = vld [vmem:[%s913_s2] ss:$0 sm:$0xff] }
   0xe   : > { %693 = vmatprep.subr.bf16.mxu1 %v728_v9  ;;  %v744_v25 = vld [vmem:[%s912_s1 + $0xf0] sm:$0xff]   ;;  %s666_s18 = sshll.u32 %s916_s21, 4  ;;  %v748_v29 = vld [vmem:[%s912_s1 + $0xf8] sm:$0xff]   ;;  %s624_s7 = sshll.u32 %s916_s21, 3 }
   0xf   : > { %v745_v26 = vld [vmem:[%s912_s1 + $0x30] sm:$0xff]   ;;  %s169_s28 = scalar_lea.vmem %s911_s0, %s666_s18  ;;  %v749_v30 = vld [vmem:[%s912_s1 + $0x38] sm:$0xff]   ;;  %s175_s10 = scalar_lea.vmem %s914_s3, %s624_s7 }
  0x10   : > { %672 = vmatpush3.bf16.msra.mxu0 %v729_v10  ;;  %v746_v27 = vld [vmem:[%s912_s1 + $0xb0] sm:$0xff]   ;;  %v750_v31 = vld [vmem:[%s912_s1 + $0xb8] sm:$0xff]  }
  0x11   : > { %694 = vmatpush3.bf16.msra.mxu1 %v730_v11  ;;  %673 = vmatprep.subr.bf16.mxu0 %v731_v12  ;;  %v751_v32 = vld [vmem:[%s169_s28] ss:$16 sps:$4 sm:$0xff]   ;;  %v753_v33 = vld [vmem:[%s169_s28 + $0x4] ss:$16 sps:$4 sm:$0xff]   ;;  %v754_v34 = vld [vmem:[%s169_s28 + $0x8] ss:$16 sps:$4 sm:$0xff]  }
  0x12   : > { %695 = vmatprep.subr.bf16.mxu1 %v732_v13  ;;  %v756_v35 = vld [vmem:[%s169_s28 + $0xc] ss:$16 sps:$4 sm:$0xff]   ;;  %497 = vmatprep.mubr.bf16.mxu0 %v753_v33 }
  0x13   : > { %538 = vmatprep.mubr.bf16.mxu1 %v756_v35 }
  0x14   : > { %674 = vmatpush3.bf16.msra.mxu0 %v733_v14 }
  0x15   : > { %696 = vmatpush3.bf16.msra.mxu1 %v734_v15  ;;  %675 = vmatprep.subr.bf16.mxu0 %v735_v16 }
  0x16   : > { %697 = vmatprep.subr.bf16.mxu1 %v736_v17 }
  0x18   : > { %676 = vmatpush3.bf16.msra.mxu0 %v737_v18 }
  0x19   : > { %698 = vmatpush3.bf16.msra.mxu1 %v738_v19  ;;  %677 = vmatprep.subr.bf16.mxu0 %v739_v20 }
  0x1a   : > { %699 = vmatprep.subr.bf16.mxu1 %v740_v21 }
  0x1c   : > { %678 = vmatpush3.bf16.msra.mxu0 %v741_v22 }
  0x1d   : > { %700 = vmatpush3.bf16.msra.mxu1 %v742_v23  ;;  %679 = vmatprep.subr.bf16.mxu0 %v743_v24 }
  0x1e   : > { %701 = vmatprep.subr.bf16.mxu1 %v744_v25 }
  0x20   : > { %680 = vmatpush3.bf16.msra.mxu0 %v745_v26 }
  0x21   : > { %702 = vmatpush3.bf16.msra.mxu1 %v746_v27  ;;  %681 = vmatprep.subr.bf16.mxu0 %v747_v28 }
  0x22   : > { %703 = vmatprep.subr.bf16.mxu1 %v748_v29 }
  0x24   : > { %682 = vmatpush3.bf16.msra.mxu0 %v749_v30 }
  0x25   : > { %704 = vmatpush3.bf16.msra.mxu1 %v750_v31 }
  0x27   : > { %498 = vmatmul.mubr.bf16.vlgmr.msra.gmra.mrb[0].mxu0 %v751_v32 }
  0x28   : > { %539 = vmatmul.mubr.bf16.vlgmr.msra.gmra.mrb[0].mxu1 %v754_v34 }
  0xfa   : > { %v683_v36 = vpop.f32.mrb[0].mxu0 }
  0xfb   : > { %v705_v37 = vpop.f32.mrb[0].mxu1  ;;  %v684_v39 = vpop.f32.mrb[1].mxu0 }
  0xfc   : > { %v685_v40 = vadd.f32 %v684_v39, %v683_v36  ;;  %v706_v41 = vpop.f32.mrb[1].mxu1  ;;  %v686_v42 = vpop.f32.mrb[2].mxu0 }
  0xfd   : > { %v707_v43 = vadd.f32 %v706_v41, %v705_v37  ;;  %v708_v44 = vpop.f32.mrb[2].mxu1  ;;  %v687_v45 = vpop.f32.mrb[3].mxu0 }
  0xfe   : > { %v500_v46 = vadd.f32 %v685_v40, %v625_v38  ;;  %v688_v47 = vadd.f32 %v687_v45, %v686_v42  ;;  %v709_v48 = vpop.f32.mrb[3].mxu1 }
  0xff   : > { %v710_v49 = vadd.f32 %v709_v48, %v708_v44 }
 0x100   : > { %v541_v50 = vadd.f32 %v707_v43, %v500_v46  ;;  %v503_v51 = vadd.f32 %v688_v47, %v625_v38 }
 0x102   : > { %v549_v52 = vmul.f32 1.442695, %v541_v50  ;;  %v544_v53 = vadd.f32 %v710_v49, %v503_v51  ;;  %vm547_vm0 = vcmp.gt.f32.partialorder %v541_v50, 0.0 }
 0x104   : > { %757 = vpow2.f32 %v549_v52  ;;  %v551_v54 = vmul.f32 1.442695, %v544_v53  ;;  %vm548_vm1 = vcmp.gt.f32.partialorder %v544_v53, 0.0 }
 0x106   : > { %759 = vpow2.f32 %v551_v54 }
 0x10e   : > { %v758_v55 = vpop.eup %757 }
 0x10f   : > { %v662_v56 = vadd.f32 -1.0, %v758_v55 }
 0x110   : > { %v760_v57 = vpop.eup %759 }
 0x111   : > { %v555_v58 = vsel %vm547_vm0, %v541_v50, %v662_v56  ;;  %v663_v59 = vadd.f32 -1.0, %v760_v57 }
 0x112   : > { %557 = vst [vmem:[%s175_s10] sm:$0xff] %v555_v58 }
 0x113   : > { %v556_v60 = vsel %vm548_vm1, %v544_v53, %v663_v59 }
 0x114   : > { %558 = vst [vmem:[%s175_s10 + $0x8] sm:$0xff] %v556_v60 }
 0x115 PF: > { %s13_s12 = sadd.s32 1, %s767_s12  }
 0x116   : > { %p10_p4 = scmp.ge.s32.totalorder %s13_s12, 4  }
 0x118   :  { %12 = sbr.rel (!%p10_p4) target bundleno = 1 (0x1), region = 62 }

</bundles_post_ra>
